<compile_context>
chip_gen: v6e
topology: v6e:2x2x1
jax: 0.10.0
libtpu: 0.0.40
codegen_flags: <defaults>
</compile_context>

<pallas_src>
import numpy as np
import jax
import jax.numpy as jnp
from jax.experimental import pallas as pl
from jax.experimental.pallas import tpu as pltpu

# ------------------------------ configuration -------------------------------
B = 2
IMG = 8                  # img_size -> H = W = 8
IN_CH = 3
IN_CH_PAD = 8            # zero-pad input channels so sublane concats stay 8-aligned
OUT_CH = 3
EMBED = 16               # embed_dim
DEPTHS = (2, 2)
NUM_HEADS = (2, 2)
WS = 4                   # window_size
MLP_RATIO = 2.0

H = W = IMG
L = H * W
N_WIN = WS * WS                       # tokens per window
NW = (H // WS) * (W // WS)            # windows per image
HIDDEN = int(EMBED * MLP_RATIO)
EPS = 1e-5                            # nn.LayerNorm default
ROWS = B * L                          # 128 fused batch*token lanes
NBLK = sum(DEPTHS)
BF = jnp.bfloat16

assert len(set(NUM_HEADS)) == 1 and EMBED % NUM_HEADS[0] == 0


# --------------------------- in-kernel building blocks -----------------------
def _layernorm(x, g, b):
    """LayerNorm over the channel (sublane) axis of a channel-major (C, ROWS) tile."""
    mu = jnp.mean(x, axis=0, keepdims=True)
    var = jnp.mean((x - mu) ** 2, axis=0, keepdims=True)
    return (x - mu) * jax.lax.rsqrt(var + EPS) * g + b


def _lrelu(x):
    return jnp.where(x >= 0, x, 0.1 * x)


def _erf(x):
    # Abramowitz & Stegun 7.1.26 (|abs err| <= ~1e-4 with the approx reciprocal).
    # TODO(synk): swap for jax.lax.erf once its Mosaic lowering is confirmed.
    a1, a2, a3, a4, a5 = 0.254829592, -0.284496736, 1.421413741, -1.453152027, 1.061405429
    p = 0.3275911
    ax = jnp.abs(x)
    t = pl.reciprocal(1.0 + p * ax, approx=True)          # EUP slot
    poly = ((((a5 * t + a4) * t + a3) * t + a2) * t + a1) * t
    y = 1.0 - poly * jnp.exp(-ax * ax)
    return jnp.where(x < 0, -y, y)


def _gelu(x):
    # exact (erf-based) GELU, matching nn.GELU default
    return 0.5 * x * (1.0 + _erf(x * 0.7071067811865476))


def _conv3x3(x, w, b, mask):
    """3x3 / stride-1 / pad-1 conv in channel-major layout.

    x:    (Cin, ROWS) fp32 activation (ROWS = B*H*W, on lanes)
    w:    (Cout, 9*Cin) bf16 prepacked weight, column index = tap*Cin + cin
    b:    (Cout, 1) fp32 bias
    mask: (9, ROWS) fp32 0/1 boundary (zero-padding / batch-separation) masks.

    Each tap is a static lane-roll of x (XLU) times its boundary mask; all nine taps
    feed the MXU as ONE (Cout, 9Cin) @ (9Cin, ROWS) matmul."""
    taps = []
    for k in range(9):
        dh, dw = k // 3 - 1, k % 3 - 1
        off = dh * W + dw                       # out[:, r] needs x[:, r + off]
        t = x if off == 0 else pltpu.roll(x, (-off) % ROWS, 1)
        taps.append(t * mask[k:k + 1, :])
    xcat = jnp.concatenate(taps, axis=0).astype(BF)        # (9*Cin, ROWS)
    return jnp.dot(w, xcat, preferred_element_type=jnp.float32) + b


def _swin_block(x, blk, n1g, n1b, qkvw, qkvb, projw, projb, bias_ref,
                n2g, n2b, f1w, f1b, f2w, f2b, *, num_heads):
    """One Swin transformer block on all B*L tokens, channel-major (C, ROWS).

    Window structure, cyclic shift, SW-MSA shift mask, relative-position bias and
    batch separation are all encoded in the prepacked additive bias bias_ref[blk]."""
    c = x.shape[0]
    hd = c // num_heads
    scale = float(hd) ** -0.5                   # qk_scale=None -> head_dim ** -0.5
    shortcut = x

    y = _layernorm(x, n1g, n1b).astype(BF)
    qkv = jnp.dot(qkvw, y, preferred_element_type=jnp.float32) + qkvb      # (3C, ROWS)

    attn = jnp.zeros((c, ROWS), jnp.float32)
    for h in range(num_heads):                  # 2 heads, static unroll
        q = (qkv[h * hd:(h + 1) * hd, :] * scale).astype(BF)
        k = qkv[c + h * hd:c + (h + 1) * hd, :].astype(BF)
        v = qkv[2 * c + h * hd:2 * c + (h + 1) * hd, :].astype(BF)
        s = jax.lax.dot_general(q, k, (((0,), (0,)), ((), ())),
                                preferred_element_type=jnp.float32)        # (ROWS, ROWS)
        s = s + bias_ref[blk, h]                # rel-pos bias + window/shift/batch mask
        s = s - jnp.max(s, axis=-1, keepdims=True)
        p = jnp.exp(s)
        p = p * pl.reciprocal(jnp.sum(p, axis=-1, keepdims=True), approx=True)
        o = jax.lax.dot_general(v, p.astype(BF), (((1,), (1,)), ((), ())),
                                preferred_element_type=jnp.float32)        # (hd, ROWS)
        # concat-over-heads followed by proj == sum of per-head block matmuls
        attn = attn + jnp.dot(projw[h], o.astype(BF),
                              preferred_element_type=jnp.float32)
    attn = attn + projb

    t = shortcut + attn                          # drop_path == identity (eval)
    z = _layernorm(t, n2g, n2b).astype(BF)
    z = jnp.dot(f1w, z, preferred_element_type=jnp.float32) + f1b
    z = _gelu(z).astype(BF)
    z = jnp.dot(f2w, z, preferred_element_type=jnp.float32) + f2b
    return t + z


# ------------------------------ the fused kernel ------------------------------
def _forward_kernel(
    x_ref, mask_ref,
    cf1w_ref, cf1b_ref, cf2w_ref, cf2b_ref,
    peg_ref, peb_ref, ng_ref, nb_ref,
    n1g_ref, n1b_ref, qkvw_ref, qkvb_ref, pw_ref, pb_ref, bias_ref,
    n2g_ref, n2b_ref, f1w_ref, f1b_ref, f2w_ref, f2b_ref,
    lcw_ref, lcb_ref,
    co1w_ref, co1b_ref, co2w_ref, co2b_ref,
    o_ref,
):
    mask = mask_ref[...]                                   # (9, ROWS) boundary masks

    # conv_first: conv3x3 -> LeakyReLU(0.1) -> conv3x3
    x = _conv3x3(x_ref[...], cf1w_ref[...], cf1b_ref[...], mask)
    x = _lrelu(x)
    x = _conv3x3(x, cf2w_ref[...], cf2b_ref[...], mask)

    peg, peb = peg_ref[...], peb_ref[...]
    ng, nb = ng_ref[...], nb_ref[...]

    blk = 0
    for li in range(len(DEPTHS)):                          # static unroll (2 layers)
        # patch_embed LayerNorm -- re-applied every layer, exactly as in the module's
        # forward (patch_embed / self.norm sit inside the layer loop).
        res = _layernorm(x, peg, peb)
        t = res
        for _ in range(DEPTHS[li]):                        # static unroll (2 blocks)
            t = _swin_block(
                t, blk,
                n1g_ref[blk], n1b_ref[blk], qkvw_ref[blk], qkvb_ref[blk],
                pw_ref[blk], pb_ref[blk], bias_ref,
                n2g_ref[blk], n2b_ref[blk],
                f1w_ref[blk], f1b_ref[blk], f2w_ref[blk], f2b_ref[blk],
                num_heads=NUM_HEADS[li])
            blk += 1
        # RSTB tail: 3x3 conv residual branch + skip, then the shared LayerNorm
        x = _conv3x3(t, lcw_ref[li], lcb_ref[li], mask) + res
        x = _layernorm(x, ng, nb)

    # conv_out: conv3x3 -> LeakyReLU(0.1) -> conv3x3
    x = _conv3x3(x, co1w_ref[...], co1b_ref[...], mask)
    x = _lrelu(x)
    x = _conv3x3(x, co2w_ref[...], co2b_ref[...], mask)
    o_ref[...] = x.astype(o_ref.dtype)


# -------------------------------- forward wrapper -----------------------------
def swin_forward(x_nchw, pp):
    # NCHW image -> channel-major (C, B*H*W) token layout (tokens on lanes)
    x_cm = jnp.transpose(x_nchw.astype(jnp.float32), (1, 0, 2, 3)).reshape(IN_CH, ROWS)
    x_cm = jnp.pad(x_cm, ((0, IN_CH_PAD - IN_CH), (0, 0)))
    out_cm = pl.pallas_call(
        _forward_kernel,
        out_shape=jax.ShapeDtypeStruct((OUT_CH, ROWS), jnp.float32),
        compiler_params=pltpu.CompilerParams(vmem_limit_bytes=16 * 1024 * 1024),
    )(
        x_cm, pp["conv_mask"],
        pp["cf1_w"], pp["cf1_b"], pp["cf2_w"], pp["cf2_b"],
        pp["pe_g"], pp["pe_b"], pp["norm_g"], pp["norm_b"],
        pp["n1_g"], pp["n1_b"], pp["qkv_w"], pp["qkv_b"],
        pp["proj_w"], pp["proj_b"], pp["attn_bias"],
        pp["n2_g"], pp["n2_b"],
        pp["fc1_w"], pp["fc1_b"], pp["fc2_w"], pp["fc2_b"],
        pp["lconv_w"], pp["lconv_b"],
        pp["co1_w"], pp["co1_b"], pp["co2_w"], pp["co2_b"],
    )
    return jnp.transpose(out_cm.reshape(OUT_CH, B, H, W), (1, 0, 2, 3))


# ----------------------- static Swin tables & bias prepack -------------------
def _relative_position_index(ws):
    coords = np.stack(np.meshgrid(np.arange(ws), np.arange(ws), indexing="ij"))
    cf = coords.reshape(2, -1)
    rel = (cf[:, :, None] - cf[:, None, :]).transpose(1, 2, 0).astype(np.int64)
    rel[:, :, 0] += ws - 1
    rel[:, :, 1] += ws - 1
    rel[:, :, 0] *= 2 * ws - 1
    return rel.sum(-1).astype(np.int32)                     # (N, N)


def _build_attn_bias(rpb_table, num_heads, shift):
    """(nH, ROWS, ROWS) additive attention bias encoding the relative-position bias,
    the (shifted-)window partition, the SW-MSA shift mask and the batch separation.
    Built ONCE at prepack time (never in the forward hot path)."""
    r = np.arange(ROWS)
    b = r // L
    h = (r // W) % H
    w = r % W
    hs = (h - shift) % H                    # coordinates in the cyclically shifted image
    ws_ = (w - shift) % W
    win = b * NW + (hs // WS) * (W // WS) + (ws_ // WS)      # global window id
    pos = (hs % WS) * WS + (ws_ % WS)                        # position within window
    same_win = (win[:, None] == win[None, :])

    rpi = _relative_position_index(WS).reshape(-1)
    rpb = jnp.take(rpb_table, jnp.asarray(rpi), axis=0)
    rpb = rpb.reshape(N_WIN, N_WIN, num_heads).transpose(2, 0, 1)          # (nH, N, N)
    bias = rpb[:, pos[:, None], pos[None, :]]                              # (nH, ROWS, ROWS)

    if shift > 0:                           # SW-MSA region mask (0 / -100), as in PyTorch
        lh = np.where(hs < H - WS, 0, np.where(hs < H - shift, 1, 2))
        lw = np.where(ws_ < W - WS, 0, np.where(ws_ < W - shift, 1, 2))
        lab = lh * 3 + lw
        smask = np.where(lab[:, None] != lab[None, :], -100.0, 0.0).astype(np.float32)
        bias = bias + smask[None]

    bias = jnp.where(jnp.asarray(same_win)[None], bias, -1e9)
    return bias.astype(jnp.float32)


def _build_conv_mask():
    """(9, ROWS) 0/1 masks: tap (dh,dw) is valid for output row r iff the source pixel
    lies inside the same image (zero padding; also kills cross-batch roll wraparound)."""
    r = np.arange(ROWS)
    h = (r // W) % H
    w = r % W
    m = np.zeros((9, ROWS), np.float32)
    for k in range(9):
        dh, dw = k // 3 - 1, k % 3 - 1
        valid = (h + dh >= 0) & (h + dh < H) & (w + dw >= 0) & (w + dw < W)
        m[k] = valid.astype(np.float32)
    return jnp.asarray(m)


# --------------------------- params: init + prepack --------------------------
def init_params(key):
    ks = iter(jax.random.split(key, 256))

    def nrm(shape, std=0.02):
        return jax.random.normal(next(ks), shape, jnp.float32) * std

    zeros = lambda s: jnp.zeros(s, jnp.float32)
    ones = lambda s: jnp.ones(s, jnp.float32)

    p = {
        # Conv2d weights in PyTorch layout (Cout, Cin, kh, kw)
        "cf1_w": nrm((EMBED, IN_CH, 3, 3), 0.10), "cf1_b": nrm((EMBED,), 0.02),
        "cf2_w": nrm((EMBED, EMBED, 3, 3), 0.05), "cf2_b": nrm((EMBED,), 0.02),
        "co1_w": nrm((EMBED, EMBED, 3, 3), 0.05), "co1_b": nrm((EMBED,), 0.02),
        "co2_w": nrm((OUT_CH, EMBED, 3, 3), 0.05), "co2_b": nrm((OUT_CH,), 0.02),
        "pe_g": ones((EMBED,)), "pe_b": zeros((EMBED,)),
        "norm_g": ones((EMBED,)), "norm_b": zeros((EMBED,)),
        "layers": [],
    }
    for li in range(len(DEPTHS)):
        blocks = []
        for _ in range(DEPTHS[li]):
            blocks.append({
                "n1_g": ones((EMBED,)), "n1_b": zeros((EMBED,)),
                "n2_g": ones((EMBED,)), "n2_b": zeros((EMBED,)),
                # Linear weights in PyTorch layout (out_features, in_features)
                "qkv_w": nrm((3 * EMBED, EMBED)), "qkv_b": zeros((3 * EMBED,)),
                "proj_w": nrm((EMBED, EMBED)), "proj_b": zeros((EMBED,)),
                "rpb_table": nrm(((2 * WS - 1) ** 2, NUM_HEADS[li])),
                "fc1_w": nrm((HIDDEN, EMBED)), "fc1_b": zeros((HIDDEN,)),
                "fc2_w": nrm((EMBED, HIDDEN)), "fc2_b": zeros((EMBED,)),
            })
        p["layers"].append({"conv_w": nrm((EMBED, EMBED, 3, 3), 0.05),
                            "conv_b": nrm((EMBED,), 0.02), "blocks": blocks})
    return p


def prepack_params(p):
    """One-time re-layout into kernel-friendly shapes (hoisted out of the forward).

    Matmul weights -> bf16, channel-major orientation; per-block params stacked over a
    leading block axis; conv weights -> (Cout, 9*Cin); attention bias densified."""
    f32, bf = jnp.float32, BF
    col = lambda v: v.reshape(-1, 1).astype(f32)

    def convw(w, cin_pad=None):                 # (Cout, Cin, 3, 3) -> (Cout, 9*Cin) bf16
        co, ci = int(w.shape[0]), int(w.shape[1])
        wt = jnp.transpose(w, (0, 2, 3, 1))     # (Cout, kh, kw, Cin): col = tap*Cin + ci
        if cin_pad is not None and cin_pad > ci:
            wt = jnp.pad(wt, ((0, 0), (0, 0), (0, 0), (0, cin_pad - ci)))
            ci = cin_pad
        return wt.reshape(co, 9 * ci).astype(bf)

    n1g, n1b, n2g, n2b = [], [], [], []
    qkvw, qkvb, pw, pb = [], [], [], []
    f1w, f1b, f2w, f2b = [], [], [], []
    biases, lcw, lcb = [], [], []
    for li, lp in enumerate(p["layers"]):
        nh = NUM_HEADS[li]
        hd = EMBED // nh
        for bi, bp in enumerate(lp["blocks"]):
            shift = 0 if bi % 2 == 0 else WS // 2            # W-MSA / SW-MSA alternation
            n1g.append(col(bp["n1_g"])); n1b.append(col(bp["n1_b"]))
            n2g.append(col(bp["n2_g"])); n2b.append(col(bp["n2_b"]))
            qkvw.append(bp["qkv_w"].astype(bf)); qkvb.append(col(bp["qkv_b"]))
            pw.append(jnp.stack([bp["proj_w"][:, h * hd:(h + 1) * hd]
                                 for h in range(nh)], 0).astype(bf))       # (nH, C, hd)
            pb.append(col(bp["proj_b"]))
            f1w.append(bp["fc1_w"].astype(bf)); f1b.append(col(bp["fc1_b"]))
            f2w.append(bp["fc2_w"].astype(bf)); f2b.append(col(bp["fc2_b"]))
            biases.append(_build_attn_bias(bp["rpb_table"], nh, shift))
        lcw.append(convw(lp["conv_w"])); lcb.append(col(lp["conv_b"]))

    stk = lambda xs: jnp.stack(xs, 0)
    return {
        "conv_mask": _build_conv_mask(),
        "cf1_w": convw(p["cf1_w"], IN_CH_PAD), "cf1_b": col(p["cf1_b"]),
        "cf2_w": convw(p["cf2_w"]), "cf2_b": col(p["cf2_b"]),
        "co1_w": convw(p["co1_w"]), "co1_b": col(p["co1_b"]),
        "co2_w": convw(p["co2_w"]), "co2_b": col(p["co2_b"]),
        "pe_g": col(p["pe_g"]), "pe_b": col(p["pe_b"]),
        "norm_g": col(p["norm_g"]), "norm_b": col(p["norm_b"]),
        "n1_g": stk(n1g), "n1_b": stk(n1b), "n2_g": stk(n2g), "n2_b": stk(n2b),
        "qkv_w": stk(qkvw), "qkv_b": stk(qkvb),
        "proj_w": stk(pw), "proj_b": stk(pb),
        "fc1_w": stk(f1w), "fc1_b": stk(f1b),
        "fc2_w": stk(f2w), "fc2_b": stk(f2b),
        "attn_bias": stk(biases),                            # (NBLK, nH, ROWS, ROWS)
        "lconv_w": stk(lcw), "lconv_b": stk(lcb),
    }


# ----------------------------------- main ------------------------------------
if __name__ == "__main__":
    raw = init_params(jax.random.PRNGKey(1))
    pp = prepack_params(raw)                    # one-time prepack, outside the hot path
    x = jax.random.normal(jax.random.PRNGKey(0), (B, IN_CH, IMG, IMG), jnp.float32)
    fwd = jax.jit(swin_forward)
    out = jax.block_until_ready(fwd(x, pp))
    assert out.shape == (B, OUT_CH, IMG, IMG), out.shape
    assert bool(jnp.all(jnp.isfinite(out)))
    print("KERNEL_OK")
</pallas_src>

<mosaic_0001>
module attributes {stable_mosaic.version = 11 : i64} {
  func.func @_forward_kernel(%arg0: memref<8x128xf32, #tpu.memory_space<vmem>>, %arg1: memref<9x128xf32, #tpu.memory_space<vmem>>, %arg2: memref<16x72xbf16, #tpu.memory_space<vmem>>, %arg3: memref<16x1xf32, #tpu.memory_space<vmem>>, %arg4: memref<16x144xbf16, #tpu.memory_space<vmem>>, %arg5: memref<16x1xf32, #tpu.memory_space<vmem>>, %arg6: memref<16x1xf32, #tpu.memory_space<vmem>>, %arg7: memref<16x1xf32, #tpu.memory_space<vmem>>, %arg8: memref<16x1xf32, #tpu.memory_space<vmem>>, %arg9: memref<16x1xf32, #tpu.memory_space<vmem>>, %arg10: memref<4x16x1xf32, #tpu.memory_space<vmem>>, %arg11: memref<4x16x1xf32, #tpu.memory_space<vmem>>, %arg12: memref<4x48x16xbf16, #tpu.memory_space<vmem>>, %arg13: memref<4x48x1xf32, #tpu.memory_space<vmem>>, %arg14: memref<4x2x16x8xbf16, #tpu.memory_space<vmem>>, %arg15: memref<4x16x1xf32, #tpu.memory_space<vmem>>, %arg16: memref<4x2x128x128xf32, #tpu.memory_space<vmem>>, %arg17: memref<4x16x1xf32, #tpu.memory_space<vmem>>, %arg18: memref<4x16x1xf32, #tpu.memory_space<vmem>>, %arg19: memref<4x32x16xbf16, #tpu.memory_space<vmem>>, %arg20: memref<4x32x1xf32, #tpu.memory_space<vmem>>, %arg21: memref<4x16x32xbf16, #tpu.memory_space<vmem>>, %arg22: memref<4x16x1xf32, #tpu.memory_space<vmem>>, %arg23: memref<2x16x144xbf16, #tpu.memory_space<vmem>>, %arg24: memref<2x16x1xf32, #tpu.memory_space<vmem>>, %arg25: memref<16x144xbf16, #tpu.memory_space<vmem>>, %arg26: memref<16x1xf32, #tpu.memory_space<vmem>>, %arg27: memref<3x144xbf16, #tpu.memory_space<vmem>>, %arg28: memref<3x1xf32, #tpu.memory_space<vmem>>, %arg29: memref<3x128xf32, #tpu.memory_space<vmem>>) attributes {dimension_semantics = [], scalar_prefetch = 0 : i64, scratch_operands = 0 : i64, tpu.core_type = #tpu.core_type<tc>} {
    %c0 = arith.constant 0 : index
    %c0_0 = arith.constant 0 : index
    %0 = vector.load %arg1[%c0, %c0_0] : memref<9x128xf32, #tpu.memory_space<vmem>>, vector<9x128xf32>
    %c0_1 = arith.constant 0 : index
    %c0_2 = arith.constant 0 : index
    %1 = vector.load %arg0[%c0_1, %c0_2] : memref<8x128xf32, #tpu.memory_space<vmem>>, vector<8x128xf32>
    %c0_3 = arith.constant 0 : index
    %c0_4 = arith.constant 0 : index
    %2 = vector.load %arg2[%c0_3, %c0_4] : memref<16x72xbf16, #tpu.memory_space<vmem>>, vector<16x72xbf16>
    %c0_5 = arith.constant 0 : index
    %c0_6 = arith.constant 0 : index
    %3 = vector.load %arg3[%c0_5, %c0_6] : memref<16x1xf32, #tpu.memory_space<vmem>>, vector<16x1xf32>
    %c9_i32 = arith.constant 9 : i32
    %4 = tpu.dynamic_rotate %1 by %c9_i32 dim 1 : vector<8x128xf32>, i32 -> vector<8x128xf32>
    %5 = vector.extract_strided_slice %0 {offsets = [0, 0], sizes = [1, 128], strides = [1, 1]} : vector<9x128xf32> to vector<1x128xf32>
    %6 = vector.broadcast %5 : vector<1x128xf32> to vector<8x128xf32>
    %7 = arith.mulf %4, %6 : vector<8x128xf32>
    %c8_i32 = arith.constant 8 : i32
    %8 = tpu.dynamic_rotate %1 by %c8_i32 dim 1 : vector<8x128xf32>, i32 -> vector<8x128xf32>
    %9 = vector.extract_strided_slice %0 {offsets = [1, 0], sizes = [1, 128], strides = [1, 1]} : vector<9x128xf32> to vector<1x128xf32>
    %10 = vector.broadcast %9 : vector<1x128xf32> to vector<8x128xf32>
    %11 = arith.mulf %8, %10 : vector<8x128xf32>
    %c7_i32 = arith.constant 7 : i32
    %12 = tpu.dynamic_rotate %1 by %c7_i32 dim 1 : vector<8x128xf32>, i32 -> vector<8x128xf32>
    %13 = vector.extract_strided_slice %0 {offsets = [2, 0], sizes = [1, 128], strides = [1, 1]} : vector<9x128xf32> to vector<1x128xf32>
    %14 = vector.broadcast %13 : vector<1x128xf32> to vector<8x128xf32>
    %15 = arith.mulf %12, %14 : vector<8x128xf32>
    %c1_i32 = arith.constant 1 : i32
    %16 = tpu.dynamic_rotate %1 by %c1_i32 dim 1 : vector<8x128xf32>, i32 -> vector<8x128xf32>
    %17 = vector.extract_strided_slice %0 {offsets = [3, 0], sizes = [1, 128], strides = [1, 1]} : vector<9x128xf32> to vector<1x128xf32>
    %18 = vector.broadcast %17 : vector<1x128xf32> to vector<8x128xf32>
    %19 = arith.mulf %16, %18 : vector<8x128xf32>
    %20 = vector.extract_strided_slice %0 {offsets = [4, 0], sizes = [1, 128], strides = [1, 1]} : vector<9x128xf32> to vector<1x128xf32>
    %21 = vector.broadcast %20 : vector<1x128xf32> to vector<8x128xf32>
    %22 = arith.mulf %1, %21 : vector<8x128xf32>
    %c127_i32 = arith.constant 127 : i32
    %23 = tpu.dynamic_rotate %1 by %c127_i32 dim 1 : vector<8x128xf32>, i32 -> vector<8x128xf32>
    %24 = vector.extract_strided_slice %0 {offsets = [5, 0], sizes = [1, 128], strides = [1, 1]} : vector<9x128xf32> to vector<1x128xf32>
    %25 = vector.broadcast %24 : vector<1x128xf32> to vector<8x128xf32>
    %26 = arith.mulf %23, %25 : vector<8x128xf32>
    %c121_i32 = arith.constant 121 : i32
    %27 = tpu.dynamic_rotate %1 by %c121_i32 dim 1 : vector<8x128xf32>, i32 -> vector<8x128xf32>
    %28 = vector.extract_strided_slice %0 {offsets = [6, 0], sizes = [1, 128], strides = [1, 1]} : vector<9x128xf32> to vector<1x128xf32>
    %29 = vector.broadcast %28 : vector<1x128xf32> to vector<8x128xf32>
    %30 = arith.mulf %27, %29 : vector<8x128xf32>
    %c120_i32 = arith.constant 120 : i32
    %31 = tpu.dynamic_rotate %1 by %c120_i32 dim 1 : vector<8x128xf32>, i32 -> vector<8x128xf32>
    %32 = vector.extract_strided_slice %0 {offsets = [7, 0], sizes = [1, 128], strides = [1, 1]} : vector<9x128xf32> to vector<1x128xf32>
    %33 = vector.broadcast %32 : vector<1x128xf32> to vector<8x128xf32>
    %34 = arith.mulf %31, %33 : vector<8x128xf32>
    %c119_i32 = arith.constant 119 : i32
    %35 = tpu.dynamic_rotate %1 by %c119_i32 dim 1 : vector<8x128xf32>, i32 -> vector<8x128xf32>
    %36 = vector.extract_strided_slice %0 {offsets = [8, 0], sizes = [1, 128], strides = [1, 1]} : vector<9x128xf32> to vector<1x128xf32>
    %37 = vector.broadcast %36 : vector<1x128xf32> to vector<8x128xf32>
    %38 = arith.mulf %35, %37 : vector<8x128xf32>
    %39 = tpu.concatenate %7, %11, %15, %19, %22, %26, %30, %34, %38 in 0 : vector<8x128xf32>, vector<8x128xf32>, vector<8x128xf32>, vector<8x128xf32>, vector<8x128xf32>, vector<8x128xf32>, vector<8x128xf32>, vector<8x128xf32>, vector<8x128xf32> -> vector<72x128xf32>
    %40 = arith.truncf %39 : vector<72x128xf32> to vector<72x128xbf16>
    %cst = arith.constant dense<0.000000e+00> : vector<16x128xf32>
    %41 = tpu.matmul %2, %40, %cst {dimension_numbers = #tpu.dot_dimension_numbers<[1], [0], [0], [1], [0, 0, 1, 1], [], []>} : vector<16x72xbf16>, vector<72x128xbf16>, vector<16x128xf32> -> vector<16x128xf32>
    %42 = vector.broadcast %3 : vector<16x1xf32> to vector<16x128xf32>
    %43 = arith.addf %41, %42 : vector<16x128xf32>
    %cst_7 = arith.constant 0.000000e+00 : f32
    %44 = vector.broadcast %cst_7 : f32 to vector<16x128xf32>
    %45 = arith.cmpf oge, %43, %44 : vector<16x128xf32>
    %cst_8 = arith.constant 1.000000e-01 : f32
    %46 = vector.broadcast %cst_8 : f32 to vector<16x128xf32>
    %47 = arith.mulf %46, %43 : vector<16x128xf32>
    %48 = arith.select %45, %43, %47 : vector<16x128xi1>, vector<16x128xf32>
    %c0_9 = arith.constant 0 : index
    %c0_10 = arith.constant 0 : index
    %49 = vector.load %arg4[%c0_9, %c0_10] : memref<16x144xbf16, #tpu.memory_space<vmem>>, vector<16x144xbf16>
    %c0_11 = arith.constant 0 : index
    %c0_12 = arith.constant 0 : index
    %50 = vector.load %arg5[%c0_11, %c0_12] : memref<16x1xf32, #tpu.memory_space<vmem>>, vector<16x1xf32>
    %c9_i32_13 = arith.constant 9 : i32
    %51 = tpu.dynamic_rotate %48 by %c9_i32_13 dim 1 : vector<16x128xf32>, i32 -> vector<16x128xf32>
    %52 = vector.extract_strided_slice %0 {offsets = [0, 0], sizes = [1, 128], strides = [1, 1]} : vector<9x128xf32> to vector<1x128xf32>
    %53 = vector.broadcast %52 : vector<1x128xf32> to vector<16x128xf32>
    %54 = arith.mulf %51, %53 : vector<16x128xf32>
    %c8_i32_14 = arith.constant 8 : i32
    %55 = tpu.dynamic_rotate %48 by %c8_i32_14 dim 1 : vector<16x128xf32>, i32 -> vector<16x128xf32>
    %56 = vector.extract_strided_slice %0 {offsets = [1, 0], sizes = [1, 128], strides = [1, 1]} : vector<9x128xf32> to vector<1x128xf32>
    %57 = vector.broadcast %56 : vector<1x128xf32> to vector<16x128xf32>
    %58 = arith.mulf %55, %57 : vector<16x128xf32>
    %c7_i32_15 = arith.constant 7 : i32
    %59 = tpu.dynamic_rotate %48 by %c7_i32_15 dim 1 : vector<16x128xf32>, i32 -> vector<16x128xf32>
    %60 = vector.extract_strided_slice %0 {offsets = [2, 0], sizes = [1, 128], strides = [1, 1]} : vector<9x128xf32> to vector<1x128xf32>
    %61 = vector.broadcast %60 : vector<1x128xf32> to vector<16x128xf32>
    %62 = arith.mulf %59, %61 : vector<16x128xf32>
    %c1_i32_16 = arith.constant 1 : i32
    %63 = tpu.dynamic_rotate %48 by %c1_i32_16 dim 1 : vector<16x128xf32>, i32 -> vector<16x128xf32>
    %64 = vector.extract_strided_slice %0 {offsets = [3, 0], sizes = [1, 128], strides = [1, 1]} : vector<9x128xf32> to vector<1x128xf32>
    %65 = vector.broadcast %64 : vector<1x128xf32> to vector<16x128xf32>
    %66 = arith.mulf %63, %65 : vector<16x128xf32>
    %67 = vector.extract_strided_slice %0 {offsets = [4, 0], sizes = [1, 128], strides = [1, 1]} : vector<9x128xf32> to vector<1x128xf32>
    %68 = vector.broadcast %67 : vector<1x128xf32> to vector<16x128xf32>
    %69 = arith.mulf %48, %68 : vector<16x128xf32>
    %c127_i32_17 = arith.constant 127 : i32
    %70 = tpu.dynamic_rotate %48 by %c127_i32_17 dim 1 : vector<16x128xf32>, i32 -> vector<16x128xf32>
    %71 = vector.extract_strided_slice %0 {offsets = [5, 0], sizes = [1, 128], strides = [1, 1]} : vector<9x128xf32> to vector<1x128xf32>
    %72 = vector.broadcast %71 : vector<1x128xf32> to vector<16x128xf32>
    %73 = arith.mulf %70, %72 : vector<16x128xf32>
    %c121_i32_18 = arith.constant 121 : i32
    %74 = tpu.dynamic_rotate %48 by %c121_i32_18 dim 1 : vector<16x128xf32>, i32 -> vector<16x128xf32>
    %75 = vector.extract_strided_slice %0 {offsets = [6, 0], sizes = [1, 128], strides = [1, 1]} : vector<9x128xf32> to vector<1x128xf32>
    %76 = vector.broadcast %75 : vector<1x128xf32> to vector<16x128xf32>
    %77 = arith.mulf %74, %76 : vector<16x128xf32>
    %c120_i32_19 = arith.constant 120 : i32
    %78 = tpu.dynamic_rotate %48 by %c120_i32_19 dim 1 : vector<16x128xf32>, i32 -> vector<16x128xf32>
    %79 = vector.extract_strided_slice %0 {offsets = [7, 0], sizes = [1, 128], strides = [1, 1]} : vector<9x128xf32> to vector<1x128xf32>
    %80 = vector.broadcast %79 : vector<1x128xf32> to vector<16x128xf32>
    %81 = arith.mulf %78, %80 : vector<16x128xf32>
    %c119_i32_20 = arith.constant 119 : i32
    %82 = tpu.dynamic_rotate %48 by %c119_i32_20 dim 1 : vector<16x128xf32>, i32 -> vector<16x128xf32>
    %83 = vector.extract_strided_slice %0 {offsets = [8, 0], sizes = [1, 128], strides = [1, 1]} : vector<9x128xf32> to vector<1x128xf32>
    %84 = vector.broadcast %83 : vector<1x128xf32> to vector<16x128xf32>
    %85 = arith.mulf %82, %84 : vector<16x128xf32>
    %86 = tpu.concatenate %54, %58, %62, %66, %69, %73, %77, %81, %85 in 0 : vector<16x128xf32>, vector<16x128xf32>, vector<16x128xf32>, vector<16x128xf32>, vector<16x128xf32>, vector<16x128xf32>, vector<16x128xf32>, vector<16x128xf32>, vector<16x128xf32> -> vector<144x128xf32>
    %87 = arith.truncf %86 : vector<144x128xf32> to vector<144x128xbf16>
    %cst_21 = arith.constant dense<0.000000e+00> : vector<16x128xf32>
    %88 = tpu.matmul %49, %87, %cst_21 {dimension_numbers = #tpu.dot_dimension_numbers<[1], [0], [0], [1], [0, 0, 1, 1], [], []>} : vector<16x144xbf16>, vector<144x128xbf16>, vector<16x128xf32> -> vector<16x128xf32>
    %89 = vector.broadcast %50 : vector<16x1xf32> to vector<16x128xf32>
    %90 = arith.addf %88, %89 : vector<16x128xf32>
    %c0_22 = arith.constant 0 : index
    %c0_23 = arith.constant 0 : index
    %91 = vector.load %arg6[%c0_22, %c0_23] : memref<16x1xf32, #tpu.memory_space<vmem>>, vector<16x1xf32>
    %c0_24 = arith.constant 0 : index
    %c0_25 = arith.constant 0 : index
    %92 = vector.load %arg7[%c0_24, %c0_25] : memref<16x1xf32, #tpu.memory_space<vmem>>, vector<16x1xf32>
    %c0_26 = arith.constant 0 : index
    %c0_27 = arith.constant 0 : index
    %93 = vector.load %arg8[%c0_26, %c0_27] : memref<16x1xf32, #tpu.memory_space<vmem>>, vector<16x1xf32>
    %c0_28 = arith.constant 0 : index
    %c0_29 = arith.constant 0 : index
    %94 = vector.load %arg9[%c0_28, %c0_29] : memref<16x1xf32, #tpu.memory_space<vmem>>, vector<16x1xf32>
    %cst_30 = arith.constant dense<0.000000e+00> : vector<128xf32>
    %95 = vector.multi_reduction <add>, %90, %cst_30 [0] : vector<16x128xf32> to vector<128xf32>
    %96 = vector.shape_cast %95 : vector<128xf32> to vector<1x128xf32>
    %cst_31 = arith.constant 1.600000e+01 : f32
    %97 = vector.broadcast %cst_31 : f32 to vector<1x128xf32>
    %98 = arith.divf %96, %97 : vector<1x128xf32>
    %99 = vector.broadcast %98 : vector<1x128xf32> to vector<16x128xf32>
    %100 = arith.subf %90, %99 : vector<16x128xf32>
    %101 = arith.mulf %100, %100 : vector<16x128xf32>
    %cst_32 = arith.constant dense<0.000000e+00> : vector<128xf32>
    %102 = vector.multi_reduction <add>, %101, %cst_32 [0] : vector<16x128xf32> to vector<128xf32>
    %103 = vector.shape_cast %102 : vector<128xf32> to vector<1x128xf32>
    %cst_33 = arith.constant 1.600000e+01 : f32
    %104 = vector.broadcast %cst_33 : f32 to vector<1x128xf32>
    %105 = arith.divf %103, %104 : vector<1x128xf32>
    %106 = vector.broadcast %98 : vector<1x128xf32> to vector<16x128xf32>
    %107 = arith.subf %90, %106 : vector<16x128xf32>
    %cst_34 = arith.constant 9.99999974E-6 : f32
    %108 = vector.broadcast %cst_34 : f32 to vector<1x128xf32>
    %109 = arith.addf %105, %108 : vector<1x128xf32>
    %110 = math.rsqrt %109 : vector<1x128xf32>
    %111 = vector.broadcast %110 : vector<1x128xf32> to vector<16x128xf32>
    %112 = arith.mulf %107, %111 : vector<16x128xf32>
    %113 = vector.broadcast %91 : vector<16x1xf32> to vector<16x128xf32>
    %114 = arith.mulf %112, %113 : vector<16x128xf32>
    %115 = vector.broadcast %92 : vector<16x1xf32> to vector<16x128xf32>
    %116 = arith.addf %114, %115 : vector<16x128xf32>
    %c0_35 = arith.constant 0 : index
    %c0_36 = arith.constant 0 : index
    %c0_37 = arith.constant 0 : index
    %117 = vector.load %arg10[%c0_35, %c0_36, %c0_37] : memref<4x16x1xf32, #tpu.memory_space<vmem>>, vector<1x16x1xf32>
    %118 = vector.shape_cast %117 : vector<1x16x1xf32> to vector<16x1xf32>
    %c0_38 = arith.constant 0 : index
    %c0_39 = arith.constant 0 : index
    %c0_40 = arith.constant 0 : index
    %119 = vector.load %arg11[%c0_38, %c0_39, %c0_40] : memref<4x16x1xf32, #tpu.memory_space<vmem>>, vector<1x16x1xf32>
    %120 = vector.shape_cast %119 : vector<1x16x1xf32> to vector<16x1xf32>
    %c0_41 = arith.constant 0 : index
    %c0_42 = arith.constant 0 : index
    %c0_43 = arith.constant 0 : index
    %121 = vector.load %arg12[%c0_41, %c0_42, %c0_43] : memref<4x48x16xbf16, #tpu.memory_space<vmem>>, vector<1x48x16xbf16>
    %122 = vector.shape_cast %121 : vector<1x48x16xbf16> to vector<48x16xbf16>
    %c0_44 = arith.constant 0 : index
    %c0_45 = arith.constant 0 : index
    %c0_46 = arith.constant 0 : index
    %123 = vector.load %arg13[%c0_44, %c0_45, %c0_46] : memref<4x48x1xf32, #tpu.memory_space<vmem>>, vector<1x48x1xf32>
    %124 = vector.shape_cast %123 : vector<1x48x1xf32> to vector<48x1xf32>
    %c0_47 = arith.constant 0 : index
    %c0_48 = arith.constant 0 : index
    %c0_49 = arith.constant 0 : index
    %c0_50 = arith.constant 0 : index
    %125 = vector.load %arg14[%c0_47, %c0_48, %c0_49, %c0_50] : memref<4x2x16x8xbf16, #tpu.memory_space<vmem>>, vector<1x2x16x8xbf16>
    %126 = vector.shape_cast %125 : vector<1x2x16x8xbf16> to vector<2x16x8xbf16>
    %c0_51 = arith.constant 0 : index
    %c0_52 = arith.constant 0 : index
    %c0_53 = arith.constant 0 : index
    %127 = vector.load %arg15[%c0_51, %c0_52, %c0_53] : memref<4x16x1xf32, #tpu.memory_space<vmem>>, vector<1x16x1xf32>
    %128 = vector.shape_cast %127 : vector<1x16x1xf32> to vector<16x1xf32>
    %c0_54 = arith.constant 0 : index
    %c0_55 = arith.constant 0 : index
    %c0_56 = arith.constant 0 : index
    %129 = vector.load %arg17[%c0_54, %c0_55, %c0_56] : memref<4x16x1xf32, #tpu.memory_space<vmem>>, vector<1x16x1xf32>
    %130 = vector.shape_cast %129 : vector<1x16x1xf32> to vector<16x1xf32>
    %c0_57 = arith.constant 0 : index
    %c0_58 = arith.constant 0 : index
    %c0_59 = arith.constant 0 : index
    %131 = vector.load %arg18[%c0_57, %c0_58, %c0_59] : memref<4x16x1xf32, #tpu.memory_space<vmem>>, vector<1x16x1xf32>
    %132 = vector.shape_cast %131 : vector<1x16x1xf32> to vector<16x1xf32>
    %c0_60 = arith.constant 0 : index
    %c0_61 = arith.constant 0 : index
    %c0_62 = arith.constant 0 : index
    %133 = vector.load %arg19[%c0_60, %c0_61, %c0_62] : memref<4x32x16xbf16, #tpu.memory_space<vmem>>, vector<1x32x16xbf16>
    %134 = vector.shape_cast %133 : vector<1x32x16xbf16> to vector<32x16xbf16>
    %c0_63 = arith.constant 0 : index
    %c0_64 = arith.constant 0 : index
    %c0_65 = arith.constant 0 : index
    %135 = vector.load %arg20[%c0_63, %c0_64, %c0_65] : memref<4x32x1xf32, #tpu.memory_space<vmem>>, vector<1x32x1xf32>
    %136 = vector.shape_cast %135 : vector<1x32x1xf32> to vector<32x1xf32>
    %c0_66 = arith.constant 0 : index
    %c0_67 = arith.constant 0 : index
    %c0_68 = arith.constant 0 : index
    %137 = vector.load %arg21[%c0_66, %c0_67, %c0_68] : memref<4x16x32xbf16, #tpu.memory_space<vmem>>, vector<1x16x32xbf16>
    %138 = vector.shape_cast %137 : vector<1x16x32xbf16> to vector<16x32xbf16>
    %c0_69 = arith.constant 0 : index
    %c0_70 = arith.constant 0 : index
    %c0_71 = arith.constant 0 : index
    %139 = vector.load %arg22[%c0_69, %c0_70, %c0_71] : memref<4x16x1xf32, #tpu.memory_space<vmem>>, vector<1x16x1xf32>
    %140 = vector.shape_cast %139 : vector<1x16x1xf32> to vector<16x1xf32>
    %cst_72 = arith.constant dense<0.000000e+00> : vector<128xf32>
    %141 = vector.multi_reduction <add>, %116, %cst_72 [0] : vector<16x128xf32> to vector<128xf32>
    %142 = vector.shape_cast %141 : vector<128xf32> to vector<1x128xf32>
    %cst_73 = arith.constant 1.600000e+01 : f32
    %143 = vector.broadcast %cst_73 : f32 to vector<1x128xf32>
    %144 = arith.divf %142, %143 : vector<1x128xf32>
    %145 = vector.broadcast %144 : vector<1x128xf32> to vector<16x128xf32>
    %146 = arith.subf %116, %145 : vector<16x128xf32>
    %147 = arith.mulf %146, %146 : vector<16x128xf32>
    %cst_74 = arith.constant dense<0.000000e+00> : vector<128xf32>
    %148 = vector.multi_reduction <add>, %147, %cst_74 [0] : vector<16x128xf32> to vector<128xf32>
    %149 = vector.shape_cast %148 : vector<128xf32> to vector<1x128xf32>
    %cst_75 = arith.constant 1.600000e+01 : f32
    %150 = vector.broadcast %cst_75 : f32 to vector<1x128xf32>
    %151 = arith.divf %149, %150 : vector<1x128xf32>
    %152 = vector.broadcast %144 : vector<1x128xf32> to vector<16x128xf32>
    %153 = arith.subf %116, %152 : vector<16x128xf32>
    %cst_76 = arith.constant 9.99999974E-6 : f32
    %154 = vector.broadcast %cst_76 : f32 to vector<1x128xf32>
    %155 = arith.addf %151, %154 : vector<1x128xf32>
    %156 = math.rsqrt %155 : vector<1x128xf32>
    %157 = vector.broadcast %156 : vector<1x128xf32> to vector<16x128xf32>
    %158 = arith.mulf %153, %157 : vector<16x128xf32>
    %159 = vector.broadcast %118 : vector<16x1xf32> to vector<16x128xf32>
    %160 = arith.mulf %158, %159 : vector<16x128xf32>
    %161 = vector.broadcast %120 : vector<16x1xf32> to vector<16x128xf32>
    %162 = arith.addf %160, %161 : vector<16x128xf32>
    %163 = arith.truncf %162 : vector<16x128xf32> to vector<16x128xbf16>
    %cst_77 = arith.constant dense<0.000000e+00> : vector<48x128xf32>
    %164 = tpu.matmul %122, %163, %cst_77 {dimension_numbers = #tpu.dot_dimension_numbers<[1], [0], [0], [1], [0, 0, 1, 1], [], []>} : vector<48x16xbf16>, vector<16x128xbf16>, vector<48x128xf32> -> vector<48x128xf32>
    %165 = vector.broadcast %124 : vector<48x1xf32> to vector<48x128xf32>
    %166 = arith.addf %164, %165 : vector<48x128xf32>
    %cst_78 = arith.constant 0.000000e+00 : f32
    %167 = vector.broadcast %cst_78 : f32 to vector<16x128xf32>
    %168 = vector.extract_strided_slice %166 {offsets = [0, 0], sizes = [8, 128], strides = [1, 1]} : vector<48x128xf32> to vector<8x128xf32>
    %cst_79 = arith.constant 0.353553385 : f32
    %169 = vector.broadcast %cst_79 : f32 to vector<8x128xf32>
    %170 = arith.mulf %168, %169 : vector<8x128xf32>
    %171 = arith.truncf %170 : vector<8x128xf32> to vector<8x128xbf16>
    %172 = vector.extract_strided_slice %166 {offsets = [16, 0], sizes = [8, 128], strides = [1, 1]} : vector<48x128xf32> to vector<8x128xf32>
    %173 = arith.truncf %172 : vector<8x128xf32> to vector<8x128xbf16>
    %174 = vector.extract_strided_slice %166 {offsets = [32, 0], sizes = [8, 128], strides = [1, 1]} : vector<48x128xf32> to vector<8x128xf32>
    %175 = arith.truncf %174 : vector<8x128xf32> to vector<8x128xbf16>
    %cst_80 = arith.constant dense<0.000000e+00> : vector<128x128xf32>
    %176 = tpu.matmul %171, %173, %cst_80 {dimension_numbers = #tpu.dot_dimension_numbers<[0], [0], [1], [1], [0, 1, 1, 1], [], []>} : vector<8x128xbf16>, vector<8x128xbf16>, vector<128x128xf32> -> vector<128x128xf32>
    %c0_81 = arith.constant 0 : index
    %c0_82 = arith.constant 0 : index
    %c0_83 = arith.constant 0 : index
    %c0_84 = arith.constant 0 : index
    %177 = vector.load %arg16[%c0_81, %c0_82, %c0_83, %c0_84] : memref<4x2x128x128xf32, #tpu.memory_space<vmem>>, vector<1x1x128x128xf32>
    %178 = vector.shape_cast %177 : vector<1x1x128x128xf32> to vector<128x128xf32>
    %179 = arith.addf %176, %178 : vector<128x128xf32>
    %cst_85 = arith.constant dense<0xFF800000> : vector<128xf32>
    %180 = vector.multi_reduction <maximumf>, %179, %cst_85 [1] : vector<128x128xf32> to vector<128xf32>
    %181 = vector.shape_cast %180 : vector<128xf32> to vector<128x1xf32>
    %182 = vector.broadcast %181 : vector<128x1xf32> to vector<128x128xf32>
    %183 = arith.subf %179, %182 : vector<128x128xf32>
    %184 = math.exp %183 : vector<128x128xf32>
    %cst_86 = arith.constant dense<0.000000e+00> : vector<128xf32>
    %185 = vector.multi_reduction <add>, %184, %cst_86 [1] : vector<128x128xf32> to vector<128xf32>
    %186 = vector.shape_cast %185 : vector<128xf32> to vector<128x1xf32>
    %187 = tpu.reciprocal %186 {approx = true} : vector<128x1xf32> -> vector<128x1xf32>
    %188 = vector.broadcast %187 : vector<128x1xf32> to vector<128x128xf32>
    %189 = arith.mulf %184, %188 : vector<128x128xf32>
    %190 = arith.truncf %189 : vector<128x128xf32> to vector<128x128xbf16>
    %cst_87 = arith.constant dense<0.000000e+00> : vector<8x128xf32>
    %191 = tpu.matmul %175, %190, %cst_87 {dimension_numbers = #tpu.dot_dimension_numbers<[1], [1], [0], [0], [0, 0, 1, 0], [], []>} : vector<8x128xbf16>, vector<128x128xbf16>, vector<8x128xf32> -> vector<8x128xf32>
    %192 = vector.extract_strided_slice %126 {offsets = [0, 0, 0], sizes = [1, 16, 8], strides = [1, 1, 1]} : vector<2x16x8xbf16> to vector<1x16x8xbf16>
    %193 = vector.shape_cast %192 : vector<1x16x8xbf16> to vector<16x8xbf16>
    %194 = arith.truncf %191 : vector<8x128xf32> to vector<8x128xbf16>
    %cst_88 = arith.constant dense<0.000000e+00> : vector<16x128xf32>
    %195 = tpu.matmul %193, %194, %cst_88 {dimension_numbers = #tpu.dot_dimension_numbers<[1], [0], [0], [1], [0, 0, 1, 1], [], []>} : vector<16x8xbf16>, vector<8x128xbf16>, vector<16x128xf32> -> vector<16x128xf32>
    %196 = arith.addf %167, %195 : vector<16x128xf32>
    %197 = vector.extract_strided_slice %166 {offsets = [8, 0], sizes = [8, 128], strides = [1, 1]} : vector<48x128xf32> to vector<8x128xf32>
    %cst_89 = arith.constant 0.353553385 : f32
    %198 = vector.broadcast %cst_89 : f32 to vector<8x128xf32>
    %199 = arith.mulf %197, %198 : vector<8x128xf32>
    %200 = arith.truncf %199 : vector<8x128xf32> to vector<8x128xbf16>
    %201 = vector.extract_strided_slice %166 {offsets = [24, 0], sizes = [8, 128], strides = [1, 1]} : vector<48x128xf32> to vector<8x128xf32>
    %202 = arith.truncf %201 : vector<8x128xf32> to vector<8x128xbf16>
    %203 = vector.extract_strided_slice %166 {offsets = [40, 0], sizes = [8, 128], strides = [1, 1]} : vector<48x128xf32> to vector<8x128xf32>
    %204 = arith.truncf %203 : vector<8x128xf32> to vector<8x128xbf16>
    %cst_90 = arith.constant dense<0.000000e+00> : vector<128x128xf32>
    %205 = tpu.matmul %200, %202, %cst_90 {dimension_numbers = #tpu.dot_dimension_numbers<[0], [0], [1], [1], [0, 1, 1, 1], [], []>} : vector<8x128xbf16>, vector<8x128xbf16>, vector<128x128xf32> -> vector<128x128xf32>
    %c0_91 = arith.constant 0 : index
    %c1 = arith.constant 1 : index
    %c0_92 = arith.constant 0 : index
    %c0_93 = arith.constant 0 : index
    %206 = vector.load %arg16[%c0_91, %c1, %c0_92, %c0_93] : memref<4x2x128x128xf32, #tpu.memory_space<vmem>>, vector<1x1x128x128xf32>
    %207 = vector.shape_cast %206 : vector<1x1x128x128xf32> to vector<128x128xf32>
    %208 = arith.addf %205, %207 : vector<128x128xf32>
    %cst_94 = arith.constant dense<0xFF800000> : vector<128xf32>
    %209 = vector.multi_reduction <maximumf>, %208, %cst_94 [1] : vector<128x128xf32> to vector<128xf32>
    %210 = vector.shape_cast %209 : vector<128xf32> to vector<128x1xf32>
    %211 = vector.broadcast %210 : vector<128x1xf32> to vector<128x128xf32>
    %212 = arith.subf %208, %211 : vector<128x128xf32>
    %213 = math.exp %212 : vector<128x128xf32>
    %cst_95 = arith.constant dense<0.000000e+00> : vector<128xf32>
    %214 = vector.multi_reduction <add>, %213, %cst_95 [1] : vector<128x128xf32> to vector<128xf32>
    %215 = vector.shape_cast %214 : vector<128xf32> to vector<128x1xf32>
    %216 = tpu.reciprocal %215 {approx = true} : vector<128x1xf32> -> vector<128x1xf32>
    %217 = vector.broadcast %216 : vector<128x1xf32> to vector<128x128xf32>
    %218 = arith.mulf %213, %217 : vector<128x128xf32>
    %219 = arith.truncf %218 : vector<128x128xf32> to vector<128x128xbf16>
    %cst_96 = arith.constant dense<0.000000e+00> : vector<8x128xf32>
    %220 = tpu.matmul %204, %219, %cst_96 {dimension_numbers = #tpu.dot_dimension_numbers<[1], [1], [0], [0], [0, 0, 1, 0], [], []>} : vector<8x128xbf16>, vector<128x128xbf16>, vector<8x128xf32> -> vector<8x128xf32>
    %221 = vector.extract_strided_slice %126 {offsets = [1, 0, 0], sizes = [1, 16, 8], strides = [1, 1, 1]} : vector<2x16x8xbf16> to vector<1x16x8xbf16>
    %222 = vector.shape_cast %221 : vector<1x16x8xbf16> to vector<16x8xbf16>
    %223 = arith.truncf %220 : vector<8x128xf32> to vector<8x128xbf16>
    %cst_97 = arith.constant dense<0.000000e+00> : vector<16x128xf32>
    %224 = tpu.matmul %222, %223, %cst_97 {dimension_numbers = #tpu.dot_dimension_numbers<[1], [0], [0], [1], [0, 0, 1, 1], [], []>} : vector<16x8xbf16>, vector<8x128xbf16>, vector<16x128xf32> -> vector<16x128xf32>
    %225 = arith.addf %196, %224 : vector<16x128xf32>
    %226 = vector.broadcast %128 : vector<16x1xf32> to vector<16x128xf32>
    %227 = arith.addf %225, %226 : vector<16x128xf32>
    %228 = arith.addf %116, %227 : vector<16x128xf32>
    %cst_98 = arith.constant dense<0.000000e+00> : vector<128xf32>
    %229 = vector.multi_reduction <add>, %228, %cst_98 [0] : vector<16x128xf32> to vector<128xf32>
    %230 = vector.shape_cast %229 : vector<128xf32> to vector<1x128xf32>
    %cst_99 = arith.constant 1.600000e+01 : f32
    %231 = vector.broadcast %cst_99 : f32 to vector<1x128xf32>
    %232 = arith.divf %230, %231 : vector<1x128xf32>
    %233 = vector.broadcast %232 : vector<1x128xf32> to vector<16x128xf32>
    %234 = arith.subf %228, %233 : vector<16x128xf32>
    %235 = arith.mulf %234, %234 : vector<16x128xf32>
    %cst_100 = arith.constant dense<0.000000e+00> : vector<128xf32>
    %236 = vector.multi_reduction <add>, %235, %cst_100 [0] : vector<16x128xf32> to vector<128xf32>
    %237 = vector.shape_cast %236 : vector<128xf32> to vector<1x128xf32>
    %cst_101 = arith.constant 1.600000e+01 : f32
    %238 = vector.broadcast %cst_101 : f32 to vector<1x128xf32>
    %239 = arith.divf %237, %238 : vector<1x128xf32>
    %240 = vector.broadcast %232 : vector<1x128xf32> to vector<16x128xf32>
    %241 = arith.subf %228, %240 : vector<16x128xf32>
    %cst_102 = arith.constant 9.99999974E-6 : f32
    %242 = vector.broadcast %cst_102 : f32 to vector<1x128xf32>
    %243 = arith.addf %239, %242 : vector<1x128xf32>
    %244 = math.rsqrt %243 : vector<1x128xf32>
    %245 = vector.broadcast %244 : vector<1x128xf32> to vector<16x128xf32>
    %246 = arith.mulf %241, %245 : vector<16x128xf32>
    %247 = vector.broadcast %130 : vector<16x1xf32> to vector<16x128xf32>
    %248 = arith.mulf %246, %247 : vector<16x128xf32>
    %249 = vector.broadcast %132 : vector<16x1xf32> to vector<16x128xf32>
    %250 = arith.addf %248, %249 : vector<16x128xf32>
    %251 = arith.truncf %250 : vector<16x128xf32> to vector<16x128xbf16>
    %cst_103 = arith.constant dense<0.000000e+00> : vector<32x128xf32>
    %252 = tpu.matmul %134, %251, %cst_103 {dimension_numbers = #tpu.dot_dimension_numbers<[1], [0], [0], [1], [0, 0, 1, 1], [], []>} : vector<32x16xbf16>, vector<16x128xbf16>, vector<32x128xf32> -> vector<32x128xf32>
    %253 = vector.broadcast %136 : vector<32x1xf32> to vector<32x128xf32>
    %254 = arith.addf %252, %253 : vector<32x128xf32>
    %cst_104 = arith.constant 5.000000e-01 : f32
    %255 = vector.broadcast %cst_104 : f32 to vector<32x128xf32>
    %256 = arith.mulf %255, %254 : vector<32x128xf32>
    %cst_105 = arith.constant 0.707106769 : f32
    %257 = vector.broadcast %cst_105 : f32 to vector<32x128xf32>
    %258 = arith.mulf %254, %257 : vector<32x128xf32>
    %259 = math.absf %258 : vector<32x128xf32>
    %cst_106 = arith.constant 0.327591091 : f32
    %260 = vector.broadcast %cst_106 : f32 to vector<32x128xf32>
    %261 = arith.mulf %260, %259 : vector<32x128xf32>
    %cst_107 = arith.constant 1.000000e+00 : f32
    %262 = vector.broadcast %cst_107 : f32 to vector<32x128xf32>
    %263 = arith.addf %262, %261 : vector<32x128xf32>
    %264 = tpu.reciprocal %263 {approx = true} : vector<32x128xf32> -> vector<32x128xf32>
    %cst_108 = arith.constant 1.06140542 : f32
    %265 = vector.broadcast %cst_108 : f32 to vector<32x128xf32>
    %266 = arith.mulf %265, %264 : vector<32x128xf32>
    %cst_109 = arith.constant -1.45315206 : f32
    %267 = vector.broadcast %cst_109 : f32 to vector<32x128xf32>
    %268 = arith.addf %266, %267 : vector<32x128xf32>
    %269 = arith.mulf %268, %264 : vector<32x128xf32>
    %cst_110 = arith.constant 1.42141378 : f32
    %270 = vector.broadcast %cst_110 : f32 to vector<32x128xf32>
    %271 = arith.addf %269, %270 : vector<32x128xf32>
    %272 = arith.mulf %271, %264 : vector<32x128xf32>
    %cst_111 = arith.constant -0.284496725 : f32
    %273 = vector.broadcast %cst_111 : f32 to vector<32x128xf32>
    %274 = arith.addf %272, %273 : vector<32x128xf32>
    %275 = arith.mulf %274, %264 : vector<32x128xf32>
    %cst_112 = arith.constant 0.254829586 : f32
    %276 = vector.broadcast %cst_112 : f32 to vector<32x128xf32>
    %277 = arith.addf %275, %276 : vector<32x128xf32>
    %278 = arith.mulf %277, %264 : vector<32x128xf32>
    %cst_113 = arith.constant 0.000000e+00 : f32
    %279 = vector.broadcast %cst_113 : f32 to vector<32x128xf32>
    %280 = arith.subf %279, %259 : vector<32x128xf32>
    %281 = arith.mulf %280, %259 : vector<32x128xf32>
    %282 = math.exp %281 : vector<32x128xf32>
    %283 = arith.mulf %278, %282 : vector<32x128xf32>
    %cst_114 = arith.constant 1.000000e+00 : f32
    %284 = vector.broadcast %cst_114 : f32 to vector<32x128xf32>
    %285 = arith.subf %284, %283 : vector<32x128xf32>
    %cst_115 = arith.constant 0.000000e+00 : f32
    %286 = vector.broadcast %cst_115 : f32 to vector<32x128xf32>
    %287 = arith.cmpf olt, %258, %286 : vector<32x128xf32>
    %cst_116 = arith.constant 0.000000e+00 : f32
    %288 = vector.broadcast %cst_116 : f32 to vector<32x128xf32>
    %289 = arith.subf %288, %285 : vector<32x128xf32>
    %290 = arith.select %287, %289, %285 : vector<32x128xi1>, vector<32x128xf32>
    %cst_117 = arith.constant 1.000000e+00 : f32
    %291 = vector.broadcast %cst_117 : f32 to vector<32x128xf32>
    %292 = arith.addf %291, %290 : vector<32x128xf32>
    %293 = arith.mulf %256, %292 : vector<32x128xf32>
    %294 = arith.truncf %293 : vector<32x128xf32> to vector<32x128xbf16>
    %cst_118 = arith.constant dense<0.000000e+00> : vector<16x128xf32>
    %295 = tpu.matmul %138, %294, %cst_118 {dimension_numbers = #tpu.dot_dimension_numbers<[1], [0], [0], [1], [0, 0, 1, 1], [], []>} : vector<16x32xbf16>, vector<32x128xbf16>, vector<16x128xf32> -> vector<16x128xf32>
    %296 = vector.broadcast %140 : vector<16x1xf32> to vector<16x128xf32>
    %297 = arith.addf %295, %296 : vector<16x128xf32>
    %298 = arith.addf %228, %297 : vector<16x128xf32>
    %c1_119 = arith.constant 1 : index
    %c0_120 = arith.constant 0 : index
    %c0_121 = arith.constant 0 : index
    %299 = vector.load %arg10[%c1_119, %c0_120, %c0_121] : memref<4x16x1xf32, #tpu.memory_space<vmem>>, vector<1x16x1xf32>
    %300 = vector.shape_cast %299 : vector<1x16x1xf32> to vector<16x1xf32>
    %c1_122 = arith.constant 1 : index
    %c0_123 = arith.constant 0 : index
    %c0_124 = arith.constant 0 : index
    %301 = vector.load %arg11[%c1_122, %c0_123, %c0_124] : memref<4x16x1xf32, #tpu.memory_space<vmem>>, vector<1x16x1xf32>
    %302 = vector.shape_cast %301 : vector<1x16x1xf32> to vector<16x1xf32>
    %c1_125 = arith.constant 1 : index
    %c0_126 = arith.constant 0 : index
    %c0_127 = arith.constant 0 : index
    %303 = vector.load %arg12[%c1_125, %c0_126, %c0_127] : memref<4x48x16xbf16, #tpu.memory_space<vmem>>, vector<1x48x16xbf16>
    %304 = vector.shape_cast %303 : vector<1x48x16xbf16> to vector<48x16xbf16>
    %c1_128 = arith.constant 1 : index
    %c0_129 = arith.constant 0 : index
    %c0_130 = arith.constant 0 : index
    %305 = vector.load %arg13[%c1_128, %c0_129, %c0_130] : memref<4x48x1xf32, #tpu.memory_space<vmem>>, vector<1x48x1xf32>
    %306 = vector.shape_cast %305 : vector<1x48x1xf32> to vector<48x1xf32>
    %c1_131 = arith.constant 1 : index
    %c0_132 = arith.constant 0 : index
    %c0_133 = arith.constant 0 : index
    %c0_134 = arith.constant 0 : index
    %307 = vector.load %arg14[%c1_131, %c0_132, %c0_133, %c0_134] : memref<4x2x16x8xbf16, #tpu.memory_space<vmem>>, vector<1x2x16x8xbf16>
    %308 = vector.shape_cast %307 : vector<1x2x16x8xbf16> to vector<2x16x8xbf16>
    %c1_135 = arith.constant 1 : index
    %c0_136 = arith.constant 0 : index
    %c0_137 = arith.constant 0 : index
    %309 = vector.load %arg15[%c1_135, %c0_136, %c0_137] : memref<4x16x1xf32, #tpu.memory_space<vmem>>, vector<1x16x1xf32>
    %310 = vector.shape_cast %309 : vector<1x16x1xf32> to vector<16x1xf32>
    %c1_138 = arith.constant 1 : index
    %c0_139 = arith.constant 0 : index
    %c0_140 = arith.constant 0 : index
    %311 = vector.load %arg17[%c1_138, %c0_139, %c0_140] : memref<4x16x1xf32, #tpu.memory_space<vmem>>, vector<1x16x1xf32>
    %312 = vector.shape_cast %311 : vector<1x16x1xf32> to vector<16x1xf32>
    %c1_141 = arith.constant 1 : index
    %c0_142 = arith.constant 0 : index
    %c0_143 = arith.constant 0 : index
    %313 = vector.load %arg18[%c1_141, %c0_142, %c0_143] : memref<4x16x1xf32, #tpu.memory_space<vmem>>, vector<1x16x1xf32>
    %314 = vector.shape_cast %313 : vector<1x16x1xf32> to vector<16x1xf32>
    %c1_144 = arith.constant 1 : index
    %c0_145 = arith.constant 0 : index
    %c0_146 = arith.constant 0 : index
    %315 = vector.load %arg19[%c1_144, %c0_145, %c0_146] : memref<4x32x16xbf16, #tpu.memory_space<vmem>>, vector<1x32x16xbf16>
    %316 = vector.shape_cast %315 : vector<1x32x16xbf16> to vector<32x16xbf16>
    %c1_147 = arith.constant 1 : index
    %c0_148 = arith.constant 0 : index
    %c0_149 = arith.constant 0 : index
    %317 = vector.load %arg20[%c1_147, %c0_148, %c0_149] : memref<4x32x1xf32, #tpu.memory_space<vmem>>, vector<1x32x1xf32>
    %318 = vector.shape_cast %317 : vector<1x32x1xf32> to vector<32x1xf32>
    %c1_150 = arith.constant 1 : index
    %c0_151 = arith.constant 0 : index
    %c0_152 = arith.constant 0 : index
    %319 = vector.load %arg21[%c1_150, %c0_151, %c0_152] : memref<4x16x32xbf16, #tpu.memory_space<vmem>>, vector<1x16x32xbf16>
    %320 = vector.shape_cast %319 : vector<1x16x32xbf16> to vector<16x32xbf16>
    %c1_153 = arith.constant 1 : index
    %c0_154 = arith.constant 0 : index
    %c0_155 = arith.constant 0 : index
    %321 = vector.load %arg22[%c1_153, %c0_154, %c0_155] : memref<4x16x1xf32, #tpu.memory_space<vmem>>, vector<1x16x1xf32>
    %322 = vector.shape_cast %321 : vector<1x16x1xf32> to vector<16x1xf32>
    %cst_156 = arith.constant dense<0.000000e+00> : vector<128xf32>
    %323 = vector.multi_reduction <add>, %298, %cst_156 [0] : vector<16x128xf32> to vector<128xf32>
    %324 = vector.shape_cast %323 : vector<128xf32> to vector<1x128xf32>
    %cst_157 = arith.constant 1.600000e+01 : f32
    %325 = vector.broadcast %cst_157 : f32 to vector<1x128xf32>
    %326 = arith.divf %324, %325 : vector<1x128xf32>
    %327 = vector.broadcast %326 : vector<1x128xf32> to vector<16x128xf32>
    %328 = arith.subf %298, %327 : vector<16x128xf32>
    %329 = arith.mulf %328, %328 : vector<16x128xf32>
    %cst_158 = arith.constant dense<0.000000e+00> : vector<128xf32>
    %330 = vector.multi_reduction <add>, %329, %cst_158 [0] : vector<16x128xf32> to vector<128xf32>
    %331 = vector.shape_cast %330 : vector<128xf32> to vector<1x128xf32>
    %cst_159 = arith.constant 1.600000e+01 : f32
    %332 = vector.broadcast %cst_159 : f32 to vector<1x128xf32>
    %333 = arith.divf %331, %332 : vector<1x128xf32>
    %334 = vector.broadcast %326 : vector<1x128xf32> to vector<16x128xf32>
    %335 = arith.subf %298, %334 : vector<16x128xf32>
    %cst_160 = arith.constant 9.99999974E-6 : f32
    %336 = vector.broadcast %cst_160 : f32 to vector<1x128xf32>
    %337 = arith.addf %333, %336 : vector<1x128xf32>
    %338 = math.rsqrt %337 : vector<1x128xf32>
    %339 = vector.broadcast %338 : vector<1x128xf32> to vector<16x128xf32>
    %340 = arith.mulf %335, %339 : vector<16x128xf32>
    %341 = vector.broadcast %300 : vector<16x1xf32> to vector<16x128xf32>
    %342 = arith.mulf %340, %341 : vector<16x128xf32>
    %343 = vector.broadcast %302 : vector<16x1xf32> to vector<16x128xf32>
    %344 = arith.addf %342, %343 : vector<16x128xf32>
    %345 = arith.truncf %344 : vector<16x128xf32> to vector<16x128xbf16>
    %cst_161 = arith.constant dense<0.000000e+00> : vector<48x128xf32>
    %346 = tpu.matmul %304, %345, %cst_161 {dimension_numbers = #tpu.dot_dimension_numbers<[1], [0], [0], [1], [0, 0, 1, 1], [], []>} : vector<48x16xbf16>, vector<16x128xbf16>, vector<48x128xf32> -> vector<48x128xf32>
    %347 = vector.broadcast %306 : vector<48x1xf32> to vector<48x128xf32>
    %348 = arith.addf %346, %347 : vector<48x128xf32>
    %cst_162 = arith.constant 0.000000e+00 : f32
    %349 = vector.broadcast %cst_162 : f32 to vector<16x128xf32>
    %350 = vector.extract_strided_slice %348 {offsets = [0, 0], sizes = [8, 128], strides = [1, 1]} : vector<48x128xf32> to vector<8x128xf32>
    %cst_163 = arith.constant 0.353553385 : f32
    %351 = vector.broadcast %cst_163 : f32 to vector<8x128xf32>
    %352 = arith.mulf %350, %351 : vector<8x128xf32>
    %353 = arith.truncf %352 : vector<8x128xf32> to vector<8x128xbf16>
    %354 = vector.extract_strided_slice %348 {offsets = [16, 0], sizes = [8, 128], strides = [1, 1]} : vector<48x128xf32> to vector<8x128xf32>
    %355 = arith.truncf %354 : vector<8x128xf32> to vector<8x128xbf16>
    %356 = vector.extract_strided_slice %348 {offsets = [32, 0], sizes = [8, 128], strides = [1, 1]} : vector<48x128xf32> to vector<8x128xf32>
    %357 = arith.truncf %356 : vector<8x128xf32> to vector<8x128xbf16>
    %cst_164 = arith.constant dense<0.000000e+00> : vector<128x128xf32>
    %358 = tpu.matmul %353, %355, %cst_164 {dimension_numbers = #tpu.dot_dimension_numbers<[0], [0], [1], [1], [0, 1, 1, 1], [], []>} : vector<8x128xbf16>, vector<8x128xbf16>, vector<128x128xf32> -> vector<128x128xf32>
    %c1_165 = arith.constant 1 : index
    %c0_166 = arith.constant 0 : index
    %c0_167 = arith.constant 0 : index
    %c0_168 = arith.constant 0 : index
    %359 = vector.load %arg16[%c1_165, %c0_166, %c0_167, %c0_168] : memref<4x2x128x128xf32, #tpu.memory_space<vmem>>, vector<1x1x128x128xf32>
    %360 = vector.shape_cast %359 : vector<1x1x128x128xf32> to vector<128x128xf32>
    %361 = arith.addf %358, %360 : vector<128x128xf32>
    %cst_169 = arith.constant dense<0xFF800000> : vector<128xf32>
    %362 = vector.multi_reduction <maximumf>, %361, %cst_169 [1] : vector<128x128xf32> to vector<128xf32>
    %363 = vector.shape_cast %362 : vector<128xf32> to vector<128x1xf32>
    %364 = vector.broadcast %363 : vector<128x1xf32> to vector<128x128xf32>
    %365 = arith.subf %361, %364 : vector<128x128xf32>
    %366 = math.exp %365 : vector<128x128xf32>
    %cst_170 = arith.constant dense<0.000000e+00> : vector<128xf32>
    %367 = vector.multi_reduction <add>, %366, %cst_170 [1] : vector<128x128xf32> to vector<128xf32>
    %368 = vector.shape_cast %367 : vector<128xf32> to vector<128x1xf32>
    %369 = tpu.reciprocal %368 {approx = true} : vector<128x1xf32> -> vector<128x1xf32>
    %370 = vector.broadcast %369 : vector<128x1xf32> to vector<128x128xf32>
    %371 = arith.mulf %366, %370 : vector<128x128xf32>
    %372 = arith.truncf %371 : vector<128x128xf32> to vector<128x128xbf16>
    %cst_171 = arith.constant dense<0.000000e+00> : vector<8x128xf32>
    %373 = tpu.matmul %357, %372, %cst_171 {dimension_numbers = #tpu.dot_dimension_numbers<[1], [1], [0], [0], [0, 0, 1, 0], [], []>} : vector<8x128xbf16>, vector<128x128xbf16>, vector<8x128xf32> -> vector<8x128xf32>
    %374 = vector.extract_strided_slice %308 {offsets = [0, 0, 0], sizes = [1, 16, 8], strides = [1, 1, 1]} : vector<2x16x8xbf16> to vector<1x16x8xbf16>
    %375 = vector.shape_cast %374 : vector<1x16x8xbf16> to vector<16x8xbf16>
    %376 = arith.truncf %373 : vector<8x128xf32> to vector<8x128xbf16>
    %cst_172 = arith.constant dense<0.000000e+00> : vector<16x128xf32>
    %377 = tpu.matmul %375, %376, %cst_172 {dimension_numbers = #tpu.dot_dimension_numbers<[1], [0], [0], [1], [0, 0, 1, 1], [], []>} : vector<16x8xbf16>, vector<8x128xbf16>, vector<16x128xf32> -> vector<16x128xf32>
    %378 = arith.addf %349, %377 : vector<16x128xf32>
    %379 = vector.extract_strided_slice %348 {offsets = [8, 0], sizes = [8, 128], strides = [1, 1]} : vector<48x128xf32> to vector<8x128xf32>
    %cst_173 = arith.constant 0.353553385 : f32
    %380 = vector.broadcast %cst_173 : f32 to vector<8x128xf32>
    %381 = arith.mulf %379, %380 : vector<8x128xf32>
    %382 = arith.truncf %381 : vector<8x128xf32> to vector<8x128xbf16>
    %383 = vector.extract_strided_slice %348 {offsets = [24, 0], sizes = [8, 128], strides = [1, 1]} : vector<48x128xf32> to vector<8x128xf32>
    %384 = arith.truncf %383 : vector<8x128xf32> to vector<8x128xbf16>
    %385 = vector.extract_strided_slice %348 {offsets = [40, 0], sizes = [8, 128], strides = [1, 1]} : vector<48x128xf32> to vector<8x128xf32>
    %386 = arith.truncf %385 : vector<8x128xf32> to vector<8x128xbf16>
    %cst_174 = arith.constant dense<0.000000e+00> : vector<128x128xf32>
    %387 = tpu.matmul %382, %384, %cst_174 {dimension_numbers = #tpu.dot_dimension_numbers<[0], [0], [1], [1], [0, 1, 1, 1], [], []>} : vector<8x128xbf16>, vector<8x128xbf16>, vector<128x128xf32> -> vector<128x128xf32>
    %c1_175 = arith.constant 1 : index
    %c1_176 = arith.constant 1 : index
    %c0_177 = arith.constant 0 : index
    %c0_178 = arith.constant 0 : index
    %388 = vector.load %arg16[%c1_175, %c1_176, %c0_177, %c0_178] : memref<4x2x128x128xf32, #tpu.memory_space<vmem>>, vector<1x1x128x128xf32>
    %389 = vector.shape_cast %388 : vector<1x1x128x128xf32> to vector<128x128xf32>
    %390 = arith.addf %387, %389 : vector<128x128xf32>
    %cst_179 = arith.constant dense<0xFF800000> : vector<128xf32>
    %391 = vector.multi_reduction <maximumf>, %390, %cst_179 [1] : vector<128x128xf32> to vector<128xf32>
    %392 = vector.shape_cast %391 : vector<128xf32> to vector<128x1xf32>
    %393 = vector.broadcast %392 : vector<128x1xf32> to vector<128x128xf32>
    %394 = arith.subf %390, %393 : vector<128x128xf32>
    %395 = math.exp %394 : vector<128x128xf32>
    %cst_180 = arith.constant dense<0.000000e+00> : vector<128xf32>
    %396 = vector.multi_reduction <add>, %395, %cst_180 [1] : vector<128x128xf32> to vector<128xf32>
    %397 = vector.shape_cast %396 : vector<128xf32> to vector<128x1xf32>
    %398 = tpu.reciprocal %397 {approx = true} : vector<128x1xf32> -> vector<128x1xf32>
    %399 = vector.broadcast %398 : vector<128x1xf32> to vector<128x128xf32>
    %400 = arith.mulf %395, %399 : vector<128x128xf32>
    %401 = arith.truncf %400 : vector<128x128xf32> to vector<128x128xbf16>
    %cst_181 = arith.constant dense<0.000000e+00> : vector<8x128xf32>
    %402 = tpu.matmul %386, %401, %cst_181 {dimension_numbers = #tpu.dot_dimension_numbers<[1], [1], [0], [0], [0, 0, 1, 0], [], []>} : vector<8x128xbf16>, vector<128x128xbf16>, vector<8x128xf32> -> vector<8x128xf32>
    %403 = vector.extract_strided_slice %308 {offsets = [1, 0, 0], sizes = [1, 16, 8], strides = [1, 1, 1]} : vector<2x16x8xbf16> to vector<1x16x8xbf16>
    %404 = vector.shape_cast %403 : vector<1x16x8xbf16> to vector<16x8xbf16>
    %405 = arith.truncf %402 : vector<8x128xf32> to vector<8x128xbf16>
    %cst_182 = arith.constant dense<0.000000e+00> : vector<16x128xf32>
    %406 = tpu.matmul %404, %405, %cst_182 {dimension_numbers = #tpu.dot_dimension_numbers<[1], [0], [0], [1], [0, 0, 1, 1], [], []>} : vector<16x8xbf16>, vector<8x128xbf16>, vector<16x128xf32> -> vector<16x128xf32>
    %407 = arith.addf %378, %406 : vector<16x128xf32>
    %408 = vector.broadcast %310 : vector<16x1xf32> to vector<16x128xf32>
    %409 = arith.addf %407, %408 : vector<16x128xf32>
    %410 = arith.addf %298, %409 : vector<16x128xf32>
    %cst_183 = arith.constant dense<0.000000e+00> : vector<128xf32>
    %411 = vector.multi_reduction <add>, %410, %cst_183 [0] : vector<16x128xf32> to vector<128xf32>
    %412 = vector.shape_cast %411 : vector<128xf32> to vector<1x128xf32>
    %cst_184 = arith.constant 1.600000e+01 : f32
    %413 = vector.broadcast %cst_184 : f32 to vector<1x128xf32>
    %414 = arith.divf %412, %413 : vector<1x128xf32>
    %415 = vector.broadcast %414 : vector<1x128xf32> to vector<16x128xf32>
    %416 = arith.subf %410, %415 : vector<16x128xf32>
    %417 = arith.mulf %416, %416 : vector<16x128xf32>
    %cst_185 = arith.constant dense<0.000000e+00> : vector<128xf32>
    %418 = vector.multi_reduction <add>, %417, %cst_185 [0] : vector<16x128xf32> to vector<128xf32>
    %419 = vector.shape_cast %418 : vector<128xf32> to vector<1x128xf32>
    %cst_186 = arith.constant 1.600000e+01 : f32
    %420 = vector.broadcast %cst_186 : f32 to vector<1x128xf32>
    %421 = arith.divf %419, %420 : vector<1x128xf32>
    %422 = vector.broadcast %414 : vector<1x128xf32> to vector<16x128xf32>
    %423 = arith.subf %410, %422 : vector<16x128xf32>
    %cst_187 = arith.constant 9.99999974E-6 : f32
    %424 = vector.broadcast %cst_187 : f32 to vector<1x128xf32>
    %425 = arith.addf %421, %424 : vector<1x128xf32>
    %426 = math.rsqrt %425 : vector<1x128xf32>
    %427 = vector.broadcast %426 : vector<1x128xf32> to vector<16x128xf32>
    %428 = arith.mulf %423, %427 : vector<16x128xf32>
    %429 = vector.broadcast %312 : vector<16x1xf32> to vector<16x128xf32>
    %430 = arith.mulf %428, %429 : vector<16x128xf32>
    %431 = vector.broadcast %314 : vector<16x1xf32> to vector<16x128xf32>
    %432 = arith.addf %430, %431 : vector<16x128xf32>
    %433 = arith.truncf %432 : vector<16x128xf32> to vector<16x128xbf16>
    %cst_188 = arith.constant dense<0.000000e+00> : vector<32x128xf32>
    %434 = tpu.matmul %316, %433, %cst_188 {dimension_numbers = #tpu.dot_dimension_numbers<[1], [0], [0], [1], [0, 0, 1, 1], [], []>} : vector<32x16xbf16>, vector<16x128xbf16>, vector<32x128xf32> -> vector<32x128xf32>
    %435 = vector.broadcast %318 : vector<32x1xf32> to vector<32x128xf32>
    %436 = arith.addf %434, %435 : vector<32x128xf32>
    %cst_189 = arith.constant 5.000000e-01 : f32
    %437 = vector.broadcast %cst_189 : f32 to vector<32x128xf32>
    %438 = arith.mulf %437, %436 : vector<32x128xf32>
    %cst_190 = arith.constant 0.707106769 : f32
    %439 = vector.broadcast %cst_190 : f32 to vector<32x128xf32>
    %440 = arith.mulf %436, %439 : vector<32x128xf32>
    %441 = math.absf %440 : vector<32x128xf32>
    %cst_191 = arith.constant 0.327591091 : f32
    %442 = vector.broadcast %cst_191 : f32 to vector<32x128xf32>
    %443 = arith.mulf %442, %441 : vector<32x128xf32>
    %cst_192 = arith.constant 1.000000e+00 : f32
    %444 = vector.broadcast %cst_192 : f32 to vector<32x128xf32>
    %445 = arith.addf %444, %443 : vector<32x128xf32>
    %446 = tpu.reciprocal %445 {approx = true} : vector<32x128xf32> -> vector<32x128xf32>
    %cst_193 = arith.constant 1.06140542 : f32
    %447 = vector.broadcast %cst_193 : f32 to vector<32x128xf32>
    %448 = arith.mulf %447, %446 : vector<32x128xf32>
    %cst_194 = arith.constant -1.45315206 : f32
    %449 = vector.broadcast %cst_194 : f32 to vector<32x128xf32>
    %450 = arith.addf %448, %449 : vector<32x128xf32>
    %451 = arith.mulf %450, %446 : vector<32x128xf32>
    %cst_195 = arith.constant 1.42141378 : f32
    %452 = vector.broadcast %cst_195 : f32 to vector<32x128xf32>
    %453 = arith.addf %451, %452 : vector<32x128xf32>
    %454 = arith.mulf %453, %446 : vector<32x128xf32>
    %cst_196 = arith.constant -0.284496725 : f32
    %455 = vector.broadcast %cst_196 : f32 to vector<32x128xf32>
    %456 = arith.addf %454, %455 : vector<32x128xf32>
    %457 = arith.mulf %456, %446 : vector<32x128xf32>
    %cst_197 = arith.constant 0.254829586 : f32
    %458 = vector.broadcast %cst_197 : f32 to vector<32x128xf32>
    %459 = arith.addf %457, %458 : vector<32x128xf32>
    %460 = arith.mulf %459, %446 : vector<32x128xf32>
    %cst_198 = arith.constant 0.000000e+00 : f32
    %461 = vector.broadcast %cst_198 : f32 to vector<32x128xf32>
    %462 = arith.subf %461, %441 : vector<32x128xf32>
    %463 = arith.mulf %462, %441 : vector<32x128xf32>
    %464 = math.exp %463 : vector<32x128xf32>
    %465 = arith.mulf %460, %464 : vector<32x128xf32>
    %cst_199 = arith.constant 1.000000e+00 : f32
    %466 = vector.broadcast %cst_199 : f32 to vector<32x128xf32>
    %467 = arith.subf %466, %465 : vector<32x128xf32>
    %cst_200 = arith.constant 0.000000e+00 : f32
    %468 = vector.broadcast %cst_200 : f32 to vector<32x128xf32>
    %469 = arith.cmpf olt, %440, %468 : vector<32x128xf32>
    %cst_201 = arith.constant 0.000000e+00 : f32
    %470 = vector.broadcast %cst_201 : f32 to vector<32x128xf32>
    %471 = arith.subf %470, %467 : vector<32x128xf32>
    %472 = arith.select %469, %471, %467 : vector<32x128xi1>, vector<32x128xf32>
    %cst_202 = arith.constant 1.000000e+00 : f32
    %473 = vector.broadcast %cst_202 : f32 to vector<32x128xf32>
    %474 = arith.addf %473, %472 : vector<32x128xf32>
    %475 = arith.mulf %438, %474 : vector<32x128xf32>
    %476 = arith.truncf %475 : vector<32x128xf32> to vector<32x128xbf16>
    %cst_203 = arith.constant dense<0.000000e+00> : vector<16x128xf32>
    %477 = tpu.matmul %320, %476, %cst_203 {dimension_numbers = #tpu.dot_dimension_numbers<[1], [0], [0], [1], [0, 0, 1, 1], [], []>} : vector<16x32xbf16>, vector<32x128xbf16>, vector<16x128xf32> -> vector<16x128xf32>
    %478 = vector.broadcast %322 : vector<16x1xf32> to vector<16x128xf32>
    %479 = arith.addf %477, %478 : vector<16x128xf32>
    %480 = arith.addf %410, %479 : vector<16x128xf32>
    %c0_204 = arith.constant 0 : index
    %c0_205 = arith.constant 0 : index
    %c0_206 = arith.constant 0 : index
    %481 = vector.load %arg23[%c0_204, %c0_205, %c0_206] : memref<2x16x144xbf16, #tpu.memory_space<vmem>>, vector<1x16x144xbf16>
    %482 = vector.shape_cast %481 : vector<1x16x144xbf16> to vector<16x144xbf16>
    %c0_207 = arith.constant 0 : index
    %c0_208 = arith.constant 0 : index
    %c0_209 = arith.constant 0 : index
    %483 = vector.load %arg24[%c0_207, %c0_208, %c0_209] : memref<2x16x1xf32, #tpu.memory_space<vmem>>, vector<1x16x1xf32>
    %484 = vector.shape_cast %483 : vector<1x16x1xf32> to vector<16x1xf32>
    %c9_i32_210 = arith.constant 9 : i32
    %485 = tpu.dynamic_rotate %480 by %c9_i32_210 dim 1 : vector<16x128xf32>, i32 -> vector<16x128xf32>
    %486 = vector.extract_strided_slice %0 {offsets = [0, 0], sizes = [1, 128], strides = [1, 1]} : vector<9x128xf32> to vector<1x128xf32>
    %487 = vector.broadcast %486 : vector<1x128xf32> to vector<16x128xf32>
    %488 = arith.mulf %485, %487 : vector<16x128xf32>
    %c8_i32_211 = arith.constant 8 : i32
    %489 = tpu.dynamic_rotate %480 by %c8_i32_211 dim 1 : vector<16x128xf32>, i32 -> vector<16x128xf32>
    %490 = vector.extract_strided_slice %0 {offsets = [1, 0], sizes = [1, 128], strides = [1, 1]} : vector<9x128xf32> to vector<1x128xf32>
    %491 = vector.broadcast %490 : vector<1x128xf32> to vector<16x128xf32>
    %492 = arith.mulf %489, %491 : vector<16x128xf32>
    %c7_i32_212 = arith.constant 7 : i32
    %493 = tpu.dynamic_rotate %480 by %c7_i32_212 dim 1 : vector<16x128xf32>, i32 -> vector<16x128xf32>
    %494 = vector.extract_strided_slice %0 {offsets = [2, 0], sizes = [1, 128], strides = [1, 1]} : vector<9x128xf32> to vector<1x128xf32>
    %495 = vector.broadcast %494 : vector<1x128xf32> to vector<16x128xf32>
    %496 = arith.mulf %493, %495 : vector<16x128xf32>
    %c1_i32_213 = arith.constant 1 : i32
    %497 = tpu.dynamic_rotate %480 by %c1_i32_213 dim 1 : vector<16x128xf32>, i32 -> vector<16x128xf32>
    %498 = vector.extract_strided_slice %0 {offsets = [3, 0], sizes = [1, 128], strides = [1, 1]} : vector<9x128xf32> to vector<1x128xf32>
    %499 = vector.broadcast %498 : vector<1x128xf32> to vector<16x128xf32>
    %500 = arith.mulf %497, %499 : vector<16x128xf32>
    %501 = vector.extract_strided_slice %0 {offsets = [4, 0], sizes = [1, 128], strides = [1, 1]} : vector<9x128xf32> to vector<1x128xf32>
    %502 = vector.broadcast %501 : vector<1x128xf32> to vector<16x128xf32>
    %503 = arith.mulf %480, %502 : vector<16x128xf32>
    %c127_i32_214 = arith.constant 127 : i32
    %504 = tpu.dynamic_rotate %480 by %c127_i32_214 dim 1 : vector<16x128xf32>, i32 -> vector<16x128xf32>
    %505 = vector.extract_strided_slice %0 {offsets = [5, 0], sizes = [1, 128], strides = [1, 1]} : vector<9x128xf32> to vector<1x128xf32>
    %506 = vector.broadcast %505 : vector<1x128xf32> to vector<16x128xf32>
    %507 = arith.mulf %504, %506 : vector<16x128xf32>
    %c121_i32_215 = arith.constant 121 : i32
    %508 = tpu.dynamic_rotate %480 by %c121_i32_215 dim 1 : vector<16x128xf32>, i32 -> vector<16x128xf32>
    %509 = vector.extract_strided_slice %0 {offsets = [6, 0], sizes = [1, 128], strides = [1, 1]} : vector<9x128xf32> to vector<1x128xf32>
    %510 = vector.broadcast %509 : vector<1x128xf32> to vector<16x128xf32>
    %511 = arith.mulf %508, %510 : vector<16x128xf32>
    %c120_i32_216 = arith.constant 120 : i32
    %512 = tpu.dynamic_rotate %480 by %c120_i32_216 dim 1 : vector<16x128xf32>, i32 -> vector<16x128xf32>
    %513 = vector.extract_strided_slice %0 {offsets = [7, 0], sizes = [1, 128], strides = [1, 1]} : vector<9x128xf32> to vector<1x128xf32>
    %514 = vector.broadcast %513 : vector<1x128xf32> to vector<16x128xf32>
    %515 = arith.mulf %512, %514 : vector<16x128xf32>
    %c119_i32_217 = arith.constant 119 : i32
    %516 = tpu.dynamic_rotate %480 by %c119_i32_217 dim 1 : vector<16x128xf32>, i32 -> vector<16x128xf32>
    %517 = vector.extract_strided_slice %0 {offsets = [8, 0], sizes = [1, 128], strides = [1, 1]} : vector<9x128xf32> to vector<1x128xf32>
    %518 = vector.broadcast %517 : vector<1x128xf32> to vector<16x128xf32>
    %519 = arith.mulf %516, %518 : vector<16x128xf32>
    %520 = tpu.concatenate %488, %492, %496, %500, %503, %507, %511, %515, %519 in 0 : vector<16x128xf32>, vector<16x128xf32>, vector<16x128xf32>, vector<16x128xf32>, vector<16x128xf32>, vector<16x128xf32>, vector<16x128xf32>, vector<16x128xf32>, vector<16x128xf32> -> vector<144x128xf32>
    %521 = arith.truncf %520 : vector<144x128xf32> to vector<144x128xbf16>
    %cst_218 = arith.constant dense<0.000000e+00> : vector<16x128xf32>
    %522 = tpu.matmul %482, %521, %cst_218 {dimension_numbers = #tpu.dot_dimension_numbers<[1], [0], [0], [1], [0, 0, 1, 1], [], []>} : vector<16x144xbf16>, vector<144x128xbf16>, vector<16x128xf32> -> vector<16x128xf32>
    %523 = vector.broadcast %484 : vector<16x1xf32> to vector<16x128xf32>
    %524 = arith.addf %522, %523 : vector<16x128xf32>
    %525 = arith.addf %524, %116 : vector<16x128xf32>
    %cst_219 = arith.constant dense<0.000000e+00> : vector<128xf32>
    %526 = vector.multi_reduction <add>, %525, %cst_219 [0] : vector<16x128xf32> to vector<128xf32>
    %527 = vector.shape_cast %526 : vector<128xf32> to vector<1x128xf32>
    %cst_220 = arith.constant 1.600000e+01 : f32
    %528 = vector.broadcast %cst_220 : f32 to vector<1x128xf32>
    %529 = arith.divf %527, %528 : vector<1x128xf32>
    %530 = vector.broadcast %529 : vector<1x128xf32> to vector<16x128xf32>
    %531 = arith.subf %525, %530 : vector<16x128xf32>
    %532 = arith.mulf %531, %531 : vector<16x128xf32>
    %cst_221 = arith.constant dense<0.000000e+00> : vector<128xf32>
    %533 = vector.multi_reduction <add>, %532, %cst_221 [0] : vector<16x128xf32> to vector<128xf32>
    %534 = vector.shape_cast %533 : vector<128xf32> to vector<1x128xf32>
    %cst_222 = arith.constant 1.600000e+01 : f32
    %535 = vector.broadcast %cst_222 : f32 to vector<1x128xf32>
    %536 = arith.divf %534, %535 : vector<1x128xf32>
    %537 = vector.broadcast %529 : vector<1x128xf32> to vector<16x128xf32>
    %538 = arith.subf %525, %537 : vector<16x128xf32>
    %cst_223 = arith.constant 9.99999974E-6 : f32
    %539 = vector.broadcast %cst_223 : f32 to vector<1x128xf32>
    %540 = arith.addf %536, %539 : vector<1x128xf32>
    %541 = math.rsqrt %540 : vector<1x128xf32>
    %542 = vector.broadcast %541 : vector<1x128xf32> to vector<16x128xf32>
    %543 = arith.mulf %538, %542 : vector<16x128xf32>
    %544 = vector.broadcast %93 : vector<16x1xf32> to vector<16x128xf32>
    %545 = arith.mulf %543, %544 : vector<16x128xf32>
    %546 = vector.broadcast %94 : vector<16x1xf32> to vector<16x128xf32>
    %547 = arith.addf %545, %546 : vector<16x128xf32>
    %cst_224 = arith.constant dense<0.000000e+00> : vector<128xf32>
    %548 = vector.multi_reduction <add>, %547, %cst_224 [0] : vector<16x128xf32> to vector<128xf32>
    %549 = vector.shape_cast %548 : vector<128xf32> to vector<1x128xf32>
    %cst_225 = arith.constant 1.600000e+01 : f32
    %550 = vector.broadcast %cst_225 : f32 to vector<1x128xf32>
    %551 = arith.divf %549, %550 : vector<1x128xf32>
    %552 = vector.broadcast %551 : vector<1x128xf32> to vector<16x128xf32>
    %553 = arith.subf %547, %552 : vector<16x128xf32>
    %554 = arith.mulf %553, %553 : vector<16x128xf32>
    %cst_226 = arith.constant dense<0.000000e+00> : vector<128xf32>
    %555 = vector.multi_reduction <add>, %554, %cst_226 [0] : vector<16x128xf32> to vector<128xf32>
    %556 = vector.shape_cast %555 : vector<128xf32> to vector<1x128xf32>
    %cst_227 = arith.constant 1.600000e+01 : f32
    %557 = vector.broadcast %cst_227 : f32 to vector<1x128xf32>
    %558 = arith.divf %556, %557 : vector<1x128xf32>
    %559 = vector.broadcast %551 : vector<1x128xf32> to vector<16x128xf32>
    %560 = arith.subf %547, %559 : vector<16x128xf32>
    %cst_228 = arith.constant 9.99999974E-6 : f32
    %561 = vector.broadcast %cst_228 : f32 to vector<1x128xf32>
    %562 = arith.addf %558, %561 : vector<1x128xf32>
    %563 = math.rsqrt %562 : vector<1x128xf32>
    %564 = vector.broadcast %563 : vector<1x128xf32> to vector<16x128xf32>
    %565 = arith.mulf %560, %564 : vector<16x128xf32>
    %566 = vector.broadcast %91 : vector<16x1xf32> to vector<16x128xf32>
    %567 = arith.mulf %565, %566 : vector<16x128xf32>
    %568 = vector.broadcast %92 : vector<16x1xf32> to vector<16x128xf32>
    %569 = arith.addf %567, %568 : vector<16x128xf32>
    %c2 = arith.constant 2 : index
    %c0_229 = arith.constant 0 : index
    %c0_230 = arith.constant 0 : index
    %570 = vector.load %arg10[%c2, %c0_229, %c0_230] : memref<4x16x1xf32, #tpu.memory_space<vmem>>, vector<1x16x1xf32>
    %571 = vector.shape_cast %570 : vector<1x16x1xf32> to vector<16x1xf32>
    %c2_231 = arith.constant 2 : index
    %c0_232 = arith.constant 0 : index
    %c0_233 = arith.constant 0 : index
    %572 = vector.load %arg11[%c2_231, %c0_232, %c0_233] : memref<4x16x1xf32, #tpu.memory_space<vmem>>, vector<1x16x1xf32>
    %573 = vector.shape_cast %572 : vector<1x16x1xf32> to vector<16x1xf32>
    %c2_234 = arith.constant 2 : index
    %c0_235 = arith.constant 0 : index
    %c0_236 = arith.constant 0 : index
    %574 = vector.load %arg12[%c2_234, %c0_235, %c0_236] : memref<4x48x16xbf16, #tpu.memory_space<vmem>>, vector<1x48x16xbf16>
    %575 = vector.shape_cast %574 : vector<1x48x16xbf16> to vector<48x16xbf16>
    %c2_237 = arith.constant 2 : index
    %c0_238 = arith.constant 0 : index
    %c0_239 = arith.constant 0 : index
    %576 = vector.load %arg13[%c2_237, %c0_238, %c0_239] : memref<4x48x1xf32, #tpu.memory_space<vmem>>, vector<1x48x1xf32>
    %577 = vector.shape_cast %576 : vector<1x48x1xf32> to vector<48x1xf32>
    %c2_240 = arith.constant 2 : index
    %c0_241 = arith.constant 0 : index
    %c0_242 = arith.constant 0 : index
    %c0_243 = arith.constant 0 : index
    %578 = vector.load %arg14[%c2_240, %c0_241, %c0_242, %c0_243] : memref<4x2x16x8xbf16, #tpu.memory_space<vmem>>, vector<1x2x16x8xbf16>
    %579 = vector.shape_cast %578 : vector<1x2x16x8xbf16> to vector<2x16x8xbf16>
    %c2_244 = arith.constant 2 : index
    %c0_245 = arith.constant 0 : index
    %c0_246 = arith.constant 0 : index
    %580 = vector.load %arg15[%c2_244, %c0_245, %c0_246] : memref<4x16x1xf32, #tpu.memory_space<vmem>>, vector<1x16x1xf32>
    %581 = vector.shape_cast %580 : vector<1x16x1xf32> to vector<16x1xf32>
    %c2_247 = arith.constant 2 : index
    %c0_248 = arith.constant 0 : index
    %c0_249 = arith.constant 0 : index
    %582 = vector.load %arg17[%c2_247, %c0_248, %c0_249] : memref<4x16x1xf32, #tpu.memory_space<vmem>>, vector<1x16x1xf32>
    %583 = vector.shape_cast %582 : vector<1x16x1xf32> to vector<16x1xf32>
    %c2_250 = arith.constant 2 : index
    %c0_251 = arith.constant 0 : index
    %c0_252 = arith.constant 0 : index
    %584 = vector.load %arg18[%c2_250, %c0_251, %c0_252] : memref<4x16x1xf32, #tpu.memory_space<vmem>>, vector<1x16x1xf32>
    %585 = vector.shape_cast %584 : vector<1x16x1xf32> to vector<16x1xf32>
    %c2_253 = arith.constant 2 : index
    %c0_254 = arith.constant 0 : index
    %c0_255 = arith.constant 0 : index
    %586 = vector.load %arg19[%c2_253, %c0_254, %c0_255] : memref<4x32x16xbf16, #tpu.memory_space<vmem>>, vector<1x32x16xbf16>
    %587 = vector.shape_cast %586 : vector<1x32x16xbf16> to vector<32x16xbf16>
    %c2_256 = arith.constant 2 : index
    %c0_257 = arith.constant 0 : index
    %c0_258 = arith.constant 0 : index
    %588 = vector.load %arg20[%c2_256, %c0_257, %c0_258] : memref<4x32x1xf32, #tpu.memory_space<vmem>>, vector<1x32x1xf32>
    %589 = vector.shape_cast %588 : vector<1x32x1xf32> to vector<32x1xf32>
    %c2_259 = arith.constant 2 : index
    %c0_260 = arith.constant 0 : index
    %c0_261 = arith.constant 0 : index
    %590 = vector.load %arg21[%c2_259, %c0_260, %c0_261] : memref<4x16x32xbf16, #tpu.memory_space<vmem>>, vector<1x16x32xbf16>
    %591 = vector.shape_cast %590 : vector<1x16x32xbf16> to vector<16x32xbf16>
    %c2_262 = arith.constant 2 : index
    %c0_263 = arith.constant 0 : index
    %c0_264 = arith.constant 0 : index
    %592 = vector.load %arg22[%c2_262, %c0_263, %c0_264] : memref<4x16x1xf32, #tpu.memory_space<vmem>>, vector<1x16x1xf32>
    %593 = vector.shape_cast %592 : vector<1x16x1xf32> to vector<16x1xf32>
    %cst_265 = arith.constant dense<0.000000e+00> : vector<128xf32>
    %594 = vector.multi_reduction <add>, %569, %cst_265 [0] : vector<16x128xf32> to vector<128xf32>
    %595 = vector.shape_cast %594 : vector<128xf32> to vector<1x128xf32>
    %cst_266 = arith.constant 1.600000e+01 : f32
    %596 = vector.broadcast %cst_266 : f32 to vector<1x128xf32>
    %597 = arith.divf %595, %596 : vector<1x128xf32>
    %598 = vector.broadcast %597 : vector<1x128xf32> to vector<16x128xf32>
    %599 = arith.subf %569, %598 : vector<16x128xf32>
    %600 = arith.mulf %599, %599 : vector<16x128xf32>
    %cst_267 = arith.constant dense<0.000000e+00> : vector<128xf32>
    %601 = vector.multi_reduction <add>, %600, %cst_267 [0] : vector<16x128xf32> to vector<128xf32>
    %602 = vector.shape_cast %601 : vector<128xf32> to vector<1x128xf32>
    %cst_268 = arith.constant 1.600000e+01 : f32
    %603 = vector.broadcast %cst_268 : f32 to vector<1x128xf32>
    %604 = arith.divf %602, %603 : vector<1x128xf32>
    %605 = vector.broadcast %597 : vector<1x128xf32> to vector<16x128xf32>
    %606 = arith.subf %569, %605 : vector<16x128xf32>
    %cst_269 = arith.constant 9.99999974E-6 : f32
    %607 = vector.broadcast %cst_269 : f32 to vector<1x128xf32>
    %608 = arith.addf %604, %607 : vector<1x128xf32>
    %609 = math.rsqrt %608 : vector<1x128xf32>
    %610 = vector.broadcast %609 : vector<1x128xf32> to vector<16x128xf32>
    %611 = arith.mulf %606, %610 : vector<16x128xf32>
    %612 = vector.broadcast %571 : vector<16x1xf32> to vector<16x128xf32>
    %613 = arith.mulf %611, %612 : vector<16x128xf32>
    %614 = vector.broadcast %573 : vector<16x1xf32> to vector<16x128xf32>
    %615 = arith.addf %613, %614 : vector<16x128xf32>
    %616 = arith.truncf %615 : vector<16x128xf32> to vector<16x128xbf16>
    %cst_270 = arith.constant dense<0.000000e+00> : vector<48x128xf32>
    %617 = tpu.matmul %575, %616, %cst_270 {dimension_numbers = #tpu.dot_dimension_numbers<[1], [0], [0], [1], [0, 0, 1, 1], [], []>} : vector<48x16xbf16>, vector<16x128xbf16>, vector<48x128xf32> -> vector<48x128xf32>
    %618 = vector.broadcast %577 : vector<48x1xf32> to vector<48x128xf32>
    %619 = arith.addf %617, %618 : vector<48x128xf32>
    %cst_271 = arith.constant 0.000000e+00 : f32
    %620 = vector.broadcast %cst_271 : f32 to vector<16x128xf32>
    %621 = vector.extract_strided_slice %619 {offsets = [0, 0], sizes = [8, 128], strides = [1, 1]} : vector<48x128xf32> to vector<8x128xf32>
    %cst_272 = arith.constant 0.353553385 : f32
    %622 = vector.broadcast %cst_272 : f32 to vector<8x128xf32>
    %623 = arith.mulf %621, %622 : vector<8x128xf32>
    %624 = arith.truncf %623 : vector<8x128xf32> to vector<8x128xbf16>
    %625 = vector.extract_strided_slice %619 {offsets = [16, 0], sizes = [8, 128], strides = [1, 1]} : vector<48x128xf32> to vector<8x128xf32>
    %626 = arith.truncf %625 : vector<8x128xf32> to vector<8x128xbf16>
    %627 = vector.extract_strided_slice %619 {offsets = [32, 0], sizes = [8, 128], strides = [1, 1]} : vector<48x128xf32> to vector<8x128xf32>
    %628 = arith.truncf %627 : vector<8x128xf32> to vector<8x128xbf16>
    %cst_273 = arith.constant dense<0.000000e+00> : vector<128x128xf32>
    %629 = tpu.matmul %624, %626, %cst_273 {dimension_numbers = #tpu.dot_dimension_numbers<[0], [0], [1], [1], [0, 1, 1, 1], [], []>} : vector<8x128xbf16>, vector<8x128xbf16>, vector<128x128xf32> -> vector<128x128xf32>
    %c2_274 = arith.constant 2 : index
    %c0_275 = arith.constant 0 : index
    %c0_276 = arith.constant 0 : index
    %c0_277 = arith.constant 0 : index
    %630 = vector.load %arg16[%c2_274, %c0_275, %c0_276, %c0_277] : memref<4x2x128x128xf32, #tpu.memory_space<vmem>>, vector<1x1x128x128xf32>
    %631 = vector.shape_cast %630 : vector<1x1x128x128xf32> to vector<128x128xf32>
    %632 = arith.addf %629, %631 : vector<128x128xf32>
    %cst_278 = arith.constant dense<0xFF800000> : vector<128xf32>
    %633 = vector.multi_reduction <maximumf>, %632, %cst_278 [1] : vector<128x128xf32> to vector<128xf32>
    %634 = vector.shape_cast %633 : vector<128xf32> to vector<128x1xf32>
    %635 = vector.broadcast %634 : vector<128x1xf32> to vector<128x128xf32>
    %636 = arith.subf %632, %635 : vector<128x128xf32>
    %637 = math.exp %636 : vector<128x128xf32>
    %cst_279 = arith.constant dense<0.000000e+00> : vector<128xf32>
    %638 = vector.multi_reduction <add>, %637, %cst_279 [1] : vector<128x128xf32> to vector<128xf32>
    %639 = vector.shape_cast %638 : vector<128xf32> to vector<128x1xf32>
    %640 = tpu.reciprocal %639 {approx = true} : vector<128x1xf32> -> vector<128x1xf32>
    %641 = vector.broadcast %640 : vector<128x1xf32> to vector<128x128xf32>
    %642 = arith.mulf %637, %641 : vector<128x128xf32>
    %643 = arith.truncf %642 : vector<128x128xf32> to vector<128x128xbf16>
    %cst_280 = arith.constant dense<0.000000e+00> : vector<8x128xf32>
    %644 = tpu.matmul %628, %643, %cst_280 {dimension_numbers = #tpu.dot_dimension_numbers<[1], [1], [0], [0], [0, 0, 1, 0], [], []>} : vector<8x128xbf16>, vector<128x128xbf16>, vector<8x128xf32> -> vector<8x128xf32>
    %645 = vector.extract_strided_slice %579 {offsets = [0, 0, 0], sizes = [1, 16, 8], strides = [1, 1, 1]} : vector<2x16x8xbf16> to vector<1x16x8xbf16>
    %646 = vector.shape_cast %645 : vector<1x16x8xbf16> to vector<16x8xbf16>
    %647 = arith.truncf %644 : vector<8x128xf32> to vector<8x128xbf16>
    %cst_281 = arith.constant dense<0.000000e+00> : vector<16x128xf32>
    %648 = tpu.matmul %646, %647, %cst_281 {dimension_numbers = #tpu.dot_dimension_numbers<[1], [0], [0], [1], [0, 0, 1, 1], [], []>} : vector<16x8xbf16>, vector<8x128xbf16>, vector<16x128xf32> -> vector<16x128xf32>
    %649 = arith.addf %620, %648 : vector<16x128xf32>
    %650 = vector.extract_strided_slice %619 {offsets = [8, 0], sizes = [8, 128], strides = [1, 1]} : vector<48x128xf32> to vector<8x128xf32>
    %cst_282 = arith.constant 0.353553385 : f32
    %651 = vector.broadcast %cst_282 : f32 to vector<8x128xf32>
    %652 = arith.mulf %650, %651 : vector<8x128xf32>
    %653 = arith.truncf %652 : vector<8x128xf32> to vector<8x128xbf16>
    %654 = vector.extract_strided_slice %619 {offsets = [24, 0], sizes = [8, 128], strides = [1, 1]} : vector<48x128xf32> to vector<8x128xf32>
    %655 = arith.truncf %654 : vector<8x128xf32> to vector<8x128xbf16>
    %656 = vector.extract_strided_slice %619 {offsets = [40, 0], sizes = [8, 128], strides = [1, 1]} : vector<48x128xf32> to vector<8x128xf32>
    %657 = arith.truncf %656 : vector<8x128xf32> to vector<8x128xbf16>
    %cst_283 = arith.constant dense<0.000000e+00> : vector<128x128xf32>
    %658 = tpu.matmul %653, %655, %cst_283 {dimension_numbers = #tpu.dot_dimension_numbers<[0], [0], [1], [1], [0, 1, 1, 1], [], []>} : vector<8x128xbf16>, vector<8x128xbf16>, vector<128x128xf32> -> vector<128x128xf32>
    %c2_284 = arith.constant 2 : index
    %c1_285 = arith.constant 1 : index
    %c0_286 = arith.constant 0 : index
    %c0_287 = arith.constant 0 : index
    %659 = vector.load %arg16[%c2_284, %c1_285, %c0_286, %c0_287] : memref<4x2x128x128xf32, #tpu.memory_space<vmem>>, vector<1x1x128x128xf32>
    %660 = vector.shape_cast %659 : vector<1x1x128x128xf32> to vector<128x128xf32>
    %661 = arith.addf %658, %660 : vector<128x128xf32>
    %cst_288 = arith.constant dense<0xFF800000> : vector<128xf32>
    %662 = vector.multi_reduction <maximumf>, %661, %cst_288 [1] : vector<128x128xf32> to vector<128xf32>
    %663 = vector.shape_cast %662 : vector<128xf32> to vector<128x1xf32>
    %664 = vector.broadcast %663 : vector<128x1xf32> to vector<128x128xf32>
    %665 = arith.subf %661, %664 : vector<128x128xf32>
    %666 = math.exp %665 : vector<128x128xf32>
    %cst_289 = arith.constant dense<0.000000e+00> : vector<128xf32>
    %667 = vector.multi_reduction <add>, %666, %cst_289 [1] : vector<128x128xf32> to vector<128xf32>
    %668 = vector.shape_cast %667 : vector<128xf32> to vector<128x1xf32>
    %669 = tpu.reciprocal %668 {approx = true} : vector<128x1xf32> -> vector<128x1xf32>
    %670 = vector.broadcast %669 : vector<128x1xf32> to vector<128x128xf32>
    %671 = arith.mulf %666, %670 : vector<128x128xf32>
    %672 = arith.truncf %671 : vector<128x128xf32> to vector<128x128xbf16>
    %cst_290 = arith.constant dense<0.000000e+00> : vector<8x128xf32>
    %673 = tpu.matmul %657, %672, %cst_290 {dimension_numbers = #tpu.dot_dimension_numbers<[1], [1], [0], [0], [0, 0, 1, 0], [], []>} : vector<8x128xbf16>, vector<128x128xbf16>, vector<8x128xf32> -> vector<8x128xf32>
    %674 = vector.extract_strided_slice %579 {offsets = [1, 0, 0], sizes = [1, 16, 8], strides = [1, 1, 1]} : vector<2x16x8xbf16> to vector<1x16x8xbf16>
    %675 = vector.shape_cast %674 : vector<1x16x8xbf16> to vector<16x8xbf16>
    %676 = arith.truncf %673 : vector<8x128xf32> to vector<8x128xbf16>
    %cst_291 = arith.constant dense<0.000000e+00> : vector<16x128xf32>
    %677 = tpu.matmul %675, %676, %cst_291 {dimension_numbers = #tpu.dot_dimension_numbers<[1], [0], [0], [1], [0, 0, 1, 1], [], []>} : vector<16x8xbf16>, vector<8x128xbf16>, vector<16x128xf32> -> vector<16x128xf32>
    %678 = arith.addf %649, %677 : vector<16x128xf32>
    %679 = vector.broadcast %581 : vector<16x1xf32> to vector<16x128xf32>
    %680 = arith.addf %678, %679 : vector<16x128xf32>
    %681 = arith.addf %569, %680 : vector<16x128xf32>
    %cst_292 = arith.constant dense<0.000000e+00> : vector<128xf32>
    %682 = vector.multi_reduction <add>, %681, %cst_292 [0] : vector<16x128xf32> to vector<128xf32>
    %683 = vector.shape_cast %682 : vector<128xf32> to vector<1x128xf32>
    %cst_293 = arith.constant 1.600000e+01 : f32
    %684 = vector.broadcast %cst_293 : f32 to vector<1x128xf32>
    %685 = arith.divf %683, %684 : vector<1x128xf32>
    %686 = vector.broadcast %685 : vector<1x128xf32> to vector<16x128xf32>
    %687 = arith.subf %681, %686 : vector<16x128xf32>
    %688 = arith.mulf %687, %687 : vector<16x128xf32>
    %cst_294 = arith.constant dense<0.000000e+00> : vector<128xf32>
    %689 = vector.multi_reduction <add>, %688, %cst_294 [0] : vector<16x128xf32> to vector<128xf32>
    %690 = vector.shape_cast %689 : vector<128xf32> to vector<1x128xf32>
    %cst_295 = arith.constant 1.600000e+01 : f32
    %691 = vector.broadcast %cst_295 : f32 to vector<1x128xf32>
    %692 = arith.divf %690, %691 : vector<1x128xf32>
    %693 = vector.broadcast %685 : vector<1x128xf32> to vector<16x128xf32>
    %694 = arith.subf %681, %693 : vector<16x128xf32>
    %cst_296 = arith.constant 9.99999974E-6 : f32
    %695 = vector.broadcast %cst_296 : f32 to vector<1x128xf32>
    %696 = arith.addf %692, %695 : vector<1x128xf32>
    %697 = math.rsqrt %696 : vector<1x128xf32>
    %698 = vector.broadcast %697 : vector<1x128xf32> to vector<16x128xf32>
    %699 = arith.mulf %694, %698 : vector<16x128xf32>
    %700 = vector.broadcast %583 : vector<16x1xf32> to vector<16x128xf32>
    %701 = arith.mulf %699, %700 : vector<16x128xf32>
    %702 = vector.broadcast %585 : vector<16x1xf32> to vector<16x128xf32>
    %703 = arith.addf %701, %702 : vector<16x128xf32>
    %704 = arith.truncf %703 : vector<16x128xf32> to vector<16x128xbf16>
    %cst_297 = arith.constant dense<0.000000e+00> : vector<32x128xf32>
    %705 = tpu.matmul %587, %704, %cst_297 {dimension_numbers = #tpu.dot_dimension_numbers<[1], [0], [0], [1], [0, 0, 1, 1], [], []>} : vector<32x16xbf16>, vector<16x128xbf16>, vector<32x128xf32> -> vector<32x128xf32>
    %706 = vector.broadcast %589 : vector<32x1xf32> to vector<32x128xf32>
    %707 = arith.addf %705, %706 : vector<32x128xf32>
    %cst_298 = arith.constant 5.000000e-01 : f32
    %708 = vector.broadcast %cst_298 : f32 to vector<32x128xf32>
    %709 = arith.mulf %708, %707 : vector<32x128xf32>
    %cst_299 = arith.constant 0.707106769 : f32
    %710 = vector.broadcast %cst_299 : f32 to vector<32x128xf32>
    %711 = arith.mulf %707, %710 : vector<32x128xf32>
    %712 = math.absf %711 : vector<32x128xf32>
    %cst_300 = arith.constant 0.327591091 : f32
    %713 = vector.broadcast %cst_300 : f32 to vector<32x128xf32>
    %714 = arith.mulf %713, %712 : vector<32x128xf32>
    %cst_301 = arith.constant 1.000000e+00 : f32
    %715 = vector.broadcast %cst_301 : f32 to vector<32x128xf32>
    %716 = arith.addf %715, %714 : vector<32x128xf32>
    %717 = tpu.reciprocal %716 {approx = true} : vector<32x128xf32> -> vector<32x128xf32>
    %cst_302 = arith.constant 1.06140542 : f32
    %718 = vector.broadcast %cst_302 : f32 to vector<32x128xf32>
    %719 = arith.mulf %718, %717 : vector<32x128xf32>
    %cst_303 = arith.constant -1.45315206 : f32
    %720 = vector.broadcast %cst_303 : f32 to vector<32x128xf32>
    %721 = arith.addf %719, %720 : vector<32x128xf32>
    %722 = arith.mulf %721, %717 : vector<32x128xf32>
    %cst_304 = arith.constant 1.42141378 : f32
    %723 = vector.broadcast %cst_304 : f32 to vector<32x128xf32>
    %724 = arith.addf %722, %723 : vector<32x128xf32>
    %725 = arith.mulf %724, %717 : vector<32x128xf32>
    %cst_305 = arith.constant -0.284496725 : f32
    %726 = vector.broadcast %cst_305 : f32 to vector<32x128xf32>
    %727 = arith.addf %725, %726 : vector<32x128xf32>
    %728 = arith.mulf %727, %717 : vector<32x128xf32>
    %cst_306 = arith.constant 0.254829586 : f32
    %729 = vector.broadcast %cst_306 : f32 to vector<32x128xf32>
    %730 = arith.addf %728, %729 : vector<32x128xf32>
    %731 = arith.mulf %730, %717 : vector<32x128xf32>
    %cst_307 = arith.constant 0.000000e+00 : f32
    %732 = vector.broadcast %cst_307 : f32 to vector<32x128xf32>
    %733 = arith.subf %732, %712 : vector<32x128xf32>
    %734 = arith.mulf %733, %712 : vector<32x128xf32>
    %735 = math.exp %734 : vector<32x128xf32>
    %736 = arith.mulf %731, %735 : vector<32x128xf32>
    %cst_308 = arith.constant 1.000000e+00 : f32
    %737 = vector.broadcast %cst_308 : f32 to vector<32x128xf32>
    %738 = arith.subf %737, %736 : vector<32x128xf32>
    %cst_309 = arith.constant 0.000000e+00 : f32
    %739 = vector.broadcast %cst_309 : f32 to vector<32x128xf32>
    %740 = arith.cmpf olt, %711, %739 : vector<32x128xf32>
    %cst_310 = arith.constant 0.000000e+00 : f32
    %741 = vector.broadcast %cst_310 : f32 to vector<32x128xf32>
    %742 = arith.subf %741, %738 : vector<32x128xf32>
    %743 = arith.select %740, %742, %738 : vector<32x128xi1>, vector<32x128xf32>
    %cst_311 = arith.constant 1.000000e+00 : f32
    %744 = vector.broadcast %cst_311 : f32 to vector<32x128xf32>
    %745 = arith.addf %744, %743 : vector<32x128xf32>
    %746 = arith.mulf %709, %745 : vector<32x128xf32>
    %747 = arith.truncf %746 : vector<32x128xf32> to vector<32x128xbf16>
    %cst_312 = arith.constant dense<0.000000e+00> : vector<16x128xf32>
    %748 = tpu.matmul %591, %747, %cst_312 {dimension_numbers = #tpu.dot_dimension_numbers<[1], [0], [0], [1], [0, 0, 1, 1], [], []>} : vector<16x32xbf16>, vector<32x128xbf16>, vector<16x128xf32> -> vector<16x128xf32>
    %749 = vector.broadcast %593 : vector<16x1xf32> to vector<16x128xf32>
    %750 = arith.addf %748, %749 : vector<16x128xf32>
    %751 = arith.addf %681, %750 : vector<16x128xf32>
    %c3 = arith.constant 3 : index
    %c0_313 = arith.constant 0 : index
    %c0_314 = arith.constant 0 : index
    %752 = vector.load %arg10[%c3, %c0_313, %c0_314] : memref<4x16x1xf32, #tpu.memory_space<vmem>>, vector<1x16x1xf32>
    %753 = vector.shape_cast %752 : vector<1x16x1xf32> to vector<16x1xf32>
    %c3_315 = arith.constant 3 : index
    %c0_316 = arith.constant 0 : index
    %c0_317 = arith.constant 0 : index
    %754 = vector.load %arg11[%c3_315, %c0_316, %c0_317] : memref<4x16x1xf32, #tpu.memory_space<vmem>>, vector<1x16x1xf32>
    %755 = vector.shape_cast %754 : vector<1x16x1xf32> to vector<16x1xf32>
    %c3_318 = arith.constant 3 : index
    %c0_319 = arith.constant 0 : index
    %c0_320 = arith.constant 0 : index
    %756 = vector.load %arg12[%c3_318, %c0_319, %c0_320] : memref<4x48x16xbf16, #tpu.memory_space<vmem>>, vector<1x48x16xbf16>
    %757 = vector.shape_cast %756 : vector<1x48x16xbf16> to vector<48x16xbf16>
    %c3_321 = arith.constant 3 : index
    %c0_322 = arith.constant 0 : index
    %c0_323 = arith.constant 0 : index
    %758 = vector.load %arg13[%c3_321, %c0_322, %c0_323] : memref<4x48x1xf32, #tpu.memory_space<vmem>>, vector<1x48x1xf32>
    %759 = vector.shape_cast %758 : vector<1x48x1xf32> to vector<48x1xf32>
    %c3_324 = arith.constant 3 : index
    %c0_325 = arith.constant 0 : index
    %c0_326 = arith.constant 0 : index
    %c0_327 = arith.constant 0 : index
    %760 = vector.load %arg14[%c3_324, %c0_325, %c0_326, %c0_327] : memref<4x2x16x8xbf16, #tpu.memory_space<vmem>>, vector<1x2x16x8xbf16>
    %761 = vector.shape_cast %760 : vector<1x2x16x8xbf16> to vector<2x16x8xbf16>
    %c3_328 = arith.constant 3 : index
    %c0_329 = arith.constant 0 : index
    %c0_330 = arith.constant 0 : index
    %762 = vector.load %arg15[%c3_328, %c0_329, %c0_330] : memref<4x16x1xf32, #tpu.memory_space<vmem>>, vector<1x16x1xf32>
    %763 = vector.shape_cast %762 : vector<1x16x1xf32> to vector<16x1xf32>
    %c3_331 = arith.constant 3 : index
    %c0_332 = arith.constant 0 : index
    %c0_333 = arith.constant 0 : index
    %764 = vector.load %arg17[%c3_331, %c0_332, %c0_333] : memref<4x16x1xf32, #tpu.memory_space<vmem>>, vector<1x16x1xf32>
    %765 = vector.shape_cast %764 : vector<1x16x1xf32> to vector<16x1xf32>
    %c3_334 = arith.constant 3 : index
    %c0_335 = arith.constant 0 : index
    %c0_336 = arith.constant 0 : index
    %766 = vector.load %arg18[%c3_334, %c0_335, %c0_336] : memref<4x16x1xf32, #tpu.memory_space<vmem>>, vector<1x16x1xf32>
    %767 = vector.shape_cast %766 : vector<1x16x1xf32> to vector<16x1xf32>
    %c3_337 = arith.constant 3 : index
    %c0_338 = arith.constant 0 : index
    %c0_339 = arith.constant 0 : index
    %768 = vector.load %arg19[%c3_337, %c0_338, %c0_339] : memref<4x32x16xbf16, #tpu.memory_space<vmem>>, vector<1x32x16xbf16>
    %769 = vector.shape_cast %768 : vector<1x32x16xbf16> to vector<32x16xbf16>
    %c3_340 = arith.constant 3 : index
    %c0_341 = arith.constant 0 : index
    %c0_342 = arith.constant 0 : index
    %770 = vector.load %arg20[%c3_340, %c0_341, %c0_342] : memref<4x32x1xf32, #tpu.memory_space<vmem>>, vector<1x32x1xf32>
    %771 = vector.shape_cast %770 : vector<1x32x1xf32> to vector<32x1xf32>
    %c3_343 = arith.constant 3 : index
    %c0_344 = arith.constant 0 : index
    %c0_345 = arith.constant 0 : index
    %772 = vector.load %arg21[%c3_343, %c0_344, %c0_345] : memref<4x16x32xbf16, #tpu.memory_space<vmem>>, vector<1x16x32xbf16>
    %773 = vector.shape_cast %772 : vector<1x16x32xbf16> to vector<16x32xbf16>
    %c3_346 = arith.constant 3 : index
    %c0_347 = arith.constant 0 : index
    %c0_348 = arith.constant 0 : index
    %774 = vector.load %arg22[%c3_346, %c0_347, %c0_348] : memref<4x16x1xf32, #tpu.memory_space<vmem>>, vector<1x16x1xf32>
    %775 = vector.shape_cast %774 : vector<1x16x1xf32> to vector<16x1xf32>
    %cst_349 = arith.constant dense<0.000000e+00> : vector<128xf32>
    %776 = vector.multi_reduction <add>, %751, %cst_349 [0] : vector<16x128xf32> to vector<128xf32>
    %777 = vector.shape_cast %776 : vector<128xf32> to vector<1x128xf32>
    %cst_350 = arith.constant 1.600000e+01 : f32
    %778 = vector.broadcast %cst_350 : f32 to vector<1x128xf32>
    %779 = arith.divf %777, %778 : vector<1x128xf32>
    %780 = vector.broadcast %779 : vector<1x128xf32> to vector<16x128xf32>
    %781 = arith.subf %751, %780 : vector<16x128xf32>
    %782 = arith.mulf %781, %781 : vector<16x128xf32>
    %cst_351 = arith.constant dense<0.000000e+00> : vector<128xf32>
    %783 = vector.multi_reduction <add>, %782, %cst_351 [0] : vector<16x128xf32> to vector<128xf32>
    %784 = vector.shape_cast %783 : vector<128xf32> to vector<1x128xf32>
    %cst_352 = arith.constant 1.600000e+01 : f32
    %785 = vector.broadcast %cst_352 : f32 to vector<1x128xf32>
    %786 = arith.divf %784, %785 : vector<1x128xf32>
    %787 = vector.broadcast %779 : vector<1x128xf32> to vector<16x128xf32>
    %788 = arith.subf %751, %787 : vector<16x128xf32>
    %cst_353 = arith.constant 9.99999974E-6 : f32
    %789 = vector.broadcast %cst_353 : f32 to vector<1x128xf32>
    %790 = arith.addf %786, %789 : vector<1x128xf32>
    %791 = math.rsqrt %790 : vector<1x128xf32>
    %792 = vector.broadcast %791 : vector<1x128xf32> to vector<16x128xf32>
    %793 = arith.mulf %788, %792 : vector<16x128xf32>
    %794 = vector.broadcast %753 : vector<16x1xf32> to vector<16x128xf32>
    %795 = arith.mulf %793, %794 : vector<16x128xf32>
    %796 = vector.broadcast %755 : vector<16x1xf32> to vector<16x128xf32>
    %797 = arith.addf %795, %796 : vector<16x128xf32>
    %798 = arith.truncf %797 : vector<16x128xf32> to vector<16x128xbf16>
    %cst_354 = arith.constant dense<0.000000e+00> : vector<48x128xf32>
    %799 = tpu.matmul %757, %798, %cst_354 {dimension_numbers = #tpu.dot_dimension_numbers<[1], [0], [0], [1], [0, 0, 1, 1], [], []>} : vector<48x16xbf16>, vector<16x128xbf16>, vector<48x128xf32> -> vector<48x128xf32>
    %800 = vector.broadcast %759 : vector<48x1xf32> to vector<48x128xf32>
    %801 = arith.addf %799, %800 : vector<48x128xf32>
    %cst_355 = arith.constant 0.000000e+00 : f32
    %802 = vector.broadcast %cst_355 : f32 to vector<16x128xf32>
    %803 = vector.extract_strided_slice %801 {offsets = [0, 0], sizes = [8, 128], strides = [1, 1]} : vector<48x128xf32> to vector<8x128xf32>
    %cst_356 = arith.constant 0.353553385 : f32
    %804 = vector.broadcast %cst_356 : f32 to vector<8x128xf32>
    %805 = arith.mulf %803, %804 : vector<8x128xf32>
    %806 = arith.truncf %805 : vector<8x128xf32> to vector<8x128xbf16>
    %807 = vector.extract_strided_slice %801 {offsets = [16, 0], sizes = [8, 128], strides = [1, 1]} : vector<48x128xf32> to vector<8x128xf32>
    %808 = arith.truncf %807 : vector<8x128xf32> to vector<8x128xbf16>
    %809 = vector.extract_strided_slice %801 {offsets = [32, 0], sizes = [8, 128], strides = [1, 1]} : vector<48x128xf32> to vector<8x128xf32>
    %810 = arith.truncf %809 : vector<8x128xf32> to vector<8x128xbf16>
    %cst_357 = arith.constant dense<0.000000e+00> : vector<128x128xf32>
    %811 = tpu.matmul %806, %808, %cst_357 {dimension_numbers = #tpu.dot_dimension_numbers<[0], [0], [1], [1], [0, 1, 1, 1], [], []>} : vector<8x128xbf16>, vector<8x128xbf16>, vector<128x128xf32> -> vector<128x128xf32>
    %c3_358 = arith.constant 3 : index
    %c0_359 = arith.constant 0 : index
    %c0_360 = arith.constant 0 : index
    %c0_361 = arith.constant 0 : index
    %812 = vector.load %arg16[%c3_358, %c0_359, %c0_360, %c0_361] : memref<4x2x128x128xf32, #tpu.memory_space<vmem>>, vector<1x1x128x128xf32>
    %813 = vector.shape_cast %812 : vector<1x1x128x128xf32> to vector<128x128xf32>
    %814 = arith.addf %811, %813 : vector<128x128xf32>
    %cst_362 = arith.constant dense<0xFF800000> : vector<128xf32>
    %815 = vector.multi_reduction <maximumf>, %814, %cst_362 [1] : vector<128x128xf32> to vector<128xf32>
    %816 = vector.shape_cast %815 : vector<128xf32> to vector<128x1xf32>
    %817 = vector.broadcast %816 : vector<128x1xf32> to vector<128x128xf32>
    %818 = arith.subf %814, %817 : vector<128x128xf32>
    %819 = math.exp %818 : vector<128x128xf32>
    %cst_363 = arith.constant dense<0.000000e+00> : vector<128xf32>
    %820 = vector.multi_reduction <add>, %819, %cst_363 [1] : vector<128x128xf32> to vector<128xf32>
    %821 = vector.shape_cast %820 : vector<128xf32> to vector<128x1xf32>
    %822 = tpu.reciprocal %821 {approx = true} : vector<128x1xf32> -> vector<128x1xf32>
    %823 = vector.broadcast %822 : vector<128x1xf32> to vector<128x128xf32>
    %824 = arith.mulf %819, %823 : vector<128x128xf32>
    %825 = arith.truncf %824 : vector<128x128xf32> to vector<128x128xbf16>
    %cst_364 = arith.constant dense<0.000000e+00> : vector<8x128xf32>
    %826 = tpu.matmul %810, %825, %cst_364 {dimension_numbers = #tpu.dot_dimension_numbers<[1], [1], [0], [0], [0, 0, 1, 0], [], []>} : vector<8x128xbf16>, vector<128x128xbf16>, vector<8x128xf32> -> vector<8x128xf32>
    %827 = vector.extract_strided_slice %761 {offsets = [0, 0, 0], sizes = [1, 16, 8], strides = [1, 1, 1]} : vector<2x16x8xbf16> to vector<1x16x8xbf16>
    %828 = vector.shape_cast %827 : vector<1x16x8xbf16> to vector<16x8xbf16>
    %829 = arith.truncf %826 : vector<8x128xf32> to vector<8x128xbf16>
    %cst_365 = arith.constant dense<0.000000e+00> : vector<16x128xf32>
    %830 = tpu.matmul %828, %829, %cst_365 {dimension_numbers = #tpu.dot_dimension_numbers<[1], [0], [0], [1], [0, 0, 1, 1], [], []>} : vector<16x8xbf16>, vector<8x128xbf16>, vector<16x128xf32> -> vector<16x128xf32>
    %831 = arith.addf %802, %830 : vector<16x128xf32>
    %832 = vector.extract_strided_slice %801 {offsets = [8, 0], sizes = [8, 128], strides = [1, 1]} : vector<48x128xf32> to vector<8x128xf32>
    %cst_366 = arith.constant 0.353553385 : f32
    %833 = vector.broadcast %cst_366 : f32 to vector<8x128xf32>
    %834 = arith.mulf %832, %833 : vector<8x128xf32>
    %835 = arith.truncf %834 : vector<8x128xf32> to vector<8x128xbf16>
    %836 = vector.extract_strided_slice %801 {offsets = [24, 0], sizes = [8, 128], strides = [1, 1]} : vector<48x128xf32> to vector<8x128xf32>
    %837 = arith.truncf %836 : vector<8x128xf32> to vector<8x128xbf16>
    %838 = vector.extract_strided_slice %801 {offsets = [40, 0], sizes = [8, 128], strides = [1, 1]} : vector<48x128xf32> to vector<8x128xf32>
    %839 = arith.truncf %838 : vector<8x128xf32> to vector<8x128xbf16>
    %cst_367 = arith.constant dense<0.000000e+00> : vector<128x128xf32>
    %840 = tpu.matmul %835, %837, %cst_367 {dimension_numbers = #tpu.dot_dimension_numbers<[0], [0], [1], [1], [0, 1, 1, 1], [], []>} : vector<8x128xbf16>, vector<8x128xbf16>, vector<128x128xf32> -> vector<128x128xf32>
    %c3_368 = arith.constant 3 : index
    %c1_369 = arith.constant 1 : index
    %c0_370 = arith.constant 0 : index
    %c0_371 = arith.constant 0 : index
    %841 = vector.load %arg16[%c3_368, %c1_369, %c0_370, %c0_371] : memref<4x2x128x128xf32, #tpu.memory_space<vmem>>, vector<1x1x128x128xf32>
    %842 = vector.shape_cast %841 : vector<1x1x128x128xf32> to vector<128x128xf32>
    %843 = arith.addf %840, %842 : vector<128x128xf32>
    %cst_372 = arith.constant dense<0xFF800000> : vector<128xf32>
    %844 = vector.multi_reduction <maximumf>, %843, %cst_372 [1] : vector<128x128xf32> to vector<128xf32>
    %845 = vector.shape_cast %844 : vector<128xf32> to vector<128x1xf32>
    %846 = vector.broadcast %845 : vector<128x1xf32> to vector<128x128xf32>
    %847 = arith.subf %843, %846 : vector<128x128xf32>
    %848 = math.exp %847 : vector<128x128xf32>
    %cst_373 = arith.constant dense<0.000000e+00> : vector<128xf32>
    %849 = vector.multi_reduction <add>, %848, %cst_373 [1] : vector<128x128xf32> to vector<128xf32>
    %850 = vector.shape_cast %849 : vector<128xf32> to vector<128x1xf32>
    %851 = tpu.reciprocal %850 {approx = true} : vector<128x1xf32> -> vector<128x1xf32>
    %852 = vector.broadcast %851 : vector<128x1xf32> to vector<128x128xf32>
    %853 = arith.mulf %848, %852 : vector<128x128xf32>
    %854 = arith.truncf %853 : vector<128x128xf32> to vector<128x128xbf16>
    %cst_374 = arith.constant dense<0.000000e+00> : vector<8x128xf32>
    %855 = tpu.matmul %839, %854, %cst_374 {dimension_numbers = #tpu.dot_dimension_numbers<[1], [1], [0], [0], [0, 0, 1, 0], [], []>} : vector<8x128xbf16>, vector<128x128xbf16>, vector<8x128xf32> -> vector<8x128xf32>
    %856 = vector.extract_strided_slice %761 {offsets = [1, 0, 0], sizes = [1, 16, 8], strides = [1, 1, 1]} : vector<2x16x8xbf16> to vector<1x16x8xbf16>
    %857 = vector.shape_cast %856 : vector<1x16x8xbf16> to vector<16x8xbf16>
    %858 = arith.truncf %855 : vector<8x128xf32> to vector<8x128xbf16>
    %cst_375 = arith.constant dense<0.000000e+00> : vector<16x128xf32>
    %859 = tpu.matmul %857, %858, %cst_375 {dimension_numbers = #tpu.dot_dimension_numbers<[1], [0], [0], [1], [0, 0, 1, 1], [], []>} : vector<16x8xbf16>, vector<8x128xbf16>, vector<16x128xf32> -> vector<16x128xf32>
    %860 = arith.addf %831, %859 : vector<16x128xf32>
    %861 = vector.broadcast %763 : vector<16x1xf32> to vector<16x128xf32>
    %862 = arith.addf %860, %861 : vector<16x128xf32>
    %863 = arith.addf %751, %862 : vector<16x128xf32>
    %cst_376 = arith.constant dense<0.000000e+00> : vector<128xf32>
    %864 = vector.multi_reduction <add>, %863, %cst_376 [0] : vector<16x128xf32> to vector<128xf32>
    %865 = vector.shape_cast %864 : vector<128xf32> to vector<1x128xf32>
    %cst_377 = arith.constant 1.600000e+01 : f32
    %866 = vector.broadcast %cst_377 : f32 to vector<1x128xf32>
    %867 = arith.divf %865, %866 : vector<1x128xf32>
    %868 = vector.broadcast %867 : vector<1x128xf32> to vector<16x128xf32>
    %869 = arith.subf %863, %868 : vector<16x128xf32>
    %870 = arith.mulf %869, %869 : vector<16x128xf32>
    %cst_378 = arith.constant dense<0.000000e+00> : vector<128xf32>
    %871 = vector.multi_reduction <add>, %870, %cst_378 [0] : vector<16x128xf32> to vector<128xf32>
    %872 = vector.shape_cast %871 : vector<128xf32> to vector<1x128xf32>
    %cst_379 = arith.constant 1.600000e+01 : f32
    %873 = vector.broadcast %cst_379 : f32 to vector<1x128xf32>
    %874 = arith.divf %872, %873 : vector<1x128xf32>
    %875 = vector.broadcast %867 : vector<1x128xf32> to vector<16x128xf32>
    %876 = arith.subf %863, %875 : vector<16x128xf32>
    %cst_380 = arith.constant 9.99999974E-6 : f32
    %877 = vector.broadcast %cst_380 : f32 to vector<1x128xf32>
    %878 = arith.addf %874, %877 : vector<1x128xf32>
    %879 = math.rsqrt %878 : vector<1x128xf32>
    %880 = vector.broadcast %879 : vector<1x128xf32> to vector<16x128xf32>
    %881 = arith.mulf %876, %880 : vector<16x128xf32>
    %882 = vector.broadcast %765 : vector<16x1xf32> to vector<16x128xf32>
    %883 = arith.mulf %881, %882 : vector<16x128xf32>
    %884 = vector.broadcast %767 : vector<16x1xf32> to vector<16x128xf32>
    %885 = arith.addf %883, %884 : vector<16x128xf32>
    %886 = arith.truncf %885 : vector<16x128xf32> to vector<16x128xbf16>
    %cst_381 = arith.constant dense<0.000000e+00> : vector<32x128xf32>
    %887 = tpu.matmul %769, %886, %cst_381 {dimension_numbers = #tpu.dot_dimension_numbers<[1], [0], [0], [1], [0, 0, 1, 1], [], []>} : vector<32x16xbf16>, vector<16x128xbf16>, vector<32x128xf32> -> vector<32x128xf32>
    %888 = vector.broadcast %771 : vector<32x1xf32> to vector<32x128xf32>
    %889 = arith.addf %887, %888 : vector<32x128xf32>
    %cst_382 = arith.constant 5.000000e-01 : f32
    %890 = vector.broadcast %cst_382 : f32 to vector<32x128xf32>
    %891 = arith.mulf %890, %889 : vector<32x128xf32>
    %cst_383 = arith.constant 0.707106769 : f32
    %892 = vector.broadcast %cst_383 : f32 to vector<32x128xf32>
    %893 = arith.mulf %889, %892 : vector<32x128xf32>
    %894 = math.absf %893 : vector<32x128xf32>
    %cst_384 = arith.constant 0.327591091 : f32
    %895 = vector.broadcast %cst_384 : f32 to vector<32x128xf32>
    %896 = arith.mulf %895, %894 : vector<32x128xf32>
    %cst_385 = arith.constant 1.000000e+00 : f32
    %897 = vector.broadcast %cst_385 : f32 to vector<32x128xf32>
    %898 = arith.addf %897, %896 : vector<32x128xf32>
    %899 = tpu.reciprocal %898 {approx = true} : vector<32x128xf32> -> vector<32x128xf32>
    %cst_386 = arith.constant 1.06140542 : f32
    %900 = vector.broadcast %cst_386 : f32 to vector<32x128xf32>
    %901 = arith.mulf %900, %899 : vector<32x128xf32>
    %cst_387 = arith.constant -1.45315206 : f32
    %902 = vector.broadcast %cst_387 : f32 to vector<32x128xf32>
    %903 = arith.addf %901, %902 : vector<32x128xf32>
    %904 = arith.mulf %903, %899 : vector<32x128xf32>
    %cst_388 = arith.constant 1.42141378 : f32
    %905 = vector.broadcast %cst_388 : f32 to vector<32x128xf32>
    %906 = arith.addf %904, %905 : vector<32x128xf32>
    %907 = arith.mulf %906, %899 : vector<32x128xf32>
    %cst_389 = arith.constant -0.284496725 : f32
    %908 = vector.broadcast %cst_389 : f32 to vector<32x128xf32>
    %909 = arith.addf %907, %908 : vector<32x128xf32>
    %910 = arith.mulf %909, %899 : vector<32x128xf32>
    %cst_390 = arith.constant 0.254829586 : f32
    %911 = vector.broadcast %cst_390 : f32 to vector<32x128xf32>
    %912 = arith.addf %910, %911 : vector<32x128xf32>
    %913 = arith.mulf %912, %899 : vector<32x128xf32>
    %cst_391 = arith.constant 0.000000e+00 : f32
    %914 = vector.broadcast %cst_391 : f32 to vector<32x128xf32>
    %915 = arith.subf %914, %894 : vector<32x128xf32>
    %916 = arith.mulf %915, %894 : vector<32x128xf32>
    %917 = math.exp %916 : vector<32x128xf32>
    %918 = arith.mulf %913, %917 : vector<32x128xf32>
    %cst_392 = arith.constant 1.000000e+00 : f32
    %919 = vector.broadcast %cst_392 : f32 to vector<32x128xf32>
    %920 = arith.subf %919, %918 : vector<32x128xf32>
    %cst_393 = arith.constant 0.000000e+00 : f32
    %921 = vector.broadcast %cst_393 : f32 to vector<32x128xf32>
    %922 = arith.cmpf olt, %893, %921 : vector<32x128xf32>
    %cst_394 = arith.constant 0.000000e+00 : f32
    %923 = vector.broadcast %cst_394 : f32 to vector<32x128xf32>
    %924 = arith.subf %923, %920 : vector<32x128xf32>
    %925 = arith.select %922, %924, %920 : vector<32x128xi1>, vector<32x128xf32>
    %cst_395 = arith.constant 1.000000e+00 : f32
    %926 = vector.broadcast %cst_395 : f32 to vector<32x128xf32>
    %927 = arith.addf %926, %925 : vector<32x128xf32>
    %928 = arith.mulf %891, %927 : vector<32x128xf32>
    %929 = arith.truncf %928 : vector<32x128xf32> to vector<32x128xbf16>
    %cst_396 = arith.constant dense<0.000000e+00> : vector<16x128xf32>
    %930 = tpu.matmul %773, %929, %cst_396 {dimension_numbers = #tpu.dot_dimension_numbers<[1], [0], [0], [1], [0, 0, 1, 1], [], []>} : vector<16x32xbf16>, vector<32x128xbf16>, vector<16x128xf32> -> vector<16x128xf32>
    %931 = vector.broadcast %775 : vector<16x1xf32> to vector<16x128xf32>
    %932 = arith.addf %930, %931 : vector<16x128xf32>
    %933 = arith.addf %863, %932 : vector<16x128xf32>
    %c1_397 = arith.constant 1 : index
    %c0_398 = arith.constant 0 : index
    %c0_399 = arith.constant 0 : index
    %934 = vector.load %arg23[%c1_397, %c0_398, %c0_399] : memref<2x16x144xbf16, #tpu.memory_space<vmem>>, vector<1x16x144xbf16>
    %935 = vector.shape_cast %934 : vector<1x16x144xbf16> to vector<16x144xbf16>
    %c1_400 = arith.constant 1 : index
    %c0_401 = arith.constant 0 : index
    %c0_402 = arith.constant 0 : index
    %936 = vector.load %arg24[%c1_400, %c0_401, %c0_402] : memref<2x16x1xf32, #tpu.memory_space<vmem>>, vector<1x16x1xf32>
    %937 = vector.shape_cast %936 : vector<1x16x1xf32> to vector<16x1xf32>
    %c9_i32_403 = arith.constant 9 : i32
    %938 = tpu.dynamic_rotate %933 by %c9_i32_403 dim 1 : vector<16x128xf32>, i32 -> vector<16x128xf32>
    %939 = vector.extract_strided_slice %0 {offsets = [0, 0], sizes = [1, 128], strides = [1, 1]} : vector<9x128xf32> to vector<1x128xf32>
    %940 = vector.broadcast %939 : vector<1x128xf32> to vector<16x128xf32>
    %941 = arith.mulf %938, %940 : vector<16x128xf32>
    %c8_i32_404 = arith.constant 8 : i32
    %942 = tpu.dynamic_rotate %933 by %c8_i32_404 dim 1 : vector<16x128xf32>, i32 -> vector<16x128xf32>
    %943 = vector.extract_strided_slice %0 {offsets = [1, 0], sizes = [1, 128], strides = [1, 1]} : vector<9x128xf32> to vector<1x128xf32>
    %944 = vector.broadcast %943 : vector<1x128xf32> to vector<16x128xf32>
    %945 = arith.mulf %942, %944 : vector<16x128xf32>
    %c7_i32_405 = arith.constant 7 : i32
    %946 = tpu.dynamic_rotate %933 by %c7_i32_405 dim 1 : vector<16x128xf32>, i32 -> vector<16x128xf32>
    %947 = vector.extract_strided_slice %0 {offsets = [2, 0], sizes = [1, 128], strides = [1, 1]} : vector<9x128xf32> to vector<1x128xf32>
    %948 = vector.broadcast %947 : vector<1x128xf32> to vector<16x128xf32>
    %949 = arith.mulf %946, %948 : vector<16x128xf32>
    %c1_i32_406 = arith.constant 1 : i32
    %950 = tpu.dynamic_rotate %933 by %c1_i32_406 dim 1 : vector<16x128xf32>, i32 -> vector<16x128xf32>
    %951 = vector.extract_strided_slice %0 {offsets = [3, 0], sizes = [1, 128], strides = [1, 1]} : vector<9x128xf32> to vector<1x128xf32>
    %952 = vector.broadcast %951 : vector<1x128xf32> to vector<16x128xf32>
    %953 = arith.mulf %950, %952 : vector<16x128xf32>
    %954 = vector.extract_strided_slice %0 {offsets = [4, 0], sizes = [1, 128], strides = [1, 1]} : vector<9x128xf32> to vector<1x128xf32>
    %955 = vector.broadcast %954 : vector<1x128xf32> to vector<16x128xf32>
    %956 = arith.mulf %933, %955 : vector<16x128xf32>
    %c127_i32_407 = arith.constant 127 : i32
    %957 = tpu.dynamic_rotate %933 by %c127_i32_407 dim 1 : vector<16x128xf32>, i32 -> vector<16x128xf32>
    %958 = vector.extract_strided_slice %0 {offsets = [5, 0], sizes = [1, 128], strides = [1, 1]} : vector<9x128xf32> to vector<1x128xf32>
    %959 = vector.broadcast %958 : vector<1x128xf32> to vector<16x128xf32>
    %960 = arith.mulf %957, %959 : vector<16x128xf32>
    %c121_i32_408 = arith.constant 121 : i32
    %961 = tpu.dynamic_rotate %933 by %c121_i32_408 dim 1 : vector<16x128xf32>, i32 -> vector<16x128xf32>
    %962 = vector.extract_strided_slice %0 {offsets = [6, 0], sizes = [1, 128], strides = [1, 1]} : vector<9x128xf32> to vector<1x128xf32>
    %963 = vector.broadcast %962 : vector<1x128xf32> to vector<16x128xf32>
    %964 = arith.mulf %961, %963 : vector<16x128xf32>
    %c120_i32_409 = arith.constant 120 : i32
    %965 = tpu.dynamic_rotate %933 by %c120_i32_409 dim 1 : vector<16x128xf32>, i32 -> vector<16x128xf32>
    %966 = vector.extract_strided_slice %0 {offsets = [7, 0], sizes = [1, 128], strides = [1, 1]} : vector<9x128xf32> to vector<1x128xf32>
    %967 = vector.broadcast %966 : vector<1x128xf32> to vector<16x128xf32>
    %968 = arith.mulf %965, %967 : vector<16x128xf32>
    %c119_i32_410 = arith.constant 119 : i32
    %969 = tpu.dynamic_rotate %933 by %c119_i32_410 dim 1 : vector<16x128xf32>, i32 -> vector<16x128xf32>
    %970 = vector.extract_strided_slice %0 {offsets = [8, 0], sizes = [1, 128], strides = [1, 1]} : vector<9x128xf32> to vector<1x128xf32>
    %971 = vector.broadcast %970 : vector<1x128xf32> to vector<16x128xf32>
    %972 = arith.mulf %969, %971 : vector<16x128xf32>
    %973 = tpu.concatenate %941, %945, %949, %953, %956, %960, %964, %968, %972 in 0 : vector<16x128xf32>, vector<16x128xf32>, vector<16x128xf32>, vector<16x128xf32>, vector<16x128xf32>, vector<16x128xf32>, vector<16x128xf32>, vector<16x128xf32>, vector<16x128xf32> -> vector<144x128xf32>
    %974 = arith.truncf %973 : vector<144x128xf32> to vector<144x128xbf16>
    %cst_411 = arith.constant dense<0.000000e+00> : vector<16x128xf32>
    %975 = tpu.matmul %935, %974, %cst_411 {dimension_numbers = #tpu.dot_dimension_numbers<[1], [0], [0], [1], [0, 0, 1, 1], [], []>} : vector<16x144xbf16>, vector<144x128xbf16>, vector<16x128xf32> -> vector<16x128xf32>
    %976 = vector.broadcast %937 : vector<16x1xf32> to vector<16x128xf32>
    %977 = arith.addf %975, %976 : vector<16x128xf32>
    %978 = arith.addf %977, %569 : vector<16x128xf32>
    %cst_412 = arith.constant dense<0.000000e+00> : vector<128xf32>
    %979 = vector.multi_reduction <add>, %978, %cst_412 [0] : vector<16x128xf32> to vector<128xf32>
    %980 = vector.shape_cast %979 : vector<128xf32> to vector<1x128xf32>
    %cst_413 = arith.constant 1.600000e+01 : f32
    %981 = vector.broadcast %cst_413 : f32 to vector<1x128xf32>
    %982 = arith.divf %980, %981 : vector<1x128xf32>
    %983 = vector.broadcast %982 : vector<1x128xf32> to vector<16x128xf32>
    %984 = arith.subf %978, %983 : vector<16x128xf32>
    %985 = arith.mulf %984, %984 : vector<16x128xf32>
    %cst_414 = arith.constant dense<0.000000e+00> : vector<128xf32>
    %986 = vector.multi_reduction <add>, %985, %cst_414 [0] : vector<16x128xf32> to vector<128xf32>
    %987 = vector.shape_cast %986 : vector<128xf32> to vector<1x128xf32>
    %cst_415 = arith.constant 1.600000e+01 : f32
    %988 = vector.broadcast %cst_415 : f32 to vector<1x128xf32>
    %989 = arith.divf %987, %988 : vector<1x128xf32>
    %990 = vector.broadcast %982 : vector<1x128xf32> to vector<16x128xf32>
    %991 = arith.subf %978, %990 : vector<16x128xf32>
    %cst_416 = arith.constant 9.99999974E-6 : f32
    %992 = vector.broadcast %cst_416 : f32 to vector<1x128xf32>
    %993 = arith.addf %989, %992 : vector<1x128xf32>
    %994 = math.rsqrt %993 : vector<1x128xf32>
    %995 = vector.broadcast %994 : vector<1x128xf32> to vector<16x128xf32>
    %996 = arith.mulf %991, %995 : vector<16x128xf32>
    %997 = vector.broadcast %93 : vector<16x1xf32> to vector<16x128xf32>
    %998 = arith.mulf %996, %997 : vector<16x128xf32>
    %999 = vector.broadcast %94 : vector<16x1xf32> to vector<16x128xf32>
    %1000 = arith.addf %998, %999 : vector<16x128xf32>
    %c0_417 = arith.constant 0 : index
    %c0_418 = arith.constant 0 : index
    %1001 = vector.load %arg25[%c0_417, %c0_418] : memref<16x144xbf16, #tpu.memory_space<vmem>>, vector<16x144xbf16>
    %c0_419 = arith.constant 0 : index
    %c0_420 = arith.constant 0 : index
    %1002 = vector.load %arg26[%c0_419, %c0_420] : memref<16x1xf32, #tpu.memory_space<vmem>>, vector<16x1xf32>
    %c9_i32_421 = arith.constant 9 : i32
    %1003 = tpu.dynamic_rotate %1000 by %c9_i32_421 dim 1 : vector<16x128xf32>, i32 -> vector<16x128xf32>
    %1004 = vector.extract_strided_slice %0 {offsets = [0, 0], sizes = [1, 128], strides = [1, 1]} : vector<9x128xf32> to vector<1x128xf32>
    %1005 = vector.broadcast %1004 : vector<1x128xf32> to vector<16x128xf32>
    %1006 = arith.mulf %1003, %1005 : vector<16x128xf32>
    %c8_i32_422 = arith.constant 8 : i32
    %1007 = tpu.dynamic_rotate %1000 by %c8_i32_422 dim 1 : vector<16x128xf32>, i32 -> vector<16x128xf32>
    %1008 = vector.extract_strided_slice %0 {offsets = [1, 0], sizes = [1, 128], strides = [1, 1]} : vector<9x128xf32> to vector<1x128xf32>
    %1009 = vector.broadcast %1008 : vector<1x128xf32> to vector<16x128xf32>
    %1010 = arith.mulf %1007, %1009 : vector<16x128xf32>
    %c7_i32_423 = arith.constant 7 : i32
    %1011 = tpu.dynamic_rotate %1000 by %c7_i32_423 dim 1 : vector<16x128xf32>, i32 -> vector<16x128xf32>
    %1012 = vector.extract_strided_slice %0 {offsets = [2, 0], sizes = [1, 128], strides = [1, 1]} : vector<9x128xf32> to vector<1x128xf32>
    %1013 = vector.broadcast %1012 : vector<1x128xf32> to vector<16x128xf32>
    %1014 = arith.mulf %1011, %1013 : vector<16x128xf32>
    %c1_i32_424 = arith.constant 1 : i32
    %1015 = tpu.dynamic_rotate %1000 by %c1_i32_424 dim 1 : vector<16x128xf32>, i32 -> vector<16x128xf32>
    %1016 = vector.extract_strided_slice %0 {offsets = [3, 0], sizes = [1, 128], strides = [1, 1]} : vector<9x128xf32> to vector<1x128xf32>
    %1017 = vector.broadcast %1016 : vector<1x128xf32> to vector<16x128xf32>
    %1018 = arith.mulf %1015, %1017 : vector<16x128xf32>
    %1019 = vector.extract_strided_slice %0 {offsets = [4, 0], sizes = [1, 128], strides = [1, 1]} : vector<9x128xf32> to vector<1x128xf32>
    %1020 = vector.broadcast %1019 : vector<1x128xf32> to vector<16x128xf32>
    %1021 = arith.mulf %1000, %1020 : vector<16x128xf32>
    %c127_i32_425 = arith.constant 127 : i32
    %1022 = tpu.dynamic_rotate %1000 by %c127_i32_425 dim 1 : vector<16x128xf32>, i32 -> vector<16x128xf32>
    %1023 = vector.extract_strided_slice %0 {offsets = [5, 0], sizes = [1, 128], strides = [1, 1]} : vector<9x128xf32> to vector<1x128xf32>
    %1024 = vector.broadcast %1023 : vector<1x128xf32> to vector<16x128xf32>
    %1025 = arith.mulf %1022, %1024 : vector<16x128xf32>
    %c121_i32_426 = arith.constant 121 : i32
    %1026 = tpu.dynamic_rotate %1000 by %c121_i32_426 dim 1 : vector<16x128xf32>, i32 -> vector<16x128xf32>
    %1027 = vector.extract_strided_slice %0 {offsets = [6, 0], sizes = [1, 128], strides = [1, 1]} : vector<9x128xf32> to vector<1x128xf32>
    %1028 = vector.broadcast %1027 : vector<1x128xf32> to vector<16x128xf32>
    %1029 = arith.mulf %1026, %1028 : vector<16x128xf32>
    %c120_i32_427 = arith.constant 120 : i32
    %1030 = tpu.dynamic_rotate %1000 by %c120_i32_427 dim 1 : vector<16x128xf32>, i32 -> vector<16x128xf32>
    %1031 = vector.extract_strided_slice %0 {offsets = [7, 0], sizes = [1, 128], strides = [1, 1]} : vector<9x128xf32> to vector<1x128xf32>
    %1032 = vector.broadcast %1031 : vector<1x128xf32> to vector<16x128xf32>
    %1033 = arith.mulf %1030, %1032 : vector<16x128xf32>
    %c119_i32_428 = arith.constant 119 : i32
    %1034 = tpu.dynamic_rotate %1000 by %c119_i32_428 dim 1 : vector<16x128xf32>, i32 -> vector<16x128xf32>
    %1035 = vector.extract_strided_slice %0 {offsets = [8, 0], sizes = [1, 128], strides = [1, 1]} : vector<9x128xf32> to vector<1x128xf32>
    %1036 = vector.broadcast %1035 : vector<1x128xf32> to vector<16x128xf32>
    %1037 = arith.mulf %1034, %1036 : vector<16x128xf32>
    %1038 = tpu.concatenate %1006, %1010, %1014, %1018, %1021, %1025, %1029, %1033, %1037 in 0 : vector<16x128xf32>, vector<16x128xf32>, vector<16x128xf32>, vector<16x128xf32>, vector<16x128xf32>, vector<16x128xf32>, vector<16x128xf32>, vector<16x128xf32>, vector<16x128xf32> -> vector<144x128xf32>
    %1039 = arith.truncf %1038 : vector<144x128xf32> to vector<144x128xbf16>
    %cst_429 = arith.constant dense<0.000000e+00> : vector<16x128xf32>
    %1040 = tpu.matmul %1001, %1039, %cst_429 {dimension_numbers = #tpu.dot_dimension_numbers<[1], [0], [0], [1], [0, 0, 1, 1], [], []>} : vector<16x144xbf16>, vector<144x128xbf16>, vector<16x128xf32> -> vector<16x128xf32>
    %1041 = vector.broadcast %1002 : vector<16x1xf32> to vector<16x128xf32>
    %1042 = arith.addf %1040, %1041 : vector<16x128xf32>
    %cst_430 = arith.constant 0.000000e+00 : f32
    %1043 = vector.broadcast %cst_430 : f32 to vector<16x128xf32>
    %1044 = arith.cmpf oge, %1042, %1043 : vector<16x128xf32>
    %cst_431 = arith.constant 1.000000e-01 : f32
    %1045 = vector.broadcast %cst_431 : f32 to vector<16x128xf32>
    %1046 = arith.mulf %1045, %1042 : vector<16x128xf32>
    %1047 = arith.select %1044, %1042, %1046 : vector<16x128xi1>, vector<16x128xf32>
    %c0_432 = arith.constant 0 : index
    %c0_433 = arith.constant 0 : index
    %1048 = vector.load %arg27[%c0_432, %c0_433] : memref<3x144xbf16, #tpu.memory_space<vmem>>, vector<3x144xbf16>
    %c0_434 = arith.constant 0 : index
    %c0_435 = arith.constant 0 : index
    %1049 = vector.load %arg28[%c0_434, %c0_435] : memref<3x1xf32, #tpu.memory_space<vmem>>, vector<3x1xf32>
    %c9_i32_436 = arith.constant 9 : i32
    %1050 = tpu.dynamic_rotate %1047 by %c9_i32_436 dim 1 : vector<16x128xf32>, i32 -> vector<16x128xf32>
    %1051 = vector.extract_strided_slice %0 {offsets = [0, 0], sizes = [1, 128], strides = [1, 1]} : vector<9x128xf32> to vector<1x128xf32>
    %1052 = vector.broadcast %1051 : vector<1x128xf32> to vector<16x128xf32>
    %1053 = arith.mulf %1050, %1052 : vector<16x128xf32>
    %c8_i32_437 = arith.constant 8 : i32
    %1054 = tpu.dynamic_rotate %1047 by %c8_i32_437 dim 1 : vector<16x128xf32>, i32 -> vector<16x128xf32>
    %1055 = vector.extract_strided_slice %0 {offsets = [1, 0], sizes = [1, 128], strides = [1, 1]} : vector<9x128xf32> to vector<1x128xf32>
    %1056 = vector.broadcast %1055 : vector<1x128xf32> to vector<16x128xf32>
    %1057 = arith.mulf %1054, %1056 : vector<16x128xf32>
    %c7_i32_438 = arith.constant 7 : i32
    %1058 = tpu.dynamic_rotate %1047 by %c7_i32_438 dim 1 : vector<16x128xf32>, i32 -> vector<16x128xf32>
    %1059 = vector.extract_strided_slice %0 {offsets = [2, 0], sizes = [1, 128], strides = [1, 1]} : vector<9x128xf32> to vector<1x128xf32>
    %1060 = vector.broadcast %1059 : vector<1x128xf32> to vector<16x128xf32>
    %1061 = arith.mulf %1058, %1060 : vector<16x128xf32>
    %c1_i32_439 = arith.constant 1 : i32
    %1062 = tpu.dynamic_rotate %1047 by %c1_i32_439 dim 1 : vector<16x128xf32>, i32 -> vector<16x128xf32>
    %1063 = vector.extract_strided_slice %0 {offsets = [3, 0], sizes = [1, 128], strides = [1, 1]} : vector<9x128xf32> to vector<1x128xf32>
    %1064 = vector.broadcast %1063 : vector<1x128xf32> to vector<16x128xf32>
    %1065 = arith.mulf %1062, %1064 : vector<16x128xf32>
    %1066 = vector.extract_strided_slice %0 {offsets = [4, 0], sizes = [1, 128], strides = [1, 1]} : vector<9x128xf32> to vector<1x128xf32>
    %1067 = vector.broadcast %1066 : vector<1x128xf32> to vector<16x128xf32>
    %1068 = arith.mulf %1047, %1067 : vector<16x128xf32>
    %c127_i32_440 = arith.constant 127 : i32
    %1069 = tpu.dynamic_rotate %1047 by %c127_i32_440 dim 1 : vector<16x128xf32>, i32 -> vector<16x128xf32>
    %1070 = vector.extract_strided_slice %0 {offsets = [5, 0], sizes = [1, 128], strides = [1, 1]} : vector<9x128xf32> to vector<1x128xf32>
    %1071 = vector.broadcast %1070 : vector<1x128xf32> to vector<16x128xf32>
    %1072 = arith.mulf %1069, %1071 : vector<16x128xf32>
    %c121_i32_441 = arith.constant 121 : i32
    %1073 = tpu.dynamic_rotate %1047 by %c121_i32_441 dim 1 : vector<16x128xf32>, i32 -> vector<16x128xf32>
    %1074 = vector.extract_strided_slice %0 {offsets = [6, 0], sizes = [1, 128], strides = [1, 1]} : vector<9x128xf32> to vector<1x128xf32>
    %1075 = vector.broadcast %1074 : vector<1x128xf32> to vector<16x128xf32>
    %1076 = arith.mulf %1073, %1075 : vector<16x128xf32>
    %c120_i32_442 = arith.constant 120 : i32
    %1077 = tpu.dynamic_rotate %1047 by %c120_i32_442 dim 1 : vector<16x128xf32>, i32 -> vector<16x128xf32>
    %1078 = vector.extract_strided_slice %0 {offsets = [7, 0], sizes = [1, 128], strides = [1, 1]} : vector<9x128xf32> to vector<1x128xf32>
    %1079 = vector.broadcast %1078 : vector<1x128xf32> to vector<16x128xf32>
    %1080 = arith.mulf %1077, %1079 : vector<16x128xf32>
    %c119_i32_443 = arith.constant 119 : i32
    %1081 = tpu.dynamic_rotate %1047 by %c119_i32_443 dim 1 : vector<16x128xf32>, i32 -> vector<16x128xf32>
    %1082 = vector.extract_strided_slice %0 {offsets = [8, 0], sizes = [1, 128], strides = [1, 1]} : vector<9x128xf32> to vector<1x128xf32>
    %1083 = vector.broadcast %1082 : vector<1x128xf32> to vector<16x128xf32>
    %1084 = arith.mulf %1081, %1083 : vector<16x128xf32>
    %1085 = tpu.concatenate %1053, %1057, %1061, %1065, %1068, %1072, %1076, %1080, %1084 in 0 : vector<16x128xf32>, vector<16x128xf32>, vector<16x128xf32>, vector<16x128xf32>, vector<16x128xf32>, vector<16x128xf32>, vector<16x128xf32>, vector<16x128xf32>, vector<16x128xf32> -> vector<144x128xf32>
    %1086 = arith.truncf %1085 : vector<144x128xf32> to vector<144x128xbf16>
    %cst_444 = arith.constant dense<0.000000e+00> : vector<3x128xf32>
    %1087 = tpu.matmul %1048, %1086, %cst_444 {dimension_numbers = #tpu.dot_dimension_numbers<[1], [0], [0], [1], [0, 0, 1, 1], [], []>} : vector<3x144xbf16>, vector<144x128xbf16>, vector<3x128xf32> -> vector<3x128xf32>
    %1088 = vector.broadcast %1049 : vector<3x1xf32> to vector<3x128xf32>
    %1089 = arith.addf %1087, %1088 : vector<3x128xf32>
    %c0_445 = arith.constant 0 : index
    %c0_446 = arith.constant 0 : index
    %1090 = vector.load %arg29[%c0_445, %c0_446] : memref<3x128xf32, #tpu.memory_space<vmem>>, vector<3x128xf32>
    tpu.vector_store %arg29[%c0_445, %c0_446], %1089 {strides = array<i32>} : memref<3x128xf32, #tpu.memory_space<vmem>>, vector<3x128xf32>,
    return
  }
}

</mosaic_0001>

<bundles_post_ra>
// kernel: swin_forward.1
= control target key start
LH: loop header
LB: loop body
LE: loop exit
PB: predicated region body
PF: predicated region fallthrough
CT: control target
= control target key end

     0   :  { %v10673_v0 = vmov 0.0   ;;  %s8187_s6 = smov 119   ;;  %s8188_s7 = smov 120   ;;  %vm8194_vm0 = vmmov 0   ;;  %v10671_v2 = vmov 0   ;;  %v132_v5 = vlaneseq  ;;  %s10670_s0 = inlined_call_operand.smem [shape: u32[30], index: -1, kind: input, shape index: {}] }
   0x1   :  { %s1_s5 = sld [smem:[%s10670_s0]]   ;;  %7015 = vmatprep.subr.bf16.mxu0 %v10673_v0  ;;  %s8189_s8 = smov 2   ;;  %7025 = vmatprep.mubr.msk.bf16.mxu0 %vm8194_vm0, %v10673_v0  ;;  %vm215_vm1 = vcmask 1043456   ;;  %vm211_vm2 = vcmask 588800   ;;  %vm348_vm5 = vcmask 130048   ;;  %vm684_vm6 = vcmask 64512  }
   0x2   :  { %s8236_s11 = sld [smem:[%s10670_s0 + %s8189_s8]]   ;;  %s8190_s12 = smov 121   ;;  %7537 = vset.pattern.permute.xlu0 %v10671_v2  ;;  %7538 = vset.pattern.permute.xlu1 %v10671_v2  ;;  %v133_v6 = vshrl.u32 %v132_v5, 7  ;;  %vm1729_vm11 = vcmask 261120  }
   0x3   :  { %s8191_s13 = smov 127   ;;  %s10678_s14 = smov 1   ;;  %352 = vmatprep.subr.bf16.mxu1 %v10671_v2 }
   0x4   :  { %s10676_s15 = smov 7   ;;  %s8195_s16 = smov 8   ;;  %v181_v7 = vsub.s32 7, %v133_v6  ;;  %v174_v9 = vsub.s32 6, %v133_v6  ;;  %v160_v11 = vsub.s32 4, %v133_v6  ;;  %v167_v12 = vsub.s32 5, %v133_v6 }
   0x5   :  { %s8196_s17 = smov 9   ;;  %s8197_s18 = smov 3   ;;  %v148_v18 = vsub.s32 2, %v133_v6  ;;  %v155_v19 = vsub.s32 3, %v133_v6  ;;  %v134_v26 = vsub.s32 0, %v133_v6  ;;  %v141_v27 = vsub.s32 1, %v133_v6 }
   0x6   :  { %s6407_s21 = sld [smem:[%s10670_s0 + %s8197_s18]]   ;;  %s8199_s25 = smov 5  }
   0x7   :  { %v125_v1 = vld [vmem:[%s1_s5] sm:$0xff]  ;;  %s8256_s24 = sld [smem:[%s10670_s0 + %s10678_s14]]   ;;  %s8200_s29 = smov 4  }
   0x8   :  { %184 = vrot.lane.b32.xlu0 %v125_v1, %s8187_s6  ;;  %177 = vrot.lane.b32.xlu1 %v125_v1, %s8188_s7  ;;  %v7539_v48 = vld [vmem:[%s8236_s11] sm:$0xff]   ;;  %s6409_s28 = sld [smem:[%s10670_s0 + %s8199_s25]]   ;;  %s8201_s3 = smov 6  }
   0x9   :  { %s8321_s2 = sld [smem:[%s10670_s0 + %s8200_s29]]   ;;  %s8202_s18 = smov 10  }
   0xa   :  { %s6410_s8 = sld [smem:[%s10670_s0 + %s8201_s3]]   ;;  %s8203_s22 = smov 11  }
   0xb   :  { %s6411_s11 = sld [smem:[%s10670_s0 + %s10676_s15]]   ;;  %s8204_s27 = smov 13  }
   0xc   :  { %170 = vrot.lane.b32.xlu0 %v125_v1, %s8190_s12  ;;  %163 = vrot.lane.b32.xlu1 %v125_v1, %s8191_s13  ;;  %v128_v3 = vld [vmem:[%s6407_s21] sm:$0xff]  ;;  %v129_v4 = vld [vmem:[%s6407_s21 + $0x8] sm:$0xff]  ;;  %s8340_s21 = sld [smem:[%s10670_s0 + %s8202_s18]]   ;;  %s8205_s1 = smov 12  }
   0xd   :  { %v123_v8 = vld [vmem:[%s8256_s24] sm:$0xff]  ;;  %v8260_v10 = vld [vmem:[%s8256_s24 + $0x8] ss:$0 sm:$0xff]  ;;  %s8345_s26 = sld [smem:[%s10670_s0 + %s8203_s22]]   ;;  %s8208_s22 = smov 17  }
   0xe   :  { %v8262_v13 = vrot.slane %v123_v8, %v181_v7  ;;  %v8264_v16 = vrot.slane %v123_v8, %v174_v9  ;;  %v8267_v20 = vrot.slane %v123_v8, %v160_v11  ;;  %v8269_v21 = vrot.slane %v123_v8, %v167_v12  ;;  %v269_v5 = vld [vmem:[%s6409_s28 + $0x8] sm:$0xff]  ;;  %s8351_s30 = sld [smem:[%s10670_s0 + %s8204_s27]]   ;;  %s8210_s4 = smov 20  }
   0xf   :  { %v8274_v30 = vrot.slane %v123_v8, %v148_v18  ;;  %v8276_v31 = vrot.slane %v123_v8, %v155_v19  ;;  %v8281_v37 = vrot.slane %v123_v8, %v134_v26  ;;  %v8283_v38 = vrot.slane %v123_v8, %v141_v27  ;;  %s8391_s5 = sld [smem:[%s10670_s0 + %s8205_s1]]   ;;  %s8212_s23 = smov 14  }
  0x10   :  { %151 = vrot.lane.b32.xlu1 %v125_v1, %s10678_s14  ;;  %144 = vrot.lane.b32.xlu0 %v125_v1, %s10676_s15  ;;  %v162_v32 = vmul.f32 %v8267_v20, %v125_v1  ;;  %v394_v7 = vld [vmem:[%s6410_s8 + $0x8] sm:$0xff]  ;;  %s8772_s27 = sld [smem:[%s10670_s0 + %s8208_s22]]   ;;  %s8213_s1 = smov 19  }
  0x11   :  { %v395_v6 = vld [vmem:[%s6411_s11] sm:$0xff]  ;;  %v396_v9 = vld [vmem:[%s6411_s11 + $0x8] sm:$0xff]  ;;  %s8207_s11 = smov 15   ;;  %s8788_s9 = sld [smem:[%s10670_s0 + %s8210_s4]]  }
  0x12   :  { %v450_v8 = vld [vmem:[%s8340_s21] sm:$0xff]  ;;  %v451_v12 = vld [vmem:[%s8340_s21 + $0x8] sm:$0xff]  ;;  %s8764_s20 = sld [smem:[%s10670_s0 + %s8207_s11]]   ;;  %s8211_s11 = smov 22  }
  0x13   :  { %v452_v11 = vld [vmem:[%s8345_s26] sm:$0xff]  ;;  %s8797_s22 = sld [smem:[%s10670_s0 + %s8211_s11]]   ;;  %s8214_s11 = smov 21  }
  0x14   :  { %137 = vrot.lane.b32.xlu1 %v125_v1, %s8195_s16  ;;  %130 = vrot.lane.b32.xlu0 %v125_v1, %s8196_s17  ;;  %v7542_v1 = vld [vmem:[%s8321_s2 + $0x4] ss:$8 sps:$4 sm:$0xff]   ;;  %v463_v19 = vld [vmem:[%s8351_s30 + $0x18] sm:$0xff]  ;;  %s8866_s29 = sld [smem:[%s10670_s0 + %s8212_s23]]   ;;  %s8215_s25 = smov 24  }
  0x15   :  { %6439 = vmatprep.mubr.msk.bf16.mxu1 %vm348_vm5, %v7542_v1  ;;  %v461_v18 = vld [vmem:[%s8351_s30 + $0x8] sm:$0xff]  ;;  %s8902_s23 = sld [smem:[%s10670_s0 + %s8214_s11]]  }
  0x16   :  { %s9453_s4 = sld [smem:[%s10670_s0 + %s8215_s25]]  }
  0x18   :  { %198 = vperm.xlu0 %7537, %v128_v3   ;;  %203 = vperm.xlu1 %7538, %v129_v4   ;;  %v268_v3 = vld [vmem:[%s6409_s28] sm:$0xff]  ;;  %s8209_s28 = smov 18  }
  0x19   :  { %v393_v4 = vld [vmem:[%s6410_s8] sm:$0xff]  ;;  %s8781_s3 = sld [smem:[%s10670_s0 + %s8209_s28]]  }
  0x1a   :  { %s8880_s8 = sld [smem:[%s10670_s0 + %s8213_s1]]  }
  0x1b   :  { %s6412_s28 = sld [smem:[%s10670_s0 + %s8195_s16]]  }
  0x7a   :  { %v185_v14 = vpop.permute.xlu0 %184  ;;  %v178_v15 = vpop.permute.xlu1 %177 }
  0x7b   :  { %v190_v17 = vmul.f32 %v8260_v10, %v185_v14  ;;  %v183_v23 = vmul.f32 %v8262_v13, %v178_v15  ;;  %v460_v14 = vld [vmem:[%s8351_s30] sm:$0xff]  ;;  %v453_v15 = vld [vmem:[%s8345_s26 + $0x8] sm:$0xff] }
  0x7d   :  { %v195_v22 = vpack.c.bf16 %v190_v17, %v190_v17  ;;  %v462_v17 = vld [vmem:[%s8351_s30 + $0x10] sm:$0xff] }
  0x7e   :  { %v171_v24 = vpop.permute.xlu0 %170  ;;  %v164_v25 = vpop.permute.xlu1 %163 }
  0x7f   :  { %v176_v28 = vmul.f32 %v8264_v16, %v171_v24  ;;  %v217_v29 = vsel %vm215_vm1, %v195_v22, 0  ;;  %v169_v33 = vmul.f32 %v8269_v21, %v164_v25 }
  0x80   :  { %7016 = vmatpush3.bf16.msra.mxu0 %v217_v29 }
  0x81   :  { %v194_v34 = vpack.c.bf16 %v183_v23, %v176_v28  ;;  %7017 = vmatprep.subr.bf16.mxu0 %v10673_v0  ;;  %v193_v39 = vpack.c.bf16 %v169_v33, %v162_v32 }
  0x82   :  { %v152_v35 = vpop.permute.xlu1 %151  ;;  %v145_v36 = vpop.permute.xlu0 %144 }
  0x83   :  { %v157_v40 = vmul.f32 %v8276_v31, %v152_v35  ;;  %v150_v41 = vmul.f32 %v8274_v30, %v145_v36 }
  0x84   :  { %7018 = vmatpush3.bf16.msra.mxu0 %v194_v34 }
  0x85   :  { %7019 = vmatprep.subr.bf16.mxu0 %v10673_v0  ;;  %v192_v44 = vpack.c.bf16 %v157_v40, %v150_v41 }
  0x86   :  { %v138_v42 = vpop.permute.xlu1 %137  ;;  %v131_v43 = vpop.permute.xlu0 %130 }
  0x87   :  { %v143_v45 = vmul.f32 %v8283_v38, %v138_v42  ;;  %v136_v46 = vmul.f32 %v8281_v37, %v131_v43 }
  0x88   :  { %7020 = vmatpush3.bf16.msra.mxu0 %v193_v39 }
  0x89   :  { %7021 = vmatprep.subr.bf16.mxu0 %v10673_v0  ;;  %v191_v47 = vpack.c.bf16 %v143_v45, %v136_v46 }
  0x8c   :  { %7022 = vmatpush3.bf16.msra.mxu0 %v192_v44 }
  0x8d   :  { %7023 = vmatprep.subr.bf16.mxu0 %v10673_v0 }
  0x90   :  { %7024 = vmatpush3.bf16.msra.mxu0 %v191_v47 }
  0x91   :  { %7029 = vmatprep.subr.bf16.mxu0 %v10673_v0 }
  0x93   :  { %7026 = vmatmul.mubr.msk.bf16.vlgmr.msra.gmra.mxu0 %vm211_vm2, %v7539_v48  ;;  %v199_v49 = vpop.permute.xlu0 %198  ;;  %v204_v53 = vpop.permute.xlu1 %203 }
  0x94   :  { %7031 = vmatprep.mubr.msk.bf16.mxu0 %vm8194_vm0, %v10673_v0 }
 0x153   :  { %v253_v50 = vpop.f32.mrf.mxu0 }
 0x154   :  { %v254_v51 = vadd.f32 %v253_v50, %v199_v49 }
 0x155   :  { %v7027_v52 = vpop.f32.mrf.mxu0 }
 0x156   :  { %vm260_vm3 = vcmp.ge.f32.partialorder %v254_v51, 0.0  ;;  %v262_v54 = vmul.f32 0.1, %v254_v51 }
 0x157   :  { %v256_v55 = vpop.f32.mrf.mxu0 }
 0x158   :  { %v264_v56 = vsel %vm260_vm3, %v254_v51, %v262_v54  ;;  %v257_v57 = vadd.f32 %v256_v55, %v204_v53 }
 0x159   :  { %308 = vrot.lane.b32.xlu1 %v264_v56, %s8188_s7  ;;  %v7028_v58 = vpop.f32.mrf.mxu0  ;;  %v8300_v61 = vmul.f32 %v264_v56, %v8267_v20 }
 0x15a   :  { %vm261_vm4 = vcmp.ge.f32.partialorder %v257_v57, 0.0  ;;  %v263_v59 = vmul.f32 0.1, %v257_v57 }
 0x15c   :  { %v265_v60 = vsel %vm261_vm4, %v257_v57, %v263_v59 }
 0x15d   :  { %302 = vrot.lane.b32.xlu1 %v264_v56, %s8190_s12  ;;  %310 = vrot.lane.b32.xlu0 %v265_v60, %s8188_s7  ;;  %v8303_v62 = vmul.f32 %v265_v60, %v8267_v20 }
 0x15f   :  { %v324_v63 = vpack.c.bf16 %v8303_v62, %v8300_v61 }
 0x161   :  { %296 = vrot.lane.b32.xlu1 %v264_v56, %s8191_s13  ;;  %304 = vrot.lane.b32.xlu0 %v265_v60, %s8190_s12 }
 0x165   :  { %288 = vrot.lane.b32.xlu1 %v264_v56, %s10678_s14  ;;  %298 = vrot.lane.b32.xlu0 %v265_v60, %s8191_s13 }
 0x169   :  { %282 = vrot.lane.b32.xlu1 %v264_v56, %s10676_s15  ;;  %290 = vrot.lane.b32.xlu0 %v265_v60, %s10678_s14 }
 0x16d   :  { %276 = vrot.lane.b32.xlu1 %v264_v56, %s8195_s16  ;;  %284 = vrot.lane.b32.xlu0 %v265_v60, %s10676_s15 }
 0x171   :  { %270 = vrot.lane.b32.xlu1 %v264_v56, %s8196_s17  ;;  %278 = vrot.lane.b32.xlu0 %v265_v60, %s8195_s16 }
 0x175   :  { %314 = vrot.lane.b32.xlu1 %v264_v56, %s8187_s6  ;;  %272 = vrot.lane.b32.xlu0 %v265_v60, %s8196_s17 }
 0x179   :  { %331 = vperm.xlu1 %7538, %v268_v3   ;;  %316 = vrot.lane.b32.xlu0 %v265_v60, %s8187_s6 }
 0x17d   :  { %428 = vperm.xlu1 %7538, %v393_v4   ;;  %336 = vperm.xlu0 %7537, %v269_v5   ;;  %v7540_v4 = vld [vmem:[%s8321_s2] ss:$8 sps:$4 sm:$0xff]   ;;  %s8206_s2 = smov 16  }
 0x17e   :  { %s8482_s10 = sld [smem:[%s10670_s0 + %s8206_s2]]   ;;  %s8216_s2 = smov 23  }
 0x17f   :  { %s9458_s19 = sld [smem:[%s10670_s0 + %s8216_s2]]  }
 0x180   :  { %s6413_s2 = sld [smem:[%s10670_s0 + %s8196_s17]]  }
 0x181   :  { %440 = vperm.xlu1 %7538, %v395_v6   ;;  %433 = vperm.xlu0 %7537, %v394_v7  }
 0x185   :  { %514 = vperm.xlu1 %7538, %v450_v8   ;;  %445 = vperm.xlu0 %7537, %v396_v9  }
 0x189   :  { %526 = vperm.xlu1 %7538, %v452_v11   ;;  %519 = vperm.xlu0 %7537, %v451_v12  }
 0x18d   :  { %539 = vperm.xlu1 %7538, %v460_v14   ;;  %531 = vperm.xlu0 %7537, %v453_v15  }
 0x191   :  { %549 = vperm.xlu1 %7538, %v462_v17   ;;  %544 = vperm.xlu0 %7537, %v461_v18  }
 0x195   :  { %554 = vperm.xlu0 %7537, %v463_v19  }
 0x1cb   :  { %v309_v22 = vpop.permute.xlu1 %308 }
 0x1cc   :  { %v312_v25 = vmul.f32 %v309_v22, %v8262_v13 }
 0x1cf   :  { %v303_v23 = vpop.permute.xlu1 %302  ;;  %v311_v24 = vpop.permute.xlu0 %310 }
 0x1d0   :  { %v313_v26 = vmul.f32 %v311_v24, %v8262_v13  ;;  %v306_v32 = vmul.f32 %v303_v23, %v8264_v16 }
 0x1d2   :  { %v327_v27 = vpack.c.bf16 %v313_v26, %v312_v25 }
 0x1d3   :  { %v297_v28 = vpop.permute.xlu1 %296  ;;  %v305_v29 = vpop.permute.xlu0 %304 }
 0x1d4   :  { %v307_v33 = vmul.f32 %v305_v29, %v8264_v16  ;;  %353 = vmatpush1.bf16.msra.mxu1 %v327_v27  ;;  %v300_v39 = vmul.f32 %v297_v28, %v8269_v21 }
 0x1d5   :  { %354 = vmatprep.subr.bf16.mxu1 %v10671_v2 }
 0x1d6   :  { %v326_v34 = vpack.c.bf16 %v307_v33, %v306_v32 }
 0x1d7   :  { %v289_v35 = vpop.permute.xlu1 %288  ;;  %v299_v36 = vpop.permute.xlu0 %298 }
 0x1d8   :  { %v301_v40 = vmul.f32 %v299_v36, %v8269_v21  ;;  %355 = vmatpush1.bf16.msra.mxu1 %v326_v34  ;;  %v292_v46 = vmul.f32 %v289_v35, %v8276_v31 }
 0x1d9   :  { %356 = vmatprep.subr.bf16.mxu1 %v10671_v2 }
 0x1da   :  { %v325_v41 = vpack.c.bf16 %v301_v40, %v300_v39 }
 0x1db   :  { %v283_v42 = vpop.permute.xlu1 %282  ;;  %v291_v43 = vpop.permute.xlu0 %290 }
 0x1dc   :  { %357 = vmatpush1.bf16.msra.mxu1 %v325_v41  ;;  %v293_v44 = vmul.f32 %v291_v43, %v8276_v31  ;;  %v286_v51 = vmul.f32 %v283_v42, %v8274_v30 }
 0x1dd   :  { %358 = vmatprep.subr.bf16.mxu1 %v10671_v2 }
 0x1de   :  { %v323_v48 = vpack.c.bf16 %v293_v44, %v292_v46 }
 0x1df   :  { %v285_v45 = vpop.permute.xlu0 %284  ;;  %v277_v47 = vpop.permute.xlu1 %276 }
 0x1e0   :  { %359 = vmatpush1.bf16.msra.mxu1 %v324_v63  ;;  %v287_v49 = vmul.f32 %v285_v45, %v8274_v30  ;;  %v280_v56 = vmul.f32 %v277_v47, %v8283_v38 }
 0x1e1   :  { %360 = vmatprep.subr.bf16.mxu1 %v10671_v2 }
 0x1e2   :  { %v322_v52 = vpack.c.bf16 %v287_v49, %v286_v51 }
 0x1e3   :  { %v279_v50 = vpop.permute.xlu0 %278  ;;  %v271_v54 = vpop.permute.xlu1 %270 }
 0x1e4   :  { %361 = vmatpush1.bf16.msra.mxu1 %v323_v48  ;;  %v281_v53 = vmul.f32 %v279_v50, %v8283_v38  ;;  %v274_v60 = vmul.f32 %v271_v54, %v8281_v37 }
 0x1e5   :  { %362 = vmatprep.subr.bf16.mxu1 %v10671_v2 }
 0x1e6   :  { %v321_v57 = vpack.c.bf16 %v281_v53, %v280_v56 }
 0x1e7   :  { %v273_v55 = vpop.permute.xlu0 %272  ;;  %v315_v61 = vpop.permute.xlu1 %314 }
 0x1e8   :  { %363 = vmatpush1.bf16.msra.mxu1 %v322_v52  ;;  %v275_v58 = vmul.f32 %v273_v55, %v8281_v37  ;;  %v318_v1 = vmul.f32 %v8260_v10, %v315_v61 }
 0x1e9   :  { %364 = vmatprep.subr.bf16.mxu1 %v10671_v2 }
 0x1ea   :  { %v320_v62 = vpack.c.bf16 %v275_v58, %v274_v60 }
 0x1eb   :  { %v317_v59 = vpop.permute.xlu0 %316 }
 0x1ec   :  { %365 = vmatpush1.bf16.msra.mxu1 %v321_v57  ;;  %v319_v63 = vmul.f32 %v8260_v10, %v317_v59 }
 0x1ed   :  { %366 = vmatprep.subr.bf16.mxu1 %v10671_v2 }
 0x1ee   :  { %v328_v3 = vpack.c.bf16 %v319_v63, %v318_v1 }
 0x1f0   :  { %367 = vmatpush1.bf16.msra.mxu1 %v320_v62 }
 0x1f1   :  { %382 = vmatprep.subr.bf16.mxu1 %v10671_v2 }
 0x1f4   :  { %383 = vmatpush2.bf16.msra.mxu1 %v328_v3  ;;  %v332_v7 = vpop.permute.xlu1 %331 }
 0x1f7   :  { %385 = vmatmul.mubr.bf16.vlgmr.msra.gmra.mxu1 %v7540_v4 }
 0x1f8   :  { %v337_v8 = vpop.permute.xlu0 %336  ;;  %v8393_v42 = vpop.permute.xlu1 %428 }
 0x1fc   :  { %v8395_v43 = vpop.permute.xlu0 %433  ;;  %v8399_v49 = vpop.permute.xlu1 %440 }
 0x200   :  { %v8401_v50 = vpop.permute.xlu0 %445 }
 0x201   :  { %10682 = vst [vmem:[#allocation2_spill] sm:$0xff] %v8401_v50 }
 0x2b7   :  { %v386_v5 = vpop.f32.mrf.mxu1 }
 0x2b8   :  { %v387_v11 = vadd.f32 %v386_v5, %v332_v7 }
 0x2b9   :  { %v388_v6 = vpop.f32.mrf.mxu1 }
 0x2bb   :  { %v389_v9 = vpop.f32.mrf.mxu1 }
 0x2bc   :  { %v390_v10 = vadd.f32 %v389_v9, %v337_v8 }
 0x2bd   :  { %v391_v12 = vpop.f32.mrf.mxu1 }
 0x2be   :  { %v401_v14 = vadd.f32 %v390_v10, %v387_v11  ;;  %v515_v12 = vpop.permute.xlu1 %514 }
 0x2c0   :  { %v402_v15 = vrot.slane %v401_v14, 4 }
 0x2c2   :  { %v403_v17 = vadd.f32 %v402_v15, %v401_v14  ;;  %v520_v14 = vpop.permute.xlu0 %519 }
 0x2c4   :  { %v404_v18 = vrot.slane %v403_v17, 2 }
 0x2c6   :  { %v405_v19 = vadd.f32 %v404_v18, %v403_v17 }
 0x2c8   :  { %v406_v22 = vrot.slane %v405_v19, 1 }
 0x2ca   :  { %v407_v23 = vadd.f32 %v406_v22, %v405_v19 }
 0x2cc   :  { %v409_v24 = vmul.f32 0.0625, %v407_v23  ;;  %v527_v23 = vpop.permute.xlu1 %526 }
 0x2ce   :  { %v410_v25 = vsub.f32 %v387_v11, %v409_v24  ;;  %v411_v26 = vsub.f32 %v390_v10, %v409_v24  ;;  %v532_v24 = vpop.permute.xlu0 %531 }
 0x2d0   :  { %v412_v27 = vmul.f32 %v410_v25, %v410_v25  ;;  %v413_v28 = vmul.f32 %v411_v26, %v411_v26 }
 0x2d2   :  { %v414_v29 = vadd.f32 %v413_v28, %v412_v27  ;;  %v7543_v28 = vld [vmem:[%s8391_s5] sm:$0xff]  }
 0x2d4   :  { %v415_v32 = vrot.slane %v414_v29, 4 }
 0x2d6   :  { %v416_v33 = vadd.f32 %v415_v32, %v414_v29  ;;  %v7544_v29 = vld [vmem:[%s8391_s5 + $0x8] sm:$0xff]   ;;  %v540_v32 = vpop.permute.xlu1 %539 }
 0x2d8   :  { %v417_v34 = vrot.slane %v416_v33, 2 }
 0x2da   :  { %v418_v35 = vadd.f32 %v417_v34, %v416_v33 }
 0x2dc   :  { %v419_v36 = vrot.slane %v418_v35, 1 }
 0x2de   :  { %v420_v39 = vadd.f32 %v419_v36, %v418_v35 }
 0x2e0   :  { %v421_v40 = vmul.f32 0.0625, %v420_v39  ;;  %v545_v39 = vpop.permute.xlu0 %544 }
 0x2e2   :  { %v422_v41 = vadd.f32 1e-05, %v421_v40 }
 0x2e4   :  { %7584 = vrsqrt.f32 %v422_v41 }
 0x2f1   :  { %v7585_v44 = vpop.eup %7584 }
 0x2f2   :  { %v424_v45 = vmul.f32 %v7585_v44, %v410_v25  ;;  %v425_v46 = vmul.f32 %v7585_v44, %v411_v26 }
 0x2f4   :  { %v436_v47 = vmul.f32 %v8393_v42, %v424_v45  ;;  %v437_v48 = vmul.f32 %v8395_v43, %v425_v46 }
 0x2f6   :  { %v8404_v51 = vadd.f32 %v8399_v49, %v436_v47  ;;  %v8407_v52 = vadd.f32 %v8401_v50, %v437_v48  ;;  %v550_v47 = vpop.permute.xlu1 %549  ;;  %v10683_v50 = vmov 0.0  }
 0x2f8   :  { %v488_v53 = vadd.f32 %v8407_v52, %v8404_v51 }
 0x2fa   :  { %v489_v54 = vrot.slane %v488_v53, 4 }
 0x2fc   :  { %v490_v55 = vadd.f32 %v489_v54, %v488_v53 }
 0x2fe   :  { %v491_v56 = vrot.slane %v490_v55, 2 }
 0x300   :  { %v492_v57 = vadd.f32 %v491_v56, %v490_v55 }
 0x302   :  { %v493_v58 = vrot.slane %v492_v57, 1 }
 0x304   :  { %v494_v59 = vadd.f32 %v493_v58, %v492_v57  ;;  %v555_v57 = vpop.permute.xlu0 %554 }
 0x306   :  { %v495_v60 = vmul.f32 0.0625, %v494_v59 }
 0x308   :  { %v496_v61 = vsub.f32 %v8404_v51, %v495_v60  ;;  %v497_v62 = vsub.f32 %v8407_v52, %v495_v60 }
 0x30a   :  { %v498_v63 = vmul.f32 %v496_v61, %v496_v61  ;;  %v499_v1 = vmul.f32 %v497_v62, %v497_v62 }
 0x30c   :  { %v500_v3 = vadd.f32 %v499_v1, %v498_v63 }
 0x30e   :  { %v501_v4 = vrot.slane %v500_v3, 4 }
 0x310   :  { %v502_v5 = vadd.f32 %v501_v4, %v500_v3 }
 0x312   :  { %v503_v6 = vrot.slane %v502_v5, 2 }
 0x314   :  { %v504_v7 = vadd.f32 %v503_v6, %v502_v5 }
 0x316   :  { %v505_v8 = vrot.slane %v504_v7, 1 }
 0x318   :  { %v506_v9 = vadd.f32 %v505_v8, %v504_v7 }
 0x31a   :  { %v507_v11 = vmul.f32 0.0625, %v506_v9 }
 0x31c   :  { %v508_v10 = vadd.f32 1e-05, %v507_v11 }
 0x31e   :  { %7586 = vrsqrt.f32 %v508_v10 }
 0x32b   :  { %v7587_v15 = vpop.eup %7586 }
 0x32c   :  { %v510_v17 = vmul.f32 %v7587_v15, %v496_v61  ;;  %v511_v18 = vmul.f32 %v7587_v15, %v497_v62 }
 0x32e   :  { %v522_v19 = vmul.f32 %v515_v12, %v510_v17  ;;  %v523_v22 = vmul.f32 %v520_v14, %v511_v18 }
 0x330   :  { %v534_v25 = vadd.f32 %v527_v23, %v522_v19  ;;  %v535_v26 = vadd.f32 %v532_v24, %v523_v22 }
 0x332   :  { %v536_v27 = vpack.c.bf16 %v535_v26, %v534_v25 }
 0x334   :  { %7030 = vmatpush3.bf16.msra.mxu0 %v536_v27 }
 0x335   :  { %7061 = vmatprep.subr.bf16.mxu0 %v10673_v0 }
 0x337   :  { %7032 = vmatmul.mubr.msk.bf16.vlgmr.msra.gmra.mxu0 %vm348_vm5, %v7543_v28 }
 0x338   :  { %7035 = vmatprep.mubr.msk.bf16.mxu0 %vm8194_vm0, %v10673_v0 }
 0x33f   :  { %7036 = vmatmul.mubr.msk.bf16.gmra.mxu0 %vm348_vm5, %v7544_v29 }
 0x340   :  { %7039 = vmatprep.mubr.msk.bf16.mxu0 %vm8194_vm0, %v10673_v0 }
 0x3f7   :  { %v625_v33 = vpop.f32.mrf.mxu0 }
 0x3f8   :  { %v626_v34 = vadd.f32 %v625_v33, %v540_v32 }
 0x3f9   :  { %v7033_v35 = vpop.f32.mrf.mxu0 }
 0x3fa   :  { %v648_v36 = vmul.f32 0.35355338, %v626_v34 }
 0x3fb   :  { %v628_v40 = vpop.f32.mrf.mxu0 }
 0x3fc   :  { %v649_v41 = vpack.c.bf16 %v648_v36, %v648_v36  ;;  %v629_v44 = vadd.f32 %v628_v40, %v545_v39 }
 0x3fd   :  { %v7034_v45 = vpop.f32.mrf.mxu0 }
 0x3fe   :  { %v1002_v46 = vmul.f32 0.35355338, %v629_v44  ;;  %668 = vxpose.xlu1.c.b16.start.end [1/1] (short) %v649_v41, 128 }
 0x3ff   :  { %v633_v48 = vpop.f32.mrf.mxu0 }
 0x400   :  { %v1003_v53 = vpack.c.bf16 %v1002_v46, %v1002_v46  ;;  %v634_v54 = vadd.f32 %v633_v48, %v550_v47 }
 0x401   :  { %v7037_v55 = vpop.f32.mrf.mxu0 }
 0x402   :  { %v650_v56 = vpack.c.bf16 %v634_v54, %v634_v54  ;;  %1023 = vxpose.xlu0.c.b16.start.end [1/1] (short) %v1003_v53, 128 }
 0x403   :  { %v636_v58 = vpop.f32.mrf.mxu0 }
 0x404   :  { %v710_v59 = vsel %vm215_vm1, %v650_v56, 0  ;;  %v637_v60 = vadd.f32 %v636_v58, %v555_v57  ;;  %7493 = vmatprep.subr.msk.bf16.mxu1 %vm215_vm1, %v650_v56 }
 0x405   :  { %7044 = vmatpush3.bf16.msra.mxu1 %v710_v59  ;;  %v7038_v61 = vpop.f32.mrf.mxu0 }
 0x406   :  { %v1004_v62 = vpack.c.bf16 %v637_v60, %v637_v60  ;;  %v6468_v60 = vld [vmem:[%s8482_s10 + $0xf0] sm:$0xff] }
 0x408   :  { %7494 = vmatprep.subr.msk.bf16.mxu1 %vm215_vm1, %v1004_v62  ;;  %v1064_v3 = vsel %vm215_vm1, %v1004_v62, 0 }
 0x460   :  { %v676_v63 = vpop.trf.xlu1 }
 0x461   :  { %7045 = vmatprep.mubr.msk.bf16.mxu1 %vm684_vm6, %v676_v63  ;;  %v666_v63 = vld [vmem:[%s8482_s10 + $0x70] sm:$0xff] }
 0x464   :  { %v677_v1 = vpop.trf.xlu1  ;;  %v1031_v6 = vpop.trf.xlu0 }
 0x465   :  { %7046 = vmatmul.mubr.msk.bf16.vlgmr.msra.gmra.mxu1 %vm684_vm6, %v677_v1 }
 0x466   :  { %7082 = vmatpush3.bf16.msra.mxu1 %v1064_v3  ;;  %v6469_v3 = vld [vmem:[%s8482_s10 + $0xf8] sm:$0xff] }
 0x467   :  { %7099 = vmatprep.subr.bf16.mxu1 %v10673_v0 }
 0x468   :  { %v678_v4 = vpop.trf.xlu1  ;;  %v1032_v9 = vpop.trf.xlu0 }
 0x469   :  { %7049 = vmatprep.mubr.msk.bf16.mxu1 %vm684_vm6, %v678_v4 }
 0x46c   :  { %v679_v5 = vpop.trf.xlu1  ;;  %v1033_v10 = vpop.trf.xlu0 }
 0x46d   :  { %7050 = vmatmul.mubr.msk.bf16.gmra.mxu1 %vm684_vm6, %v679_v5 }
 0x470   :  { %v680_v7 = vpop.trf.xlu1  ;;  %v1034_v14 = vpop.trf.xlu0 }
 0x471   :  { %7053 = vmatprep.mubr.msk.bf16.mxu1 %vm684_vm6, %v680_v7  ;;  %v667_v7 = vld [vmem:[%s8482_s10 + $0x78] sm:$0xff] }
 0x474   :  { %v681_v8 = vpop.trf.xlu1  ;;  %v1035_v15 = vpop.trf.xlu0 }
 0x475   :  { %7054 = vmatmul.mubr.msk.bf16.gmra.mxu1 %vm684_vm6, %v681_v8  ;;  %v6466_v8 = vld [vmem:[%s8482_s10 + $0xe0] sm:$0xff] }
 0x478   :  { %v682_v11 = vpop.trf.xlu1  ;;  %v1036_v17 = vpop.trf.xlu0 }
 0x479   :  { %7057 = vmatprep.mubr.msk.bf16.mxu1 %vm684_vm6, %v682_v11 }
 0x47c   :  { %v683_v12 = vpop.trf.xlu1  ;;  %v1037_v18 = vpop.trf.xlu0 }
 0x47d   :  { %7058 = vmatmul.mubr.msk.bf16.gmra.mxu1 %vm684_vm6, %v683_v12 }
 0x47e   :  { %7083 = vmatprep.mubr.msk.bf16.mxu1 %vm684_vm6, %v1031_v6 }
 0x480   :  { %v1038_v19 = vpop.trf.xlu0 }
 0x485   :  { %7084 = vmatmul.mubr.msk.bf16.vlgmr.msra.gmra.mxu1 %vm684_vm6, %v1032_v9 }
 0x486   :  { %7087 = vmatprep.mubr.msk.bf16.mxu1 %vm684_vm6, %v1033_v10  ;;  %v664_v10 = vld [vmem:[%s8482_s10 + $0x60] sm:$0xff] }
 0x48d   :  { %7088 = vmatmul.mubr.msk.bf16.gmra.mxu1 %vm684_vm6, %v1034_v14  ;;  %v6467_v14 = vld [vmem:[%s8482_s10 + $0xe8] sm:$0xff] }
 0x48e   :  { %7091 = vmatprep.mubr.msk.bf16.mxu1 %vm684_vm6, %v1035_v15 }
 0x495   :  { %7092 = vmatmul.mubr.msk.bf16.gmra.mxu1 %vm684_vm6, %v1036_v17 }
 0x496   :  { %7095 = vmatprep.mubr.msk.bf16.mxu1 %vm684_vm6, %v1037_v18  ;;  %v6464_v18 = vld [vmem:[%s8482_s10 + $0xd0] sm:$0xff] }
 0x49d   :  { %7096 = vmatmul.mubr.msk.bf16.gmra.mxu1 %vm684_vm6, %v1038_v19  ;;  %v665_v19 = vld [vmem:[%s8482_s10 + $0x68] sm:$0xff] }
 0x49e   :  { %7115 = vmatprep.mubr.msk.bf16.mxu1 %vm8194_vm0, %v10673_v0 }
 0x525   :  { %v8445_v22 = vpop.f32.mrf.mxu1 }
 0x527   :  { %v8447_v23 = vpop.f32.mrf.mxu1 }
 0x529   :  { %v8449_v24 = vpop.f32.mrf.mxu1 }
 0x52b   :  { %v8451_v25 = vpop.f32.mrf.mxu1 }
 0x52d   :  { %v8453_v26 = vpop.f32.mrf.mxu1 }
 0x52f   :  { %v8455_v27 = vpop.f32.mrf.mxu1 }
 0x531   :  { %v8457_v28 = vpop.f32.mrf.mxu1 }
 0x533   :  { %v8459_v29 = vpop.f32.mrf.mxu1 }
 0x535   :  { %v7055_v32 = vpop.f32.mrf.mxu1 }
 0x537   :  { %v8461_v33 = vpop.f32.mrf.mxu1 }
 0x539   :  { %v7056_v34 = vpop.f32.mrf.mxu1 }
 0x53b   :  { %v8463_v35 = vpop.f32.mrf.mxu1 }
 0x53d   :  { %v7059_v36 = vpop.f32.mrf.mxu1 }
 0x53e   :  { %v8490_v5 = vadd.f32 %v7059_v36, %v666_v63 }
 0x53f   :  { %v794_v39 = vpop.f32.mrf.mxu1 }
 0x540   :  { %v8506_v15 = vadd.f32 %v794_v39, %v664_v10  ;;  %v661_v10 = vld [vmem:[%s8482_s10 + $0x48] sm:$0xff] }
 0x541   :  { %v7060_v40 = vpop.f32.mrf.mxu1 }
 0x542   :  { %v8498_v9 = vadd.f32 %v7060_v40, %v667_v7  ;;  %v6463_v7 = vld [vmem:[%s8482_s10 + $0xc8] sm:$0xff] }
 0x543   :  { %v797_v41 = vpop.f32.mrf.mxu1 }
 0x544   :  { %v8516_v40 = vadd.f32 %v797_v41, %v665_v19 }
 0x545   :  { %v8465_v44 = vpop.f32.mrf.mxu1 }
 0x547   :  { %v8467_v45 = vpop.f32.mrf.mxu1 }
 0x549   :  { %v8469_v46 = vpop.f32.mrf.mxu1 }
 0x54b   :  { %v8471_v47 = vpop.f32.mrf.mxu1 }
 0x54d   :  { %v7089_v48 = vpop.f32.mrf.mxu1 }
 0x54f   :  { %v8473_v53 = vpop.f32.mrf.mxu1 }
 0x551   :  { %v8475_v54 = vpop.f32.mrf.mxu1 }
 0x553   :  { %v8477_v55 = vpop.f32.mrf.mxu1 }
 0x555   :  { %v7093_v56 = vpop.f32.mrf.mxu1 }
 0x556   :  { %v8514_v36 = vadd.f32 %v7093_v56, %v6464_v18  ;;  %v6458_v18 = vld [vmem:[%s8482_s10 + $0xa0] sm:$0xff] }
 0x557   :  { %v1132_v57 = vpop.f32.mrf.mxu1  ;;  %v8570_v19 = vadd.f32 %v6458_v18, %v8473_v53  ;;  %v657_v53 = vld [vmem:[%s8482_s10 + $0x28] sm:$0xff] }
 0x558   :  { %v653_v18 = vld [vmem:[%s8482_s10 + $0x8] sm:$0xff] }
 0x559   :  { %v7094_v58 = vpop.f32.mrf.mxu1 }
 0x55b   :  { %v1135_v59 = vpop.f32.mrf.mxu1 }
 0x55d   :  { %v7097_v61 = vpop.f32.mrf.mxu1 }
 0x55e   :  { %v8485_v62 = vadd.f32 %v7097_v61, %v6468_v60  ;;  %v662_v60 = vld [vmem:[%s8482_s10 + $0x50] sm:$0xff]  ;;  %v6465_v61 = vld [vmem:[%s8482_s10 + $0xd8] sm:$0xff] }
 0x55f   :  { %v1148_v1 = vpop.f32.mrf.mxu1  ;;  %v8522_v39 = vadd.f32 %v7055_v32, %v662_v60  ;;  %v8524_v63 = vadd.f32 %v7094_v58, %v6465_v61  ;;  %v8541_v58 = vadd.f32 %v6463_v7, %v1135_v59  ;;  %v6459_v60 = vld [vmem:[%s8482_s10 + $0xa8] sm:$0xff] }
 0x560   :  { %1191 = vmax.xlane.f32.xlu0 %v8485_v62  ;;  %v8500_v11 = vadd.f32 %v6466_v8, %v1148_v1  ;;  %v663_v1 = vld [vmem:[%s8482_s10 + $0x58] sm:$0xff]  ;;  %v6460_v8 = vld [vmem:[%s8482_s10 + $0xb0] sm:$0xff] }
 0x561   :  { %v7098_v4 = vpop.f32.mrf.mxu1  ;;  %v8530_v41 = vadd.f32 %v7056_v34, %v663_v1  ;;  %v8547_v34 = vadd.f32 %v7089_v48, %v6460_v8  ;;  %v659_v48 = vld [vmem:[%s8482_s10 + $0x38] sm:$0xff]  ;;  %v8581_v1 = vadd.f32 %v6459_v60, %v8477_v55  ;;  %v8594_v55 = vadd.f32 %v8459_v29, %v657_v53 }
 0x562   :  { %v8492_v6 = vadd.f32 %v7098_v4, %v6469_v3  ;;  %v6462_v3 = vld [vmem:[%s8482_s10 + $0xc0] sm:$0xff] }
 0x563   :  { %v1151_v12 = vpop.f32.mrf.mxu1  ;;  %v8532_v56 = vadd.f32 %v6462_v3, %v1132_v57  ;;  %v660_v4 = vld [vmem:[%s8482_s10 + $0x40] sm:$0xff]  ;;  %v8550_v57 = vadd.f32 %v8463_v35, %v661_v10  ;;  %v8567_v35 = vadd.f32 %v8457_v28, %v659_v48  ;;  %v6456_v28 = vld [vmem:[%s8482_s10 + $0x90] sm:$0xff]  ;;  %v655_v10 = vld [vmem:[%s8482_s10 + $0x18] sm:$0xff] }
 0x564   :  { %837 = vmax.xlane.f32.xlu0 %v8490_v5  ;;  %1193 = vmax.xlane.f32.xlu1 %v8492_v6  ;;  %v8508_v17 = vadd.f32 %v6467_v14, %v1151_v12  ;;  %v8539_v32 = vadd.f32 %v8461_v33, %v660_v4  ;;  %v658_v12 = vld [vmem:[%s8482_s10 + $0x30] sm:$0xff]  ;;  %v6461_v14 = vld [vmem:[%s8482_s10 + $0xb8] sm:$0xff]  ;;  %v8611_v29 = vadd.f32 %v8449_v24, %v655_v10  ;;  %v6455_v48 = vld [vmem:[%s8482_s10 + $0x88] sm:$0xff] }
 0x565   :  { %v8557_v33 = vadd.f32 %v8453_v26, %v658_v12  ;;  %v8560_v59 = vadd.f32 %v8475_v54, %v6461_v14  ;;  %v656_v26 = vld [vmem:[%s8482_s10 + $0x20] sm:$0xff]  ;;  %v7545_v54 = vld [vmem:[%s8391_s5 + $0x10] sm:$0xff]   ;;  %v6457_v4 = vld [vmem:[%s8482_s10 + $0x98] sm:$0xff]  ;;  %v8630_v24 = vadd.f32 %v8451_v25, %v653_v18 }
 0x566   :  { %v8578_v61 = vadd.f32 %v8455_v27, %v656_v26  ;;  %7040 = vmatmul.mubr.msk.bf16.gmra.mxu0 %vm348_vm5, %v7545_v54  ;;  %v8591_v27 = vadd.f32 %v8465_v44, %v6456_v28  ;;  %v654_v3 = vld [vmem:[%s8482_s10 + $0x10] sm:$0xff]  ;;  %v8604_v8 = vadd.f32 %v8469_v46, %v6457_v4  ;;  %v6454_v12 = vld [vmem:[%s8482_s10 + $0x80] sm:$0xff]  ;;  %v8624_v46 = vadd.f32 %v6455_v48, %v8471_v47 }
 0x567   :  { %7077 = vmatprep.mubr.msk.bf16.mxu0 %vm8194_vm0, %v10673_v0  ;;  %v8601_v7 = vadd.f32 %v8445_v22, %v654_v3  ;;  %v8614_v44 = vadd.f32 %v6454_v12, %v8467_v45  ;;  %v652_v14 = vld [vmem:[%s8482_s10] sm:$0xff] }
 0x568   :  { %839 = vmax.xlane.f32.xlu1 %v8498_v9  ;;  %1187 = vmax.xlane.f32.xlu0 %v8500_v11  ;;  %v8621_v22 = vadd.f32 %v8447_v23, %v652_v14 }
 0x56c   :  { %1189 = vmax.xlane.f32.xlu1 %v8508_v17  ;;  %833 = vmax.xlane.f32.xlu0 %v8506_v15 }
 0x570   :  { %835 = vmax.xlane.f32.xlu1 %v8516_v40  ;;  %1183 = vmax.xlane.f32.xlu0 %v8514_v36 }
 0x574   :  { %1185 = vmax.xlane.f32.xlu1 %v8524_v63  ;;  %829 = vmax.xlane.f32.xlu0 %v8522_v39 }
 0x578   :  { %831 = vmax.xlane.f32.xlu1 %v8530_v41  ;;  %1179 = vmax.xlane.f32.xlu0 %v8532_v56 }
 0x57c   :  { %1181 = vmax.xlane.f32.xlu1 %v8541_v58  ;;  %825 = vmax.xlane.f32.xlu0 %v8539_v32 }
 0x580   :  { %827 = vmax.xlane.f32.xlu1 %v8550_v57  ;;  %1175 = vmax.xlane.f32.xlu0 %v8547_v34 }
 0x584   :  { %1177 = vmax.xlane.f32.xlu1 %v8560_v59  ;;  %821 = vmax.xlane.f32.xlu0 %v8557_v33 }
 0x588   :  { %823 = vmax.xlane.f32.xlu1 %v8567_v35  ;;  %1171 = vmax.xlane.f32.xlu0 %v8570_v19 }
 0x58c   :  { %1173 = vmax.xlane.f32.xlu1 %v8581_v1  ;;  %817 = vmax.xlane.f32.xlu0 %v8578_v61 }
 0x590   :  { %819 = vmax.xlane.f32.xlu1 %v8594_v55  ;;  %1167 = vmax.xlane.f32.xlu0 %v8591_v27 }
 0x594   :  { %1169 = vmax.xlane.f32.xlu1 %v8604_v8  ;;  %813 = vmax.xlane.f32.xlu0 %v8601_v7 }
 0x598   :  { %815 = vmax.xlane.f32.xlu1 %v8611_v29  ;;  %1163 = vmax.xlane.f32.xlu0 %v8614_v44 }
 0x59c   :  { %1165 = vmax.xlane.f32.xlu1 %v8624_v46  ;;  %809 = vmax.xlane.f32.xlu0 %v8621_v22 }
 0x5a0   :  { %811 = vmax.xlane.f32.xlu1 %v8630_v24 }
 0x5e9   :  { %v1192_v45 = vpop.xlane.xlu0 %1191 }
 0x5ea   :  { %v1209_v26 = vsub.f32 %v8485_v62, %v1192_v45 }
 0x5ec   :  { %v1239_v47 = vmul.f32 1.442695, %v1209_v26 }
 0x5ed   :  { %v838_v60 = vpop.xlane.xlu0 %837  ;;  %v1194_v54 = vpop.xlane.xlu1 %1193 }
 0x5ee   :  { %v855_v23 = vsub.f32 %v8490_v5, %v838_v60  ;;  %v1210_v4 = vsub.f32 %v8492_v6, %v1194_v54 }
 0x5f0   :  { %v885_v28 = vmul.f32 1.442695, %v855_v23  ;;  %v1241_v48 = vmul.f32 1.442695, %v1210_v4 }
 0x5f1   :  { %v840_v53 = vpop.xlane.xlu1 %839  ;;  %v1188_v3 = vpop.xlane.xlu0 %1187 }
 0x5f2   :  { %7588 = vpow2.f32 %v885_v28  ;;  %v856_v10 = vsub.f32 %v8498_v9, %v840_v53  ;;  %v1207_v18 = vsub.f32 %v8500_v11, %v1188_v3 }
 0x5f3   :  { %7590 = vpow2.f32 %v1239_v47 }
 0x5f4   :  { %v887_v25 = vmul.f32 1.442695, %v856_v10  ;;  %v1235_v54 = vmul.f32 1.442695, %v1207_v18 }
 0x5f5   :  { %v1190_v12 = vpop.xlane.xlu1 %1189  ;;  %v834_v14 = vpop.xlane.xlu0 %833 }
 0x5f6   :  { %7592 = vpow2.f32 %v887_v25  ;;  %v853_v62 = vsub.f32 %v8506_v15, %v834_v14  ;;  %v1208_v60 = vsub.f32 %v8508_v17, %v1190_v12 }
 0x5f7   :  { %7594 = vpow2.f32 %v1241_v48 }
 0x5f8   :  { %v881_v5 = vmul.f32 1.442695, %v853_v62  ;;  %v1237_v53 = vmul.f32 1.442695, %v1208_v60 }
 0x5f9   :  { %v836_v45 = vpop.xlane.xlu1 %835  ;;  %v1184_v26 = vpop.xlane.xlu0 %1183 }
 0x5fa   :  { %v854_v6 = vsub.f32 %v8516_v40, %v836_v45  ;;  %7596 = vpow2.f32 %v881_v5  ;;  %v1205_v9 = vsub.f32 %v8514_v36, %v1184_v26 }
 0x5fc   :  { %v883_v23 = vmul.f32 1.442695, %v854_v6  ;;  %v1231_v3 = vmul.f32 1.442695, %v1205_v9 }
 0x5fd   :  { %v1186_v28 = vpop.xlane.xlu1 %1185  ;;  %v830_v47 = vpop.xlane.xlu0 %829 }
 0x5fe   :  { %7598 = vpow2.f32 %v883_v23  ;;  %v1206_v15 = vsub.f32 %v8524_v63, %v1186_v28  ;;  %v851_v4 = vsub.f32 %v8522_v39, %v830_v47 }
 0x5ff   :  { %v8643_v11 = vpop.eup %7588  ;;  %7600 = vpow2.f32 %v1235_v54 }
 0x600   :  { %917 = vadd.xlane.f32.xlu0 %v8643_v11  ;;  %v8647_v10 = vpop.eup %7590  ;;  %7602 = vpow2.f32 %v1237_v53  ;;  %v1233_v36 = vmul.f32 1.442695, %v1206_v15  ;;  %v877_v63 = vmul.f32 1.442695, %v851_v4 }
 0x601   :  { %v832_v17 = vpop.xlane.xlu1 %831  ;;  %v1180_v40 = vpop.xlane.xlu0 %1179  ;;  %7604 = vpow2.f32 %v1231_v3 }
 0x602   :  { %v852_v25 = vsub.f32 %v8530_v41, %v832_v17  ;;  %v1203_v14 = vsub.f32 %v8532_v56, %v1180_v40  ;;  %7606 = vpow2.f32 %v1233_v36 }
 0x603   :  { %v8650_v12 = vpop.eup %7592  ;;  %7608 = vpow2.f32 %v877_v63 }
 0x604   :  { %919 = vadd.xlane.f32.xlu1 %v8650_v12  ;;  %1271 = vadd.xlane.f32.xlu0 %v8647_v10  ;;  %v879_v62 = vmul.f32 1.442695, %v852_v25  ;;  %v8656_v5 = vpop.eup %7594  ;;  %v1227_v41 = vmul.f32 1.442695, %v1203_v14 }
 0x605   :  { %v1182_v39 = vpop.xlane.xlu1 %1181  ;;  %v826_v48 = vpop.xlane.xlu0 %825 }
 0x606   :  { %v1204_v18 = vsub.f32 %v8541_v58, %v1182_v39  ;;  %v849_v45 = vsub.f32 %v8539_v32, %v826_v48  ;;  %7610 = vpow2.f32 %v879_v62 }
 0x607   :  { %v8659_v26 = vpop.eup %7596  ;;  %7612 = vpow2.f32 %v1227_v41 }
 0x608   :  { %1273 = vadd.xlane.f32.xlu1 %v8656_v5  ;;  %913 = vadd.xlane.f32.xlu0 %v8659_v26  ;;  %v1229_v6 = vmul.f32 1.442695, %v1204_v18  ;;  %v873_v58 = vmul.f32 1.442695, %v849_v45 }
 0x609   :  { %v828_v56 = vpop.xlane.xlu1 %827  ;;  %v1176_v60 = vpop.xlane.xlu0 %1175 }
 0x60a   :  { %v850_v54 = vsub.f32 %v8550_v57, %v828_v56  ;;  %v1201_v23 = vsub.f32 %v8547_v34, %v1176_v60  ;;  %7614 = vpow2.f32 %v1229_v6 }
 0x60b   :  { %v8664_v9 = vpop.eup %7598  ;;  %7616 = vpow2.f32 %v873_v58 }
 0x60c   :  { %v8667_v28 = vpop.eup %7600  ;;  %915 = vadd.xlane.f32.xlu1 %v8664_v9  ;;  %v875_v53 = vmul.f32 1.442695, %v850_v54  ;;  %v1223_v57 = vmul.f32 1.442695, %v1201_v23 }
 0x60d   :  { %1267 = vadd.xlane.f32.xlu0 %v8667_v28  ;;  %v1178_v32 = vpop.xlane.xlu1 %1177  ;;  %v822_v47 = vpop.xlane.xlu0 %821 }
 0x60e   :  { %v1202_v15 = vsub.f32 %v8560_v59, %v1178_v32  ;;  %v8672_v3 = vpop.eup %7602  ;;  %v847_v4 = vsub.f32 %v8557_v33, %v822_v47  ;;  %7618 = vpow2.f32 %v875_v53 }
 0x60f   :  { %v8675_v17 = vpop.eup %7604  ;;  %7620 = vpow2.f32 %v1223_v57 }
 0x610   :  { %1269 = vadd.xlane.f32.xlu1 %v8672_v3  ;;  %v1225_v36 = vmul.f32 1.442695, %v1202_v15  ;;  %v8680_v63 = vpop.eup %7606  ;;  %v869_v59 = vmul.f32 1.442695, %v847_v4 }
 0x611   :  { %1263 = vadd.xlane.f32.xlu0 %v8675_v17  ;;  %v824_v34 = vpop.xlane.xlu1 %823  ;;  %v1172_v40 = vpop.xlane.xlu0 %1171 }
 0x612   :  { %v848_v25 = vsub.f32 %v8567_v35, %v824_v34  ;;  %v1199_v14 = vsub.f32 %v8570_v19, %v1172_v40  ;;  %v8683_v39 = vpop.eup %7608  ;;  %7622 = vpow2.f32 %v1225_v36 }
 0x613   :  { %v8688_v41 = vpop.eup %7610  ;;  %7624 = vpow2.f32 %v869_v59 }
 0x614   :  { %1265 = vadd.xlane.f32.xlu1 %v8680_v63  ;;  %v871_v62 = vmul.f32 1.442695, %v848_v25  ;;  %v1219_v35 = vmul.f32 1.442695, %v1199_v14  ;;  %v8691_v56 = vpop.eup %7612 }
 0x615   :  { %909 = vadd.xlane.f32.xlu0 %v8683_v39  ;;  %v1174_v33 = vpop.xlane.xlu1 %1173  ;;  %v818_v48 = vpop.xlane.xlu0 %817 }
 0x616   :  { %v1200_v18 = vsub.f32 %v8581_v1, %v1174_v33  ;;  %v845_v45 = vsub.f32 %v8578_v61, %v818_v48  ;;  %7626 = vpow2.f32 %v871_v62 }
 0x617   :  { %v8696_v58 = vpop.eup %7614  ;;  %7628 = vpow2.f32 %v1219_v35 }
 0x618   :  { %911 = vadd.xlane.f32.xlu1 %v8688_v41  ;;  %v1221_v6 = vmul.f32 1.442695, %v1200_v18  ;;  %v865_v1 = vmul.f32 1.442695, %v845_v45  ;;  %v8699_v32 = vpop.eup %7616 }
 0x619   :  { %1259 = vadd.xlane.f32.xlu0 %v8691_v56  ;;  %v820_v19 = vpop.xlane.xlu1 %819  ;;  %v1168_v60 = vpop.xlane.xlu0 %1167 }
 0x61a   :  { %v846_v54 = vsub.f32 %v8594_v55, %v820_v19  ;;  %v1197_v23 = vsub.f32 %v8591_v27, %v1168_v60  ;;  %7630 = vpow2.f32 %v1221_v6 }
 0x61b   :  { %v8704_v57 = vpop.eup %7618  ;;  %7632 = vpow2.f32 %v865_v1 }
 0x61c   :  { %1261 = vadd.xlane.f32.xlu1 %v8696_v58  ;;  %v867_v53 = vmul.f32 1.442695, %v846_v54  ;;  %v1215_v55 = vmul.f32 1.442695, %v1197_v23  ;;  %v8707_v34 = vpop.eup %7620 }
 0x61d   :  { %905 = vadd.xlane.f32.xlu0 %v8699_v32  ;;  %v1170_v61 = vpop.xlane.xlu1 %1169  ;;  %v814_v47 = vpop.xlane.xlu0 %813 }
 0x61e   :  { %v1198_v15 = vsub.f32 %v8604_v8, %v1170_v61  ;;  %v843_v4 = vsub.f32 %v8601_v7, %v814_v47  ;;  %7634 = vpow2.f32 %v867_v53 }
 0x61f   :  { %v8712_v59 = vpop.eup %7622  ;;  %7636 = vpow2.f32 %v1215_v55 }
 0x620   :  { %907 = vadd.xlane.f32.xlu1 %v8704_v57  ;;  %v1217_v36 = vmul.f32 1.442695, %v1198_v15  ;;  %v861_v8 = vmul.f32 1.442695, %v843_v4  ;;  %v8715_v33 = vpop.eup %7624 }
 0x621   :  { %1255 = vadd.xlane.f32.xlu0 %v8707_v34  ;;  %v816_v27 = vpop.xlane.xlu1 %815  ;;  %v1164_v40 = vpop.xlane.xlu0 %1163 }
 0x622   :  { %v844_v25 = vsub.f32 %v8611_v29, %v816_v27  ;;  %v1195_v14 = vsub.f32 %v8614_v44, %v1164_v40  ;;  %7638 = vpow2.f32 %v1217_v36 }
 0x623   :  { %v8720_v35 = vpop.eup %7626  ;;  %7640 = vpow2.f32 %v861_v8 }
 0x624   :  { %1257 = vadd.xlane.f32.xlu1 %v8712_v59  ;;  %v863_v62 = vmul.f32 1.442695, %v844_v25  ;;  %v1211_v29 = vmul.f32 1.442695, %v1195_v14  ;;  %v8723_v19 = vpop.eup %7628  ;;  %v464_v25 = vld [vmem:[%s8351_s30 + $0x20] sm:$0xff]  ;;  %v465_v14 = vld [vmem:[%s8351_s30 + $0x28] sm:$0xff] }
 0x625   :  { %901 = vadd.xlane.f32.xlu0 %v8715_v33  ;;  %v1166_v7 = vpop.xlane.xlu1 %1165  ;;  %v810_v48 = vpop.xlane.xlu0 %809 }
 0x626   :  { %v1196_v18 = vsub.f32 %v8624_v46, %v1166_v7  ;;  %v841_v45 = vsub.f32 %v8621_v22, %v810_v48  ;;  %7642 = vpow2.f32 %v863_v62  ;;  %v8766_v40 = vpop.f32.mrf.mxu0  ;;  %v470_v48 = vld [vmem:[%s8764_s20] sm:$0xff]  ;;  %v471_v62 = vld [vmem:[%s8764_s20 + $0x8] sm:$0xff] }
 0x627   :  { %v8728_v54 = vpop.eup %7630  ;;  %7644 = vpow2.f32 %v1211_v29  ;;  %v473_v29 = vld [vmem:[%s8772_s27 + $0x8] sm:$0xff] }
 0x628   :  { %903 = vadd.xlane.f32.xlu1 %v8720_v35  ;;  %v1213_v60 = vmul.f32 1.442695, %v1196_v18  ;;  %v857_v46 = vmul.f32 1.442695, %v841_v45  ;;  %v8730_v1 = vpop.eup %7632  ;;  %v7041_v36 = vpop.f32.mrf.mxu0  ;;  %v472_v18 = vld [vmem:[%s8772_s27] sm:$0xff] }
 0x629   :  { %1251 = vadd.xlane.f32.xlu0 %v8723_v19  ;;  %v812_v44 = vpop.xlane.xlu1 %811  ;;  %v474_v45 = vld [vmem:[%s8781_s3] sm:$0xff] }
 0x62a   :  { %v842_v6 = vsub.f32 %v8630_v24, %v812_v44  ;;  %7646 = vpow2.f32 %v1213_v60  ;;  %v8774_v8 = vpop.f32.mrf.mxu0  ;;  %v475_v44 = vld [vmem:[%s8781_s3 + $0x8] sm:$0xff]  ;;  %v482_v60 = vld [vmem:[%s8788_s9 + $0x10] sm:$0xff]  ;;  %v486_v36 = vld [vmem:[%s8797_s22] sm:$0xff] }
 0x62b   :  { %v8734_v23 = vpop.eup %7634  ;;  %7648 = vpow2.f32 %v857_v46  ;;  %v480_v46 = vld [vmem:[%s8788_s9] sm:$0xff] }
 0x62c   :  { %1253 = vadd.xlane.f32.xlu1 %v8728_v54  ;;  %v859_v22 = vmul.f32 1.442695, %v842_v6  ;;  %v8736_v61 = vpop.eup %7636  ;;  %v7042_v7 = vpop.f32.mrf.mxu0  ;;  %v483_v6 = vld [vmem:[%s8788_s9 + $0x18] sm:$0xff] }
 0x62d   :  { %897 = vadd.xlane.f32.xlu0 %v8730_v1  ;;  %v6489_v7 = vld [vmem:[%s8340_s21 + $0x18] sm:$0xff] }
 0x62e   :  { %7650 = vpow2.f32 %v859_v22  ;;  %v481_v22 = vld [vmem:[%s8788_s9 + $0x8] sm:$0xff] }
 0x62f   :  { %v8740_v24 = vpop.eup %7638 }
 0x630   :  { %899 = vadd.xlane.f32.xlu1 %v8734_v23  ;;  %v8742_v47 = vpop.eup %7640 }
 0x631   :  { %1247 = vadd.xlane.f32.xlu0 %v8736_v61 }
 0x633   :  { %v8746_v53 = vpop.eup %7642 }
 0x634   :  { %1249 = vadd.xlane.f32.xlu1 %v8740_v24  ;;  %v8748_v15 = vpop.eup %7644 }
 0x635   :  { %893 = vadd.xlane.f32.xlu0 %v8742_v47 }
 0x637   :  { %v8752_v55 = vpop.eup %7646 }
 0x638   :  { %895 = vadd.xlane.f32.xlu1 %v8746_v53  ;;  %v8754_v4 = vpop.eup %7648 }
 0x639   :  { %1243 = vadd.xlane.f32.xlu0 %v8748_v15 }
 0x63b   :  { %v8758_v27 = vpop.eup %7650 }
 0x63c   :  { %1245 = vadd.xlane.f32.xlu1 %v8752_v55 }
 0x63d   :  { %889 = vadd.xlane.f32.xlu0 %v8754_v4 }
 0x640   :  { %891 = vadd.xlane.f32.xlu1 %v8758_v27 }
 0x651   :  { %559 = vperm.xlu1 %7538, %v464_v25   ;;  %v487_v25 = vld [vmem:[%s8797_s22 + $0x8] sm:$0xff] }
 0x653   :  { %564 = vperm.xlu0 %7537, %v465_v14   ;;  %v6488_v14 = vld [vmem:[%s8340_s21 + $0x10] sm:$0xff] }
 0x655   :  { %1462 = vperm.xlu1 %7538, %v470_v48   ;;  %v6490_v48 = vld [vmem:[%s8345_s26 + $0x10] sm:$0xff] }
 0x657   :  { %1467 = vperm.xlu0 %7537, %v471_v62   ;;  %v6491_v62 = vld [vmem:[%s8345_s26 + $0x18] sm:$0xff] }
 0x659   :  { %1500 = vperm.xlu1 %7538, %v472_v18   ;;  %v6498_v18 = vld [vmem:[%s8351_s30 + $0x30] sm:$0xff] }
 0x65b   :  { %1505 = vperm.xlu0 %7537, %v473_v29   ;;  %v6499_v29 = vld [vmem:[%s8351_s30 + $0x38] sm:$0xff] }
 0x65d   :  { %1512 = vperm.xlu1 %7538, %v474_v45   ;;  %v6500_v45 = vld [vmem:[%s8351_s30 + $0x40] sm:$0xff] }
 0x65f   :  { %1517 = vperm.xlu0 %7537, %v475_v44   ;;  %v6501_v44 = vld [vmem:[%s8351_s30 + $0x48] sm:$0xff] }
 0x661   :  { %1535 = vperm.xlu1 %7538, %v482_v60  }
 0x663   :  { %1540 = vperm.xlu0 %7537, %v483_v6  }
 0x665   :  { %1525 = vperm.xlu1 %7538, %v480_v46  }
 0x667   :  { %1530 = vperm.xlu0 %7537, %v481_v22  }
 0x669   :  { %1716 = vperm.xlu1 %7538, %v486_v36  }
 0x66b   :  { %1721 = vperm.xlu0 %7537, %v487_v25  }
 0x66d   :  { %1852 = vperm.xlu1 %7538, %v6488_v14  }
 0x66f   :  { %1857 = vperm.xlu0 %7537, %v6489_v7  }
 0x671   :  { %1864 = vperm.xlu1 %7538, %v6490_v48  }
 0x673   :  { %1869 = vperm.xlu0 %7537, %v6491_v62  }
 0x675   :  { %1877 = vperm.xlu1 %7538, %v6498_v18  }
 0x677   :  { %1882 = vperm.xlu0 %7537, %v6499_v29  }
 0x679   :  { %1887 = vperm.xlu1 %7538, %v6500_v45  }
 0x67b   :  { %1892 = vperm.xlu0 %7537, %v6501_v44  }
 0x689   :  { %v918_v60 = vpop.xlane.xlu0 %917 }
 0x68a   :  { %7652 = vrcp.f32 %v918_v60 }
 0x68d   :  { %v920_v6 = vpop.xlane.xlu1 %919  ;;  %v1272_v46 = vpop.xlane.xlu0 %1271 }
 0x68e   :  { %7654 = vrcp.f32 %v920_v6 }
 0x68f   :  { %7656 = vrcp.f32 %v1272_v46 }
 0x691   :  { %v1274_v22 = vpop.xlane.xlu1 %1273  ;;  %v914_v36 = vpop.xlane.xlu0 %913 }
 0x692   :  { %7658 = vrcp.f32 %v1274_v22 }
 0x693   :  { %7660 = vrcp.f32 %v914_v36 }
 0x695   :  { %v916_v25 = vpop.xlane.xlu1 %915 }
 0x696   :  { %7662 = vrcp.f32 %v916_v25  ;;  %v1268_v14 = vpop.xlane.xlu0 %1267 }
 0x697   :  { %7664 = vrcp.f32 %v1268_v14  ;;  %v7653_v7 = vpop.eup %7652 }
 0x698   :  { %v951_v29 = vmul.f32 %v7653_v7, %v8643_v11 }
 0x699   :  { %v1270_v48 = vpop.xlane.xlu1 %1269 }
 0x69a   :  { %7666 = vrcp.f32 %v1270_v48  ;;  %v1264_v62 = vpop.xlane.xlu0 %1263 }
 0x69b   :  { %v7655_v18 = vpop.eup %7654 }
 0x69c   :  { %v952_v45 = vmul.f32 %v7655_v18, %v8650_v12  ;;  %v7657_v44 = vpop.eup %7656 }
 0x69d   :  { %v1266_v60 = vpop.xlane.xlu1 %1265  ;;  %v1305_v36 = vmul.f32 %v7657_v44, %v8647_v10 }
 0x69e   :  { %7668 = vrcp.f32 %v1266_v60  ;;  %v910_v6 = vpop.xlane.xlu0 %909  ;;  %v960_v46 = vpack.c.bf16 %v952_v45, %v951_v29 }
 0x69f   :  { %v7659_v22 = vpop.eup %7658  ;;  %7670 = vrcp.f32 %v1264_v62 }
 0x6a0   :  { %7672 = vrcp.f32 %v910_v6  ;;  %7062 = vmatpush3.bf16.xpose.msra.mxu0 %v960_v46  ;;  %v1306_v25 = vmul.f32 %v7659_v22, %v8656_v5  ;;  %v7661_v14 = vpop.eup %7660 }
 0x6a1   :  { %v912_v48 = vpop.xlane.xlu1 %911  ;;  %7063 = vmatprep.subr.bf16.mxu0 %v10673_v0  ;;  %v949_v18 = vmul.f32 %v7661_v14, %v8659_v26 }
 0x6a2   :  { %7674 = vrcp.f32 %v912_v48  ;;  %v1260_v11 = vpop.xlane.xlu0 %1259  ;;  %v1314_v12 = vpack.c.bf16 %v1306_v25, %v1305_v36 }
 0x6a3   :  { %v7663_v7 = vpop.eup %7662 }
 0x6a4   :  { %7100 = vmatpush3.bf16.xpose.msra.mxu1 %v1314_v12  ;;  %v950_v29 = vmul.f32 %v7663_v7, %v8664_v9  ;;  %v7665_v62 = vpop.eup %7664 }
 0x6a5   :  { %v1262_v45 = vpop.xlane.xlu1 %1261  ;;  %7101 = vmatprep.subr.bf16.mxu1 %v10673_v0  ;;  %v1303_v60 = vmul.f32 %v7665_v62, %v8667_v28 }
 0x6a6   :  { %7676 = vrcp.f32 %v1262_v45  ;;  %v906_v10 = vpop.xlane.xlu0 %905  ;;  %v959_v5 = vpack.c.bf16 %v950_v29, %v949_v18 }
 0x6a7   :  { %v7667_v44 = vpop.eup %7666  ;;  %7678 = vrcp.f32 %v1260_v11 }
 0x6a8   :  { %7680 = vrcp.f32 %v906_v10  ;;  %7064 = vmatpush3.bf16.xpose.msra.mxu0 %v959_v5  ;;  %v1304_v6 = vmul.f32 %v7667_v44, %v8672_v3 }
 0x6a9   :  { %v908_v46 = vpop.xlane.xlu1 %907  ;;  %7065 = vmatprep.subr.bf16.mxu0 %v10673_v0 }
 0x6aa   :  { %7682 = vrcp.f32 %v908_v46  ;;  %v1256_v26 = vpop.xlane.xlu0 %1255  ;;  %v1313_v9 = vpack.c.bf16 %v1304_v6, %v1303_v60 }
 0x6ab   :  { %v7669_v22 = vpop.eup %7668 }
 0x6ac   :  { %v7671_v36 = vpop.eup %7670  ;;  %7102 = vmatpush3.bf16.xpose.msra.mxu1 %v1313_v9  ;;  %v1302_v11 = vmul.f32 %v7669_v22, %v8680_v63 }
 0x6ad   :  { %v7673_v25 = vpop.eup %7672  ;;  %v1258_v14 = vpop.xlane.xlu1 %1257  ;;  %7103 = vmatprep.subr.bf16.mxu1 %v10673_v0  ;;  %v1301_v7 = vmul.f32 %v7671_v36, %v8675_v17 }
 0x6ae   :  { %7684 = vrcp.f32 %v1258_v14  ;;  %v902_v48 = vpop.xlane.xlu0 %901  ;;  %v947_v3 = vmul.f32 %v7673_v25, %v8683_v39 }
 0x6af   :  { %v7675_v28 = vpop.eup %7674  ;;  %7686 = vrcp.f32 %v1256_v26  ;;  %v1312_v45 = vpack.c.bf16 %v1302_v11, %v1301_v7 }
 0x6b0   :  { %7688 = vrcp.f32 %v902_v48  ;;  %v948_v12 = vmul.f32 %v7675_v28, %v8688_v41 }
 0x6b1   :  { %v904_v18 = vpop.xlane.xlu1 %903 }
 0x6b2   :  { %7690 = vrcp.f32 %v904_v18  ;;  %v1252_v29 = vpop.xlane.xlu0 %1251  ;;  %v958_v62 = vpack.c.bf16 %v948_v12, %v947_v3 }
 0x6b3   :  { %v7677_v10 = vpop.eup %7676 }
 0x6b4   :  { %v7679_v5 = vpop.eup %7678  ;;  %7066 = vmatpush3.bf16.xpose.msra.mxu0 %v958_v62  ;;  %7104 = vmatpush3.bf16.xpose.msra.mxu1 %v1312_v45  ;;  %v1300_v41 = vmul.f32 %v7677_v10, %v8696_v58 }
 0x6b5   :  { %v7681_v44 = vpop.eup %7680  ;;  %v1254_v63 = vpop.xlane.xlu1 %1253  ;;  %7067 = vmatprep.subr.bf16.mxu0 %v10673_v0  ;;  %7105 = vmatprep.subr.bf16.mxu1 %v10673_v0  ;;  %v1299_v46 = vmul.f32 %v7679_v5, %v8691_v56 }
 0x6b6   :  { %7692 = vrcp.f32 %v1254_v63  ;;  %v898_v39 = vpop.xlane.xlu0 %897  ;;  %v945_v60 = vmul.f32 %v7681_v44, %v8699_v32 }
 0x6b7   :  { %v7683_v17 = vpop.eup %7682  ;;  %7694 = vrcp.f32 %v1252_v29  ;;  %v1311_v36 = vpack.c.bf16 %v1300_v41, %v1299_v46 }
 0x6b8   :  { %7696 = vrcp.f32 %v898_v39  ;;  %v946_v6 = vmul.f32 %v7683_v17, %v8704_v57 }
 0x6b9   :  { %v900_v26 = vpop.xlane.xlu1 %899 }
 0x6ba   :  { %7698 = vrcp.f32 %v900_v26  ;;  %v1248_v9 = vpop.xlane.xlu0 %1247  ;;  %v957_v22 = vpack.c.bf16 %v946_v6, %v945_v60 }
 0x6bb   :  { %v7685_v25 = vpop.eup %7684 }
 0x6bc   :  { %v7687_v14 = vpop.eup %7686  ;;  %7068 = vmatpush3.bf16.xpose.msra.mxu0 %v957_v22  ;;  %7106 = vmatpush3.bf16.xpose.msra.mxu1 %v1311_v36  ;;  %v1298_v57 = vmul.f32 %v7685_v25, %v8712_v59 }
 0x6bd   :  { %v7689_v48 = vpop.eup %7688  ;;  %v1250_v58 = vpop.xlane.xlu1 %1249  ;;  %7069 = vmatprep.subr.bf16.mxu0 %v10673_v0  ;;  %7107 = vmatprep.subr.bf16.mxu1 %v10673_v0  ;;  %v1297_v3 = vmul.f32 %v7687_v14, %v8707_v34 }
 0x6be   :  { %7700 = vrcp.f32 %v1250_v58  ;;  %v894_v32 = vpop.xlane.xlu0 %893  ;;  %v943_v11 = vmul.f32 %v7689_v48, %v8715_v33 }
 0x6bf   :  { %v7691_v56 = vpop.eup %7690  ;;  %7702 = vrcp.f32 %v1248_v9  ;;  %v1310_v29 = vpack.c.bf16 %v1298_v57, %v1297_v3 }
 0x6c0   :  { %7704 = vrcp.f32 %v894_v32  ;;  %v944_v28 = vmul.f32 %v7691_v56, %v8720_v35 }
 0x6c1   :  { %v896_v12 = vpop.xlane.xlu1 %895 }
 0x6c2   :  { %7706 = vrcp.f32 %v896_v12  ;;  %v1244_v7 = vpop.xlane.xlu0 %1243  ;;  %v956_v18 = vpack.c.bf16 %v944_v28, %v943_v11 }
 0x6c3   :  { %v7693_v62 = vpop.eup %7692 }
 0x6c4   :  { %v7695_v45 = vpop.eup %7694  ;;  %7070 = vmatpush3.bf16.xpose.msra.mxu0 %v956_v18  ;;  %7108 = vmatpush3.bf16.xpose.msra.mxu1 %v1310_v29  ;;  %v1296_v35 = vmul.f32 %v7693_v62, %v8728_v54  ;;  %v7546_v18 = vld [vmem:[%s8866_s29 + $0x8] sm:$0xff]  }
 0x6c5   :  { %v7697_v10 = vpop.eup %7696  ;;  %v1246_v59 = vpop.xlane.xlu1 %1245  ;;  %7071 = vmatprep.subr.bf16.mxu0 %v10673_v0  ;;  %7109 = vmatprep.subr.bf16.mxu1 %v10673_v0  ;;  %v1295_v63 = vmul.f32 %v7695_v45, %v8723_v19 }
 0x6c6   :  { %7708 = vrcp.f32 %v1246_v59  ;;  %v890_v33 = vpop.xlane.xlu0 %889  ;;  %v941_v5 = vmul.f32 %v7697_v10, %v8730_v1 }
 0x6c7   :  { %v7699_v34 = vpop.eup %7698  ;;  %7710 = vrcp.f32 %v1244_v7  ;;  %v1309_v17 = vpack.c.bf16 %v1296_v35, %v1295_v63  ;;  %v7548_v35 = vld [vmem:[%s8880_s8] sm:$0xff]  }
 0x6c8   :  { %7712 = vrcp.f32 %v890_v33  ;;  %v942_v44 = vmul.f32 %v7699_v34, %v8734_v23  ;;  %v7547_v33 = vld [vmem:[%s8866_s29] sm:$0xff]  }
 0x6c9   :  { %v892_v39 = vpop.xlane.xlu1 %891 }
 0x6ca   :  { %7714 = vrcp.f32 %v892_v39  ;;  %v955_v41 = vpack.c.bf16 %v942_v44, %v941_v5 }
 0x6cb   :  { %v7701_v60 = vpop.eup %7700 }
 0x6cc   :  { %v7703_v6 = vpop.eup %7702  ;;  %7072 = vmatpush3.bf16.xpose.msra.mxu0 %v955_v41  ;;  %7110 = vmatpush3.bf16.xpose.msra.mxu1 %v1309_v17  ;;  %v1294_v54 = vmul.f32 %v7701_v60, %v8740_v24 }
 0x6cd   :  { %v7705_v46 = vpop.eup %7704  ;;  %7073 = vmatprep.subr.bf16.mxu0 %v10673_v0  ;;  %7111 = vmatprep.subr.bf16.mxu1 %v10673_v0  ;;  %v1293_v26 = vmul.f32 %v7703_v6, %v8736_v61  ;;  %v560_v58 = vpop.permute.xlu1 %559 }
 0x6ce   :  { %v939_v23 = vmul.f32 %v7705_v46, %v8742_v47  ;;  %v565_v32 = vpop.permute.xlu0 %564  ;;  %v642_v11 = vadd.f32 %v8766_v40, %v560_v58 }
 0x6cf   :  { %v7707_v1 = vpop.eup %7706  ;;  %v1308_v22 = vpack.c.bf16 %v1294_v54, %v1293_v26  ;;  %v645_v28 = vadd.f32 %v8774_v8, %v565_v32 }
 0x6d0   :  { %v940_v19 = vmul.f32 %v7707_v1, %v8746_v53 }
 0x6d1   :  { %v1005_v3 = vpack.c.bf16 %v645_v28, %v645_v28  ;;  %v1463_v60 = vpop.permute.xlu1 %1462 }
 0x6d2   :  { %v954_v9 = vpack.c.bf16 %v940_v19, %v939_v23  ;;  %v1468_v1 = vpop.permute.xlu0 %1467 }
 0x6d3   :  { %v7709_v36 = vpop.eup %7708 }
 0x6d4   :  { %v7711_v25 = vpop.eup %7710  ;;  %7074 = vmatpush3.bf16.xpose.msra.mxu0 %v954_v9  ;;  %7112 = vmatpush3.bf16.xpose.msra.mxu1 %v1308_v22  ;;  %v1292_v24 = vmul.f32 %v7709_v36, %v8752_v55  ;;  %v651_v55 = vpack.c.bf16 %v642_v11, %v642_v11 }
 0x6d5   :  { %v7713_v14 = vpop.eup %7712  ;;  %7075 = vmatprep.subr.bf16.mxu0 %v10673_v0  ;;  %7113 = vmatprep.subr.bf16.mxu1 %v10673_v0  ;;  %v1291_v61 = vmul.f32 %v7711_v25, %v8748_v15 }
 0x6d6   :  { %v937_v47 = vmul.f32 %v7713_v14, %v8754_v4 }
 0x6d7   :  { %v7715_v48 = vpop.eup %7714  ;;  %v1307_v56 = vpack.c.bf16 %v1292_v24, %v1291_v61 }
 0x6d8   :  { %v938_v53 = vmul.f32 %v7715_v48, %v8758_v27 }
 0x6da   :  { %v953_v57 = vpack.c.bf16 %v938_v53, %v937_v47 }
 0x6dc   :  { %7076 = vmatpush3.bf16.xpose.msra.mxu0 %v953_v57  ;;  %7114 = vmatpush3.bf16.xpose.msra.mxu1 %v1307_v56 }
 0x6dd   :  { %7119 = vmatprep.subr.bf16.mxu0 %v10673_v0 }
 0x6e3   :  { %7078 = vmatmul.mubr.bf16.vlgmr.msra.gmra.mxu0 %v651_v55  ;;  %7116 = vmatmul.mubr.bf16.vlgmr.msra.gmra.mxu1 %v1005_v3 }
 0x6e4   :  { %7121 = vmatprep.mubr.msk.bf16.mxu0 %vm8194_vm0, %v10673_v0 }
 0x7a3   :  { %v995_v15 = vpop.f32.mrf.mxu0  ;;  %v1349_v4 = vpop.f32.mrf.mxu1 }
 0x7a4   :  { %v1355_v27 = vpack.c.bf16 %v1349_v4, %v1349_v4  ;;  %v1001_v12 = vpack.c.bf16 %v995_v15, %v995_v15 }
 0x7a5   :  { %v7079_v40 = vpop.f32.mrf.mxu0  ;;  %v7117_v8 = vpop.f32.mrf.mxu1 }
 0x7a6   :  { %v1365_v7 = vsel %vm215_vm1, %v1355_v27, 0  ;;  %v1417_v59 = vsel %vm215_vm1, %v1001_v12, 0  ;;  %v1501_v8 = vpop.permute.xlu1 %1500  ;;  %v1506_v12 = vpop.permute.xlu0 %1505 }
 0x7a7   :  { %v998_v29 = vpop.f32.mrf.mxu0  ;;  %v1352_v62 = vpop.f32.mrf.mxu1  ;;  %7120 = vmatpush3.bf16.msra.mxu0 %v1365_v7 }
 0x7a8   :  { %7125 = vmatprep.subr.bf16.mxu0 %v10673_v0 }
 0x7a9   :  { %v7080_v45 = vpop.f32.mrf.mxu0  ;;  %v7118_v10 = vpop.f32.mrf.mxu1 }
 0x7aa   :  { %7122 = vmatmul.mubr.msk.bf16.vlgmr.msra.gmra.mxu0 %vm684_vm6, %v7546_v18  ;;  %v1513_v10 = vpop.permute.xlu1 %1512 }
 0x7ab   :  { %7126 = vmatpush3.bf16.msra.mxu0 %v1417_v59  ;;  %7127 = vmatprep.mubr.msk.bf16.mxu0 %vm8194_vm0, %v10673_v0  ;;  %v1518_v59 = vpop.permute.xlu0 %1517 }
 0x7b2   :  { %7128 = vmatmul.mubr.msk.bf16.vlgmr.msra.gmra.mxu0 %vm684_vm6, %v7547_v33 }
 0x7b3   :  { %7133 = vmatprep.mubr.msk.bf16.mxu0 %vm348_vm5, %v7548_v35 }
 0x86a   :  { %v1401_v34 = vpop.f32.mrf.mxu0 }
 0x86c   :  { %v7123_v5 = vpop.f32.mrf.mxu0 }
 0x86d   :  { %v7549_v5 = vld [vmem:[%s8880_s8 + $0x8] sm:$0xff]  }
 0x86e   :  { %v1404_v44 = vpop.f32.mrf.mxu0 }
 0x870   :  { %v7124_v63 = vpop.f32.mrf.mxu0 }
 0x872   :  { %v1453_v39 = vpop.f32.mrf.mxu0 }
 0x873   :  { %v1454_v41 = vadd.f32 %v1453_v39, %v1401_v34  ;;  %v1541_v39 = vpop.permute.xlu0 %1540 }
 0x874   :  { %v7129_v17 = vpop.f32.mrf.mxu0 }
 0x875   :  { %v1470_v46 = vadd.f32 %v1463_v60, %v1454_v41 }
 0x876   :  { %v1456_v6 = vpop.f32.mrf.mxu0 }
 0x877   :  { %v1457_v54 = vadd.f32 %v1456_v6, %v1404_v44  ;;  %v8885_v26 = vadd.f32 %v1470_v46, %v8404_v51  ;;  %v1536_v44 = vpop.permute.xlu1 %1535 }
 0x878   :  { %v7130_v23 = vpop.f32.mrf.mxu0 }
 0x879   :  { %v1471_v19 = vadd.f32 %v1468_v1, %v1457_v54 }
 0x87b   :  { %v8888_v9 = vadd.f32 %v1471_v19, %v8407_v52  ;;  %v1526_v17 = vpop.permute.xlu1 %1525 }
 0x87d   :  { %v1474_v22 = vadd.f32 %v8888_v9, %v8885_v26 }
 0x87f   :  { %v1475_v36 = vrot.slane %v1474_v22, 4 }
 0x881   :  { %v1476_v25 = vadd.f32 %v1475_v36, %v1474_v22  ;;  %v1531_v36 = vpop.permute.xlu0 %1530 }
 0x883   :  { %v1477_v14 = vrot.slane %v1476_v25, 2 }
 0x885   :  { %v1478_v24 = vadd.f32 %v1477_v14, %v1476_v25 }
 0x887   :  { %v1479_v48 = vrot.slane %v1478_v24, 1 }
 0x889   :  { %v1480_v47 = vadd.f32 %v1479_v48, %v1478_v24 }
 0x88b   :  { %v1481_v53 = vmul.f32 0.0625, %v1480_v47 }
 0x88d   :  { %v1483_v61 = vsub.f32 %v8888_v9, %v1481_v53  ;;  %v1482_v58 = vsub.f32 %v8885_v26, %v1481_v53 }
 0x88f   :  { %v1485_v32 = vmul.f32 %v1483_v61, %v1483_v61  ;;  %v1484_v57 = vmul.f32 %v1482_v58, %v1482_v58 }
 0x891   :  { %v1486_v56 = vadd.f32 %v1485_v32, %v1484_v57 }
 0x893   :  { %v1487_v11 = vrot.slane %v1486_v56, 4 }
 0x895   :  { %v1488_v28 = vadd.f32 %v1487_v11, %v1486_v56 }
 0x897   :  { %v1489_v55 = vrot.slane %v1488_v28, 2 }
 0x899   :  { %v1490_v3 = vadd.f32 %v1489_v55, %v1488_v28 }
 0x89b   :  { %v1491_v15 = vrot.slane %v1490_v3, 1 }
 0x89d   :  { %v1492_v4 = vadd.f32 %v1491_v15, %v1490_v3 }
 0x89f   :  { %v1493_v27 = vmul.f32 0.0625, %v1492_v4 }
 0x8a1   :  { %v1494_v40 = vadd.f32 1e-05, %v1493_v27 }
 0x8a3   :  { %7716 = vrsqrt.f32 %v1494_v40 }
 0x8b0   :  { %v7717_v7 = vpop.eup %7716 }
 0x8b1   :  { %v1496_v18 = vmul.f32 %v7717_v7, %v1482_v58  ;;  %v1497_v29 = vmul.f32 %v7717_v7, %v1483_v61 }
 0x8b3   :  { %v1508_v62 = vmul.f32 %v1501_v8, %v1496_v18  ;;  %v1509_v45 = vmul.f32 %v1506_v12, %v1497_v29 }
 0x8b5   :  { %v1520_v33 = vadd.f32 %v1513_v10, %v1508_v62  ;;  %v1521_v35 = vadd.f32 %v1518_v59, %v1509_v45 }
 0x8b7   :  { %v1522_v34 = vpack.c.bf16 %v1521_v35, %v1520_v33 }
 0x8b9   :  { %7131 = vmatprep.subr.bf16.mxu0 %v1522_v34 }
 0x8ba   :  { %7132 = vmatpush3.bf16.msra.mxu0 %v1522_v34 }
 0x8bb   :  { %7137 = vmatprep.subr.bf16.mxu0 %v10673_v0 }
 0x8bd   :  { %7134 = vmatmul.mubr.msk.bf16.vlgmr.msra.gmra.mxu0 %vm348_vm5, %v7549_v5 }
 0x8be   :  { %7141 = vmatprep.mubr.msk.bf16.mxu0 %vm8194_vm0, %v10673_v0 }
 0x97d   :  { %v7135_v63 = vpop.f32.mrf.mxu0 }
 0x97e   :  { %v8904_v41 = vadd.f32 %v7135_v63, %v1536_v44 }
 0x97f   :  { %v1593_v60 = vpop.f32.mrf.mxu0 }
 0x980   :  { %v8907_v6 = vmul.f32 0.70710677, %v8904_v41  ;;  %v8909_v46 = vadd.f32 %v1593_v60, %v1526_v17 }
 0x981   :  { %v7136_v54 = vpop.f32.mrf.mxu0 }
 0x982   :  { %v1618_v1 = vand.u32 2147483647, %v8907_v6  ;;  %v8913_v23 = vmul.f32 0.70710677, %v8909_v46  ;;  %v8915_v19 = vadd.f32 %v7136_v54, %v1541_v39  ;;  %vm1694_vm7 = vcmp.lt.f32.partialorder %v8907_v6, 0.0 }
 0x983   :  { %v1596_v22 = vpop.f32.mrf.mxu0 }
 0x984   :  { %v1622_v25 = vmul.f32 0.3275911, %v1618_v1  ;;  %v1616_v14 = vand.u32 2147483647, %v8913_v23  ;;  %v8919_v24 = vmul.f32 0.70710677, %v8915_v19  ;;  %v8921_v48 = vadd.f32 %v1596_v22, %v1531_v36 }
 0x985   :  { %v1670_v3 = vsub.f32 0.0, %v1618_v1  ;;  %vm1692_vm8 = vcmp.lt.f32.partialorder %v8913_v23, 0.0 }
 0x986   :  { %v1626_v47 = vadd.f32 1.0, %v1622_v25  ;;  %v1620_v53 = vmul.f32 0.3275911, %v1616_v14  ;;  %v1619_v61 = vand.u32 2147483647, %v8919_v24  ;;  %v1668_v15 = vsub.f32 0.0, %v1616_v14 }
 0x987   :  { %v8925_v58 = vmul.f32 0.70710677, %v8921_v48  ;;  %v1674_v4 = vmul.f32 %v1670_v3, %v1618_v1  ;;  %vm1695_vm9 = vcmp.lt.f32.partialorder %v8919_v24, 0.0  ;;  %v1609_v23 = vmul.f32 0.5, %v8921_v48 }
 0x988   :  { %7718 = vrcp.f32 %v1626_v47  ;;  %v1624_v32 = vadd.f32 1.0, %v1620_v53  ;;  %v1623_v57 = vmul.f32 0.3275911, %v1619_v61  ;;  %v1671_v27 = vsub.f32 0.0, %v1619_v61 }
 0x989   :  { %v1617_v56 = vand.u32 2147483647, %v8925_v58  ;;  %v1672_v8 = vmul.f32 %v1668_v15, %v1616_v14  ;;  %v1680_v7 = vmul.f32 1.442695, %v1674_v4  ;;  %vm1693_vm10 = vcmp.lt.f32.partialorder %v8925_v58, 0.0  ;;  %v1717_v58 = vpop.permute.xlu1 %1716 }
 0x98a   :  { %7720 = vrcp.f32 %v1624_v32  ;;  %v1627_v11 = vadd.f32 1.0, %v1623_v57  ;;  %v1675_v29 = vmul.f32 %v1671_v27, %v1619_v61  ;;  %v1608_v24 = vmul.f32 0.5, %v8909_v46 }
 0x98b   :  { %v1621_v28 = vmul.f32 0.3275911, %v1617_v56  ;;  %v1669_v18 = vsub.f32 0.0, %v1617_v56  ;;  %v1676_v59 = vmul.f32 1.442695, %v1672_v8 }
 0x98c   :  { %7722 = vrcp.f32 %v1627_v11  ;;  %v1682_v63 = vmul.f32 1.442695, %v1675_v29 }
 0x98d   :  { %v1625_v55 = vadd.f32 1.0, %v1621_v28  ;;  %v1673_v34 = vmul.f32 %v1669_v18, %v1617_v56 }
 0x98f   :  { %7724 = vrcp.f32 %v1625_v55  ;;  %v1678_v36 = vmul.f32 1.442695, %v1673_v34 }
 0x990   :  { %7726 = vpow2.f32 %v1680_v7 }
 0x991   :  { %7728 = vpow2.f32 %v1676_v59 }
 0x992   :  { %7730 = vpow2.f32 %v1682_v63 }
 0x993   :  { %7732 = vpow2.f32 %v1678_v36 }
 0x995   :  { %v7719_v40 = vpop.eup %7718 }
 0x996   :  { %v1634_v12 = vmul.f32 1.0614054, %v7719_v40 }
 0x997   :  { %v7721_v62 = vpop.eup %7720 }
 0x998   :  { %v1638_v45 = vadd.f32 -1.4531521, %v1634_v12  ;;  %v1632_v10 = vmul.f32 1.0614054, %v7721_v62 }
 0x999   :  { %v7723_v33 = vpop.eup %7722 }
 0x99a   :  { %v1642_v35 = vmul.f32 %v7719_v40, %v1638_v45  ;;  %v1636_v5 = vadd.f32 -1.4531521, %v1632_v10  ;;  %v1635_v44 = vmul.f32 1.0614054, %v7723_v33 }
 0x99c   :  { %v1646_v39 = vadd.f32 1.4214138, %v1642_v35  ;;  %v7725_v17 = vpop.eup %7724  ;;  %v1640_v60 = vmul.f32 %v7721_v62, %v1636_v5  ;;  %v1639_v54 = vadd.f32 -1.4531521, %v1635_v44 }
 0x99d   :  { %v1633_v22 = vmul.f32 1.0614054, %v7725_v17  ;;  %v7727_v12 = vpop.eup %7726 }
 0x99e   :  { %v1650_v1 = vmul.f32 %v7719_v40, %v1646_v39  ;;  %v1644_v25 = vadd.f32 1.4214138, %v1640_v60  ;;  %v1643_v14 = vmul.f32 %v7723_v33, %v1639_v54  ;;  %v7729_v35 = vpop.eup %7728 }
 0x99f   :  { %v1637_v53 = vadd.f32 -1.4531521, %v1633_v22  ;;  %v7731_v39 = vpop.eup %7730 }
 0x9a0   :  { %v1654_v47 = vadd.f32 -0.28449672, %v1650_v1  ;;  %v1648_v61 = vmul.f32 %v7721_v62, %v1644_v25  ;;  %v1647_v32 = vadd.f32 1.4214138, %v1643_v14  ;;  %v7733_v36 = vpop.eup %7732 }
 0x9a1   :  { %v1641_v56 = vmul.f32 %v7725_v17, %v1637_v53 }
 0x9a2   :  { %v1658_v57 = vmul.f32 %v7719_v40, %v1654_v47  ;;  %v1652_v11 = vadd.f32 -0.28449672, %v1648_v61  ;;  %v1651_v28 = vmul.f32 %v7723_v33, %v1647_v32 }
 0x9a3   :  { %v1645_v3 = vadd.f32 1.4214138, %v1641_v56  ;;  %v1610_v56 = vmul.f32 0.5, %v8904_v41 }
 0x9a4   :  { %v1662_v55 = vadd.f32 0.2548296, %v1658_v57  ;;  %v1656_v15 = vmul.f32 %v7721_v62, %v1652_v11  ;;  %v1655_v4 = vadd.f32 -0.28449672, %v1651_v28  ;;  %v1611_v11 = vmul.f32 0.5, %v8915_v19  ;;  %v7550_v19 = vld [vmem:[%s8902_s23] sm:$0xff]  }
 0x9a5   :  { %v1649_v8 = vmul.f32 %v7725_v17, %v1645_v3 }
 0x9a6   :  { %v1666_v27 = vmul.f32 %v7719_v40, %v1662_v55  ;;  %v1660_v7 = vadd.f32 0.2548296, %v1656_v15  ;;  %v1659_v18 = vmul.f32 %v7723_v33, %v1655_v4 }
 0x9a7   :  { %v1653_v45 = vadd.f32 -0.28449672, %v1649_v8 }
 0x9a8   :  { %v1686_v29 = vmul.f32 %v7727_v12, %v1666_v27  ;;  %v1664_v10 = vmul.f32 %v7721_v62, %v1660_v7  ;;  %v1663_v59 = vadd.f32 0.2548296, %v1659_v18  ;;  %v1722_v18 = vpop.permute.xlu0 %1721 }
 0x9a9   :  { %v1657_v5 = vmul.f32 %v7725_v17, %v1653_v45 }
 0x9aa   :  { %v1690_v34 = vsub.f32 1.0, %v1686_v29  ;;  %v1684_v44 = vmul.f32 %v7729_v35, %v1664_v10  ;;  %v1667_v63 = vmul.f32 %v7723_v33, %v1663_v59 }
 0x9ab   :  { %v1661_v54 = vadd.f32 0.2548296, %v1657_v5 }
 0x9ac   :  { %v1698_v60 = vsub.f32 0.0, %v1690_v34  ;;  %v1688_v1 = vsub.f32 1.0, %v1684_v44  ;;  %v1687_v22 = vmul.f32 %v7731_v39, %v1667_v63 }
 0x9ad   :  { %v1665_v40 = vmul.f32 %v7725_v17, %v1661_v54 }
 0x9ae   :  { %v1702_v25 = vsel %vm1694_vm7, %v1698_v60, %v1690_v34  ;;  %v1696_v14 = vsub.f32 0.0, %v1688_v1  ;;  %v1691_v47 = vsub.f32 1.0, %v1687_v22 }
 0x9af   :  { %v1685_v53 = vmul.f32 %v7733_v36, %v1665_v40  ;;  %v1706_v61 = vadd.f32 1.0, %v1702_v25 }
 0x9b0   :  { %v1699_v62 = vsub.f32 0.0, %v1691_v47  ;;  %v1700_v32 = vsel %vm1692_vm8, %v1696_v14, %v1688_v1 }
 0x9b1   :  { %v1689_v33 = vsub.f32 1.0, %v1685_v53  ;;  %v1710_v28 = vmul.f32 %v1706_v61, %v1610_v56  ;;  %v1704_v55 = vadd.f32 1.0, %v1700_v32  ;;  %v1858_v56 = vpop.permute.xlu0 %1857 }
 0x9b2   :  { %v1703_v57 = vsel %vm1695_vm9, %v1699_v62, %v1691_v47 }
 0x9b3   :  { %v1707_v6 = vadd.f32 1.0, %v1703_v57  ;;  %v1697_v17 = vsub.f32 0.0, %v1689_v33  ;;  %v1708_v12 = vmul.f32 %v1704_v55, %v1608_v24  ;;  %v1853_v57 = vpop.permute.xlu1 %1852 }
 0x9b5   :  { %v1711_v3 = vmul.f32 %v1707_v6, %v1611_v11  ;;  %v1701_v15 = vsel %vm1693_vm10, %v1697_v17, %v1689_v33 }
 0x9b6   :  { %v1705_v4 = vadd.f32 1.0, %v1701_v15  ;;  %v1870_v15 = vpop.permute.xlu0 %1869 }
 0x9b7   :  { %v1713_v27 = vpack.c.bf16 %v1711_v3, %v1710_v28  ;;  %v1865_v3 = vpop.permute.xlu1 %1864 }
 0x9b8   :  { %v1709_v8 = vmul.f32 %v1705_v4, %v1609_v23 }
 0x9b9   :  { %7138 = vmatpush3.bf16.msra.mxu0 %v1713_v27  ;;  %v7551_v27 = vld [vmem:[%s8391_s5 + $0x18] sm:$0xff]  }
 0x9ba   :  { %7139 = vmatprep.subr.bf16.mxu0 %v10673_v0  ;;  %v1712_v41 = vpack.c.bf16 %v1709_v8, %v1708_v12  ;;  %v7552_v8 = vld [vmem:[%s8391_s5 + $0x20] sm:$0xff]  }
 0x9bb   :  { %v1878_v12 = vpop.permute.xlu1 %1877 }
 0x9bd   :  { %7140 = vmatpush3.bf16.msra.mxu0 %v1712_v41 }
 0x9be   :  { %7145 = vmatprep.subr.bf16.mxu0 %v10673_v0 }
 0x9c0   :  { %7142 = vmatmul.mubr.msk.bf16.vlgmr.msra.gmra.mxu0 %vm1729_vm11, %v7550_v19 }
 0x9c1   :  { %7147 = vmatprep.mubr.msk.bf16.mxu0 %vm8194_vm0, %v10673_v0 }
 0xa80   :  { %v1767_v48 = vpop.f32.mrf.mxu0 }
 0xa81   :  { %v1768_v7 = vadd.f32 %v1767_v48, %v1717_v58 }
 0xa82   :  { %v7143_v46 = vpop.f32.mrf.mxu0 }
 0xa83   :  { %v8943_v59 = vadd.f32 %v1768_v7, %v8885_v26  ;;  %v1883_v46 = vpop.permute.xlu0 %1882 }
 0xa84   :  { %v1770_v29 = vpop.f32.mrf.mxu0 }
 0xa85   :  { %v1771_v45 = vadd.f32 %v1770_v29, %v1722_v18 }
 0xa86   :  { %v7144_v10 = vpop.f32.mrf.mxu0 }
 0xa87   :  { %v8946_v35 = vadd.f32 %v1771_v45, %v8888_v9 }
 0xa89   :  { %v1826_v34 = vadd.f32 %v8946_v35, %v8943_v59 }
 0xa8b   :  { %v1827_v5 = vrot.slane %v1826_v34, 4 }
 0xa8d   :  { %v1828_v44 = vadd.f32 %v1827_v5, %v1826_v34  ;;  %v1888_v34 = vpop.permute.xlu1 %1887 }
 0xa8f   :  { %v1829_v63 = vrot.slane %v1828_v44, 2 }
 0xa91   :  { %v1830_v39 = vadd.f32 %v1829_v63, %v1828_v44 }
 0xa93   :  { %v1831_v60 = vrot.slane %v1830_v39, 1 }
 0xa95   :  { %v1832_v54 = vadd.f32 %v1831_v60, %v1830_v39 }
 0xa97   :  { %v1833_v1 = vmul.f32 0.0625, %v1832_v54  ;;  %v1893_v54 = vpop.permute.xlu0 %1892 }
 0xa99   :  { %v1834_v22 = vsub.f32 %v8943_v59, %v1833_v1  ;;  %v1835_v40 = vsub.f32 %v8946_v35, %v1833_v1 }
 0xa9b   :  { %v1836_v36 = vmul.f32 %v1834_v22, %v1834_v22  ;;  %v1837_v26 = vmul.f32 %v1835_v40, %v1835_v40 }
 0xa9d   :  { %v1838_v25 = vadd.f32 %v1837_v26, %v1836_v36 }
 0xa9f   :  { %v1839_v14 = vrot.slane %v1838_v25, 4 }
 0xaa1   :  { %v1840_v9 = vadd.f32 %v1839_v14, %v1838_v25 }
 0xaa3   :  { %v1841_v47 = vrot.slane %v1840_v9, 2 }
 0xaa5   :  { %v1842_v53 = vadd.f32 %v1841_v47, %v1840_v9 }
 0xaa7   :  { %v1843_v62 = vrot.slane %v1842_v53, 1 }
 0xaa9   :  { %v1844_v61 = vadd.f32 %v1843_v62, %v1842_v53 }
 0xaab   :  { %v1845_v33 = vmul.f32 0.0625, %v1844_v61 }
 0xaad   :  { %v1846_v32 = vadd.f32 1e-05, %v1845_v33 }
 0xaaf   :  { %7734 = vrsqrt.f32 %v1846_v32 }
 0xabc   :  { %v7735_v11 = vpop.eup %7734 }
 0xabd   :  { %v1848_v6 = vmul.f32 %v7735_v11, %v1834_v22  ;;  %v1849_v17 = vmul.f32 %v7735_v11, %v1835_v40 }
 0xabf   :  { %v1861_v28 = vmul.f32 %v1858_v56, %v1849_v17  ;;  %v1860_v55 = vmul.f32 %v1853_v57, %v1848_v6 }
 0xac1   :  { %v1872_v23 = vadd.f32 %v1865_v3, %v1860_v55  ;;  %v1873_v4 = vadd.f32 %v1870_v15, %v1861_v28 }
 0xac3   :  { %v1874_v24 = vpack.c.bf16 %v1873_v4, %v1872_v23 }
 0xac5   :  { %7146 = vmatpush3.bf16.msra.mxu0 %v1874_v24 }
 0xac6   :  { %7177 = vmatprep.subr.bf16.mxu0 %v10673_v0 }
 0xac8   :  { %7148 = vmatmul.mubr.msk.bf16.vlgmr.msra.gmra.mxu0 %vm348_vm5, %v7551_v27 }
 0xac9   :  { %7151 = vmatprep.mubr.msk.bf16.mxu0 %vm8194_vm0, %v10673_v0 }
 0xad0   :  { %7152 = vmatmul.mubr.msk.bf16.gmra.mxu0 %vm348_vm5, %v7552_v8 }
 0xad1   :  { %7155 = vmatprep.mubr.msk.bf16.mxu0 %vm8194_vm0, %v10673_v0 }
 0xb88   :  { %v1963_v41 = vpop.f32.mrf.mxu0 }
 0xb89   :  { %v1964_v19 = vadd.f32 %v1963_v41, %v1878_v12 }
 0xb8a   :  { %v7149_v48 = vpop.f32.mrf.mxu0 }
 0xb8b   :  { %v1986_v58 = vmul.f32 0.35355338, %v1964_v19 }
 0xb8c   :  { %v1966_v7 = vpop.f32.mrf.mxu0 }
 0xb8d   :  { %v1987_v18 = vpack.c.bf16 %v1986_v58, %v1986_v58  ;;  %v1967_v29 = vadd.f32 %v1966_v7, %v1883_v46 }
 0xb8e   :  { %v7150_v45 = vpop.f32.mrf.mxu0 }
 0xb8f   :  { %v2340_v10 = vmul.f32 0.35355338, %v1967_v29  ;;  %2007 = vxpose.xlu1.c.b16.start.end [1/1] (short) %v1987_v18, 128 }
 0xb90   :  { %v1971_v5 = vpop.f32.mrf.mxu0 }
 0xb91   :  { %v2341_v44 = vpack.c.bf16 %v2340_v10, %v2340_v10  ;;  %v1972_v63 = vadd.f32 %v1971_v5, %v1888_v34 }
 0xb92   :  { %v7153_v39 = vpop.f32.mrf.mxu0 }
 0xb93   :  { %v1988_v60 = vpack.c.bf16 %v1972_v63, %v1972_v63  ;;  %2361 = vxpose.xlu0.c.b16.start.end [1/1] (short) %v2341_v44, 128 }
 0xb94   :  { %v1974_v1 = vpop.f32.mrf.mxu0 }
 0xb95   :  { %v2048_v22 = vsel %vm215_vm1, %v1988_v60, 0  ;;  %v1975_v40 = vadd.f32 %v1974_v1, %v1893_v54  ;;  %7495 = vmatprep.subr.msk.bf16.mxu1 %vm215_vm1, %v1988_v60 }
 0xb96   :  { %7160 = vmatpush3.bf16.msra.mxu1 %v2048_v22  ;;  %v7154_v36 = vpop.f32.mrf.mxu0 }
 0xb97   :  { %v2342_v26 = vpack.c.bf16 %v1975_v40, %v1975_v40 }
 0xb99   :  { %7496 = vmatprep.subr.msk.bf16.mxu1 %vm215_vm1, %v2342_v26  ;;  %v2402_v9 = vsel %vm215_vm1, %v2342_v26, 0  ;;  %v6570_v26 = vld [vmem:[%s8482_s10 + $0x1f0] sm:$0xff] }
 0xbf1   :  { %v2015_v25 = vpop.trf.xlu1 }
 0xbf2   :  { %7161 = vmatprep.mubr.msk.bf16.mxu1 %vm684_vm6, %v2015_v25 }
 0xbf5   :  { %v2016_v14 = vpop.trf.xlu1  ;;  %v2369_v62 = vpop.trf.xlu0 }
 0xbf6   :  { %7162 = vmatmul.mubr.msk.bf16.vlgmr.msra.gmra.mxu1 %vm684_vm6, %v2016_v14 }
 0xbf7   :  { %7198 = vmatpush3.bf16.msra.mxu1 %v2402_v9  ;;  %v6546_v9 = vld [vmem:[%s8482_s10 + $0x170] sm:$0xff] }
 0xbf8   :  { %7215 = vmatprep.subr.bf16.mxu1 %v10673_v0 }
 0xbf9   :  { %v2017_v47 = vpop.trf.xlu1  ;;  %v2370_v32 = vpop.trf.xlu0 }
 0xbfa   :  { %7165 = vmatprep.mubr.msk.bf16.mxu1 %vm684_vm6, %v2017_v47 }
 0xbfd   :  { %v2018_v53 = vpop.trf.xlu1  ;;  %v2371_v56 = vpop.trf.xlu0 }
 0xbfe   :  { %7166 = vmatmul.mubr.msk.bf16.gmra.mxu1 %vm684_vm6, %v2018_v53  ;;  %v6571_v53 = vld [vmem:[%s8482_s10 + $0x1f8] sm:$0xff] }
 0xc01   :  { %v2019_v61 = vpop.trf.xlu1  ;;  %v2372_v6 = vpop.trf.xlu0 }
 0xc02   :  { %7169 = vmatprep.mubr.msk.bf16.mxu1 %vm684_vm6, %v2019_v61 }
 0xc05   :  { %v2020_v33 = vpop.trf.xlu1  ;;  %v2373_v17 = vpop.trf.xlu0 }
 0xc06   :  { %7170 = vmatmul.mubr.msk.bf16.gmra.mxu1 %vm684_vm6, %v2020_v33 }
 0xc09   :  { %v2021_v57 = vpop.trf.xlu1  ;;  %v2374_v28 = vpop.trf.xlu0 }
 0xc0a   :  { %7173 = vmatprep.mubr.msk.bf16.mxu1 %vm684_vm6, %v2021_v57  ;;  %v6568_v57 = vld [vmem:[%s8482_s10 + $0x1e0] sm:$0xff] }
 0xc0d   :  { %v2022_v11 = vpop.trf.xlu1  ;;  %v2375_v55 = vpop.trf.xlu0 }
 0xc0e   :  { %7174 = vmatmul.mubr.msk.bf16.gmra.mxu1 %vm684_vm6, %v2022_v11 }
 0xc0f   :  { %7199 = vmatprep.mubr.msk.bf16.mxu1 %vm684_vm6, %v2369_v62 }
 0xc11   :  { %v2376_v3 = vpop.trf.xlu0 }
 0xc16   :  { %7200 = vmatmul.mubr.msk.bf16.vlgmr.msra.gmra.mxu1 %vm684_vm6, %v2370_v32  ;;  %v6547_v32 = vld [vmem:[%s8482_s10 + $0x178] sm:$0xff] }
 0xc17   :  { %7203 = vmatprep.mubr.msk.bf16.mxu1 %vm684_vm6, %v2371_v56 }
 0xc1e   :  { %7204 = vmatmul.mubr.msk.bf16.gmra.mxu1 %vm684_vm6, %v2372_v6  ;;  %v6544_v6 = vld [vmem:[%s8482_s10 + $0x160] sm:$0xff] }
 0xc1f   :  { %7207 = vmatprep.mubr.msk.bf16.mxu1 %vm684_vm6, %v2373_v17 }
 0xc26   :  { %7208 = vmatmul.mubr.msk.bf16.gmra.mxu1 %vm684_vm6, %v2374_v28  ;;  %v6569_v28 = vld [vmem:[%s8482_s10 + $0x1e8] sm:$0xff] }
 0xc27   :  { %7211 = vmatprep.mubr.msk.bf16.mxu1 %vm684_vm6, %v2375_v55 }
 0xc2e   :  { %7212 = vmatmul.mubr.msk.bf16.gmra.mxu1 %vm684_vm6, %v2376_v3 }
 0xc2f   :  { %7231 = vmatprep.mubr.msk.bf16.mxu1 %vm8194_vm0, %v10673_v0 }
 0xcb6   :  { %v8984_v15 = vpop.f32.mrf.mxu1 }
 0xcb8   :  { %v8986_v23 = vpop.f32.mrf.mxu1 }
 0xcba   :  { %v8988_v4 = vpop.f32.mrf.mxu1 }
 0xcbc   :  { %v8990_v24 = vpop.f32.mrf.mxu1 }
 0xcbe   :  { %v8992_v27 = vpop.f32.mrf.mxu1 }
 0xcc0   :  { %v8994_v8 = vpop.f32.mrf.mxu1 }
 0xcc2   :  { %v8996_v12 = vpop.f32.mrf.mxu1 }
 0xcc4   :  { %v8998_v41 = vpop.f32.mrf.mxu1 }
 0xcc6   :  { %v7171_v19 = vpop.f32.mrf.mxu1 }
 0xcc8   :  { %v9000_v48 = vpop.f32.mrf.mxu1 }
 0xcca   :  { %v7172_v58 = vpop.f32.mrf.mxu1 }
 0xccc   :  { %v9002_v46 = vpop.f32.mrf.mxu1 }
 0xcce   :  { %v7175_v7 = vpop.f32.mrf.mxu1 }
 0xccf   :  { %v9024_v61 = vadd.f32 %v7175_v7, %v6546_v9  ;;  %v6545_v7 = vld [vmem:[%s8482_s10 + $0x168] sm:$0xff]  ;;  %v6542_v9 = vld [vmem:[%s8482_s10 + $0x150] sm:$0xff] }
 0xcd0   :  { %v2132_v18 = vpop.f32.mrf.mxu1 }
 0xcd1   :  { %v9040_v55 = vadd.f32 %v6544_v6, %v2132_v18  ;;  %v9056_v18 = vadd.f32 %v7171_v19, %v6542_v9  ;;  %v6565_v6 = vld [vmem:[%s8482_s10 + $0x1c8] sm:$0xff]  ;;  %v6539_v9 = vld [vmem:[%s8482_s10 + $0x138] sm:$0xff] }
 0xcd2   :  { %v7176_v29 = vpop.f32.mrf.mxu1 }
 0xcd3   :  { %v9032_v56 = vadd.f32 %v7176_v29, %v6547_v32  ;;  %v6564_v32 = vld [vmem:[%s8482_s10 + $0x1c0] sm:$0xff] }
 0xcd4   :  { %v2135_v45 = vpop.f32.mrf.mxu1 }
 0xcd5   :  { %v9048_v29 = vadd.f32 %v6545_v7, %v2135_v45  ;;  %v6538_v7 = vld [vmem:[%s8482_s10 + $0x130] sm:$0xff] }
 0xcd6   :  { %v9004_v10 = vpop.f32.mrf.mxu1 }
 0xcd8   :  { %v9006_v34 = vpop.f32.mrf.mxu1 }
 0xcda   :  { %v9008_v5 = vpop.f32.mrf.mxu1 }
 0xcdc   :  { %v9010_v44 = vpop.f32.mrf.mxu1 }
 0xcde   :  { %v7205_v63 = vpop.f32.mrf.mxu1 }
 0xce0   :  { %v9012_v39 = vpop.f32.mrf.mxu1 }
 0xce2   :  { %v9014_v60 = vpop.f32.mrf.mxu1 }
 0xce4   :  { %v9016_v54 = vpop.f32.mrf.mxu1 }
 0xce6   :  { %v7209_v1 = vpop.f32.mrf.mxu1 }
 0xce8   :  { %v2470_v22 = vpop.f32.mrf.mxu1 }
 0xcea   :  { %v7210_v40 = vpop.f32.mrf.mxu1 }
 0xcec   :  { %v2473_v36 = vpop.f32.mrf.mxu1 }
 0xcee   :  { %v7213_v25 = vpop.f32.mrf.mxu1 }
 0xcef   :  { %v9019_v14 = vadd.f32 %v7213_v25, %v6570_v26  ;;  %v6566_v26 = vld [vmem:[%s8482_s10 + $0x1d0] sm:$0xff] }
 0xcf0   :  { %v2486_v47 = vpop.f32.mrf.mxu1  ;;  %v9050_v25 = vadd.f32 %v7209_v1, %v6566_v26  ;;  %v9066_v1 = vadd.f32 %v6564_v32, %v2470_v22  ;;  %v6563_v26 = vld [vmem:[%s8482_s10 + $0x1b8] sm:$0xff] }
 0xcf1   :  { %2529 = vmax.xlane.f32.xlu0 %v9019_v14  ;;  %v9034_v11 = vadd.f32 %v6568_v57, %v2486_v47  ;;  %v6567_v47 = vld [vmem:[%s8482_s10 + $0x1d8] sm:$0xff]  ;;  %v6540_v57 = vld [vmem:[%s8482_s10 + $0x140] sm:$0xff] }
 0xcf2   :  { %v7214_v62 = vpop.f32.mrf.mxu1  ;;  %v9073_v19 = vadd.f32 %v6540_v57, %v9000_v48  ;;  %v9091_v48 = vadd.f32 %v8992_v27, %v6538_v7  ;;  %v6536_v27 = vld [vmem:[%s8482_s10 + $0x120] sm:$0xff] }
 0xcf3   :  { %v9026_v33 = vadd.f32 %v7214_v62, %v6571_v53  ;;  %v9058_v53 = vadd.f32 %v7210_v40, %v6567_v47  ;;  %v6543_v62 = vld [vmem:[%s8482_s10 + $0x158] sm:$0xff]  ;;  %v9075_v40 = vadd.f32 %v6565_v6, %v2473_v36  ;;  %v9094_v36 = vadd.f32 %v9014_v60, %v6563_v26  ;;  %v7553_v60 = vld [vmem:[%s8391_s5 + $0x28] sm:$0xff]   ;;  %v6534_v6 = vld [vmem:[%s8482_s10 + $0x110] sm:$0xff] }
 0xcf4   :  { %v2489_v17 = vpop.f32.mrf.mxu1  ;;  %v9064_v45 = vadd.f32 %v7172_v58, %v6543_v62  ;;  %v6561_v62 = vld [vmem:[%s8482_s10 + $0x1a8] sm:$0xff]  ;;  %v9112_v32 = vadd.f32 %v6536_v27, %v8994_v8  ;;  %7156 = vmatmul.mubr.msk.bf16.gmra.mxu0 %vm348_vm5, %v7553_v60  ;;  %v6535_v26 = vld [vmem:[%s8482_s10 + $0x118] sm:$0xff] }
 0xcf5   :  { %2175 = vmax.xlane.f32.xlu0 %v9024_v61  ;;  %2531 = vmax.xlane.f32.xlu1 %v9026_v33  ;;  %v9042_v3 = vadd.f32 %v6569_v28, %v2489_v17  ;;  %v6541_v17 = vld [vmem:[%s8482_s10 + $0x148] sm:$0xff]  ;;  %v6562_v28 = vld [vmem:[%s8482_s10 + $0x1b0] sm:$0xff]  ;;  %v9115_v57 = vadd.f32 %v6561_v62, %v9016_v54 }
 0xcf6   :  { %v9082_v58 = vadd.f32 %v6541_v17, %v9002_v46  ;;  %v9084_v22 = vadd.f32 %v7205_v63, %v6562_v28  ;;  %v6560_v46 = vld [vmem:[%s8482_s10 + $0x1a0] sm:$0xff]  ;;  %v9101_v63 = vadd.f32 %v8996_v12, %v6539_v9  ;;  %v6537_v12 = vld [vmem:[%s8482_s10 + $0x128] sm:$0xff]  ;;  %7193 = vmatprep.mubr.msk.bf16.mxu0 %vm8194_vm0, %v10673_v0  ;;  %v6559_v17 = vld [vmem:[%s8482_s10 + $0x198] sm:$0xff]  ;;  %v9135_v28 = vadd.f32 %v8984_v15, %v6534_v6 }
 0xcf7   :  { %v9104_v47 = vadd.f32 %v6560_v46, %v9012_v39  ;;  %v6558_v39 = vld [vmem:[%s8482_s10 + $0x190] sm:$0xff]  ;;  %v9125_v8 = vadd.f32 %v6537_v12, %v8998_v41  ;;  %v9138_v7 = vadd.f32 %v9008_v5, %v6559_v17  ;;  %v6556_v9 = vld [vmem:[%s8482_s10 + $0x180] sm:$0xff]  ;;  %v9145_v41 = vadd.f32 %v8988_v4, %v6535_v26  ;;  %v6557_v27 = vld [vmem:[%s8482_s10 + $0x188] sm:$0xff] }
 0xcf8   :  { %v9128_v54 = vadd.f32 %v9004_v10, %v6558_v39  ;;  %v9148_v10 = vadd.f32 %v6556_v9, %v9006_v34  ;;  %v6532_v46 = vld [vmem:[%s8482_s10 + $0x100] sm:$0xff]  ;;  %v9158_v5 = vadd.f32 %v6557_v27, %v9010_v44  ;;  %v6533_v62 = vld [vmem:[%s8482_s10 + $0x108] sm:$0xff] }
 0xcf9   :  { %2177 = vmax.xlane.f32.xlu1 %v9032_v56  ;;  %2525 = vmax.xlane.f32.xlu0 %v9034_v11  ;;  %v9155_v15 = vadd.f32 %v6532_v46, %v8986_v23  ;;  %v9164_v4 = vadd.f32 %v6533_v62, %v8990_v24 }
 0xcfd   :  { %2527 = vmax.xlane.f32.xlu1 %v9042_v3  ;;  %2171 = vmax.xlane.f32.xlu0 %v9040_v55 }
 0xd01   :  { %2173 = vmax.xlane.f32.xlu1 %v9048_v29  ;;  %2521 = vmax.xlane.f32.xlu0 %v9050_v25 }
 0xd05   :  { %2523 = vmax.xlane.f32.xlu1 %v9058_v53  ;;  %2167 = vmax.xlane.f32.xlu0 %v9056_v18 }
 0xd09   :  { %2169 = vmax.xlane.f32.xlu1 %v9064_v45  ;;  %2517 = vmax.xlane.f32.xlu0 %v9066_v1 }
 0xd0d   :  { %2519 = vmax.xlane.f32.xlu1 %v9075_v40  ;;  %2163 = vmax.xlane.f32.xlu0 %v9073_v19 }
 0xd11   :  { %2165 = vmax.xlane.f32.xlu1 %v9082_v58  ;;  %2513 = vmax.xlane.f32.xlu0 %v9084_v22 }
 0xd15   :  { %2515 = vmax.xlane.f32.xlu1 %v9094_v36  ;;  %2159 = vmax.xlane.f32.xlu0 %v9091_v48 }
 0xd19   :  { %2161 = vmax.xlane.f32.xlu1 %v9101_v63  ;;  %2509 = vmax.xlane.f32.xlu0 %v9104_v47 }
 0xd1d   :  { %2511 = vmax.xlane.f32.xlu1 %v9115_v57  ;;  %2155 = vmax.xlane.f32.xlu0 %v9112_v32 }
 0xd21   :  { %2157 = vmax.xlane.f32.xlu1 %v9125_v8  ;;  %2505 = vmax.xlane.f32.xlu0 %v9128_v54 }
 0xd25   :  { %2507 = vmax.xlane.f32.xlu1 %v9138_v7  ;;  %2151 = vmax.xlane.f32.xlu0 %v9135_v28 }
 0xd29   :  { %2153 = vmax.xlane.f32.xlu1 %v9145_v41  ;;  %2501 = vmax.xlane.f32.xlu0 %v9148_v10 }
 0xd2d   :  { %2503 = vmax.xlane.f32.xlu1 %v9158_v5  ;;  %2147 = vmax.xlane.f32.xlu0 %v9155_v15 }
 0xd31   :  { %2149 = vmax.xlane.f32.xlu1 %v9164_v4 }
 0xd7a   :  { %v2530_v34 = vpop.xlane.xlu0 %2529 }
 0xd7b   :  { %v2547_v60 = vsub.f32 %v9019_v14, %v2530_v34 }
 0xd7d   :  { %v2577_v44 = vmul.f32 1.442695, %v2547_v60 }
 0xd7e   :  { %v2176_v12 = vpop.xlane.xlu0 %2175  ;;  %v2532_v39 = vpop.xlane.xlu1 %2531 }
 0xd7f   :  { %v2193_v23 = vsub.f32 %v9024_v61, %v2176_v12  ;;  %v2548_v9 = vsub.f32 %v9026_v33, %v2532_v39 }
 0xd81   :  { %v2223_v6 = vmul.f32 1.442695, %v2193_v23  ;;  %v2579_v2 = vmul.f32 1.442695, %v2548_v9 }
 0xd82   :  { %v2178_v17 = vpop.xlane.xlu1 %2177  ;;  %v2526_v26 = vpop.xlane.xlu0 %2525 }
 0xd83   :  { %7736 = vpow2.f32 %v2223_v6  ;;  %v2194_v46 = vsub.f32 %v9032_v56, %v2178_v17  ;;  %v2545_v34 = vsub.f32 %v9034_v11, %v2526_v26 }
 0xd84   :  { %7738 = vpow2.f32 %v2577_v44 }
 0xd85   :  { %v2225_v24 = vmul.f32 1.442695, %v2194_v46  ;;  %v2573_v39 = vmul.f32 1.442695, %v2545_v34 }
 0xd86   :  { %v2528_v27 = vpop.xlane.xlu1 %2527  ;;  %v2172_v62 = vpop.xlane.xlu0 %2171 }
 0xd87   :  { %7740 = vpow2.f32 %v2225_v24  ;;  %v2191_v14 = vsub.f32 %v9040_v55, %v2172_v62  ;;  %v2546_v23 = vsub.f32 %v9042_v3, %v2528_v27 }
 0xd88   :  { %7742 = vpow2.f32 %v2579_v2 }
 0xd89   :  { %v2219_v61 = vmul.f32 1.442695, %v2191_v14  ;;  %v2575_v9 = vmul.f32 1.442695, %v2546_v23 }
 0xd8a   :  { %v2174_v12 = vpop.xlane.xlu1 %2173  ;;  %v2522_v60 = vpop.xlane.xlu0 %2521 }
 0xd8b   :  { %v2192_v33 = vsub.f32 %v9048_v29, %v2174_v12  ;;  %7744 = vpow2.f32 %v2219_v61  ;;  %v2543_v56 = vsub.f32 %v9050_v25, %v2522_v60 }
 0xd8d   :  { %v2221_v6 = vmul.f32 1.442695, %v2192_v33  ;;  %v2569_v26 = vmul.f32 1.442695, %v2543_v56 }
 0xd8e   :  { %v2524_v44 = vpop.xlane.xlu1 %2523  ;;  %v2168_v17 = vpop.xlane.xlu0 %2167 }
 0xd8f   :  { %7746 = vpow2.f32 %v2221_v6  ;;  %v2544_v55 = vsub.f32 %v9058_v53, %v2524_v44  ;;  %v2189_v2 = vsub.f32 %v9056_v18, %v2168_v17 }
 0xd90   :  { %v9177_v11 = vpop.eup %7736  ;;  %7748 = vpow2.f32 %v2573_v39 }
 0xd91   :  { %2255 = vadd.xlane.f32.xlu0 %v9177_v11  ;;  %v9181_v46 = vpop.eup %7738  ;;  %7750 = vpow2.f32 %v2575_v9  ;;  %v2571_v25 = vmul.f32 1.442695, %v2544_v55  ;;  %v2215_v53 = vmul.f32 1.442695, %v2189_v2 }
 0xd92   :  { %v2170_v3 = vpop.xlane.xlu1 %2169  ;;  %v2518_v29 = vpop.xlane.xlu0 %2517  ;;  %7752 = vpow2.f32 %v2569_v26 }
 0xd93   :  { %v2190_v24 = vsub.f32 %v9064_v45, %v2170_v3  ;;  %v2541_v62 = vsub.f32 %v9066_v1, %v2518_v29  ;;  %7754 = vpow2.f32 %v2571_v25 }
 0xd94   :  { %v9184_v27 = vpop.eup %7740  ;;  %7756 = vpow2.f32 %v2215_v53 }
 0xd95   :  { %2257 = vadd.xlane.f32.xlu1 %v9184_v27  ;;  %2609 = vadd.xlane.f32.xlu0 %v9181_v46  ;;  %v2217_v34 = vmul.f32 1.442695, %v2190_v24  ;;  %v9190_v12 = vpop.eup %7742  ;;  %v2565_v45 = vmul.f32 1.442695, %v2541_v62 }
 0xd96   :  { %v2520_v18 = vpop.xlane.xlu1 %2519  ;;  %v2164_v14 = vpop.xlane.xlu0 %2163 }
 0xd97   :  { %v2542_v61 = vsub.f32 %v9075_v40, %v2520_v18  ;;  %v2187_v60 = vsub.f32 %v9073_v19, %v2164_v14  ;;  %7758 = vpow2.f32 %v2217_v34 }
 0xd98   :  { %v9193_v23 = vpop.eup %7744  ;;  %7760 = vpow2.f32 %v2565_v45 }
 0xd99   :  { %2611 = vadd.xlane.f32.xlu1 %v9190_v12  ;;  %2251 = vadd.xlane.f32.xlu0 %v9193_v23  ;;  %v2567_v39 = vmul.f32 1.442695, %v2542_v61  ;;  %v2211_v40 = vmul.f32 1.442695, %v2187_v60 }
 0xd9a   :  { %v2166_v1 = vpop.xlane.xlu1 %2165  ;;  %v2514_v33 = vpop.xlane.xlu0 %2513 }
 0xd9b   :  { %v2188_v56 = vsub.f32 %v9082_v58, %v2166_v1  ;;  %v2539_v44 = vsub.f32 %v9084_v22, %v2514_v33  ;;  %7762 = vpow2.f32 %v2567_v39 }
 0xd9c   :  { %v9198_v6 = vpop.eup %7746  ;;  %7764 = vpow2.f32 %v2211_v40 }
 0xd9d   :  { %v9201_v17 = vpop.eup %7748  ;;  %2253 = vadd.xlane.f32.xlu1 %v9198_v6  ;;  %v2213_v55 = vmul.f32 1.442695, %v2188_v56  ;;  %v2561_v58 = vmul.f32 1.442695, %v2539_v44 }
 0xd9e   :  { %2605 = vadd.xlane.f32.xlu0 %v9201_v17  ;;  %v2516_v19 = vpop.xlane.xlu1 %2515  ;;  %v2160_v9 = vpop.xlane.xlu0 %2159 }
 0xd9f   :  { %v2540_v26 = vsub.f32 %v9094_v36, %v2516_v19  ;;  %v9206_v2 = vpop.eup %7750  ;;  %v2185_v3 = vsub.f32 %v9091_v48, %v2160_v9  ;;  %7766 = vpow2.f32 %v2213_v55 }
 0xda0   :  { %v9209_v29 = vpop.eup %7752  ;;  %7768 = vpow2.f32 %v2561_v58 }
 0xda1   :  { %2607 = vadd.xlane.f32.xlu1 %v9206_v2  ;;  %v2563_v24 = vmul.f32 1.442695, %v2540_v26  ;;  %v9214_v62 = vpop.eup %7754  ;;  %v2207_v36 = vmul.f32 1.442695, %v2185_v3 }
 0xda2   :  { %2601 = vadd.xlane.f32.xlu0 %v9209_v29  ;;  %v2162_v22 = vpop.xlane.xlu1 %2161  ;;  %v2510_v25 = vpop.xlane.xlu0 %2509 }
 0xda3   :  { %v2186_v53 = vsub.f32 %v9101_v63, %v2162_v22  ;;  %v2537_v18 = vsub.f32 %v9104_v47, %v2510_v25  ;;  %v9217_v14 = vpop.eup %7756  ;;  %7770 = vpow2.f32 %v2563_v24 }
 0xda4   :  { %v9222_v60 = vpop.eup %7758  ;;  %7772 = vpow2.f32 %v2207_v36 }
 0xda5   :  { %2603 = vadd.xlane.f32.xlu1 %v9214_v62  ;;  %v2209_v61 = vmul.f32 1.442695, %v2186_v53  ;;  %v2557_v63 = vmul.f32 1.442695, %v2537_v18  ;;  %v9225_v33 = vpop.eup %7760 }
 0xda6   :  { %2247 = vadd.xlane.f32.xlu0 %v9217_v14  ;;  %v2512_v48 = vpop.xlane.xlu1 %2511  ;;  %v2156_v34 = vpop.xlane.xlu0 %2155 }
 0xda7   :  { %v2538_v45 = vsub.f32 %v9115_v57, %v2512_v48  ;;  %v2183_v1 = vsub.f32 %v9112_v32, %v2156_v34  ;;  %7774 = vpow2.f32 %v2209_v61 }
 0xda8   :  { %v9230_v44 = vpop.eup %7762  ;;  %7776 = vpow2.f32 %v2557_v63 }
 0xda9   :  { %2249 = vadd.xlane.f32.xlu1 %v9222_v60  ;;  %v2559_v56 = vmul.f32 1.442695, %v2538_v45  ;;  %v2203_v57 = vmul.f32 1.442695, %v2183_v1  ;;  %v9233_v9 = vpop.eup %7764 }
 0xdaa   :  { %2597 = vadd.xlane.f32.xlu0 %v9225_v33  ;;  %v2158_v47 = vpop.xlane.xlu1 %2157  ;;  %v2506_v39 = vpop.xlane.xlu0 %2505 }
 0xdab   :  { %v2184_v40 = vsub.f32 %v9125_v8, %v2158_v47  ;;  %v2535_v19 = vsub.f32 %v9128_v54, %v2506_v39  ;;  %7778 = vpow2.f32 %v2559_v56 }
 0xdac   :  { %v9238_v3 = vpop.eup %7766  ;;  %7780 = vpow2.f32 %v2203_v57 }
 0xdad   :  { %2599 = vadd.xlane.f32.xlu1 %v9230_v44  ;;  %v2205_v26 = vmul.f32 1.442695, %v2184_v40  ;;  %v2553_v8 = vmul.f32 1.442695, %v2535_v19  ;;  %v9241_v25 = vpop.eup %7768 }
 0xdae   :  { %2243 = vadd.xlane.f32.xlu0 %v9233_v9  ;;  %v2508_v32 = vpop.xlane.xlu1 %2507  ;;  %v2152_v55 = vpop.xlane.xlu0 %2151 }
 0xdaf   :  { %v2536_v58 = vsub.f32 %v9138_v7, %v2508_v32  ;;  %v2181_v22 = vsub.f32 %v9135_v28, %v2152_v55  ;;  %7782 = vpow2.f32 %v2205_v26 }
 0xdb0   :  { %v9246_v18 = vpop.eup %7770  ;;  %7784 = vpow2.f32 %v2553_v8 }
 0xdb1   :  { %2245 = vadd.xlane.f32.xlu1 %v9238_v3  ;;  %v2555_v53 = vmul.f32 1.442695, %v2536_v58  ;;  %v2199_v7 = vmul.f32 1.442695, %v2181_v22  ;;  %v9249_v34 = vpop.eup %7772 }
 0xdb2   :  { %2593 = vadd.xlane.f32.xlu0 %v9241_v25  ;;  %v2154_v54 = vpop.xlane.xlu1 %2153  ;;  %v2502_v24 = vpop.xlane.xlu0 %2501 }
 0xdb3   :  { %v2182_v36 = vsub.f32 %v9145_v41, %v2154_v54  ;;  %v2533_v48 = vsub.f32 %v9148_v10, %v2502_v24  ;;  %7786 = vpow2.f32 %v2555_v53 }
 0xdb4   :  { %v9254_v1 = vpop.eup %7774  ;;  %7788 = vpow2.f32 %v2199_v7  ;;  %v9295_v53 = vpop.f32.mrf.mxu0  ;;  %v6502_v7 = vld [vmem:[%s8351_s30 + $0x50] sm:$0xff] }
 0xdb5   :  { %2595 = vadd.xlane.f32.xlu1 %v9246_v18  ;;  %v2201_v45 = vmul.f32 1.442695, %v2182_v36  ;;  %v2549_v41 = vmul.f32 1.442695, %v2533_v48  ;;  %v9257_v39 = vpop.eup %7776 }
 0xdb6   :  { %2239 = vadd.xlane.f32.xlu0 %v9249_v34  ;;  %v2504_v28 = vpop.xlane.xlu1 %2503  ;;  %v2148_v61 = vpop.xlane.xlu0 %2147 }
 0xdb7   :  { %v2534_v63 = vsub.f32 %v9158_v5, %v2504_v28  ;;  %v2179_v47 = vsub.f32 %v9155_v15, %v2148_v61  ;;  %7790 = vpow2.f32 %v2201_v45  ;;  %v7157_v36 = vpop.f32.mrf.mxu0  ;;  %v6503_v28 = vld [vmem:[%s8351_s30 + $0x58] sm:$0xff]  ;;  %v6508_v45 = vld [vmem:[%s8764_s20 + $0x10] sm:$0xff] }
 0xdb8   :  { %v9262_v57 = vpop.eup %7778  ;;  %7792 = vpow2.f32 %v2549_v41  ;;  %v6510_v41 = vld [vmem:[%s8772_s27 + $0x10] sm:$0xff]  ;;  %v6519_v36 = vld [vmem:[%s8788_s9 + $0x28] sm:$0xff] }
 0xdb9   :  { %2241 = vadd.xlane.f32.xlu1 %v9254_v1  ;;  %v2551_v56 = vmul.f32 1.442695, %v2534_v63  ;;  %v2195_v5 = vmul.f32 1.442695, %v2179_v47  ;;  %v9264_v19 = vpop.eup %7780  ;;  %v9298_v48 = vpop.f32.mrf.mxu0  ;;  %v6509_v63 = vld [vmem:[%s8764_s20 + $0x18] sm:$0xff] }
 0xdba   :  { %2589 = vadd.xlane.f32.xlu0 %v9257_v39  ;;  %v2150_v10 = vpop.xlane.xlu1 %2149  ;;  %v6511_v47 = vld [vmem:[%s8772_s27 + $0x18] sm:$0xff] }
 0xdbb   :  { %v2180_v40 = vsub.f32 %v9164_v4, %v2150_v10  ;;  %7794 = vpow2.f32 %v2551_v56  ;;  %v7158_v61 = vpop.f32.mrf.mxu0  ;;  %v6512_v10 = vld [vmem:[%s8781_s3 + $0x10] sm:$0xff]  ;;  %v6513_v56 = vld [vmem:[%s8781_s3 + $0x18] sm:$0xff] }
 0xdbc   :  { %v9268_v32 = vpop.eup %7782  ;;  %7796 = vpow2.f32 %v2195_v5  ;;  %v6521_v5 = vld [vmem:[%s8788_s9 + $0x38] sm:$0xff] }
 0xdbd   :  { %2591 = vadd.xlane.f32.xlu1 %v9262_v57  ;;  %v2197_v15 = vmul.f32 1.442695, %v2180_v40  ;;  %v9270_v55 = vpop.eup %7784  ;;  %v6520_v40 = vld [vmem:[%s8788_s9 + $0x30] sm:$0xff] }
 0xdbe   :  { %2235 = vadd.xlane.f32.xlu0 %v9264_v19 }
 0xdbf   :  { %7798 = vpow2.f32 %v2197_v15  ;;  %v6518_v15 = vld [vmem:[%s8788_s9 + $0x20] sm:$0xff] }
 0xdc0   :  { %v9274_v4 = vpop.eup %7786 }
 0xdc1   :  { %2237 = vadd.xlane.f32.xlu1 %v9268_v32  ;;  %v9276_v26 = vpop.eup %7788 }
 0xdc2   :  { %2585 = vadd.xlane.f32.xlu0 %v9270_v55 }
 0xdc4   :  { %v9280_v58 = vpop.eup %7790 }
 0xdc5   :  { %2587 = vadd.xlane.f32.xlu1 %v9274_v4  ;;  %v9282_v8 = vpop.eup %7792 }
 0xdc6   :  { %2231 = vadd.xlane.f32.xlu0 %v9276_v26 }
 0xdc8   :  { %v9286_v22 = vpop.eup %7794 }
 0xdc9   :  { %2233 = vadd.xlane.f32.xlu1 %v9280_v58  ;;  %v9288_v54 = vpop.eup %7796 }
 0xdca   :  { %2581 = vadd.xlane.f32.xlu0 %v9282_v8 }
 0xdcc   :  { %v9292_v24 = vpop.eup %7798 }
 0xdcd   :  { %2583 = vadd.xlane.f32.xlu1 %v9286_v22 }
 0xdce   :  { %2227 = vadd.xlane.f32.xlu0 %v9288_v54 }
 0xdd1   :  { %2229 = vadd.xlane.f32.xlu1 %v9292_v24 }
 0xde2   :  { %1897 = vperm.xlu1 %7538, %v6502_v7   ;;  %v6524_v7 = vld [vmem:[%s8797_s22 + $0x10] sm:$0xff] }
 0xde4   :  { %1902 = vperm.xlu0 %7537, %v6503_v28   ;;  %v6525_v28 = vld [vmem:[%s8797_s22 + $0x18] sm:$0xff] }
 0xde6   :  { %2800 = vperm.xlu1 %7538, %v6508_v45  }
 0xde8   :  { %2805 = vperm.xlu0 %7537, %v6509_v63  }
 0xdea   :  { %2838 = vperm.xlu1 %7538, %v6510_v41  }
 0xdec   :  { %2843 = vperm.xlu0 %7537, %v6511_v47  }
 0xdee   :  { %2850 = vperm.xlu1 %7538, %v6512_v10  }
 0xdf0   :  { %2855 = vperm.xlu0 %7537, %v6513_v56  }
 0xdf2   :  { %2873 = vperm.xlu1 %7538, %v6520_v40  }
 0xdf4   :  { %2878 = vperm.xlu0 %7537, %v6521_v5  }
 0xdf6   :  { %2863 = vperm.xlu1 %7538, %v6518_v15  }
 0xdf8   :  { %2868 = vperm.xlu0 %7537, %v6519_v36  }
 0xdfa   :  { %3054 = vperm.xlu1 %7538, %v6524_v7  }
 0xdfc   :  { %3059 = vperm.xlu0 %7537, %v6525_v28  }
 0xe1a   :  { %v2256_v61 = vpop.xlane.xlu0 %2255 }
 0xe1b   :  { %7800 = vrcp.f32 %v2256_v61 }
 0xe1e   :  { %v2258_v45 = vpop.xlane.xlu1 %2257  ;;  %v2610_v63 = vpop.xlane.xlu0 %2609 }
 0xe1f   :  { %7802 = vrcp.f32 %v2258_v45 }
 0xe20   :  { %7804 = vrcp.f32 %v2610_v63 }
 0xe22   :  { %v2612_v41 = vpop.xlane.xlu1 %2611  ;;  %v2252_v47 = vpop.xlane.xlu0 %2251 }
 0xe23   :  { %7806 = vrcp.f32 %v2612_v41 }
 0xe24   :  { %7808 = vrcp.f32 %v2252_v47 }
 0xe26   :  { %v2254_v10 = vpop.xlane.xlu1 %2253 }
 0xe27   :  { %7810 = vrcp.f32 %v2254_v10  ;;  %v2606_v56 = vpop.xlane.xlu0 %2605 }
 0xe28   :  { %7812 = vrcp.f32 %v2606_v56  ;;  %v7801_v40 = vpop.eup %7800 }
 0xe29   :  { %v2289_v7 = vmul.f32 %v7801_v40, %v9177_v11 }
 0xe2a   :  { %v2608_v5 = vpop.xlane.xlu1 %2607 }
 0xe2b   :  { %7814 = vrcp.f32 %v2608_v5  ;;  %v2602_v15 = vpop.xlane.xlu0 %2601 }
 0xe2c   :  { %v7803_v36 = vpop.eup %7802 }
 0xe2d   :  { %v2290_v28 = vmul.f32 %v7803_v36, %v9184_v27  ;;  %v7805_v61 = vpop.eup %7804 }
 0xe2e   :  { %v2604_v45 = vpop.xlane.xlu1 %2603  ;;  %v2643_v47 = vmul.f32 %v7805_v61, %v9181_v46 }
 0xe2f   :  { %7816 = vrcp.f32 %v2604_v45  ;;  %v2248_v63 = vpop.xlane.xlu0 %2247  ;;  %v2298_v41 = vpack.c.bf16 %v2290_v28, %v2289_v7 }
 0xe30   :  { %v7807_v0 = vpop.eup %7806  ;;  %7818 = vrcp.f32 %v2602_v15 }
 0xe31   :  { %7820 = vrcp.f32 %v2248_v63  ;;  %7178 = vmatpush3.bf16.xpose.msra.mxu0 %v2298_v41  ;;  %v2644_v10 = vmul.f32 %v7807_v0, %v9190_v12  ;;  %v7809_v56 = vpop.eup %7808 }
 0xe32   :  { %v2250_v5 = vpop.xlane.xlu1 %2249  ;;  %7179 = vmatprep.subr.bf16.mxu0 %v10683_v50  ;;  %v2287_v36 = vmul.f32 %v7809_v56, %v9193_v23 }
 0xe33   :  { %7822 = vrcp.f32 %v2250_v5  ;;  %v2598_v11 = vpop.xlane.xlu0 %2597  ;;  %v2652_v27 = vpack.c.bf16 %v2644_v10, %v2643_v47 }
 0xe34   :  { %v7811_v40 = vpop.eup %7810 }
 0xe35   :  { %7216 = vmatpush3.bf16.xpose.msra.mxu1 %v2652_v27  ;;  %v2288_v7 = vmul.f32 %v7811_v40, %v9198_v6  ;;  %v7813_v15 = vpop.eup %7812 }
 0xe36   :  { %v2600_v28 = vpop.xlane.xlu1 %2599  ;;  %7217 = vmatprep.subr.bf16.mxu1 %v10683_v50  ;;  %v2641_v61 = vmul.f32 %v7813_v15, %v9201_v17 }
 0xe37   :  { %7824 = vrcp.f32 %v2600_v28  ;;  %v2244_v46 = vpop.xlane.xlu0 %2243  ;;  %v2297_v0 = vpack.c.bf16 %v2288_v7, %v2287_v36 }
 0xe38   :  { %v7815_v12 = vpop.eup %7814  ;;  %7826 = vrcp.f32 %v2598_v11 }
 0xe39   :  { %7828 = vrcp.f32 %v2244_v46  ;;  %7180 = vmatpush3.bf16.xpose.msra.mxu0 %v2297_v0  ;;  %v2642_v45 = vmul.f32 %v7815_v12, %v9206_v2 }
 0xe3a   :  { %v2246_v63 = vpop.xlane.xlu1 %2245  ;;  %7181 = vmatprep.subr.bf16.mxu0 %v10683_v50 }
 0xe3b   :  { %7830 = vrcp.f32 %v2246_v63  ;;  %v2594_v23 = vpop.xlane.xlu0 %2593  ;;  %v2651_v6 = vpack.c.bf16 %v2642_v45, %v2641_v61 }
 0xe3c   :  { %v7817_v41 = vpop.eup %7816 }
 0xe3d   :  { %v7819_v47 = vpop.eup %7818  ;;  %7218 = vmatpush3.bf16.xpose.msra.mxu1 %v2651_v6  ;;  %v2640_v11 = vmul.f32 %v7817_v41, %v9214_v62 }
 0xe3e   :  { %v7821_v10 = vpop.eup %7820  ;;  %v2596_v56 = vpop.xlane.xlu1 %2595  ;;  %7219 = vmatprep.subr.bf16.mxu1 %v10683_v50  ;;  %v2639_v40 = vmul.f32 %v7819_v47, %v9209_v29 }
 0xe3f   :  { %7832 = vrcp.f32 %v2596_v56  ;;  %v2240_v5 = vpop.xlane.xlu0 %2239  ;;  %v2285_v2 = vmul.f32 %v7821_v10, %v9217_v14 }
 0xe40   :  { %v7823_v17 = vpop.eup %7822  ;;  %7834 = vrcp.f32 %v2594_v23  ;;  %v2650_v28 = vpack.c.bf16 %v2640_v11, %v2639_v40 }
 0xe41   :  { %7836 = vrcp.f32 %v2240_v5  ;;  %v2286_v27 = vmul.f32 %v7823_v17, %v9222_v60 }
 0xe42   :  { %v2242_v36 = vpop.xlane.xlu1 %2241 }
 0xe43   :  { %7838 = vrcp.f32 %v2242_v36  ;;  %v2590_v7 = vpop.xlane.xlu0 %2589  ;;  %v2296_v15 = vpack.c.bf16 %v2286_v27, %v2285_v2 }
 0xe44   :  { %v7825_v46 = vpop.eup %7824 }
 0xe45   :  { %v7827_v0 = vpop.eup %7826  ;;  %7182 = vmatpush3.bf16.xpose.msra.mxu0 %v2296_v15  ;;  %7220 = vmatpush3.bf16.xpose.msra.mxu1 %v2650_v28  ;;  %v2638_v60 = vmul.f32 %v7825_v46, %v9230_v44 }
 0xe46   :  { %v7829_v12 = vpop.eup %7828  ;;  %v2592_v62 = vpop.xlane.xlu1 %2591  ;;  %7183 = vmatprep.subr.bf16.mxu0 %v10683_v50  ;;  %7221 = vmatprep.subr.bf16.mxu1 %v10683_v50  ;;  %v2637_v63 = vmul.f32 %v7827_v0, %v9225_v33 }
 0xe47   :  { %7840 = vrcp.f32 %v2592_v62  ;;  %v2236_v14 = vpop.xlane.xlu0 %2235  ;;  %v2283_v61 = vmul.f32 %v7829_v12, %v9233_v9 }
 0xe48   :  { %v7831_v29 = vpop.eup %7830  ;;  %7842 = vrcp.f32 %v2590_v7  ;;  %v2649_v47 = vpack.c.bf16 %v2638_v60, %v2637_v63 }
 0xe49   :  { %7844 = vrcp.f32 %v2236_v14  ;;  %v2284_v45 = vmul.f32 %v7831_v29, %v9238_v3 }
 0xe4a   :  { %v2238_v23 = vpop.xlane.xlu1 %2237 }
 0xe4b   :  { %7846 = vrcp.f32 %v2238_v23  ;;  %v2586_v6 = vpop.xlane.xlu0 %2585  ;;  %v2295_v41 = vpack.c.bf16 %v2284_v45, %v2283_v61 }
 0xe4c   :  { %v7833_v10 = vpop.eup %7832 }
 0xe4d   :  { %v7835_v56 = vpop.eup %7834  ;;  %7184 = vmatpush3.bf16.xpose.msra.mxu0 %v2295_v41  ;;  %7222 = vmatpush3.bf16.xpose.msra.mxu1 %v2649_v47  ;;  %v2636_v3 = vmul.f32 %v7833_v10, %v9246_v18 }
 0xe4e   :  { %v7837_v5 = vpop.eup %7836  ;;  %v2588_v44 = vpop.xlane.xlu1 %2587  ;;  %7185 = vmatprep.subr.bf16.mxu0 %v10683_v50  ;;  %7223 = vmatprep.subr.bf16.mxu1 %v10683_v50  ;;  %v2635_v2 = vmul.f32 %v7835_v56, %v9241_v25 }
 0xe4f   :  { %7848 = vrcp.f32 %v2588_v44  ;;  %v2232_v9 = vpop.xlane.xlu0 %2231  ;;  %v2281_v11 = vmul.f32 %v7837_v5, %v9249_v34 }
 0xe50   :  { %v7839_v33 = vpop.eup %7838  ;;  %7850 = vrcp.f32 %v2586_v6  ;;  %v2648_v7 = vpack.c.bf16 %v2636_v3, %v2635_v2 }
 0xe51   :  { %7852 = vrcp.f32 %v2232_v9  ;;  %v2282_v17 = vmul.f32 %v7839_v33, %v9254_v1 }
 0xe52   :  { %v2234_v27 = vpop.xlane.xlu1 %2233 }
 0xe53   :  { %7854 = vrcp.f32 %v2234_v27  ;;  %v2582_v40 = vpop.xlane.xlu0 %2581  ;;  %v2294_v36 = vpack.c.bf16 %v2282_v17, %v2281_v11 }
 0xe54   :  { %v7841_v15 = vpop.eup %7840 }
 0xe55   :  { %v7843_v28 = vpop.eup %7842  ;;  %7186 = vmatpush3.bf16.xpose.msra.mxu0 %v2294_v36  ;;  %7224 = vmatpush3.bf16.xpose.msra.mxu1 %v2648_v7  ;;  %v2634_v1 = vmul.f32 %v7841_v15, %v9262_v57  ;;  %v7554_v36 = vld [vmem:[%s8866_s29 + $0x18] sm:$0xff]  }
 0xe56   :  { %v7845_v46 = vpop.eup %7844  ;;  %v2584_v18 = vpop.xlane.xlu1 %2583  ;;  %7187 = vmatprep.subr.bf16.mxu0 %v10683_v50  ;;  %7225 = vmatprep.subr.bf16.mxu1 %v10683_v50  ;;  %v2633_v62 = vmul.f32 %v7843_v28, %v9257_v39 }
 0xe57   :  { %7856 = vrcp.f32 %v2584_v18  ;;  %v2228_v34 = vpop.xlane.xlu0 %2227  ;;  %v2279_v0 = vmul.f32 %v7845_v46, %v9264_v19 }
 0xe58   :  { %v7847_v25 = vpop.eup %7846  ;;  %7858 = vrcp.f32 %v2582_v40  ;;  %v2647_v29 = vpack.c.bf16 %v2634_v1, %v2633_v62  ;;  %v7556_v1 = vld [vmem:[%s8880_s8 + $0x10] sm:$0xff]  }
 0xe59   :  { %7860 = vrcp.f32 %v2228_v34  ;;  %v2280_v12 = vmul.f32 %v7847_v25, %v9268_v32  ;;  %v7555_v34 = vld [vmem:[%s8866_s29 + $0x10] sm:$0xff]  }
 0xe5a   :  { %v2230_v14 = vpop.xlane.xlu1 %2229 }
 0xe5b   :  { %7862 = vrcp.f32 %v2230_v14  ;;  %v2293_v60 = vpack.c.bf16 %v2280_v12, %v2279_v0 }
 0xe5c   :  { %v7849_v61 = vpop.eup %7848 }
 0xe5d   :  { %v7851_v45 = vpop.eup %7850  ;;  %7188 = vmatpush3.bf16.xpose.msra.mxu0 %v2293_v60  ;;  %7226 = vmatpush3.bf16.xpose.msra.mxu1 %v2647_v29  ;;  %v2632_v57 = vmul.f32 %v7849_v61, %v9274_v4 }
 0xe5e   :  { %v7853_v63 = vpop.eup %7852  ;;  %7189 = vmatprep.subr.bf16.mxu0 %v10683_v50  ;;  %7227 = vmatprep.subr.bf16.mxu1 %v10683_v50  ;;  %v2631_v23 = vmul.f32 %v7851_v45, %v9270_v55  ;;  %v1898_v44 = vpop.permute.xlu1 %1897 }
 0xe5f   :  { %v2277_v32 = vmul.f32 %v7853_v63, %v9276_v26  ;;  %v1903_v9 = vpop.permute.xlu0 %1902  ;;  %v1980_v11 = vadd.f32 %v9295_v53, %v1898_v44 }
 0xe60   :  { %v7855_v19 = vpop.eup %7854  ;;  %v2646_v41 = vpack.c.bf16 %v2632_v57, %v2631_v23  ;;  %v1983_v17 = vadd.f32 %v9298_v48, %v1903_v9 }
 0xe61   :  { %v2278_v39 = vmul.f32 %v7855_v19, %v9280_v58 }
 0xe62   :  { %v2801_v61 = vpop.permute.xlu1 %2800 }
 0xe63   :  { %v2292_v6 = vpack.c.bf16 %v2278_v39, %v2277_v32  ;;  %v2806_v19 = vpop.permute.xlu0 %2805 }
 0xe64   :  { %v7857_v47 = vpop.eup %7856 }
 0xe65   :  { %v7859_v10 = vpop.eup %7858  ;;  %7190 = vmatpush3.bf16.xpose.msra.mxu0 %v2292_v6  ;;  %7228 = vmatpush3.bf16.xpose.msra.mxu1 %v2646_v41  ;;  %v2630_v4 = vmul.f32 %v7857_v47, %v9286_v22  ;;  %v1989_v22 = vpack.c.bf16 %v1980_v11, %v1980_v11 }
 0xe66   :  { %v7861_v56 = vpop.eup %7860  ;;  %7191 = vmatprep.subr.bf16.mxu0 %v10683_v50  ;;  %7229 = vmatprep.subr.bf16.mxu1 %v10683_v50  ;;  %v2629_v55 = vmul.f32 %v7859_v10, %v9282_v8 }
 0xe67   :  { %v2275_v26 = vmul.f32 %v7861_v56, %v9288_v54  ;;  %v2343_v54 = vpack.c.bf16 %v1983_v17, %v1983_v17 }
 0xe68   :  { %v7863_v5 = vpop.eup %7862  ;;  %v2645_v33 = vpack.c.bf16 %v2630_v4, %v2629_v55 }
 0xe69   :  { %v2276_v58 = vmul.f32 %v7863_v5, %v9292_v24 }
 0xe6b   :  { %v2291_v3 = vpack.c.bf16 %v2276_v58, %v2275_v26 }
 0xe6d   :  { %7192 = vmatpush3.bf16.xpose.msra.mxu0 %v2291_v3  ;;  %7230 = vmatpush3.bf16.xpose.msra.mxu1 %v2645_v33 }
 0xe6e   :  { %7235 = vmatprep.subr.bf16.mxu0 %v10683_v50  ;;  %7261 = vmatprep.subr.bf16.mxu1 %v10683_v50 }
 0xe74   :  { %7194 = vmatmul.mubr.bf16.vlgmr.msra.gmra.mxu0 %v1989_v22  ;;  %7232 = vmatmul.mubr.bf16.vlgmr.msra.gmra.mxu1 %v2343_v54 }
 0xe75   :  { %7237 = vmatprep.mubr.msk.bf16.mxu0 %vm8194_vm0, %v10683_v50  ;;  %7263 = vmatprep.mubr.msk.bf16.mxu1 %vm8194_vm0, %v10683_v50 }
 0xf34   :  { %v2333_v8 = vpop.f32.mrf.mxu0  ;;  %v2687_v24 = vpop.f32.mrf.mxu1 }
 0xf35   :  { %v2693_v53 = vpack.c.bf16 %v2687_v24, %v2687_v24  ;;  %v2339_v27 = vpack.c.bf16 %v2333_v8, %v2333_v8 }
 0xf36   :  { %v7195_v48 = vpop.f32.mrf.mxu0  ;;  %v7233_v2 = vpop.f32.mrf.mxu1 }
 0xf37   :  { %v2703_v40 = vsel %vm215_vm1, %v2693_v53, 0  ;;  %v2755_v18 = vsel %vm215_vm1, %v2339_v27, 0  ;;  %v2839_v53 = vpop.permute.xlu1 %2838  ;;  %v2844_v48 = vpop.permute.xlu0 %2843 }
 0xf38   :  { %v2336_v7 = vpop.f32.mrf.mxu0  ;;  %v2690_v15 = vpop.f32.mrf.mxu1  ;;  %7236 = vmatpush3.bf16.msra.mxu0 %v2703_v40 }
 0xf39   :  { %7241 = vmatprep.subr.bf16.mxu0 %v10683_v50 }
 0xf3a   :  { %v7196_v28 = vpop.f32.mrf.mxu0  ;;  %v7234_v46 = vpop.f32.mrf.mxu1 }
 0xf3b   :  { %7238 = vmatmul.mubr.msk.bf16.vlgmr.msra.gmra.mxu0 %vm684_vm6, %v7554_v36  ;;  %v2851_v15 = vpop.permute.xlu1 %2850  ;;  %v2856_v28 = vpop.permute.xlu0 %2855 }
 0xf3c   :  { %7242 = vmatpush3.bf16.msra.mxu0 %v2755_v18  ;;  %7243 = vmatprep.mubr.msk.bf16.mxu0 %vm8194_vm0, %v10683_v50 }
 0xf43   :  { %7244 = vmatmul.mubr.msk.bf16.vlgmr.msra.gmra.mxu0 %vm684_vm6, %v7555_v34 }
 0xf44   :  { %7249 = vmatprep.mubr.msk.bf16.mxu0 %vm348_vm5, %v7556_v1  ;;  %v7557_v1 = vld [vmem:[%s8880_s8 + $0x18] sm:$0xff]  }
 0xffb   :  { %v2739_v25 = vpop.f32.mrf.mxu0 }
 0xffd   :  { %v7239_v0 = vpop.f32.mrf.mxu0 }
 0xfff   :  { %v2742_v12 = vpop.f32.mrf.mxu0 }
0x1001   :  { %v7240_v62 = vpop.f32.mrf.mxu0 }
0x1003   :  { %v2791_v14 = vpop.f32.mrf.mxu0 }
0x1004   :  { %v2792_v60 = vadd.f32 %v2791_v14, %v2739_v25  ;;  %v2874_v25 = vpop.permute.xlu1 %2873 }
0x1005   :  { %v7245_v29 = vpop.f32.mrf.mxu0 }
0x1006   :  { %v2808_v63 = vadd.f32 %v2801_v61, %v2792_v60 }
0x1007   :  { %v2794_v45 = vpop.f32.mrf.mxu0 }
0x1008   :  { %v2795_v57 = vadd.f32 %v2794_v45, %v2742_v12  ;;  %v9379_v23 = vadd.f32 %v2808_v63, %v8943_v59  ;;  %v2879_v12 = vpop.permute.xlu0 %2878  ;;  %v2864_v14 = vpop.permute.xlu1 %2863 }
0x1009   :  { %v7246_v32 = vpop.f32.mrf.mxu0 }
0x100a   :  { %v2809_v39 = vadd.f32 %v2806_v19, %v2795_v57 }
0x100c   :  { %v9382_v6 = vadd.f32 %v2809_v39, %v8946_v35  ;;  %v2869_v39 = vpop.permute.xlu0 %2868 }
0x100e   :  { %v2812_v41 = vadd.f32 %v9382_v6, %v9379_v23 }
0x1010   :  { %v2813_v47 = vrot.slane %v2812_v41, 4 }
0x1012   :  { %v2814_v10 = vadd.f32 %v2813_v47, %v2812_v41 }
0x1014   :  { %v2815_v56 = vrot.slane %v2814_v10, 2 }
0x1016   :  { %v2816_v4 = vadd.f32 %v2815_v56, %v2814_v10 }
0x1018   :  { %v2817_v5 = vrot.slane %v2816_v4, 1 }
0x101a   :  { %v2818_v26 = vadd.f32 %v2817_v5, %v2816_v4 }
0x101c   :  { %v2819_v58 = vmul.f32 0.0625, %v2818_v26 }
0x101e   :  { %v2821_v55 = vsub.f32 %v9382_v6, %v2819_v58  ;;  %v2820_v44 = vsub.f32 %v9379_v23, %v2819_v58 }
0x1020   :  { %v2823_v9 = vmul.f32 %v2821_v55, %v2821_v55  ;;  %v2822_v59 = vmul.f32 %v2820_v44, %v2820_v44 }
0x1022   :  { %v2824_v3 = vadd.f32 %v2823_v9, %v2822_v59 }
0x1024   :  { %v2825_v33 = vrot.slane %v2824_v3, 4 }
0x1026   :  { %v2826_v35 = vadd.f32 %v2825_v33, %v2824_v3 }
0x1028   :  { %v2827_v11 = vrot.slane %v2826_v35, 2 }
0x102a   :  { %v2828_v17 = vadd.f32 %v2827_v11, %v2826_v35 }
0x102c   :  { %v2829_v22 = vrot.slane %v2828_v17, 1 }
0x102e   :  { %v2830_v54 = vadd.f32 %v2829_v22, %v2828_v17 }
0x1030   :  { %v2831_v8 = vmul.f32 0.0625, %v2830_v54 }
0x1032   :  { %v2832_v24 = vadd.f32 1e-05, %v2831_v8 }
0x1034   :  { %7864 = vrsqrt.f32 %v2832_v24 }
0x1041   :  { %v7865_v2 = vpop.eup %7864 }
0x1042   :  { %v2834_v27 = vmul.f32 %v7865_v2, %v2820_v44  ;;  %v2835_v40 = vmul.f32 %v7865_v2, %v2821_v55 }
0x1044   :  { %v2846_v36 = vmul.f32 %v2839_v53, %v2834_v27  ;;  %v2847_v7 = vmul.f32 %v2844_v48, %v2835_v40 }
0x1046   :  { %v2858_v46 = vadd.f32 %v2851_v15, %v2846_v36  ;;  %v2859_v18 = vadd.f32 %v2856_v28, %v2847_v7 }
0x1048   :  { %v2860_v34 = vpack.c.bf16 %v2859_v18, %v2858_v46 }
0x104a   :  { %7247 = vmatprep.subr.bf16.mxu0 %v2860_v34 }
0x104b   :  { %7248 = vmatpush3.bf16.msra.mxu0 %v2860_v34 }
0x104c   :  { %7253 = vmatprep.subr.bf16.mxu0 %v10683_v50 }
0x104e   :  { %7250 = vmatmul.mubr.msk.bf16.vlgmr.msra.gmra.mxu0 %vm348_vm5, %v7557_v1 }
0x104f   :  { %7257 = vmatprep.mubr.msk.bf16.mxu0 %vm8194_vm0, %v10683_v50 }
0x110e   :  { %v7251_v0 = vpop.f32.mrf.mxu0 }
0x110f   :  { %v9393_v62 = vadd.f32 %v7251_v0, %v2874_v25 }
0x1110   :  { %v2931_v60 = vpop.f32.mrf.mxu0 }
0x1111   :  { %v9396_v29 = vmul.f32 0.70710677, %v9393_v62  ;;  %v9398_v61 = vadd.f32 %v2931_v60, %v2864_v14 }
0x1112   :  { %v7252_v45 = vpop.f32.mrf.mxu0 }
0x1113   :  { %v2956_v63 = vand.u32 2147483647, %v9396_v29  ;;  %v9402_v57 = vmul.f32 0.70710677, %v9398_v61  ;;  %v9404_v19 = vadd.f32 %v7252_v45, %v2879_v12  ;;  %vm3032_vm12 = vcmp.lt.f32.partialorder %v9396_v29, 0.0 }
0x1114   :  { %v2934_v32 = vpop.f32.mrf.mxu0 }
0x1115   :  { %v2960_v41 = vmul.f32 0.3275911, %v2956_v63  ;;  %v2954_v47 = vand.u32 2147483647, %v9402_v57  ;;  %v9408_v10 = vmul.f32 0.70710677, %v9404_v19  ;;  %v9410_v56 = vadd.f32 %v2934_v32, %v2869_v39 }
0x1116   :  { %v3008_v35 = vsub.f32 0.0, %v2956_v63  ;;  %vm3030_vm13 = vcmp.lt.f32.partialorder %v9402_v57, 0.0 }
0x1117   :  { %v2964_v4 = vadd.f32 1.0, %v2960_v41  ;;  %v2958_v5 = vmul.f32 0.3275911, %v2954_v47  ;;  %v2957_v26 = vand.u32 2147483647, %v9408_v10  ;;  %v3006_v11 = vsub.f32 0.0, %v2954_v47 }
0x1118   :  { %v9414_v58 = vmul.f32 0.70710677, %v9410_v56  ;;  %v3012_v17 = vmul.f32 %v3008_v35, %v2956_v63  ;;  %vm3033_vm14 = vcmp.lt.f32.partialorder %v9408_v10, 0.0  ;;  %v2947_v57 = vmul.f32 0.5, %v9410_v56 }
0x1119   :  { %7866 = vrcp.f32 %v2964_v4  ;;  %v2962_v55 = vadd.f32 1.0, %v2958_v5  ;;  %v2961_v44 = vmul.f32 0.3275911, %v2957_v26  ;;  %v3009_v22 = vsub.f32 0.0, %v2957_v26 }
0x111a   :  { %v2955_v9 = vand.u32 2147483647, %v9414_v58  ;;  %v3010_v8 = vmul.f32 %v3006_v11, %v2954_v47  ;;  %v3018_v53 = vmul.f32 1.442695, %v3012_v17  ;;  %vm3031_vm15 = vcmp.lt.f32.partialorder %v9414_v58, 0.0  ;;  %v3055_v58 = vpop.permute.xlu1 %3054 }
0x111b   :  { %7868 = vrcp.f32 %v2962_v55  ;;  %v2965_v59 = vadd.f32 1.0, %v2961_v44  ;;  %v3013_v2 = vmul.f32 %v3009_v22, %v2957_v26  ;;  %v2946_v10 = vmul.f32 0.5, %v9398_v61  ;;  %v3060_v61 = vpop.permute.xlu0 %3059 }
0x111c   :  { %v2959_v3 = vmul.f32 0.3275911, %v2955_v9  ;;  %v3007_v48 = vsub.f32 0.0, %v2955_v9  ;;  %v3014_v7 = vmul.f32 1.442695, %v3010_v8 }
0x111d   :  { %7870 = vrcp.f32 %v2965_v59  ;;  %v3020_v1 = vmul.f32 1.442695, %v3013_v2 }
0x111e   :  { %v2963_v33 = vadd.f32 1.0, %v2959_v3  ;;  %v3011_v46 = vmul.f32 %v3007_v48, %v2955_v9 }
0x1120   :  { %7872 = vrcp.f32 %v2963_v33  ;;  %v3016_v63 = vmul.f32 1.442695, %v3011_v46 }
0x1121   :  { %7874 = vpow2.f32 %v3018_v53 }
0x1122   :  { %7876 = vpow2.f32 %v3014_v7 }
0x1123   :  { %7878 = vpow2.f32 %v3020_v1 }
0x1124   :  { %7880 = vpow2.f32 %v3016_v63 }
0x1126   :  { %v7867_v54 = vpop.eup %7866 }
0x1127   :  { %v2972_v24 = vmul.f32 1.0614054, %v7867_v54 }
0x1128   :  { %v7869_v27 = vpop.eup %7868 }
0x1129   :  { %v2976_v40 = vadd.f32 -1.4531521, %v2972_v24  ;;  %v2970_v36 = vmul.f32 1.0614054, %v7869_v27 }
0x112a   :  { %v7871_v15 = vpop.eup %7870 }
0x112b   :  { %v2980_v28 = vmul.f32 %v7867_v54, %v2976_v40  ;;  %v2974_v18 = vadd.f32 -1.4531521, %v2970_v36  ;;  %v2973_v34 = vmul.f32 1.0614054, %v7871_v15 }
0x112d   :  { %v2984_v25 = vadd.f32 1.4214138, %v2980_v28  ;;  %v7873_v0 = vpop.eup %7872  ;;  %v2978_v12 = vmul.f32 %v7869_v27, %v2974_v18  ;;  %v2977_v14 = vadd.f32 -1.4531521, %v2973_v34 }
0x112e   :  { %v2971_v45 = vmul.f32 1.0614054, %v7873_v0  ;;  %v7875_v22 = vpop.eup %7874 }
0x112f   :  { %v2988_v60 = vmul.f32 %v7867_v54, %v2984_v25  ;;  %v2982_v32 = vadd.f32 1.4214138, %v2978_v12  ;;  %v2981_v39 = vmul.f32 %v7871_v15, %v2977_v14  ;;  %v7877_v36 = vpop.eup %7876 }
0x1130   :  { %v2975_v47 = vadd.f32 -1.4531521, %v2971_v45  ;;  %v7879_v34 = vpop.eup %7878 }
0x1131   :  { %v2992_v41 = vadd.f32 -0.28449672, %v2988_v60  ;;  %v2986_v4 = vmul.f32 %v7869_v27, %v2982_v32  ;;  %v2985_v5 = vadd.f32 1.4214138, %v2981_v39  ;;  %v7881_v60 = vpop.eup %7880 }
0x1132   :  { %v2979_v55 = vmul.f32 %v7873_v0, %v2975_v47 }
0x1133   :  { %v2996_v26 = vmul.f32 %v7867_v54, %v2992_v41  ;;  %v2990_v44 = vadd.f32 -0.28449672, %v2986_v4  ;;  %v2989_v9 = vmul.f32 %v7871_v15, %v2985_v5  ;;  %v2948_v5 = vmul.f32 0.5, %v9393_v62 }
0x1134   :  { %v2983_v3 = vadd.f32 1.4214138, %v2979_v55 }
0x1135   :  { %v3000_v59 = vadd.f32 0.2548296, %v2996_v26  ;;  %v2994_v33 = vmul.f32 %v7869_v27, %v2990_v44  ;;  %v2993_v35 = vadd.f32 -0.28449672, %v2989_v9  ;;  %v2949_v26 = vmul.f32 0.5, %v9404_v19  ;;  %v7558_v19 = vld [vmem:[%s8902_s23 + $0x8] sm:$0xff]  }
0x1136   :  { %v2987_v17 = vmul.f32 %v7873_v0, %v2983_v3 }
0x1137   :  { %v3004_v11 = vmul.f32 %v7867_v54, %v3000_v59  ;;  %v2998_v8 = vadd.f32 0.2548296, %v2994_v33  ;;  %v2997_v24 = vmul.f32 %v7871_v15, %v2993_v35 }
0x1138   :  { %v2991_v48 = vadd.f32 -0.28449672, %v2987_v17  ;;  %v10684_v17 = vmov 0  }
0x1139   :  { %v3024_v53 = vmul.f32 %v7875_v22, %v3004_v11  ;;  %v3002_v2 = vmul.f32 %v7869_v27, %v2998_v8  ;;  %v3001_v40 = vadd.f32 0.2548296, %v2997_v24 }
0x113a   :  { %v2995_v28 = vmul.f32 %v7873_v0, %v2991_v48 }
0x113b   :  { %v3028_v7 = vsub.f32 1.0, %v3024_v53  ;;  %v3022_v46 = vmul.f32 %v7877_v36, %v3002_v2  ;;  %v3005_v18 = vmul.f32 %v7871_v15, %v3001_v40 }
0x113c   :  { %v2999_v25 = vadd.f32 0.2548296, %v2995_v28  ;;  %v7559_v28 = vld [vmem:[%s9458_s19 + $0x4] ss:$8 sps:$4 sm:$0xff]  }
0x113d   :  { %v3036_v1 = vsub.f32 0.0, %v3028_v7  ;;  %v3026_v12 = vsub.f32 1.0, %v3022_v46  ;;  %v3025_v14 = vmul.f32 %v7879_v34, %v3005_v18  ;;  %v397_v46 = vld [vmem:[%s6412_s28] sm:$0xff]  ;;  %v3116_v18 = vld [vmem:[%s9453_s4 + $0x8] sm:$0xff] }
0x113e   :  { %v3003_v54 = vmul.f32 %v7873_v0, %v2999_v25  ;;  %v399_v34 = vld [vmem:[%s6413_s2] sm:$0xff] }
0x113f   :  { %v3040_v45 = vsel %vm3032_vm12, %v3036_v1, %v3028_v7  ;;  %v3034_v63 = vsub.f32 0.0, %v3026_v12  ;;  %v3029_v32 = vsub.f32 1.0, %v3025_v14  ;;  %v398_v1 = vld [vmem:[%s6412_s28 + $0x8] sm:$0xff]  ;;  %v6593_v25 = vld [vmem:[%s8340_s21 + $0x20] sm:$0xff] }
0x1140   :  { %v3023_v39 = vmul.f32 %v7881_v60, %v3003_v54  ;;  %v3044_v41 = vadd.f32 1.0, %v3040_v45  ;;  %v6595_v14 = vld [vmem:[%s8345_s26 + $0x20] sm:$0xff]  ;;  %v6594_v54 = vld [vmem:[%s8340_s21 + $0x28] sm:$0xff] }
0x1141   :  { %v3037_v27 = vsub.f32 0.0, %v3029_v32  ;;  %v3038_v47 = vsel %vm3030_vm13, %v3034_v63, %v3026_v12  ;;  %v400_v12 = vld [vmem:[%s6413_s2 + $0x8] sm:$0xff]  ;;  %v6603_v60 = vld [vmem:[%s8351_s30 + $0x60] sm:$0xff]  ;;  %v6605_v63 = vld [vmem:[%s8351_s30 + $0x70] sm:$0xff] }
0x1142   :  { %v3027_v15 = vsub.f32 1.0, %v3023_v39  ;;  %v3048_v55 = vmul.f32 %v3044_v41, %v2948_v5  ;;  %v3042_v44 = vadd.f32 1.0, %v3038_v47  ;;  %v6596_v45 = vld [vmem:[%s8345_s26 + $0x28] sm:$0xff]  ;;  %v6606_v39 = vld [vmem:[%s8351_s30 + $0x78] sm:$0xff] }
0x1143   :  { %v3041_v4 = vsel %vm3033_vm14, %v3037_v27, %v3029_v32  ;;  %v6604_v32 = vld [vmem:[%s8351_s30 + $0x68] sm:$0xff] }
0x1144   :  { %v3045_v29 = vadd.f32 1.0, %v3041_v4  ;;  %v3035_v0 = vsub.f32 0.0, %v3027_v15  ;;  %v3046_v11 = vmul.f32 %v3042_v44, %v2946_v10 }
0x1146   :  { %v3049_v9 = vmul.f32 %v3045_v29, %v2949_v26  ;;  %v3039_v59 = vsel %vm3031_vm15, %v3035_v0, %v3027_v15 }
0x1147   :  { %v3043_v3 = vadd.f32 1.0, %v3039_v59 }
0x1148   :  { %v3051_v33 = vpack.c.bf16 %v3049_v9, %v3048_v55 }
0x1149   :  { %v3047_v35 = vmul.f32 %v3043_v3, %v2947_v57 }
0x114a   :  { %7254 = vmatpush3.bf16.msra.mxu0 %v3051_v33 }
0x114b   :  { %7255 = vmatprep.subr.bf16.mxu0 %v10683_v50  ;;  %v3050_v62 = vpack.c.bf16 %v3047_v35, %v3046_v11 }
0x114e   :  { %7256 = vmatpush3.bf16.msra.mxu0 %v3050_v62 }
0x114f   :  { %3198 = vmatprep.subr.bf16.mxu0 %v10684_v17 }
0x1151   :  { %7258 = vmatmul.mubr.msk.bf16.vlgmr.msra.gmra.mxu0 %vm1729_vm11, %v7558_v19 }
0x1152   :  { %6592 = vmatprep.mubr.msk.bf16.mxu0 %vm348_vm5, %v7559_v28 }
0x1211   :  { %v3104_v22 = vpop.f32.mrf.mxu0 }
0x1212   :  { %v3105_v8 = vadd.f32 %v3104_v22, %v3055_v58 }
0x1213   :  { %v7259_v56 = vpop.f32.mrf.mxu0 }
0x1214   :  { %v3111_v24 = vadd.f32 %v3105_v8, %v9379_v23 }
0x1215   :  { %v3107_v53 = vpop.f32.mrf.mxu0 }
0x1216   :  { %v3108_v48 = vadd.f32 %v3107_v53, %v3060_v61  ;;  %3155 = vrot.lane.b32.xlu1 %v3111_v24, %s8188_s7  ;;  %v9435_v36 = vmul.f32 %v3111_v24, %v8267_v20 }
0x1217   :  { %v7260_v2 = vpop.f32.mrf.mxu0 }
0x1218   :  { %v3112_v40 = vadd.f32 %v3108_v48, %v9382_v6  ;;  %v3115_v6 = vld [vmem:[%s9453_s4] sm:$0xff] }
0x121a   :  { %3149 = vrot.lane.b32.xlu1 %v3111_v24, %s8190_s12  ;;  %3157 = vrot.lane.b32.xlu0 %v3112_v40, %s8188_s7  ;;  %v9438_v7 = vmul.f32 %v3112_v40, %v8267_v20 }
0x121c   :  { %v3171_v23 = vpack.c.bf16 %v9438_v7, %v9435_v36 }
0x121e   :  { %3143 = vrot.lane.b32.xlu1 %v3111_v24, %s8191_s13  ;;  %3151 = vrot.lane.b32.xlu0 %v3112_v40, %s8190_s12 }
0x1222   :  { %3135 = vrot.lane.b32.xlu1 %v3111_v24, %s10678_s14  ;;  %3145 = vrot.lane.b32.xlu0 %v3112_v40, %s8191_s13 }
0x1226   :  { %3129 = vrot.lane.b32.xlu1 %v3111_v24, %s10676_s15  ;;  %3137 = vrot.lane.b32.xlu0 %v3112_v40, %s10678_s14  ;;  %s10688_s14 = smov 1  }
0x122a   :  { %3123 = vrot.lane.b32.xlu1 %v3111_v24, %s8195_s16  ;;  %3131 = vrot.lane.b32.xlu0 %v3112_v40, %s10676_s15  ;;  %s10689_s15 = smov 7  }
0x122e   :  { %3117 = vrot.lane.b32.xlu1 %v3111_v24, %s8196_s17  ;;  %3125 = vrot.lane.b32.xlu0 %v3112_v40, %s8195_s16 }
0x1232   :  { %3161 = vrot.lane.b32.xlu1 %v3111_v24, %s8187_s6  ;;  %3119 = vrot.lane.b32.xlu0 %v3112_v40, %s8196_s17 }
0x1236   :  { %3178 = vperm.xlu1 %7538, %v3115_v6   ;;  %3163 = vrot.lane.b32.xlu0 %v3112_v40, %s8187_s6 }
0x123a   :  { %3267 = vperm.xlu1 %7538, %v397_v46   ;;  %3183 = vperm.xlu0 %7537, %v3116_v18   ;;  %v8184_v18 = vld [vmem:[%s8256_s24 + $0x8] ss:$0 sm:$0xff] }
0x123e   :  { %3279 = vperm.xlu1 %7538, %v399_v34   ;;  %3272 = vperm.xlu0 %7537, %v398_v1  }
0x1242   :  { %3393 = vperm.xlu1 %7538, %v6593_v25   ;;  %3284 = vperm.xlu0 %7537, %v400_v12   ;;  %v7561_v12 = vld [vmem:[%s9458_s19] ss:$8 sps:$4 sm:$0xff]  }
0x1246   :  { %3405 = vperm.xlu1 %7538, %v6595_v14   ;;  %3398 = vperm.xlu0 %7537, %v6594_v54  }
0x124a   :  { %3418 = vperm.xlu1 %7538, %v6603_v60   ;;  %3410 = vperm.xlu0 %7537, %v6596_v45  }
0x124e   :  { %3428 = vperm.xlu1 %7538, %v6605_v63   ;;  %3423 = vperm.xlu0 %7537, %v6604_v32  }
0x1252   :  { %3433 = vperm.xlu0 %7537, %v6606_v39  }
0x1288   :  { %v3156_v27 = vpop.permute.xlu1 %3155 }
0x1289   :  { %v3159_v47 = vmul.f32 %v3156_v27, %v8262_v13 }
0x128c   :  { %v3150_v41 = vpop.permute.xlu1 %3149  ;;  %v3158_v15 = vpop.permute.xlu0 %3157 }
0x128d   :  { %v3160_v4 = vmul.f32 %v3158_v15, %v8262_v13  ;;  %v3153_v0 = vmul.f32 %v3150_v41, %v8264_v16 }
0x128f   :  { %v3174_v5 = vpack.c.bf16 %v3160_v4, %v3159_v47 }
0x1290   :  { %v3144_v26 = vpop.permute.xlu1 %3143  ;;  %v3152_v29 = vpop.permute.xlu0 %3151 }
0x1291   :  { %v3154_v55 = vmul.f32 %v3152_v29, %v8264_v16  ;;  %3199 = vmatpush1.bf16.msra.mxu0 %v3174_v5  ;;  %v3147_v57 = vmul.f32 %v3144_v26, %v8269_v21 }
0x1292   :  { %3200 = vmatprep.subr.bf16.mxu0 %v10684_v17 }
0x1293   :  { %v3173_v44 = vpack.c.bf16 %v3154_v55, %v3153_v0 }
0x1294   :  { %v3136_v9 = vpop.permute.xlu1 %3135  ;;  %v3146_v59 = vpop.permute.xlu0 %3145 }
0x1295   :  { %v3148_v3 = vmul.f32 %v3146_v59, %v8269_v21  ;;  %3201 = vmatpush1.bf16.msra.mxu0 %v3173_v44  ;;  %v3139_v19 = vmul.f32 %v3136_v9, %v8276_v31 }
0x1296   :  { %3202 = vmatprep.subr.bf16.mxu0 %v10684_v17 }
0x1297   :  { %v3172_v10 = vpack.c.bf16 %v3148_v3, %v3147_v57 }
0x1298   :  { %v3130_v33 = vpop.permute.xlu1 %3129  ;;  %v3138_v35 = vpop.permute.xlu0 %3137 }
0x1299   :  { %3203 = vmatpush1.bf16.msra.mxu0 %v3172_v10  ;;  %v3140_v11 = vmul.f32 %v3138_v35, %v8276_v31  ;;  %v3133_v24 = vmul.f32 %v3130_v33, %v8274_v30 }
0x129a   :  { %3204 = vmatprep.subr.bf16.mxu0 %v10684_v17 }
0x129b   :  { %v3170_v22 = vpack.c.bf16 %v3140_v11, %v3139_v19 }
0x129c   :  { %v3132_v62 = vpop.permute.xlu0 %3131  ;;  %v3124_v58 = vpop.permute.xlu1 %3123 }
0x129d   :  { %3205 = vmatpush1.bf16.msra.mxu0 %v3171_v23  ;;  %v3134_v8 = vmul.f32 %v3132_v62, %v8274_v30  ;;  %v3127_v40 = vmul.f32 %v3124_v58, %v8283_v38 }
0x129e   :  { %3206 = vmatprep.subr.bf16.mxu0 %v10684_v17 }
0x129f   :  { %v3169_v61 = vpack.c.bf16 %v3134_v8, %v3133_v24 }
0x12a0   :  { %v3126_v56 = vpop.permute.xlu0 %3125  ;;  %v3118_v48 = vpop.permute.xlu1 %3117 }
0x12a1   :  { %3207 = vmatpush1.bf16.msra.mxu0 %v3170_v22  ;;  %v3128_v53 = vmul.f32 %v3126_v56, %v8283_v38  ;;  %v3121_v6 = vmul.f32 %v3118_v48, %v8281_v37 }
0x12a2   :  { %3208 = vmatprep.subr.bf16.mxu0 %v10684_v17 }
0x12a3   :  { %v3168_v36 = vpack.c.bf16 %v3128_v53, %v3127_v40 }
0x12a4   :  { %v3120_v2 = vpop.permute.xlu0 %3119  ;;  %v3162_v28 = vpop.permute.xlu1 %3161 }
0x12a5   :  { %3209 = vmatpush1.bf16.msra.mxu0 %v3169_v61  ;;  %v3122_v7 = vmul.f32 %v3120_v2, %v8281_v37  ;;  %v3165_v1 = vmul.f32 %v8184_v18, %v3162_v28 }
0x12a6   :  { %3210 = vmatprep.subr.bf16.mxu0 %v10684_v17 }
0x12a7   :  { %v3167_v46 = vpack.c.bf16 %v3122_v7, %v3121_v6 }
0x12a8   :  { %v3164_v23 = vpop.permute.xlu0 %3163 }
0x12a9   :  { %3211 = vmatpush1.bf16.msra.mxu0 %v3168_v36  ;;  %v3166_v34 = vmul.f32 %v8184_v18, %v3164_v23 }
0x12aa   :  { %3212 = vmatprep.subr.bf16.mxu0 %v10684_v17 }
0x12ab   :  { %v3175_v25 = vpack.c.bf16 %v3166_v34, %v3165_v1 }
0x12ad   :  { %3213 = vmatpush1.bf16.msra.mxu0 %v3167_v46 }
0x12ae   :  { %3228 = vmatprep.subr.bf16.mxu0 %v10684_v17 }
0x12b1   :  { %3229 = vmatpush2.bf16.msra.mxu0 %v3175_v25  ;;  %v3179_v54 = vpop.permute.xlu1 %3178 }
0x12b4   :  { %3231 = vmatmul.mubr.bf16.vlgmr.msra.gmra.mxu0 %v7561_v12 }
0x12b5   :  { %v3184_v63 = vpop.permute.xlu0 %3183  ;;  %v9514_v22 = vpop.permute.xlu1 %3267 }
0x12b9   :  { %v9516_v8 = vpop.permute.xlu0 %3272  ;;  %v9520_v2 = vpop.permute.xlu1 %3279 }
0x12ba   :  { %10685 = vst [vmem:[#allocation3_spill] sm:$0xff] %v9520_v2 }
0x12bd   :  { %v9522_v40 = vpop.permute.xlu0 %3284 }
0x12be   :  { %10686 = vst [vmem:[#allocation4_spill] sm:$0xff] %v9522_v40 }
0x1374   :  { %v3232_v14 = vpop.f32.mrf.mxu0 }
0x1375   :  { %v3233_v45 = vadd.f32 %v3232_v14, %v3179_v54 }
0x1376   :  { %v3234_v60 = vpop.f32.mrf.mxu0 }
0x1377   :  { %v3239_v41 = vadd.f32 %v3233_v45, %v8404_v51 }
0x1378   :  { %v3235_v32 = vpop.f32.mrf.mxu0 }
0x1379   :  { %v3236_v39 = vadd.f32 %v3235_v32, %v3184_v63 }
0x137a   :  { %v3237_v27 = vpop.f32.mrf.mxu0 }
0x137b   :  { %v3240_v15 = vadd.f32 %v3236_v39, %v8407_v52 }
0x137d   :  { %v3241_v47 = vadd.f32 %v3240_v15, %v3239_v41 }
0x137f   :  { %v3242_v4 = vrot.slane %v3241_v47, 4 }
0x1381   :  { %v3243_v5 = vadd.f32 %v3242_v4, %v3241_v47 }
0x1383   :  { %v3244_v26 = vrot.slane %v3243_v5, 2 }
0x1385   :  { %v3245_v29 = vadd.f32 %v3244_v26, %v3243_v5 }
0x1387   :  { %v3246_v0 = vrot.slane %v3245_v29, 1 }
0x1389   :  { %v3247_v55 = vadd.f32 %v3246_v0, %v3245_v29 }
0x138b   :  { %v3248_v44 = vmul.f32 0.0625, %v3247_v55 }
0x138d   :  { %v3249_v9 = vsub.f32 %v3239_v41, %v3248_v44  ;;  %v3250_v59 = vsub.f32 %v3240_v15, %v3248_v44 }
0x138f   :  { %v3251_v57 = vmul.f32 %v3249_v9, %v3249_v9  ;;  %v3252_v3 = vmul.f32 %v3250_v59, %v3250_v59 }
0x1391   :  { %v3253_v10 = vadd.f32 %v3252_v3, %v3251_v57 }
0x1393   :  { %v3254_v33 = vrot.slane %v3253_v10, 4 }
0x1395   :  { %v3255_v35 = vadd.f32 %v3254_v33, %v3253_v10 }
0x1397   :  { %v3256_v11 = vrot.slane %v3255_v35, 2 }
0x1399   :  { %v3257_v62 = vadd.f32 %v3256_v11, %v3255_v35 }
0x139b   :  { %v3258_v51 = vrot.slane %v3257_v62, 1 }
0x139d   :  { %v3259_v19 = vadd.f32 %v3258_v51, %v3257_v62 }
0x139f   :  { %v3260_v52 = vmul.f32 0.0625, %v3259_v19 }
0x13a1   :  { %v3261_v58 = vadd.f32 1e-05, %v3260_v52 }
0x13a3   :  { %7882 = vrsqrt.f32 %v3261_v58 }
0x13b0   :  { %v7883_v56 = vpop.eup %7882 }
0x13b1   :  { %v3263_v24 = vmul.f32 %v7883_v56, %v3249_v9  ;;  %v3264_v61 = vmul.f32 %v7883_v56, %v3250_v59  ;;  %v10687_v9 = vld [vmem:[#allocation2_spill] sm:$0xff] }
0x13b3   :  { %v3275_v53 = vmul.f32 %v9514_v22, %v3263_v24  ;;  %v3276_v48 = vmul.f32 %v9516_v8, %v3264_v61 }
0x13b5   :  { %v3287_v36 = vadd.f32 %v9520_v2, %v3275_v53  ;;  %v3288_v7 = vadd.f32 %v9522_v40, %v3276_v48 }
0x13b7   :  { %v3289_v23 = vadd.f32 %v3288_v7, %v3287_v36 }
0x13b9   :  { %v3290_v6 = vrot.slane %v3289_v23, 4 }
0x13bb   :  { %v3291_v28 = vadd.f32 %v3290_v6, %v3289_v23  ;;  %v3394_v23 = vpop.permute.xlu1 %3393  ;;  %v3399_v6 = vpop.permute.xlu0 %3398 }
0x13bd   :  { %v3292_v46 = vrot.slane %v3291_v28, 2 }
0x13bf   :  { %v3293_v18 = vadd.f32 %v3292_v46, %v3291_v28 }
0x13c1   :  { %v3294_v34 = vrot.slane %v3293_v18, 1 }
0x13c3   :  { %v3295_v1 = vadd.f32 %v3294_v34, %v3293_v18 }
0x13c5   :  { %v3296_v25 = vmul.f32 0.0625, %v3295_v1 }
0x13c7   :  { %v3297_v12 = vsub.f32 %v3287_v36, %v3296_v25  ;;  %v3298_v14 = vsub.f32 %v3288_v7, %v3296_v25  ;;  %v3406_v25 = vpop.permute.xlu1 %3405 }
0x13c9   :  { %v3299_v54 = vmul.f32 %v3297_v12, %v3297_v12  ;;  %v3300_v60 = vmul.f32 %v3298_v14, %v3298_v14 }
0x13cb   :  { %v3301_v45 = vadd.f32 %v3300_v60, %v3299_v54 }
0x13cd   :  { %v3302_v63 = vrot.slane %v3301_v45, 4 }
0x13cf   :  { %v3303_v32 = vadd.f32 %v3302_v63, %v3301_v45  ;;  %v7562_v45 = vld [vmem:[%s8391_s5 + $0x30] sm:$0xff]   ;;  %v7563_v63 = vld [vmem:[%s8391_s5 + $0x38] sm:$0xff]  }
0x13d1   :  { %v3304_v39 = vrot.slane %v3303_v32, 2 }
0x13d3   :  { %v3305_v27 = vadd.f32 %v3304_v39, %v3303_v32  ;;  %v3419_v32 = vpop.permute.xlu1 %3418 }
0x13d5   :  { %v3306_v41 = vrot.slane %v3305_v27, 1 }
0x13d7   :  { %v3307_v15 = vadd.f32 %v3306_v41, %v3305_v27 }
0x13d9   :  { %v3308_v47 = vmul.f32 0.0625, %v3307_v15 }
0x13db   :  { %v3309_v4 = vadd.f32 1e-05, %v3308_v47 }
0x13dd   :  { %7884 = vrsqrt.f32 %v3309_v4 }
0x13ea   :  { %v7885_v5 = vpop.eup %7884 }
0x13eb   :  { %v3311_v26 = vmul.f32 %v7885_v5, %v3297_v12  ;;  %v3312_v29 = vmul.f32 %v7885_v5, %v3298_v14  ;;  %v3411_v12 = vpop.permute.xlu0 %3410 }
0x13ed   :  { %v3313_v0 = vmul.f32 %v3311_v26, %v8393_v42  ;;  %v3314_v55 = vmul.f32 %v3312_v29, %v8395_v43 }
0x13ef   :  { %v9529_v44 = vadd.f32 %v3313_v0, %v8399_v49  ;;  %v9532_v59 = vadd.f32 %v3314_v55, %v10687_v9  ;;  %v3424_v47 = vpop.permute.xlu0 %3423  ;;  %v3429_v55 = vpop.permute.xlu1 %3428 }
0x13f1   :  { %v3367_v57 = vadd.f32 %v9532_v59, %v9529_v44 }
0x13f3   :  { %v3368_v3 = vrot.slane %v3367_v57, 4 }
0x13f5   :  { %v3369_v10 = vadd.f32 %v3368_v3, %v3367_v57 }
0x13f7   :  { %v3370_v33 = vrot.slane %v3369_v10, 2 }
0x13f9   :  { %v3371_v35 = vadd.f32 %v3370_v33, %v3369_v10 }
0x13fb   :  { %v3372_v11 = vrot.slane %v3371_v35, 1 }
0x13fd   :  { %v3373_v62 = vadd.f32 %v3372_v11, %v3371_v35  ;;  %v3434_v35 = vpop.permute.xlu0 %3433 }
0x13ff   :  { %v3374_v51 = vmul.f32 0.0625, %v3373_v62 }
0x1401   :  { %v3375_v42 = vsub.f32 %v9529_v44, %v3374_v51  ;;  %v3376_v43 = vsub.f32 %v9532_v59, %v3374_v51 }
0x1403   :  { %v3377_v19 = vmul.f32 %v3375_v42, %v3375_v42  ;;  %v3378_v49 = vmul.f32 %v3376_v43, %v3376_v43 }
0x1405   :  { %v3379_v52 = vadd.f32 %v3378_v49, %v3377_v19 }
0x1407   :  { %v3380_v58 = vrot.slane %v3379_v52, 4 }
0x1409   :  { %v3381_v56 = vadd.f32 %v3380_v58, %v3379_v52 }
0x140b   :  { %v3382_v24 = vrot.slane %v3381_v56, 2 }
0x140d   :  { %v3383_v61 = vadd.f32 %v3382_v24, %v3381_v56 }
0x140f   :  { %v3384_v53 = vrot.slane %v3383_v61, 1 }
0x1411   :  { %v3385_v48 = vadd.f32 %v3384_v53, %v3383_v61 }
0x1413   :  { %v3386_v36 = vmul.f32 0.0625, %v3385_v48 }
0x1415   :  { %v3387_v7 = vadd.f32 1e-05, %v3386_v36 }
0x1417   :  { %7886 = vrsqrt.f32 %v3387_v7 }
0x1424   :  { %v7887_v28 = vpop.eup %7886 }
0x1425   :  { %v3389_v46 = vmul.f32 %v7887_v28, %v3375_v42  ;;  %v3390_v18 = vmul.f32 %v7887_v28, %v3376_v43 }
0x1427   :  { %v3401_v34 = vmul.f32 %v3394_v23, %v3389_v46  ;;  %v3402_v1 = vmul.f32 %v3399_v6, %v3390_v18 }
0x1429   :  { %v3413_v14 = vadd.f32 %v3406_v25, %v3401_v34  ;;  %v3414_v54 = vadd.f32 %v3411_v12, %v3402_v1 }
0x142b   :  { %v3415_v60 = vpack.c.bf16 %v3414_v54, %v3413_v14 }
0x142d   :  { %7262 = vmatpush3.bf16.msra.mxu1 %v3415_v60 }
0x142e   :  { %7293 = vmatprep.subr.bf16.mxu1 %v10683_v50 }
0x1430   :  { %7264 = vmatmul.mubr.msk.bf16.vlgmr.msra.gmra.mxu1 %vm348_vm5, %v7562_v45 }
0x1431   :  { %7267 = vmatprep.mubr.msk.bf16.mxu1 %vm8194_vm0, %v10683_v50 }
0x1438   :  { %7268 = vmatmul.mubr.msk.bf16.gmra.mxu1 %vm348_vm5, %v7563_v63 }
0x1439   :  { %7271 = vmatprep.mubr.msk.bf16.mxu1 %vm8194_vm0, %v10683_v50 }
0x14f0   :  { %v3504_v39 = vpop.f32.mrf.mxu1 }
0x14f1   :  { %v3505_v27 = vadd.f32 %v3504_v39, %v3419_v32 }
0x14f2   :  { %v7265_v41 = vpop.f32.mrf.mxu1 }
0x14f3   :  { %v3527_v15 = vmul.f32 0.35355338, %v3505_v27 }
0x14f4   :  { %v3507_v4 = vpop.f32.mrf.mxu1 }
0x14f5   :  { %v3528_v5 = vpack.c.bf16 %v3527_v15, %v3527_v15  ;;  %v3508_v26 = vadd.f32 %v3507_v4, %v3424_v47  ;;  %v6651_v15 = vld [vmem:[%s8482_s10 + $0x270] sm:$0xff] }
0x14f6   :  { %v7266_v29 = vpop.f32.mrf.mxu1 }
0x14f7   :  { %v3881_v0 = vmul.f32 0.35355338, %v3508_v26  ;;  %3548 = vxpose.xlu1.c.b16.start.end [1/1] (short) %v3528_v5, 128  ;;  %v6652_v26 = vld [vmem:[%s8482_s10 + $0x278] sm:$0xff] }
0x14f8   :  { %v3512_v9 = vpop.f32.mrf.mxu1 }
0x14f9   :  { %v3882_v57 = vpack.c.bf16 %v3881_v0, %v3881_v0  ;;  %v3513_v3 = vadd.f32 %v3512_v9, %v3429_v55 }
0x14fa   :  { %v7269_v10 = vpop.f32.mrf.mxu1 }
0x14fb   :  { %v3529_v33 = vpack.c.bf16 %v3513_v3, %v3513_v3  ;;  %3902 = vxpose.xlu0.c.b16.start.end [1/1] (short) %v3882_v57, 128 }
0x14fc   :  { %v3515_v11 = vpop.f32.mrf.mxu1 }
0x14fd   :  { %v3589_v62 = vsel %vm215_vm1, %v3529_v33, 0  ;;  %v3516_v51 = vadd.f32 %v3515_v11, %v3434_v35  ;;  %7497 = vmatprep.subr.msk.bf16.mxu0 %vm215_vm1, %v3529_v33 }
0x14fe   :  { %7276 = vmatpush3.bf16.msra.mxu0 %v3589_v62  ;;  %v7270_v42 = vpop.f32.mrf.mxu1 }
0x14ff   :  { %v3883_v43 = vpack.c.bf16 %v3516_v51, %v3516_v51 }
0x1501   :  { %7498 = vmatprep.subr.msk.bf16.mxu0 %vm215_vm1, %v3883_v43  ;;  %v3943_v52 = vsel %vm215_vm1, %v3883_v43, 0 }
0x1559   :  { %v3556_v19 = vpop.trf.xlu1 }
0x155a   :  { %7277 = vmatprep.mubr.msk.bf16.mxu0 %vm684_vm6, %v3556_v19 }
0x155d   :  { %v3557_v49 = vpop.trf.xlu1  ;;  %v3910_v24 = vpop.trf.xlu0 }
0x155e   :  { %7278 = vmatmul.mubr.msk.bf16.vlgmr.msra.gmra.mxu0 %vm684_vm6, %v3557_v49  ;;  %v6675_v49 = vld [vmem:[%s8482_s10 + $0x2f0] sm:$0xff] }
0x155f   :  { %7314 = vmatpush3.bf16.msra.mxu0 %v3943_v52 }
0x1560   :  { %7331 = vmatprep.subr.bf16.mxu0 %v10683_v50 }
0x1561   :  { %v3558_v58 = vpop.trf.xlu1  ;;  %v3911_v48 = vpop.trf.xlu0 }
0x1562   :  { %7281 = vmatprep.mubr.msk.bf16.mxu0 %vm684_vm6, %v3558_v58 }
0x1565   :  { %v3559_v56 = vpop.trf.xlu1  ;;  %v3912_v7 = vpop.trf.xlu0 }
0x1566   :  { %7282 = vmatmul.mubr.msk.bf16.gmra.mxu0 %vm684_vm6, %v3559_v56  ;;  %v6649_v56 = vld [vmem:[%s8482_s10 + $0x260] sm:$0xff] }
0x1569   :  { %v3560_v61 = vpop.trf.xlu1  ;;  %v3913_v6 = vpop.trf.xlu0 }
0x156a   :  { %7285 = vmatprep.mubr.msk.bf16.mxu0 %vm684_vm6, %v3560_v61  ;;  %v6676_v61 = vld [vmem:[%s8482_s10 + $0x2f8] sm:$0xff] }
0x156d   :  { %v3561_v53 = vpop.trf.xlu1  ;;  %v3914_v28 = vpop.trf.xlu0 }
0x156e   :  { %7286 = vmatmul.mubr.msk.bf16.gmra.mxu0 %vm684_vm6, %v3561_v53 }
0x1571   :  { %v3562_v36 = vpop.trf.xlu1  ;;  %v3915_v46 = vpop.trf.xlu0 }
0x1572   :  { %7289 = vmatprep.mubr.msk.bf16.mxu0 %vm684_vm6, %v3562_v36 }
0x1575   :  { %v3563_v23 = vpop.trf.xlu1  ;;  %v3916_v18 = vpop.trf.xlu0 }
0x1576   :  { %7290 = vmatmul.mubr.msk.bf16.gmra.mxu0 %vm684_vm6, %v3563_v23  ;;  %v6673_v23 = vld [vmem:[%s8482_s10 + $0x2e0] sm:$0xff] }
0x1577   :  { %7315 = vmatprep.mubr.msk.bf16.mxu0 %vm684_vm6, %v3910_v24 }
0x1579   :  { %v3917_v34 = vpop.trf.xlu0 }
0x157e   :  { %7316 = vmatmul.mubr.msk.bf16.vlgmr.msra.gmra.mxu0 %vm684_vm6, %v3911_v48 }
0x157f   :  { %7319 = vmatprep.mubr.msk.bf16.mxu0 %vm684_vm6, %v3912_v7  ;;  %v6650_v7 = vld [vmem:[%s8482_s10 + $0x268] sm:$0xff] }
0x1586   :  { %7320 = vmatmul.mubr.msk.bf16.gmra.mxu0 %vm684_vm6, %v3913_v6 }
0x1587   :  { %7323 = vmatprep.mubr.msk.bf16.mxu0 %vm684_vm6, %v3914_v28 }
0x158e   :  { %7324 = vmatmul.mubr.msk.bf16.gmra.mxu0 %vm684_vm6, %v3915_v46  ;;  %v6647_v46 = vld [vmem:[%s8482_s10 + $0x250] sm:$0xff] }
0x158f   :  { %7327 = vmatprep.mubr.msk.bf16.mxu0 %vm684_vm6, %v3916_v18 }
0x1596   :  { %7328 = vmatmul.mubr.msk.bf16.gmra.mxu0 %vm684_vm6, %v3917_v34  ;;  %v6674_v34 = vld [vmem:[%s8482_s10 + $0x2e8] sm:$0xff] }
0x1597   :  { %7347 = vmatprep.mubr.msk.bf16.mxu0 %vm8194_vm0, %v10683_v50 }
0x161e   :  { %v9570_v1 = vpop.f32.mrf.mxu0 }
0x1620   :  { %v9572_v25 = vpop.f32.mrf.mxu0 }
0x1622   :  { %v9574_v12 = vpop.f32.mrf.mxu0 }
0x1624   :  { %v9576_v14 = vpop.f32.mrf.mxu0 }
0x1626   :  { %v9578_v54 = vpop.f32.mrf.mxu0 }
0x1628   :  { %v9580_v60 = vpop.f32.mrf.mxu0 }
0x162a   :  { %v9582_v45 = vpop.f32.mrf.mxu0 }
0x162c   :  { %v9584_v63 = vpop.f32.mrf.mxu0 }
0x162e   :  { %v7287_v32 = vpop.f32.mrf.mxu0 }
0x1630   :  { %v3657_v39 = vpop.f32.mrf.mxu0 }
0x1632   :  { %v7288_v27 = vpop.f32.mrf.mxu0 }
0x1634   :  { %v3660_v41 = vpop.f32.mrf.mxu0 }
0x1636   :  { %v7291_v47 = vpop.f32.mrf.mxu0 }
0x1637   :  { %v9587_v4 = vadd.f32 %v7291_v47, %v6651_v15  ;;  %v9630_v15 = vadd.f32 %v7287_v32, %v6647_v46  ;;  %v6667_v46 = vld [vmem:[%s8482_s10 + $0x2b0] sm:$0xff] }
0x1638   :  { %v3673_v5 = vpop.f32.mrf.mxu0 }
0x1639   :  { %3716 = vmax.xlane.f32.xlu0 %v9587_v4  ;;  %v9614_v48 = vadd.f32 %v6649_v56, %v3673_v5  ;;  %v6648_v5 = vld [vmem:[%s8482_s10 + $0x258] sm:$0xff] }
0x163a   :  { %v7292_v29 = vpop.f32.mrf.mxu0 }
0x163b   :  { %v9591_v0 = vadd.f32 %v7292_v29, %v6652_v26  ;;  %v6671_v26 = vld [vmem:[%s8482_s10 + $0x2d0] sm:$0xff]  ;;  %v9638_v29 = vadd.f32 %v7288_v27, %v6648_v5  ;;  %v6642_v5 = vld [vmem:[%s8482_s10 + $0x228] sm:$0xff] }
0x163c   :  { %v3676_v55 = vpop.f32.mrf.mxu0 }
0x163d   :  { %3718 = vmax.xlane.f32.xlu1 %v9591_v0  ;;  %v9622_v6 = vadd.f32 %v6650_v7, %v3676_v55  ;;  %v6670_v7 = vld [vmem:[%s8482_s10 + $0x2c8] sm:$0xff] }
0x163e   :  { %v9594_v9 = vpop.f32.mrf.mxu0 }
0x1640   :  { %v9596_v57 = vpop.f32.mrf.mxu0 }
0x1642   :  { %v9598_v3 = vpop.f32.mrf.mxu0 }
0x1644   :  { %v9600_v10 = vpop.f32.mrf.mxu0 }
0x1646   :  { %v7321_v33 = vpop.f32.mrf.mxu0 }
0x1648   :  { %v9602_v35 = vpop.f32.mrf.mxu0 }
0x164a   :  { %v9604_v11 = vpop.f32.mrf.mxu0 }
0x164c   :  { %v9606_v62 = vpop.f32.mrf.mxu0 }
0x164e   :  { %v7325_v51 = vpop.f32.mrf.mxu0 }
0x164f   :  { %v9640_v55 = vadd.f32 %v7325_v51, %v6671_v26  ;;  %v9692_v26 = vadd.f32 %v6642_v5, %v9584_v63 }
0x1650   :  { %v4011_v42 = vpop.f32.mrf.mxu0 }
0x1652   :  { %v7326_v43 = vpop.f32.mrf.mxu0 }
0x1654   :  { %v4014_v19 = vpop.f32.mrf.mxu0 }
0x1656   :  { %v7329_v52 = vpop.f32.mrf.mxu0 }
0x1657   :  { %v9609_v58 = vadd.f32 %v7329_v52, %v6675_v49  ;;  %v6645_v49 = vld [vmem:[%s8482_s10 + $0x240] sm:$0xff]  ;;  %v6672_v52 = vld [vmem:[%s8482_s10 + $0x2d8] sm:$0xff] }
0x1658   :  { %v4027_v24 = vpop.f32.mrf.mxu0  ;;  %v9646_v32 = vadd.f32 %v6645_v49, %v3657_v39  ;;  %v9648_v56 = vadd.f32 %v7326_v43, %v6672_v52  ;;  %v9665_v43 = vadd.f32 %v6670_v7, %v4014_v19  ;;  %v6640_v52 = vld [vmem:[%s8482_s10 + $0x218] sm:$0xff]  ;;  %v6637_v7 = vld [vmem:[%s8482_s10 + $0x200] sm:$0xff] }
0x1659   :  { %4070 = vmax.xlane.f32.xlu0 %v9609_v58  ;;  %v9624_v28 = vadd.f32 %v6673_v23, %v4027_v24  ;;  %v6646_v24 = vld [vmem:[%s8482_s10 + $0x248] sm:$0xff]  ;;  %v6644_v23 = vld [vmem:[%s8482_s10 + $0x238] sm:$0xff] }
0x165a   :  { %v7330_v53 = vpop.f32.mrf.mxu0  ;;  %v9654_v27 = vadd.f32 %v6646_v24, %v3660_v41  ;;  %v9672_v41 = vadd.f32 %v9582_v45, %v6644_v23  ;;  %v6665_v45 = vld [vmem:[%s8482_s10 + $0x2a0] sm:$0xff]  ;;  %v6663_v24 = vld [vmem:[%s8482_s10 + $0x290] sm:$0xff]  ;;  %v6664_v23 = vld [vmem:[%s8482_s10 + $0x298] sm:$0xff] }
0x165b   :  { %v9616_v36 = vadd.f32 %v7330_v53, %v6676_v61  ;;  %v6669_v61 = vld [vmem:[%s8482_s10 + $0x2c0] sm:$0xff]  ;;  %v6643_v53 = vld [vmem:[%s8482_s10 + $0x230] sm:$0xff]  ;;  %v9695_v49 = vadd.f32 %v6665_v45, %v9602_v35 }
0x165c   :  { %v4030_v18 = vpop.f32.mrf.mxu0  ;;  %v9656_v51 = vadd.f32 %v6669_v61, %v4011_v42  ;;  %v9663_v39 = vadd.f32 %v9578_v54, %v6643_v53  ;;  %v9674_v42 = vadd.f32 %v7321_v33, %v6667_v46  ;;  %v7564_v33 = vld [vmem:[%s8391_s5 + $0x40] sm:$0xff]   ;;  %v9715_v61 = vadd.f32 %v9574_v12, %v6640_v52  ;;  %v6638_v46 = vld [vmem:[%s8482_s10 + $0x208] sm:$0xff] }
0x165d   :  { %3712 = vmax.xlane.f32.xlu0 %v9614_v48  ;;  %4072 = vmax.xlane.f32.xlu1 %v9616_v36  ;;  %v9632_v47 = vadd.f32 %v6674_v34, %v4030_v18  ;;  %v6641_v18 = vld [vmem:[%s8482_s10 + $0x220] sm:$0xff]  ;;  %v6668_v34 = vld [vmem:[%s8482_s10 + $0x2b8] sm:$0xff]  ;;  %v9718_v53 = vadd.f32 %v9594_v9, %v6663_v24  ;;  %v9735_v12 = vadd.f32 %v6638_v46, %v9576_v14 }
0x165e   :  { %v9681_v54 = vadd.f32 %v6641_v18, %v9580_v60  ;;  %v9684_v19 = vadd.f32 %v9604_v11, %v6668_v34  ;;  %7272 = vmatmul.mubr.msk.bf16.gmra.mxu1 %vm348_vm5, %v7564_v33  ;;  %v6639_v60 = vld [vmem:[%s8482_s10 + $0x210] sm:$0xff]  ;;  %v6666_v11 = vld [vmem:[%s8482_s10 + $0x2a8] sm:$0xff]  ;;  %v6661_v18 = vld [vmem:[%s8482_s10 + $0x280] sm:$0xff] }
0x165f   :  { %7309 = vmatprep.mubr.msk.bf16.mxu1 %vm8194_vm0, %v10683_v50  ;;  %v9705_v63 = vadd.f32 %v9570_v1, %v6639_v60  ;;  %v9708_v35 = vadd.f32 %v6666_v11, %v9606_v62  ;;  %v9725_v1 = vadd.f32 %v6637_v7, %v9572_v25  ;;  %v9728_v62 = vadd.f32 %v9598_v3, %v6664_v23  ;;  %v6662_v34 = vld [vmem:[%s8482_s10 + $0x288] sm:$0xff] }
0x1660   :  { %v9738_v9 = vadd.f32 %v6661_v18, %v9596_v57  ;;  %v9744_v25 = vadd.f32 %v6662_v34, %v9600_v10 }
0x1661   :  { %3714 = vmax.xlane.f32.xlu1 %v9622_v6  ;;  %4066 = vmax.xlane.f32.xlu0 %v9624_v28 }
0x1665   :  { %4068 = vmax.xlane.f32.xlu1 %v9632_v47  ;;  %3708 = vmax.xlane.f32.xlu0 %v9630_v15 }
0x1669   :  { %3710 = vmax.xlane.f32.xlu1 %v9638_v29  ;;  %4062 = vmax.xlane.f32.xlu0 %v9640_v55 }
0x166d   :  { %4064 = vmax.xlane.f32.xlu1 %v9648_v56  ;;  %3704 = vmax.xlane.f32.xlu0 %v9646_v32 }
0x1671   :  { %3706 = vmax.xlane.f32.xlu1 %v9654_v27  ;;  %4058 = vmax.xlane.f32.xlu0 %v9656_v51 }
0x1675   :  { %4060 = vmax.xlane.f32.xlu1 %v9665_v43  ;;  %3700 = vmax.xlane.f32.xlu0 %v9663_v39 }
0x1679   :  { %3702 = vmax.xlane.f32.xlu1 %v9672_v41  ;;  %4054 = vmax.xlane.f32.xlu0 %v9674_v42 }
0x167d   :  { %4056 = vmax.xlane.f32.xlu1 %v9684_v19  ;;  %3696 = vmax.xlane.f32.xlu0 %v9681_v54 }
0x1681   :  { %3698 = vmax.xlane.f32.xlu1 %v9692_v26  ;;  %4050 = vmax.xlane.f32.xlu0 %v9695_v49 }
0x1685   :  { %4052 = vmax.xlane.f32.xlu1 %v9708_v35  ;;  %3692 = vmax.xlane.f32.xlu0 %v9705_v63 }
0x1689   :  { %3694 = vmax.xlane.f32.xlu1 %v9715_v61  ;;  %4046 = vmax.xlane.f32.xlu0 %v9718_v53 }
0x168d   :  { %4048 = vmax.xlane.f32.xlu1 %v9728_v62  ;;  %3688 = vmax.xlane.f32.xlu0 %v9725_v1 }
0x1691   :  { %3690 = vmax.xlane.f32.xlu1 %v9735_v12  ;;  %4042 = vmax.xlane.f32.xlu0 %v9738_v9 }
0x1695   :  { %4044 = vmax.xlane.f32.xlu1 %v9744_v25 }
0x16c2   :  { %v3717_v3 = vpop.xlane.xlu0 %3716 }
0x16c3   :  { %v3734_v5 = vsub.f32 %v9587_v4, %v3717_v3 }
0x16c5   :  { %v3764_v45 = vmul.f32 1.442695, %v3734_v5 }
0x16c6   :  { %v3719_v33 = vpop.xlane.xlu1 %3718 }
0x16c7   :  { %7888 = vpow2.f32 %v3764_v45  ;;  %v3735_v14 = vsub.f32 %v9591_v0, %v3719_v33 }
0x16c9   :  { %v3766_v57 = vmul.f32 1.442695, %v3735_v14 }
0x16cb   :  { %7890 = vpow2.f32 %v3766_v57 }
0x16d4   :  { %v9749_v60 = vpop.eup %7888 }
0x16d5   :  { %3796 = vadd.xlane.f32.xlu0 %v9749_v60 }
0x16d8   :  { %v9752_v11 = vpop.eup %7890 }
0x16d9   :  { %3798 = vadd.xlane.f32.xlu1 %v9752_v11 }
0x16e2   :  { %v4071_v10 = vpop.xlane.xlu0 %4070 }
0x16e3   :  { %v4088_v52 = vsub.f32 %v9609_v58, %v4071_v10 }
0x16e5   :  { %v4118_v24 = vmul.f32 1.442695, %v4088_v52 }
0x16e6   :  { %v3713_v4 = vpop.xlane.xlu0 %3712  ;;  %v4073_v7 = vpop.xlane.xlu1 %4072 }
0x16e7   :  { %7892 = vpow2.f32 %v4118_v24  ;;  %v3732_v23 = vsub.f32 %v9614_v48, %v3713_v4  ;;  %v4089_v48 = vsub.f32 %v9616_v36, %v4073_v7 }
0x16e9   :  { %v3760_v0 = vmul.f32 1.442695, %v3732_v23 }
0x16ea   :  { %v3715_v46 = vpop.xlane.xlu1 %3714  ;;  %v4067_v18 = vpop.xlane.xlu0 %4066 }
0x16eb   :  { %7894 = vpow2.f32 %v3760_v0  ;;  %v3733_v34 = vsub.f32 %v9622_v6, %v3715_v46  ;;  %v4086_v3 = vsub.f32 %v9624_v28, %v4067_v18 }
0x16ed   :  { %v3762_v5 = vmul.f32 1.442695, %v3733_v34  ;;  %v4114_v45 = vmul.f32 1.442695, %v4086_v3 }
0x16ee   :  { %v4069_v33 = vpop.xlane.xlu1 %4068  ;;  %v3709_v14 = vpop.xlane.xlu0 %3708 }
0x16ef   :  { %7896 = vpow2.f32 %v3762_v5  ;;  %v3730_v58 = vsub.f32 %v9630_v15, %v3709_v14  ;;  %v4120_v15 = vmul.f32 1.442695, %v4089_v48  ;;  %v4087_v3 = vsub.f32 %v9632_v47, %v4069_v33 }
0x16f0   :  { %7898 = vpow2.f32 %v4114_v45 }
0x16f1   :  { %v3756_v57 = vmul.f32 1.442695, %v3730_v58 }
0x16f2   :  { %v3711_v10 = vpop.xlane.xlu1 %3710  ;;  %v4063_v52 = vpop.xlane.xlu0 %4062 }
0x16f3   :  { %v3731_v24 = vsub.f32 %v9638_v29, %v3711_v10  ;;  %v4084_v4 = vsub.f32 %v9640_v55, %v4063_v52  ;;  %7900 = vpow2.f32 %v3756_v57  ;;  %v4116_v10 = vmul.f32 1.442695, %v4087_v3 }
0x16f4   :  { %v9763_v6 = vpop.eup %7892 }
0x16f5   :  { %v3758_v28 = vmul.f32 1.442695, %v3731_v24  ;;  %v4110_v23 = vmul.f32 1.442695, %v4084_v4  ;;  %4150 = vadd.xlane.f32.xlu0 %v9763_v6 }
0x16f6   :  { %v4065_v0 = vpop.xlane.xlu1 %4064  ;;  %v3705_v46 = vpop.xlane.xlu0 %3704 }
0x16f7   :  { %7902 = vpow2.f32 %v3758_v28  ;;  %v4085_v18 = vsub.f32 %v9648_v56, %v4065_v0  ;;  %v3728_v34 = vsub.f32 %v9646_v32, %v3705_v46 }
0x16f8   :  { %v9768_v36 = vpop.eup %7894  ;;  %7904 = vpow2.f32 %v4110_v23 }
0x16f9   :  { %v3752_v29 = vmul.f32 1.442695, %v3728_v34  ;;  %3792 = vadd.xlane.f32.xlu0 %v9768_v36  ;;  %7906 = vpow2.f32 %v4120_v15  ;;  %v4112_v5 = vmul.f32 1.442695, %v4085_v18 }
0x16fa   :  { %v3707_v55 = vpop.xlane.xlu1 %3706  ;;  %v4059_v7 = vpop.xlane.xlu0 %4058 }
0x16fb   :  { %v4082_v45 = vsub.f32 %v9656_v51, %v4059_v7  ;;  %7908 = vpow2.f32 %v3752_v29  ;;  %v3729_v52 = vsub.f32 %v9654_v27, %v3707_v55 }
0x16fc   :  { %v9773_v14 = vpop.eup %7896  ;;  %7910 = vpow2.f32 %v4112_v5 }
0x16fd   :  { %v9775_v56 = vpop.eup %7898  ;;  %v4106_v32 = vmul.f32 1.442695, %v4082_v45  ;;  %3794 = vadd.xlane.f32.xlu1 %v9773_v14  ;;  %v3754_v4 = vmul.f32 1.442695, %v3729_v52 }
0x16fe   :  { %4146 = vadd.xlane.f32.xlu0 %v9775_v56  ;;  %v4061_v58 = vpop.xlane.xlu1 %4060  ;;  %v3701_v57 = vpop.xlane.xlu0 %3700 }
0x16ff   :  { %v3726_v47 = vsub.f32 %v9663_v39, %v3701_v57  ;;  %7912 = vpow2.f32 %v4106_v32  ;;  %v4083_v28 = vsub.f32 %v9665_v43, %v4061_v58 }
0x1700   :  { %v9781_v51 = vpop.eup %7900  ;;  %7914 = vpow2.f32 %v4116_v10 }
0x1701   :  { %v3748_v33 = vmul.f32 1.442695, %v3726_v47  ;;  %v4108_v18 = vmul.f32 1.442695, %v4083_v28 }
0x1702   :  { %3788 = vadd.xlane.f32.xlu0 %v9781_v51  ;;  %v3703_v48 = vpop.xlane.xlu1 %3702  ;;  %v4055_v24 = vpop.xlane.xlu0 %4054 }
0x1703   :  { %v4080_v23 = vsub.f32 %v9674_v42, %v4055_v24  ;;  %7916 = vpow2.f32 %v3748_v33  ;;  %v3727_v34 = vsub.f32 %v9672_v41, %v3703_v48 }
0x1704   :  { %v9786_v0 = vpop.eup %7902  ;;  %7918 = vpow2.f32 %v3754_v4 }
0x1705   :  { %v9788_v27 = vpop.eup %7904  ;;  %v4102_v39 = vmul.f32 1.442695, %v4080_v23  ;;  %3790 = vadd.xlane.f32.xlu1 %v9786_v0  ;;  %v3750_v5 = vmul.f32 1.442695, %v3727_v34 }
0x1706   :  { %4142 = vadd.xlane.f32.xlu0 %v9788_v27  ;;  %v4057_v46 = vpop.xlane.xlu1 %4056  ;;  %v3697_v15 = vpop.xlane.xlu0 %3696 }
0x1707   :  { %v3724_v43 = vsub.f32 %v9681_v54, %v3697_v15  ;;  %v9794_v29 = vpop.eup %7906  ;;  %7920 = vpow2.f32 %v4102_v39  ;;  %v4081_v45 = vsub.f32 %v9684_v19, %v4057_v46 }
0x1708   :  { %v9796_v42 = vpop.eup %7908  ;;  %7922 = vpow2.f32 %v4108_v18 }
0x1709   :  { %v3744_v55 = vmul.f32 1.442695, %v3724_v43  ;;  %4152 = vadd.xlane.f32.xlu1 %v9794_v29  ;;  %v9802_v32 = vpop.eup %7910  ;;  %v4104_v52 = vmul.f32 1.442695, %v4081_v45 }
0x170a   :  { %3784 = vadd.xlane.f32.xlu0 %v9796_v42  ;;  %v3699_v7 = vpop.xlane.xlu1 %3698  ;;  %v4051_v3 = vpop.xlane.xlu0 %4050 }
0x170b   :  { %v4078_v41 = vsub.f32 %v9695_v49, %v4051_v3  ;;  %7924 = vpow2.f32 %v3744_v55  ;;  %v3725_v47 = vsub.f32 %v9692_v26, %v3699_v7 }
0x170c   :  { %v9804_v54 = vpop.eup %7912  ;;  %7926 = vpow2.f32 %v3750_v5 }
0x170d   :  { %v4098_v58 = vmul.f32 1.442695, %v4078_v41  ;;  %4144 = vadd.xlane.f32.xlu1 %v9802_v32  ;;  %v9810_v33 = vpop.eup %7914  ;;  %v3746_v28 = vmul.f32 1.442695, %v3725_v47 }
0x170e   :  { %4138 = vadd.xlane.f32.xlu0 %v9804_v54  ;;  %v4053_v57 = vpop.xlane.xlu1 %4052  ;;  %v3693_v10 = vpop.xlane.xlu0 %3692 }
0x170f   :  { %v3722_v19 = vsub.f32 %v9705_v63, %v3693_v10  ;;  %7928 = vpow2.f32 %v4098_v58  ;;  %v4079_v23 = vsub.f32 %v9708_v35, %v4053_v57 }
0x1710   :  { %v9812_v49 = vpop.eup %7916  ;;  %7930 = vpow2.f32 %v4104_v52 }
0x1711   :  { %v3740_v48 = vmul.f32 1.442695, %v3722_v19  ;;  %4148 = vadd.xlane.f32.xlu1 %v9810_v33  ;;  %v9818_v39 = vpop.eup %7918  ;;  %v4100_v34 = vmul.f32 1.442695, %v4079_v23 }
0x1712   :  { %3780 = vadd.xlane.f32.xlu0 %v9812_v49  ;;  %v3695_v24 = vpop.xlane.xlu1 %3694  ;;  %v4047_v4 = vpop.xlane.xlu0 %4046 }
0x1713   :  { %v4076_v26 = vsub.f32 %v9718_v53, %v4047_v4  ;;  %7932 = vpow2.f32 %v3740_v48  ;;  %v3723_v43 = vsub.f32 %v9715_v61, %v3695_v24 }
0x1714   :  { %v9820_v63 = vpop.eup %7920  ;;  %7934 = vpow2.f32 %v3746_v28 }
0x1715   :  { %v4094_v46 = vmul.f32 1.442695, %v4076_v26  ;;  %3786 = vadd.xlane.f32.xlu1 %v9818_v39  ;;  %v9826_v55 = vpop.eup %7922  ;;  %v3742_v45 = vmul.f32 1.442695, %v3723_v43  ;;  %v6607_v43 = vld [vmem:[%s8351_s30 + $0x80] sm:$0xff] }
0x1716   :  { %4134 = vadd.xlane.f32.xlu0 %v9820_v63  ;;  %v4049_v15 = vpop.xlane.xlu1 %4048  ;;  %v3689_v18 = vpop.xlane.xlu0 %3688 }
0x1717   :  { %v3720_v35 = vsub.f32 %v9725_v1, %v3689_v18  ;;  %7936 = vpow2.f32 %v4094_v46  ;;  %v4077_v41 = vsub.f32 %v9728_v62, %v4049_v15 }
0x1718   :  { %v9828_v53 = vpop.eup %7924  ;;  %7938 = vpow2.f32 %v4100_v34 }
0x1719   :  { %v3736_v7 = vmul.f32 1.442695, %v3720_v35  ;;  %4140 = vadd.xlane.f32.xlu1 %v9826_v55  ;;  %v9834_v58 = vpop.eup %7926  ;;  %v4096_v10 = vmul.f32 1.442695, %v4077_v41 }
0x171a   :  { %3776 = vadd.xlane.f32.xlu0 %v9828_v53  ;;  %v3691_v3 = vpop.xlane.xlu1 %3690  ;;  %v4043_v5 = vpop.xlane.xlu0 %4042 }
0x171b   :  { %v4074_v61 = vsub.f32 %v9738_v9, %v4043_v5  ;;  %7940 = vpow2.f32 %v3736_v7  ;;  %v3721_v52 = vsub.f32 %v9735_v12, %v3691_v3  ;;  %v6614_v7 = vld [vmem:[%s8764_s20 + $0x28] sm:$0xff] }
0x171c   :  { %v9836_v1 = vpop.eup %7928  ;;  %7942 = vpow2.f32 %v3742_v45  ;;  %v6608_v3 = vld [vmem:[%s8351_s30 + $0x88] sm:$0xff] }
0x171d   :  { %v4090_v57 = vmul.f32 1.442695, %v4074_v61  ;;  %3782 = vadd.xlane.f32.xlu1 %v9834_v58  ;;  %v9841_v47 = vpop.eup %7930  ;;  %v3738_v9 = vmul.f32 1.442695, %v3721_v52  ;;  %v6616_v45 = vld [vmem:[%s8772_s27 + $0x28] sm:$0xff]  ;;  %v6613_v61 = vld [vmem:[%s8764_s20 + $0x20] sm:$0xff] }
0x171e   :  { %4130 = vadd.xlane.f32.xlu0 %v9836_v1  ;;  %v4045_v62 = vpop.xlane.xlu1 %4044  ;;  %v9875_v34 = vpop.f32.mrf.mxu1  ;;  %v6626_v52 = vld [vmem:[%s8788_s9 + $0x58] sm:$0xff] }
0x171f   :  { %7944 = vpow2.f32 %v4090_v57  ;;  %v4075_v48 = vsub.f32 %v9744_v25, %v4045_v62  ;;  %v6618_v57 = vld [vmem:[%s8781_s3 + $0x28] sm:$0xff]  ;;  %v6617_v62 = vld [vmem:[%s8781_s3 + $0x20] sm:$0xff] }
0x1720   :  { %v9843_v19 = vpop.eup %7932  ;;  %7946 = vpow2.f32 %v4096_v10  ;;  %v7273_v35 = vpop.f32.mrf.mxu1  ;;  %v6615_v10 = vld [vmem:[%s8772_s27 + $0x20] sm:$0xff] }
0x1721   :  { %4136 = vadd.xlane.f32.xlu1 %v9841_v47  ;;  %v9848_v24 = vpop.eup %7934  ;;  %7948 = vpow2.f32 %v3738_v9  ;;  %v4092_v12 = vmul.f32 1.442695, %v4075_v48  ;;  %v6624_v9 = vld [vmem:[%s8788_s9 + $0x48] sm:$0xff]  ;;  %v6625_v48 = vld [vmem:[%s8788_s9 + $0x50] sm:$0xff]  ;;  %v6696_v35 = vld [vmem:[%s8340_s21 + $0x38] sm:$0xff] }
0x1722   :  { %3772 = vadd.xlane.f32.xlu0 %v9843_v19  ;;  %v9880_v5 = vpop.f32.mrf.mxu1 }
0x1723   :  { %7950 = vpow2.f32 %v4092_v12  ;;  %v6630_v12 = vld [vmem:[%s8797_s22 + $0x28] sm:$0xff] }
0x1724   :  { %v9850_v4 = vpop.eup %7936  ;;  %v7274_v41 = vpop.f32.mrf.mxu1 }
0x1725   :  { %3778 = vadd.xlane.f32.xlu1 %v9848_v24  ;;  %v9854_v28 = vpop.eup %7938 }
0x1726   :  { %4126 = vadd.xlane.f32.xlu0 %v9850_v4 }
0x1728   :  { %v9856_v23 = vpop.eup %7940 }
0x1729   :  { %4132 = vadd.xlane.f32.xlu1 %v9854_v28  ;;  %v9860_v25 = vpop.eup %7942 }
0x172a   :  { %3768 = vadd.xlane.f32.xlu0 %v9856_v23 }
0x172c   :  { %v9862_v26 = vpop.eup %7944 }
0x172d   :  { %3774 = vadd.xlane.f32.xlu1 %v9860_v25  ;;  %v9866_v46 = vpop.eup %7946 }
0x172e   :  { %4122 = vadd.xlane.f32.xlu0 %v9862_v26  ;;  %v9869_v15 = vpop.eup %7948 }
0x1730   :  { %v9872_v18 = vpop.eup %7950 }
0x1731   :  { %4128 = vadd.xlane.f32.xlu1 %v9866_v46 }
0x1735   :  { %3770 = vadd.xlane.f32.xlu1 %v9869_v15 }
0x1739   :  { %4124 = vadd.xlane.f32.xlu1 %v9872_v18 }
0x1744   :  { %3438 = vperm.xlu0 %7537, %v6607_v43   ;;  %v6623_v43 = vld [vmem:[%s8788_s9 + $0x40] sm:$0xff] }
0x1748   :  { %4346 = vperm.xlu0 %7537, %v6614_v7  }
0x174a   :  { %3443 = vperm.xlu1 %7538, %v6608_v3   ;;  %v6629_v3 = vld [vmem:[%s8797_s22 + $0x20] sm:$0xff] }
0x174c   :  { %4384 = vperm.xlu0 %7537, %v6616_v45   ;;  %v6698_v45 = vld [vmem:[%s8345_s26 + $0x38] sm:$0xff] }
0x174e   :  { %4341 = vperm.xlu1 %7538, %v6613_v61   ;;  %v6695_v61 = vld [vmem:[%s8340_s21 + $0x30] sm:$0xff] }
0x1750   :  { %4396 = vperm.xlu0 %7537, %v6618_v57   ;;  %v6706_v57 = vld [vmem:[%s8351_s30 + $0x98] sm:$0xff] }
0x1752   :  { %4379 = vperm.xlu1 %7538, %v6615_v10   ;;  %v6697_v10 = vld [vmem:[%s8345_s26 + $0x30] sm:$0xff] }
0x1754   :  { %4419 = vperm.xlu0 %7537, %v6626_v52   ;;  %v6708_v52 = vld [vmem:[%s8351_s30 + $0xa8] sm:$0xff] }
0x1756   :  { %4391 = vperm.xlu1 %7538, %v6617_v62   ;;  %v6705_v62 = vld [vmem:[%s8351_s30 + $0x90] sm:$0xff] }
0x1758   :  { %4409 = vperm.xlu0 %7537, %v6624_v9  }
0x175a   :  { %4414 = vperm.xlu1 %7538, %v6625_v48   ;;  %v6707_v48 = vld [vmem:[%s8351_s30 + $0xa0] sm:$0xff] }
0x175c   :  { %4600 = vperm.xlu0 %7537, %v6630_v12  }
0x175e   :  { %4404 = vperm.xlu1 %7538, %v6623_v43   ;;  %v3797_v7 = vpop.xlane.xlu0 %3796 }
0x175f   :  { %7952 = vrcp.f32 %v3797_v7 }
0x1760   :  { %4735 = vperm.xlu0 %7537, %v6696_v35  }
0x1762   :  { %4595 = vperm.xlu1 %7538, %v6629_v3   ;;  %v3799_v41 = vpop.xlane.xlu1 %3798 }
0x1763   :  { %7954 = vrcp.f32 %v3799_v41 }
0x1764   :  { %4747 = vperm.xlu0 %7537, %v6698_v45  }
0x1766   :  { %4730 = vperm.xlu1 %7538, %v6695_v61  }
0x1768   :  { %4760 = vperm.xlu0 %7537, %v6706_v57  }
0x176a   :  { %4742 = vperm.xlu1 %7538, %v6697_v10  }
0x176c   :  { %4770 = vperm.xlu0 %7537, %v6708_v52   ;;  %v7953_v9 = vpop.eup %7952 }
0x176d   :  { %v3830_v43 = vmul.f32 %v7953_v9, %v9749_v60 }
0x176e   :  { %4755 = vperm.xlu1 %7538, %v6705_v62  }
0x1770   :  { %v7955_v12 = vpop.eup %7954 }
0x1771   :  { %v3831_v35 = vmul.f32 %v7955_v12, %v9752_v11 }
0x1772   :  { %4765 = vperm.xlu1 %7538, %v6707_v48  }
0x1773   :  { %v3839_v7 = vpack.c.bf16 %v3831_v35, %v3830_v43 }
0x1775   :  { %7294 = vmatpush3.bf16.xpose.msra.mxu1 %v3839_v7 }
0x1776   :  { %7295 = vmatprep.subr.bf16.mxu1 %v10683_v50 }
0x177e   :  { %v4151_v3 = vpop.xlane.xlu0 %4150 }
0x1782   :  { %v3793_v45 = vpop.xlane.xlu0 %3792 }
0x1783   :  { %7956 = vrcp.f32 %v3793_v45 }
0x1786   :  { %v3795_v41 = vpop.xlane.xlu1 %3794 }
0x1787   :  { %7958 = vrcp.f32 %v3795_v41  ;;  %v4147_v61 = vpop.xlane.xlu0 %4146 }
0x178b   :  { %v3789_v57 = vpop.xlane.xlu0 %3788 }
0x178c   :  { %7960 = vrcp.f32 %v3789_v57 }
0x178e   :  { %v3791_v10 = vpop.xlane.xlu1 %3790 }
0x178f   :  { %7962 = vrcp.f32 %v3791_v10  ;;  %v4143_v52 = vpop.xlane.xlu0 %4142 }
0x1790   :  { %7964 = vrcp.f32 %v4151_v3  ;;  %v7957_v60 = vpop.eup %7956 }
0x1791   :  { %v3828_v48 = vmul.f32 %v7957_v60, %v9768_v36 }
0x1792   :  { %v4153_v62 = vpop.xlane.xlu1 %4152 }
0x1793   :  { %7966 = vrcp.f32 %v4153_v62  ;;  %v3785_v11 = vpop.xlane.xlu0 %3784 }
0x1794   :  { %v7959_v9 = vpop.eup %7958  ;;  %7968 = vrcp.f32 %v4147_v61 }
0x1795   :  { %v3829_v12 = vmul.f32 %v7959_v9, %v9773_v14 }
0x1796   :  { %v4145_v43 = vpop.xlane.xlu1 %4144 }
0x1797   :  { %v4139_v35 = vpop.xlane.xlu0 %4138  ;;  %v3838_v7 = vpack.c.bf16 %v3829_v12, %v3828_v48 }
0x1799   :  { %7296 = vmatpush3.bf16.xpose.msra.mxu1 %v3838_v7  ;;  %v7961_v45 = vpop.eup %7960 }
0x179a   :  { %v4149_v41 = vpop.xlane.xlu1 %4148  ;;  %7297 = vmatprep.subr.bf16.mxu1 %v10683_v50  ;;  %v3826_v10 = vmul.f32 %v7961_v45, %v9781_v51 }
0x179b   :  { %7970 = vrcp.f32 %v4149_v41  ;;  %v3781_v3 = vpop.xlane.xlu0 %3780 }
0x179c   :  { %v7963_v57 = vpop.eup %7962  ;;  %7972 = vrcp.f32 %v3785_v11 }
0x179d   :  { %v3827_v62 = vmul.f32 %v7963_v57, %v9786_v0  ;;  %v7965_v36 = vpop.eup %7964  ;;  %7974 = vrcp.f32 %v4145_v43 }
0x179e   :  { %v3787_v14 = vpop.xlane.xlu1 %3786  ;;  %v4184_v48 = vmul.f32 %v7965_v36, %v9763_v6 }
0x179f   :  { %7976 = vrcp.f32 %v3787_v14  ;;  %v4135_v60 = vpop.xlane.xlu0 %4134  ;;  %v3837_v9 = vpack.c.bf16 %v3827_v62, %v3826_v10 }
0x17a0   :  { %v7967_v61 = vpop.eup %7966  ;;  %7978 = vrcp.f32 %v4143_v52 }
0x17a1   :  { %7298 = vmatpush3.bf16.xpose.msra.mxu1 %v3837_v9  ;;  %v4185_v12 = vmul.f32 %v7967_v61, %v9794_v29  ;;  %7980 = vrcp.f32 %v3781_v3  ;;  %v7969_v0 = vpop.eup %7968 }
0x17a2   :  { %v4141_v7 = vpop.xlane.xlu1 %4140  ;;  %7299 = vmatprep.subr.bf16.mxu1 %v10683_v50  ;;  %v4182_v6 = vmul.f32 %v7969_v0, %v9775_v56 }
0x17a3   :  { %v3777_v11 = vpop.xlane.xlu0 %3776  ;;  %v4193_v51 = vpack.c.bf16 %v4185_v12, %v4184_v48  ;;  %7982 = vrcp.f32 %v4141_v7 }
0x17a5   :  { %7332 = vmatpush3.bf16.xpose.msra.mxu0 %v4193_v51 }
0x17a6   :  { %v3783_v43 = vpop.xlane.xlu1 %3782  ;;  %7333 = vmatprep.subr.bf16.mxu0 %v10683_v50 }
0x17a7   :  { %7984 = vrcp.f32 %v3783_v43  ;;  %v4131_v52 = vpop.xlane.xlu0 %4130 }
0x17a8   :  { %v7971_v45 = vpop.eup %7970  ;;  %7986 = vrcp.f32 %v4139_v35 }
0x17a9   :  { %v4183_v29 = vmul.f32 %v7971_v45, %v9810_v33  ;;  %v7973_v41 = vpop.eup %7972  ;;  %7988 = vrcp.f32 %v3777_v11 }
0x17aa   :  { %v4137_v57 = vpop.xlane.xlu1 %4136  ;;  %v7975_v10 = vpop.eup %7974  ;;  %v3824_v3 = vmul.f32 %v7973_v41, %v9796_v42 }
0x17ab   :  { %v4192_v62 = vpack.c.bf16 %v4183_v29, %v4182_v6  ;;  %7990 = vrcp.f32 %v4137_v57  ;;  %v3773_v61 = vpop.xlane.xlu0 %3772  ;;  %v4181_v33 = vmul.f32 %v7975_v10, %v9802_v32 }
0x17ac   :  { %v7977_v36 = vpop.eup %7976 }
0x17ad   :  { %7334 = vmatpush3.bf16.xpose.msra.mxu0 %v4192_v62  ;;  %v3825_v14 = vmul.f32 %v7977_v36, %v9818_v39  ;;  %v7979_v9 = vpop.eup %7978 }
0x17ae   :  { %v3779_v48 = vpop.xlane.xlu1 %3778  ;;  %7335 = vmatprep.subr.bf16.mxu0 %v10683_v50  ;;  %v4180_v35 = vmul.f32 %v7979_v9, %v9788_v27  ;;  %v7981_v12 = vpop.eup %7980 }
0x17af   :  { %7992 = vrcp.f32 %v3779_v48  ;;  %v3836_v56 = vpack.c.bf16 %v3825_v14, %v3824_v3  ;;  %v4127_v51 = vpop.xlane.xlu0 %4126  ;;  %v3822_v0 = vmul.f32 %v7981_v12, %v9812_v49 }
0x17b0   :  { %7994 = vrcp.f32 %v4135_v60  ;;  %v7983_v42 = vpop.eup %7982  ;;  %v4191_v39 = vpack.c.bf16 %v4181_v33, %v4180_v35 }
0x17b1   :  { %7300 = vmatpush3.bf16.xpose.msra.mxu1 %v3836_v56  ;;  %7996 = vrcp.f32 %v3773_v61  ;;  %v4179_v60 = vmul.f32 %v7983_v42, %v9826_v55 }
0x17b2   :  { %v4133_v7 = vpop.xlane.xlu1 %4132  ;;  %7301 = vmatprep.subr.bf16.mxu1 %v10683_v50 }
0x17b3   :  { %7998 = vrcp.f32 %v4133_v7  ;;  %v3769_v41 = vpop.xlane.xlu0 %3768 }
0x17b4   :  { %v7985_v11 = vpop.eup %7984 }
0x17b5   :  { %7336 = vmatpush3.bf16.xpose.msra.mxu0 %v4191_v39  ;;  %v3823_v43 = vmul.f32 %v7985_v11, %v9834_v58  ;;  %v7987_v45 = vpop.eup %7986 }
0x17b6   :  { %v3775_v32 = vpop.xlane.xlu1 %3774  ;;  %7337 = vmatprep.subr.bf16.mxu0 %v10683_v50  ;;  %v4178_v6 = vmul.f32 %v7987_v45, %v9804_v54  ;;  %v7989_v29 = vpop.eup %7988 }
0x17b7   :  { %8000 = vrcp.f32 %v3775_v32  ;;  %v3835_v27 = vpack.c.bf16 %v3823_v43, %v3822_v0  ;;  %v3820_v62 = vmul.f32 %v7989_v29, %v9828_v53  ;;  %v4123_v12 = vpop.xlane.xlu0 %4122 }
0x17b8   :  { %8002 = vrcp.f32 %v4131_v52  ;;  %v7991_v49 = vpop.eup %7990  ;;  %v4190_v58 = vpack.c.bf16 %v4179_v60, %v4178_v6 }
0x17b9   :  { %7302 = vmatpush3.bf16.xpose.msra.mxu1 %v3835_v27  ;;  %8004 = vrcp.f32 %v3769_v41  ;;  %v4177_v52 = vmul.f32 %v7991_v49, %v9841_v47 }
0x17ba   :  { %v4129_v57 = vpop.xlane.xlu1 %4128  ;;  %7303 = vmatprep.subr.bf16.mxu1 %v10683_v50 }
0x17bb   :  { %8006 = vrcp.f32 %v4129_v57 }
0x17bc   :  { %v7993_v10 = vpop.eup %7992 }
0x17bd   :  { %7338 = vmatpush3.bf16.xpose.msra.mxu0 %v4190_v58  ;;  %v3821_v36 = vmul.f32 %v7993_v10, %v9848_v24  ;;  %v7995_v3 = vpop.eup %7994  ;;  %v7565_v58 = vld [vmem:[%s8866_s29 + $0x20] sm:$0xff]  }
0x17be   :  { %v3771_v55 = vpop.xlane.xlu1 %3770  ;;  %7339 = vmatprep.subr.bf16.mxu0 %v10683_v50  ;;  %v4176_v14 = vmul.f32 %v7995_v3, %v9820_v63  ;;  %v7997_v9 = vpop.eup %7996 }
0x17bf   :  { %8008 = vrcp.f32 %v3771_v55  ;;  %v3834_v54 = vpack.c.bf16 %v3821_v36, %v3820_v62  ;;  %v3818_v56 = vmul.f32 %v7997_v9, %v9843_v19  ;;  %v3439_v43 = vpop.permute.xlu0 %3438  ;;  %v7567_v9 = vld [vmem:[%s8880_s8 + $0x20] sm:$0xff]  }
0x17c0   :  { %8010 = vrcp.f32 %v4127_v51  ;;  %v7999_v61 = vpop.eup %7998  ;;  %v4189_v53 = vpack.c.bf16 %v4177_v52, %v4176_v14  ;;  %v3521_v32 = vadd.f32 %v9875_v34, %v3439_v43 }
0x17c1   :  { %7304 = vmatpush3.bf16.xpose.msra.mxu1 %v3834_v54  ;;  %v4175_v63 = vmul.f32 %v7999_v61, %v9854_v28  ;;  %v7566_v54 = vld [vmem:[%s8866_s29 + $0x28] sm:$0xff]  }
0x17c2   :  { %7305 = vmatprep.subr.bf16.mxu1 %v10683_v50  ;;  %v4125_v24 = vpop.xlane.xlu1 %4124  ;;  %v3530_v6 = vpack.c.bf16 %v3521_v32, %v3521_v32 }
0x17c3   :  { %8012 = vrcp.f32 %v4125_v24 }
0x17c4   :  { %v8001_v48 = vpop.eup %8000  ;;  %8014 = vrcp.f32 %v4123_v12 }
0x17c5   :  { %7340 = vmatpush3.bf16.xpose.msra.mxu0 %v4189_v53  ;;  %v3819_v33 = vmul.f32 %v8001_v48, %v9860_v25  ;;  %v8003_v35 = vpop.eup %8002 }
0x17c6   :  { %7341 = vmatprep.subr.bf16.mxu0 %v10683_v50  ;;  %v4174_v7 = vmul.f32 %v8003_v35, %v9836_v1  ;;  %v8005_v42 = vpop.eup %8004 }
0x17c7   :  { %v3833_v47 = vpack.c.bf16 %v3819_v33, %v3818_v56  ;;  %v3816_v25 = vmul.f32 %v8005_v42, %v9856_v23  ;;  %v4347_v42 = vpop.permute.xlu0 %4346 }
0x17c8   :  { %v8007_v39 = vpop.eup %8006  ;;  %v4188_v11 = vpack.c.bf16 %v4175_v63, %v4174_v7 }
0x17c9   :  { %7306 = vmatpush3.bf16.xpose.msra.mxu1 %v3833_v47  ;;  %v4173_v45 = vmul.f32 %v8007_v39, %v9866_v46 }
0x17ca   :  { %7307 = vmatprep.subr.bf16.mxu1 %v10683_v50 }
0x17cc   :  { %v8009_v19 = vpop.eup %8008 }
0x17cd   :  { %7342 = vmatpush3.bf16.xpose.msra.mxu0 %v4188_v11  ;;  %v3817_v51 = vmul.f32 %v8009_v19, %v9869_v15  ;;  %v8011_v0 = vpop.eup %8010 }
0x17ce   :  { %7343 = vmatprep.subr.bf16.mxu0 %v10683_v50  ;;  %v4172_v1 = vmul.f32 %v8011_v0, %v9850_v4  ;;  %v3444_v4 = vpop.permute.xlu1 %3443 }
0x17cf   :  { %v3832_v28 = vpack.c.bf16 %v3817_v51, %v3816_v25  ;;  %v3524_v29 = vadd.f32 %v9880_v5, %v3444_v4 }
0x17d0   :  { %v4187_v27 = vpack.c.bf16 %v4173_v45, %v4172_v1  ;;  %v8013_v60 = vpop.eup %8012 }
0x17d1   :  { %7308 = vmatpush3.bf16.xpose.msra.mxu1 %v3832_v28  ;;  %v8015_v23 = vpop.eup %8014  ;;  %v4171_v15 = vmul.f32 %v8013_v60, %v9872_v18  ;;  %v3884_v41 = vpack.c.bf16 %v3524_v29, %v3524_v29 }
0x17d2   :  { %7357 = vmatprep.subr.bf16.mxu1 %v10683_v50  ;;  %v4170_v46 = vmul.f32 %v8015_v23, %v9862_v26  ;;  %v4342_v12 = vpop.permute.xlu1 %4341 }
0x17d4   :  { %v4186_v34 = vpack.c.bf16 %v4171_v15, %v4170_v46 }
0x17d5   :  { %7344 = vmatpush3.bf16.xpose.msra.mxu0 %v4187_v27 }
0x17d6   :  { %7345 = vmatprep.subr.bf16.mxu0 %v10683_v50 }
0x17d8   :  { %7310 = vmatmul.mubr.bf16.vlgmr.msra.gmra.mxu1 %v3530_v6 }
0x17d9   :  { %7359 = vmatprep.mubr.msk.bf16.mxu1 %vm8194_vm0, %v10683_v50 }
0x17dd   :  { %7346 = vmatpush3.bf16.xpose.msra.mxu0 %v4186_v34 }
0x17de   :  { %7351 = vmatprep.subr.bf16.mxu0 %v10683_v50 }
0x17e4   :  { %7348 = vmatmul.mubr.bf16.vlgmr.msra.gmra.mxu0 %v3884_v41 }
0x17e5   :  { %7353 = vmatprep.mubr.msk.bf16.mxu0 %vm8194_vm0, %v10683_v50 }
0x1898   :  { %v3874_v18 = vpop.f32.mrf.mxu1 }
0x1899   :  { %v3880_v57 = vpack.c.bf16 %v3874_v18, %v3874_v18 }
0x189a   :  { %v7311_v49 = vpop.f32.mrf.mxu1 }
0x189b   :  { %v4296_v26 = vsel %vm215_vm1, %v3880_v57, 0 }
0x189c   :  { %v3877_v10 = vpop.f32.mrf.mxu1  ;;  %7358 = vmatpush3.bf16.msra.mxu1 %v4296_v26 }
0x189d   :  { %v4380_v10 = vpop.permute.xlu1 %4379 }
0x189e   :  { %v7312_v62 = vpop.f32.mrf.mxu1 }
0x189f   :  { %7360 = vmatmul.mubr.msk.bf16.vlgmr.msra.gmra.mxu1 %vm684_vm6, %v7565_v58  ;;  %v4385_v58 = vpop.permute.xlu0 %4384 }
0x18a0   :  { %7365 = vmatprep.mubr.msk.bf16.mxu1 %vm348_vm5, %v7567_v9 }
0x18a4   :  { %v4228_v5 = vpop.f32.mrf.mxu0 }
0x18a5   :  { %v4234_v36 = vpack.c.bf16 %v4228_v5, %v4228_v5 }
0x18a6   :  { %v7349_v3 = vpop.f32.mrf.mxu0 }
0x18a7   :  { %v4244_v55 = vsel %vm215_vm1, %v4234_v36, 0 }
0x18a8   :  { %v4231_v52 = vpop.f32.mrf.mxu0  ;;  %7352 = vmatpush3.bf16.msra.mxu0 %v4244_v55 }
0x18a9   :  { %v4392_v52 = vpop.permute.xlu1 %4391 }
0x18aa   :  { %v7350_v14 = vpop.f32.mrf.mxu0 }
0x18ab   :  { %7354 = vmatmul.mubr.msk.bf16.vlgmr.msra.gmra.mxu0 %vm684_vm6, %v7566_v54  ;;  %v4397_v54 = vpop.permute.xlu0 %4396 }
0x195f   :  { %v4332_v61 = vpop.f32.mrf.mxu1 }
0x1961   :  { %v7361_v53 = vpop.f32.mrf.mxu1 }
0x1962   :  { %v7568_v53 = vld [vmem:[%s8880_s8 + $0x28] sm:$0xff]  }
0x1963   :  { %v4335_v48 = vpop.f32.mrf.mxu1 }
0x1965   :  { %v7362_v24 = vpop.f32.mrf.mxu1 }
0x196b   :  { %v4280_v56 = vpop.f32.mrf.mxu0 }
0x196c   :  { %v4333_v33 = vadd.f32 %v4332_v61, %v4280_v56  ;;  %v4420_v56 = vpop.permute.xlu0 %4419 }
0x196d   :  { %v7355_v35 = vpop.f32.mrf.mxu0 }
0x196e   :  { %v4349_v63 = vadd.f32 %v4342_v12, %v4333_v33 }
0x196f   :  { %v4283_v47 = vpop.f32.mrf.mxu0 }
0x1970   :  { %v4336_v7 = vadd.f32 %v4335_v48, %v4283_v47  ;;  %v9964_v19 = vadd.f32 %v4349_v63, %v9529_v44  ;;  %v4415_v48 = vpop.permute.xlu1 %4414 }
0x1971   :  { %v7356_v39 = vpop.f32.mrf.mxu0 }
0x1972   :  { %v4350_v11 = vadd.f32 %v4347_v42, %v4336_v7 }
0x1974   :  { %v9967_v25 = vadd.f32 %v4350_v11, %v9532_v59  ;;  %v4405_v35 = vpop.permute.xlu1 %4404 }
0x1976   :  { %v4353_v51 = vadd.f32 %v9967_v25, %v9964_v19 }
0x1978   :  { %v4354_v0 = vrot.slane %v4353_v51, 4 }
0x197a   :  { %v4355_v43 = vadd.f32 %v4354_v0, %v4353_v51  ;;  %v4410_v0 = vpop.permute.xlu0 %4409 }
0x197c   :  { %v4356_v28 = vrot.slane %v4355_v43, 2 }
0x197e   :  { %v4357_v45 = vadd.f32 %v4356_v28, %v4355_v43 }
0x1980   :  { %v4358_v1 = vrot.slane %v4357_v45, 1 }
0x1982   :  { %v4359_v32 = vadd.f32 %v4358_v1, %v4357_v45 }
0x1984   :  { %v4360_v27 = vmul.f32 0.0625, %v4359_v32 }
0x1986   :  { %v4362_v60 = vsub.f32 %v9967_v25, %v4360_v27  ;;  %v4361_v23 = vsub.f32 %v9964_v19, %v4360_v27 }
0x1988   :  { %v4364_v6 = vmul.f32 %v4362_v60, %v4362_v60  ;;  %v4363_v15 = vmul.f32 %v4361_v23, %v4361_v23 }
0x198a   :  { %v4365_v46 = vadd.f32 %v4364_v6, %v4363_v15 }
0x198c   :  { %v4366_v4 = vrot.slane %v4365_v46, 4 }
0x198e   :  { %v4367_v34 = vadd.f32 %v4366_v4, %v4365_v46 }
0x1990   :  { %v4368_v29 = vrot.slane %v4367_v34, 2 }
0x1992   :  { %v4369_v41 = vadd.f32 %v4368_v29, %v4367_v34 }
0x1994   :  { %v4370_v18 = vrot.slane %v4369_v41, 1 }
0x1996   :  { %v4371_v57 = vadd.f32 %v4370_v18, %v4369_v41 }
0x1998   :  { %v4372_v49 = vmul.f32 0.0625, %v4371_v57 }
0x199a   :  { %v4373_v26 = vadd.f32 1e-05, %v4372_v49 }
0x199c   :  { %8016 = vrsqrt.f32 %v4373_v26 }
0x19a9   :  { %v8017_v62 = vpop.eup %8016 }
0x19aa   :  { %v4375_v5 = vmul.f32 %v8017_v62, %v4361_v23  ;;  %v4376_v36 = vmul.f32 %v8017_v62, %v4362_v60 }
0x19ac   :  { %v4387_v3 = vmul.f32 %v4380_v10, %v4375_v5  ;;  %v4388_v55 = vmul.f32 %v4385_v58, %v4376_v36 }
0x19ae   :  { %v4399_v14 = vadd.f32 %v4392_v52, %v4387_v3  ;;  %v4400_v9 = vadd.f32 %v4397_v54, %v4388_v55 }
0x19b0   :  { %v4401_v61 = vpack.c.bf16 %v4400_v9, %v4399_v14 }
0x19b2   :  { %7363 = vmatprep.subr.bf16.mxu1 %v4401_v61 }
0x19b3   :  { %7364 = vmatpush3.bf16.msra.mxu1 %v4401_v61 }
0x19b4   :  { %7369 = vmatprep.subr.bf16.mxu1 %v10683_v50 }
0x19b6   :  { %7366 = vmatmul.mubr.msk.bf16.vlgmr.msra.gmra.mxu1 %vm348_vm5, %v7568_v53 }
0x19b7   :  { %7373 = vmatprep.mubr.msk.bf16.mxu1 %vm8194_vm0, %v10683_v50 }
0x1a76   :  { %v7367_v24 = vpop.f32.mrf.mxu1 }
0x1a77   :  { %v9978_v33 = vadd.f32 %v7367_v24, %v4415_v48 }
0x1a78   :  { %v4472_v12 = vpop.f32.mrf.mxu1 }
0x1a79   :  { %v9981_v47 = vmul.f32 0.70710677, %v9978_v33  ;;  %v9983_v63 = vadd.f32 %v4472_v12, %v4405_v35 }
0x1a7a   :  { %v7368_v7 = vpop.f32.mrf.mxu1 }
0x1a7b   :  { %v4497_v42 = vand.u32 2147483647, %v9981_v47  ;;  %v9987_v39 = vmul.f32 0.70710677, %v9983_v63  ;;  %v9989_v11 = vadd.f32 %v7368_v7, %v4420_v56  ;;  %vm4573_vm2 = vcmp.lt.f32.partialorder %v9981_v47, 0.0 }
0x1a7c   :  { %v4475_v51 = vpop.f32.mrf.mxu1 }
0x1a7d   :  { %v4501_v43 = vmul.f32 0.3275911, %v4497_v42  ;;  %v4495_v28 = vand.u32 2147483647, %v9987_v39  ;;  %v9993_v45 = vmul.f32 0.70710677, %v9989_v11  ;;  %v9995_v1 = vadd.f32 %v4475_v51, %v4410_v0 }
0x1a7e   :  { %v4549_v41 = vsub.f32 0.0, %v4497_v42  ;;  %vm4571_vm3 = vcmp.lt.f32.partialorder %v9987_v39, 0.0 }
0x1a7f   :  { %v4505_v32 = vadd.f32 1.0, %v4501_v43  ;;  %v4499_v27 = vmul.f32 0.3275911, %v4495_v28  ;;  %v4498_v60 = vand.u32 2147483647, %v9993_v45  ;;  %v4547_v18 = vsub.f32 0.0, %v4495_v28 }
0x1a80   :  { %v9999_v23 = vmul.f32 0.70710677, %v9995_v1  ;;  %v4553_v57 = vmul.f32 %v4549_v41, %v4497_v42  ;;  %vm4574_vm4 = vcmp.lt.f32.partialorder %v9993_v45, 0.0  ;;  %v4488_v39 = vmul.f32 0.5, %v9995_v1 }
0x1a81   :  { %8018 = vrcp.f32 %v4505_v32  ;;  %v4503_v6 = vadd.f32 1.0, %v4499_v27  ;;  %v4502_v15 = vmul.f32 0.3275911, %v4498_v60  ;;  %v4550_v49 = vsub.f32 0.0, %v4498_v60 }
0x1a82   :  { %v4496_v46 = vand.u32 2147483647, %v9999_v23  ;;  %v4551_v58 = vmul.f32 %v4547_v18, %v4495_v28  ;;  %v4559_v62 = vmul.f32 1.442695, %v4553_v57  ;;  %vm4572_vm7 = vcmp.lt.f32.partialorder %v9999_v23, 0.0  ;;  %v4596_v23 = vpop.permute.xlu1 %4595 }
0x1a83   :  { %8020 = vrcp.f32 %v4503_v6  ;;  %v4506_v4 = vadd.f32 1.0, %v4502_v15  ;;  %v4554_v36 = vmul.f32 %v4550_v49, %v4498_v60  ;;  %v4487_v45 = vmul.f32 0.5, %v9983_v63 }
0x1a84   :  { %v4500_v34 = vmul.f32 0.3275911, %v4496_v46  ;;  %v4548_v5 = vsub.f32 0.0, %v4496_v46  ;;  %v4555_v52 = vmul.f32 1.442695, %v4551_v58 }
0x1a85   :  { %8022 = vrcp.f32 %v4506_v4  ;;  %v4561_v24 = vmul.f32 1.442695, %v4554_v36 }
0x1a86   :  { %v4504_v29 = vadd.f32 1.0, %v4500_v34  ;;  %v4552_v61 = vmul.f32 %v4548_v5, %v4496_v46 }
0x1a88   :  { %8024 = vrcp.f32 %v4504_v29  ;;  %v4557_v0 = vmul.f32 1.442695, %v4552_v61 }
0x1a89   :  { %8026 = vpow2.f32 %v4559_v62 }
0x1a8a   :  { %8028 = vpow2.f32 %v4555_v52 }
0x1a8b   :  { %8030 = vpow2.f32 %v4561_v24 }
0x1a8c   :  { %8032 = vpow2.f32 %v4557_v0 }
0x1a8e   :  { %v8019_v26 = vpop.eup %8018 }
0x1a8f   :  { %v4513_v10 = vmul.f32 1.0614054, %v8019_v26 }
0x1a90   :  { %v8021_v3 = vpop.eup %8020 }
0x1a91   :  { %v4517_v55 = vadd.f32 -1.4531521, %v4513_v10  ;;  %v4511_v54 = vmul.f32 1.0614054, %v8021_v3 }
0x1a92   :  { %v8023_v14 = vpop.eup %8022 }
0x1a93   :  { %v4521_v9 = vmul.f32 %v8019_v26, %v4517_v55  ;;  %v4515_v53 = vadd.f32 -1.4531521, %v4511_v54  ;;  %v4514_v48 = vmul.f32 1.0614054, %v8023_v14 }
0x1a95   :  { %v4525_v56 = vadd.f32 1.4214138, %v4521_v9  ;;  %v8025_v35 = vpop.eup %8024  ;;  %v4519_v12 = vmul.f32 %v8021_v3, %v4515_v53  ;;  %v4518_v7 = vadd.f32 -1.4531521, %v4514_v48 }
0x1a96   :  { %v4512_v51 = vmul.f32 1.0614054, %v8025_v35  ;;  %v8027_v10 = vpop.eup %8026 }
0x1a97   :  { %v4529_v42 = vmul.f32 %v8019_v26, %v4525_v56  ;;  %v4523_v43 = vadd.f32 1.4214138, %v4519_v12  ;;  %v4522_v28 = vmul.f32 %v8023_v14, %v4518_v7  ;;  %v8029_v9 = vpop.eup %8028 }
0x1a98   :  { %v4516_v27 = vadd.f32 -1.4531521, %v4512_v51  ;;  %v8031_v56 = vpop.eup %8030 }
0x1a99   :  { %v4533_v32 = vadd.f32 -0.28449672, %v4529_v42  ;;  %v4527_v60 = vmul.f32 %v8021_v3, %v4523_v43  ;;  %v4526_v6 = vadd.f32 1.4214138, %v4522_v28  ;;  %v8033_v0 = vpop.eup %8032 }
0x1a9a   :  { %v4520_v46 = vmul.f32 %v8025_v35, %v4516_v27 }
0x1a9b   :  { %v4537_v15 = vmul.f32 %v8019_v26, %v4533_v32  ;;  %v4531_v4 = vadd.f32 -0.28449672, %v4527_v60  ;;  %v4530_v34 = vmul.f32 %v8023_v14, %v4526_v6 }
0x1a9c   :  { %v4524_v41 = vadd.f32 1.4214138, %v4520_v46  ;;  %v4489_v46 = vmul.f32 0.5, %v9978_v33 }
0x1a9d   :  { %v4541_v29 = vadd.f32 0.2548296, %v4537_v15  ;;  %v4535_v18 = vmul.f32 %v8021_v3, %v4531_v4  ;;  %v4534_v57 = vadd.f32 -0.28449672, %v4530_v34  ;;  %v4490_v4 = vmul.f32 0.5, %v9989_v11  ;;  %v7569_v11 = vld [vmem:[%s8902_s23 + $0x10] sm:$0xff]  }
0x1a9e   :  { %v4528_v58 = vmul.f32 %v8025_v35, %v4524_v41 }
0x1a9f   :  { %v4545_v49 = vmul.f32 %v8019_v26, %v4541_v29  ;;  %v4539_v62 = vadd.f32 0.2548296, %v4535_v18  ;;  %v4538_v5 = vmul.f32 %v8023_v14, %v4534_v57 }
0x1aa0   :  { %v4532_v55 = vadd.f32 -0.28449672, %v4528_v58 }
0x1aa1   :  { %v4565_v36 = vmul.f32 %v8027_v10, %v4545_v49  ;;  %v4543_v54 = vmul.f32 %v8021_v3, %v4539_v62  ;;  %v4542_v52 = vadd.f32 0.2548296, %v4538_v5  ;;  %v4601_v5 = vpop.permute.xlu0 %4600 }
0x1aa2   :  { %v4536_v53 = vmul.f32 %v8025_v35, %v4532_v55 }
0x1aa3   :  { %v4569_v61 = vsub.f32 1.0, %v4565_v36  ;;  %v4563_v48 = vmul.f32 %v8029_v9, %v4543_v54  ;;  %v4546_v24 = vmul.f32 %v8023_v14, %v4542_v52 }
0x1aa4   :  { %v4540_v7 = vadd.f32 0.2548296, %v4536_v53 }
0x1aa5   :  { %v4577_v12 = vsub.f32 0.0, %v4569_v61  ;;  %v4567_v42 = vsub.f32 1.0, %v4563_v48  ;;  %v4566_v51 = vmul.f32 %v8031_v56, %v4546_v24 }
0x1aa6   :  { %v4544_v26 = vmul.f32 %v8025_v35, %v4540_v7 }
0x1aa7   :  { %v4581_v43 = vsel %vm4573_vm2, %v4577_v12, %v4569_v61  ;;  %v4575_v28 = vsub.f32 0.0, %v4567_v42  ;;  %v4570_v32 = vsub.f32 1.0, %v4566_v51 }
0x1aa8   :  { %v4564_v27 = vmul.f32 %v8033_v0, %v4544_v26  ;;  %v4585_v60 = vadd.f32 1.0, %v4581_v43 }
0x1aa9   :  { %v4578_v3 = vsub.f32 0.0, %v4570_v32  ;;  %v4579_v6 = vsel %vm4571_vm3, %v4575_v28, %v4567_v42 }
0x1aaa   :  { %v4568_v14 = vsub.f32 1.0, %v4564_v27  ;;  %v4589_v34 = vmul.f32 %v4585_v60, %v4489_v46  ;;  %v4583_v29 = vadd.f32 1.0, %v4579_v6  ;;  %v4731_v46 = vpop.permute.xlu1 %4730 }
0x1aab   :  { %v4582_v15 = vsel %vm4574_vm4, %v4578_v3, %v4570_v32 }
0x1aac   :  { %v4586_v47 = vadd.f32 1.0, %v4582_v15  ;;  %v4576_v35 = vsub.f32 0.0, %v4568_v14  ;;  %v4587_v10 = vmul.f32 %v4583_v29, %v4487_v45  ;;  %v4736_v15 = vpop.permute.xlu0 %4735 }
0x1aae   :  { %v4590_v41 = vmul.f32 %v4586_v47, %v4490_v4  ;;  %v4580_v18 = vsel %vm4572_vm7, %v4576_v35, %v4568_v14 }
0x1aaf   :  { %v4584_v57 = vadd.f32 1.0, %v4580_v18  ;;  %v4743_v18 = vpop.permute.xlu1 %4742 }
0x1ab0   :  { %v4592_v49 = vpack.c.bf16 %v4590_v41, %v4589_v34  ;;  %v4748_v41 = vpop.permute.xlu0 %4747 }
0x1ab1   :  { %v4588_v58 = vmul.f32 %v4584_v57, %v4488_v39 }
0x1ab2   :  { %7370 = vmatpush3.bf16.msra.mxu1 %v4592_v49  ;;  %v7570_v49 = vld [vmem:[%s8391_s5 + $0x48] sm:$0xff]  }
0x1ab3   :  { %7371 = vmatprep.subr.bf16.mxu1 %v10683_v50  ;;  %v4591_v33 = vpack.c.bf16 %v4588_v58, %v4587_v10  ;;  %v7571_v58 = vld [vmem:[%s8391_s5 + $0x50] sm:$0xff]   ;;  %v4756_v10 = vpop.permute.xlu1 %4755 }
0x1ab6   :  { %7372 = vmatpush3.bf16.msra.mxu1 %v4591_v33 }
0x1ab7   :  { %7377 = vmatprep.subr.bf16.mxu1 %v10683_v50 }
0x1ab9   :  { %7374 = vmatmul.mubr.msk.bf16.vlgmr.msra.gmra.mxu1 %vm1729_vm11, %v7569_v11 }
0x1aba   :  { %7379 = vmatprep.mubr.msk.bf16.mxu1 %vm8194_vm0, %v10683_v50 }
0x1b79   :  { %v4645_v1 = vpop.f32.mrf.mxu1 }
0x1b7a   :  { %v4646_v63 = vadd.f32 %v4645_v1, %v4596_v23 }
0x1b7b   :  { %v7375_v62 = vpop.f32.mrf.mxu1 }
0x1b7c   :  { %v10017_v52 = vadd.f32 %v4646_v63, %v9964_v19  ;;  %v4761_v62 = vpop.permute.xlu0 %4760 }
0x1b7d   :  { %v4648_v36 = vpop.f32.mrf.mxu1 }
0x1b7e   :  { %v4649_v55 = vadd.f32 %v4648_v36, %v4601_v5 }
0x1b7f   :  { %v7376_v54 = vpop.f32.mrf.mxu1 }
0x1b80   :  { %v10020_v9 = vadd.f32 %v4649_v55, %v9967_v25 }
0x1b82   :  { %v4704_v61 = vadd.f32 %v10020_v9, %v10017_v52 }
0x1b84   :  { %v4705_v53 = vrot.slane %v4704_v61, 4 }
0x1b86   :  { %v4706_v48 = vadd.f32 %v4705_v53, %v4704_v61  ;;  %v4766_v61 = vpop.permute.xlu1 %4765 }
0x1b88   :  { %v4707_v24 = vrot.slane %v4706_v48, 2 }
0x1b8a   :  { %v4708_v56 = vadd.f32 %v4707_v24, %v4706_v48 }
0x1b8c   :  { %v4709_v12 = vrot.slane %v4708_v56, 1 }
0x1b8e   :  { %v4710_v7 = vadd.f32 %v4709_v12, %v4708_v56 }
0x1b90   :  { %v4711_v42 = vmul.f32 0.0625, %v4710_v7  ;;  %v4771_v7 = vpop.permute.xlu0 %4770 }
0x1b92   :  { %v4712_v51 = vsub.f32 %v10017_v52, %v4711_v42  ;;  %v4713_v26 = vsub.f32 %v10020_v9, %v4711_v42 }
0x1b94   :  { %v4714_v0 = vmul.f32 %v4712_v51, %v4712_v51  ;;  %v4715_v19 = vmul.f32 %v4713_v26, %v4713_v26 }
0x1b96   :  { %v4716_v43 = vadd.f32 %v4715_v19, %v4714_v0 }
0x1b98   :  { %v4717_v28 = vrot.slane %v4716_v43, 4 }
0x1b9a   :  { %v4718_v25 = vadd.f32 %v4717_v28, %v4716_v43 }
0x1b9c   :  { %v4719_v32 = vrot.slane %v4718_v25, 2 }
0x1b9e   :  { %v4720_v27 = vadd.f32 %v4719_v32, %v4718_v25 }
0x1ba0   :  { %v4721_v3 = vrot.slane %v4720_v27, 1 }
0x1ba2   :  { %v4722_v60 = vadd.f32 %v4721_v3, %v4720_v27 }
0x1ba4   :  { %v4723_v14 = vmul.f32 0.0625, %v4722_v60 }
0x1ba6   :  { %v4724_v6 = vadd.f32 1e-05, %v4723_v14 }
0x1ba8   :  { %8034 = vrsqrt.f32 %v4724_v6 }
0x1bb5   :  { %v8035_v4 = vpop.eup %8034 }
0x1bb6   :  { %v4726_v47 = vmul.f32 %v8035_v4, %v4712_v51  ;;  %v4727_v35 = vmul.f32 %v8035_v4, %v4713_v26 }
0x1bb8   :  { %v4739_v34 = vmul.f32 %v4736_v15, %v4727_v35  ;;  %v4738_v29 = vmul.f32 %v4731_v46, %v4726_v47 }
0x1bba   :  { %v4750_v39 = vadd.f32 %v4743_v18, %v4738_v29  ;;  %v4751_v57 = vadd.f32 %v4748_v41, %v4739_v34 }
0x1bbc   :  { %v4752_v45 = vpack.c.bf16 %v4751_v57, %v4750_v39 }
0x1bbe   :  { %7378 = vmatpush3.bf16.msra.mxu1 %v4752_v45 }
0x1bbf   :  { %7409 = vmatprep.subr.bf16.mxu1 %v10683_v50 }
0x1bc1   :  { %7380 = vmatmul.mubr.msk.bf16.vlgmr.msra.gmra.mxu1 %vm348_vm5, %v7570_v49 }
0x1bc2   :  { %7383 = vmatprep.mubr.msk.bf16.mxu1 %vm8194_vm0, %v10683_v50 }
0x1bc9   :  { %7384 = vmatmul.mubr.msk.bf16.gmra.mxu1 %vm348_vm5, %v7571_v58 }
0x1bca   :  { %7387 = vmatprep.mubr.msk.bf16.mxu1 %vm8194_vm0, %v10683_v50 }
0x1c81   :  { %v4841_v33 = vpop.f32.mrf.mxu1 }
0x1c82   :  { %v4842_v11 = vadd.f32 %v4841_v33, %v4756_v10 }
0x1c83   :  { %v7381_v1 = vpop.f32.mrf.mxu1 }
0x1c84   :  { %v4864_v23 = vmul.f32 0.35355338, %v4842_v11 }
0x1c85   :  { %v4844_v63 = vpop.f32.mrf.mxu1 }
0x1c86   :  { %v4865_v5 = vpack.c.bf16 %v4864_v23, %v4864_v23  ;;  %v4845_v36 = vadd.f32 %v4844_v63, %v4761_v62 }
0x1c87   :  { %v7382_v55 = vpop.f32.mrf.mxu1 }
0x1c88   :  { %v5218_v54 = vmul.f32 0.35355338, %v4845_v36  ;;  %4885 = vxpose.xlu1.c.b16.start.end [1/1] (short) %v4865_v5, 128 }
0x1c89   :  { %v4849_v53 = vpop.f32.mrf.mxu1 }
0x1c8a   :  { %v5219_v48 = vpack.c.bf16 %v5218_v54, %v5218_v54  ;;  %v4850_v24 = vadd.f32 %v4849_v53, %v4766_v61 }
0x1c8b   :  { %v7385_v56 = vpop.f32.mrf.mxu1 }
0x1c8c   :  { %v4866_v12 = vpack.c.bf16 %v4850_v24, %v4850_v24  ;;  %5239 = vxpose.xlu0.c.b16.start.end [1/1] (short) %v5219_v48, 128 }
0x1c8d   :  { %v4852_v42 = vpop.f32.mrf.mxu1 }
0x1c8e   :  { %v4926_v51 = vsel %vm215_vm1, %v4866_v12, 0  ;;  %v4853_v26 = vadd.f32 %v4852_v42, %v4771_v7  ;;  %7499 = vmatprep.subr.msk.bf16.mxu0 %vm215_vm1, %v4866_v12 }
0x1c8f   :  { %7392 = vmatpush3.bf16.msra.mxu0 %v4926_v51  ;;  %v7386_v0 = vpop.f32.mrf.mxu1 }
0x1c90   :  { %v5220_v19 = vpack.c.bf16 %v4853_v26, %v4853_v26 }
0x1c92   :  { %7500 = vmatprep.subr.msk.bf16.mxu0 %vm215_vm1, %v5220_v19  ;;  %v5280_v25 = vsel %vm215_vm1, %v5220_v19, 0  ;;  %v6777_v19 = vld [vmem:[%s8482_s10 + $0x3f0] sm:$0xff] }
0x1cea   :  { %v4893_v43 = vpop.trf.xlu1 }
0x1ceb   :  { %7393 = vmatprep.mubr.msk.bf16.mxu0 %vm684_vm6, %v4893_v43 }
0x1cee   :  { %v4894_v28 = vpop.trf.xlu1  ;;  %v5247_v3 = vpop.trf.xlu0 }
0x1cef   :  { %7394 = vmatmul.mubr.msk.bf16.vlgmr.msra.gmra.mxu0 %vm684_vm6, %v4894_v28 }
0x1cf0   :  { %7430 = vmatpush3.bf16.msra.mxu0 %v5280_v25  ;;  %v6753_v25 = vld [vmem:[%s8482_s10 + $0x370] sm:$0xff] }
0x1cf1   :  { %7447 = vmatprep.subr.bf16.mxu0 %v10683_v50 }
0x1cf2   :  { %v4895_v32 = vpop.trf.xlu1  ;;  %v5248_v6 = vpop.trf.xlu0 }
0x1cf3   :  { %7397 = vmatprep.mubr.msk.bf16.mxu0 %vm684_vm6, %v4895_v32 }
0x1cf6   :  { %v4896_v27 = vpop.trf.xlu1  ;;  %v5249_v46 = vpop.trf.xlu0 }
0x1cf7   :  { %7398 = vmatmul.mubr.msk.bf16.gmra.mxu0 %vm684_vm6, %v4896_v27  ;;  %v6778_v27 = vld [vmem:[%s8482_s10 + $0x3f8] sm:$0xff] }
0x1cfa   :  { %v4897_v60 = vpop.trf.xlu1  ;;  %v5250_v47 = vpop.trf.xlu0 }
0x1cfb   :  { %7401 = vmatprep.mubr.msk.bf16.mxu0 %vm684_vm6, %v4897_v60 }
0x1cfe   :  { %v4898_v14 = vpop.trf.xlu1  ;;  %v5251_v35 = vpop.trf.xlu0 }
0x1cff   :  { %7402 = vmatmul.mubr.msk.bf16.gmra.mxu0 %vm684_vm6, %v4898_v14 }
0x1d02   :  { %v4899_v15 = vpop.trf.xlu1  ;;  %v5252_v34 = vpop.trf.xlu0 }
0x1d03   :  { %7405 = vmatprep.mubr.msk.bf16.mxu0 %vm684_vm6, %v4899_v15  ;;  %v6775_v15 = vld [vmem:[%s8482_s10 + $0x3e0] sm:$0xff] }
0x1d06   :  { %v4900_v4 = vpop.trf.xlu1  ;;  %v5253_v29 = vpop.trf.xlu0 }
0x1d07   :  { %7406 = vmatmul.mubr.msk.bf16.gmra.mxu0 %vm684_vm6, %v4900_v4 }
0x1d08   :  { %7431 = vmatprep.mubr.msk.bf16.mxu0 %vm684_vm6, %v5247_v3 }
0x1d0a   :  { %v5254_v41 = vpop.trf.xlu0 }
0x1d0f   :  { %7432 = vmatmul.mubr.msk.bf16.vlgmr.msra.gmra.mxu0 %vm684_vm6, %v5248_v6  ;;  %v6754_v6 = vld [vmem:[%s8482_s10 + $0x378] sm:$0xff] }
0x1d10   :  { %7435 = vmatprep.mubr.msk.bf16.mxu0 %vm684_vm6, %v5249_v46 }
0x1d17   :  { %7436 = vmatmul.mubr.msk.bf16.gmra.mxu0 %vm684_vm6, %v5250_v47  ;;  %v6751_v47 = vld [vmem:[%s8482_s10 + $0x360] sm:$0xff] }
0x1d18   :  { %7439 = vmatprep.mubr.msk.bf16.mxu0 %vm684_vm6, %v5251_v35 }
0x1d1f   :  { %7440 = vmatmul.mubr.msk.bf16.gmra.mxu0 %vm684_vm6, %v5252_v34  ;;  %v6776_v34 = vld [vmem:[%s8482_s10 + $0x3e8] sm:$0xff] }
0x1d20   :  { %7443 = vmatprep.mubr.msk.bf16.mxu0 %vm684_vm6, %v5253_v29 }
0x1d27   :  { %7444 = vmatmul.mubr.msk.bf16.gmra.mxu0 %vm684_vm6, %v5254_v41 }
0x1d28   :  { %7463 = vmatprep.mubr.msk.bf16.mxu0 %vm8194_vm0, %v10683_v50 }
0x1daf   :  { %v10058_v18 = vpop.f32.mrf.mxu0 }
0x1db1   :  { %v10060_v39 = vpop.f32.mrf.mxu0 }
0x1db3   :  { %v10062_v57 = vpop.f32.mrf.mxu0 }
0x1db5   :  { %v10064_v45 = vpop.f32.mrf.mxu0 }
0x1db7   :  { %v10066_v49 = vpop.f32.mrf.mxu0 }
0x1db9   :  { %v10068_v58 = vpop.f32.mrf.mxu0 }
0x1dbb   :  { %v10070_v10 = vpop.f32.mrf.mxu0 }
0x1dbd   :  { %v10072_v33 = vpop.f32.mrf.mxu0 }
0x1dbf   :  { %v7403_v11 = vpop.f32.mrf.mxu0 }
0x1dc1   :  { %v10074_v1 = vpop.f32.mrf.mxu0 }
0x1dc3   :  { %v7404_v23 = vpop.f32.mrf.mxu0 }
0x1dc5   :  { %v10076_v62 = vpop.f32.mrf.mxu0 }
0x1dc7   :  { %v7407_v63 = vpop.f32.mrf.mxu0 }
0x1dc8   :  { %v10098_v60 = vadd.f32 %v7407_v63, %v6753_v25  ;;  %v6752_v63 = vld [vmem:[%s8482_s10 + $0x368] sm:$0xff]  ;;  %v6749_v25 = vld [vmem:[%s8482_s10 + $0x350] sm:$0xff] }
0x1dc9   :  { %v5010_v5 = vpop.f32.mrf.mxu0 }
0x1dca   :  { %v10114_v29 = vadd.f32 %v6751_v47, %v5010_v5  ;;  %v10130_v5 = vadd.f32 %v7403_v11, %v6749_v25  ;;  %v6772_v47 = vld [vmem:[%s8482_s10 + $0x3c8] sm:$0xff]  ;;  %v6746_v25 = vld [vmem:[%s8482_s10 + $0x338] sm:$0xff] }
0x1dcb   :  { %v7408_v36 = vpop.f32.mrf.mxu0 }
0x1dcc   :  { %v10106_v46 = vadd.f32 %v7408_v36, %v6754_v6  ;;  %v6771_v6 = vld [vmem:[%s8482_s10 + $0x3c0] sm:$0xff] }
0x1dcd   :  { %v5013_v55 = vpop.f32.mrf.mxu0 }
0x1dce   :  { %v10122_v36 = vadd.f32 %v6752_v63, %v5013_v55  ;;  %v6745_v63 = vld [vmem:[%s8482_s10 + $0x330] sm:$0xff] }
0x1dcf   :  { %v10078_v54 = vpop.f32.mrf.mxu0 }
0x1dd1   :  { %v10080_v61 = vpop.f32.mrf.mxu0 }
0x1dd3   :  { %v10082_v53 = vpop.f32.mrf.mxu0 }
0x1dd5   :  { %v10084_v48 = vpop.f32.mrf.mxu0 }
0x1dd7   :  { %v7437_v24 = vpop.f32.mrf.mxu0 }
0x1dd9   :  { %v10086_v56 = vpop.f32.mrf.mxu0 }
0x1ddb   :  { %v10088_v12 = vpop.f32.mrf.mxu0 }
0x1ddd   :  { %v10090_v7 = vpop.f32.mrf.mxu0 }
0x1ddf   :  { %v7441_v42 = vpop.f32.mrf.mxu0 }
0x1de1   :  { %v5348_v51 = vpop.f32.mrf.mxu0 }
0x1de3   :  { %v7442_v26 = vpop.f32.mrf.mxu0 }
0x1de5   :  { %v5351_v0 = vpop.f32.mrf.mxu0 }
0x1de7   :  { %v7445_v43 = vpop.f32.mrf.mxu0 }
0x1de8   :  { %v10093_v28 = vadd.f32 %v7445_v43, %v6777_v19  ;;  %v6773_v19 = vld [vmem:[%s8482_s10 + $0x3d0] sm:$0xff] }
0x1de9   :  { %v5364_v32 = vpop.f32.mrf.mxu0  ;;  %v10124_v43 = vadd.f32 %v7441_v42, %v6773_v19  ;;  %v10140_v42 = vadd.f32 %v6771_v6, %v5348_v51  ;;  %v6770_v19 = vld [vmem:[%s8482_s10 + $0x3b8] sm:$0xff] }
0x1dea   :  { %5407 = vmax.xlane.f32.xlu0 %v10093_v28  ;;  %v10108_v4 = vadd.f32 %v6775_v15, %v5364_v32  ;;  %v6774_v32 = vld [vmem:[%s8482_s10 + $0x3d8] sm:$0xff]  ;;  %v6747_v15 = vld [vmem:[%s8482_s10 + $0x340] sm:$0xff] }
0x1deb   :  { %v7446_v3 = vpop.f32.mrf.mxu0  ;;  %v10147_v11 = vadd.f32 %v6747_v15, %v10074_v1  ;;  %v10165_v1 = vadd.f32 %v10066_v49, %v6745_v63  ;;  %v6743_v49 = vld [vmem:[%s8482_s10 + $0x320] sm:$0xff] }
0x1dec   :  { %v10100_v14 = vadd.f32 %v7446_v3, %v6778_v27  ;;  %v10132_v27 = vadd.f32 %v7442_v26, %v6774_v32  ;;  %v6750_v3 = vld [vmem:[%s8482_s10 + $0x358] sm:$0xff]  ;;  %v10149_v26 = vadd.f32 %v6772_v47, %v5351_v0  ;;  %v10168_v0 = vadd.f32 %v10088_v12, %v6770_v19  ;;  %v6741_v47 = vld [vmem:[%s8482_s10 + $0x310] sm:$0xff] }
0x1ded   :  { %v5367_v35 = vpop.f32.mrf.mxu0  ;;  %v10138_v55 = vadd.f32 %v7404_v23, %v6750_v3  ;;  %v6768_v3 = vld [vmem:[%s8482_s10 + $0x3a8] sm:$0xff]  ;;  %v7572_v12 = vld [vmem:[%s8391_s5 + $0x58] sm:$0xff]   ;;  %v10186_v6 = vadd.f32 %v6743_v49, %v10068_v58  ;;  %s8218_s5 = smov 26  }
0x1dee   :  { %5053 = vmax.xlane.f32.xlu0 %v10098_v60  ;;  %5409 = vmax.xlane.f32.xlu1 %v10100_v14  ;;  %v10116_v41 = vadd.f32 %v6776_v34, %v5367_v35  ;;  %v6748_v35 = vld [vmem:[%s8482_s10 + $0x348] sm:$0xff]  ;;  %v6769_v34 = vld [vmem:[%s8482_s10 + $0x3b0] sm:$0xff]  ;;  %v10189_v15 = vadd.f32 %v6768_v3, %v10090_v7  ;;  %v6742_v19 = vld [vmem:[%s8482_s10 + $0x318] sm:$0xff] }
0x1def   :  { %v10156_v23 = vadd.f32 %v6748_v35, %v10076_v62  ;;  %v10158_v51 = vadd.f32 %v7437_v24, %v6769_v34  ;;  %v6767_v62 = vld [vmem:[%s8482_s10 + $0x3a0] sm:$0xff]  ;;  %v10175_v24 = vadd.f32 %v10070_v10, %v6746_v25  ;;  %7388 = vmatmul.mubr.msk.bf16.gmra.mxu1 %vm348_vm5, %v7572_v12  ;;  %v6744_v10 = vld [vmem:[%s8482_s10 + $0x328] sm:$0xff]  ;;  %v6766_v35 = vld [vmem:[%s8482_s10 + $0x398] sm:$0xff]  ;;  %v10209_v34 = vadd.f32 %v10058_v18, %v6741_v47 }
0x1df0   :  { %v10178_v32 = vadd.f32 %v6767_v62, %v10086_v56  ;;  %v6765_v56 = vld [vmem:[%s8482_s10 + $0x390] sm:$0xff]  ;;  %7425 = vmatprep.mubr.msk.bf16.mxu1 %vm8194_vm0, %v10683_v50  ;;  %v10199_v58 = vadd.f32 %v6744_v10, %v10072_v33  ;;  %v10212_v63 = vadd.f32 %v10082_v53, %v6766_v35  ;;  %v6763_v25 = vld [vmem:[%s8482_s10 + $0x380] sm:$0xff]  ;;  %v10219_v33 = vadd.f32 %v10062_v57, %v6742_v19  ;;  %v6764_v49 = vld [vmem:[%s8482_s10 + $0x388] sm:$0xff] }
0x1df1   :  { %v10202_v7 = vadd.f32 %v10078_v54, %v6765_v56  ;;  %v10222_v54 = vadd.f32 %v6763_v25, %v10080_v61  ;;  %v6739_v62 = vld [vmem:[%s8482_s10 + $0x300] sm:$0xff]  ;;  %v10232_v53 = vadd.f32 %v6764_v49, %v10084_v48  ;;  %v6740_v3 = vld [vmem:[%s8482_s10 + $0x308] sm:$0xff] }
0x1df2   :  { %5055 = vmax.xlane.f32.xlu1 %v10106_v46  ;;  %5403 = vmax.xlane.f32.xlu0 %v10108_v4  ;;  %v10229_v18 = vadd.f32 %v6739_v62, %v10060_v39  ;;  %v10238_v57 = vadd.f32 %v6740_v3, %v10064_v45 }
0x1df6   :  { %5405 = vmax.xlane.f32.xlu1 %v10116_v41  ;;  %5049 = vmax.xlane.f32.xlu0 %v10114_v29 }
0x1dfa   :  { %5051 = vmax.xlane.f32.xlu1 %v10122_v36  ;;  %5399 = vmax.xlane.f32.xlu0 %v10124_v43 }
0x1dfe   :  { %5401 = vmax.xlane.f32.xlu1 %v10132_v27  ;;  %5045 = vmax.xlane.f32.xlu0 %v10130_v5 }
0x1e02   :  { %5047 = vmax.xlane.f32.xlu1 %v10138_v55  ;;  %5395 = vmax.xlane.f32.xlu0 %v10140_v42 }
0x1e06   :  { %5397 = vmax.xlane.f32.xlu1 %v10149_v26  ;;  %5041 = vmax.xlane.f32.xlu0 %v10147_v11 }
0x1e0a   :  { %5043 = vmax.xlane.f32.xlu1 %v10156_v23  ;;  %5391 = vmax.xlane.f32.xlu0 %v10158_v51 }
0x1e0e   :  { %5393 = vmax.xlane.f32.xlu1 %v10168_v0  ;;  %5037 = vmax.xlane.f32.xlu0 %v10165_v1 }
0x1e12   :  { %5039 = vmax.xlane.f32.xlu1 %v10175_v24  ;;  %5387 = vmax.xlane.f32.xlu0 %v10178_v32 }
0x1e16   :  { %5389 = vmax.xlane.f32.xlu1 %v10189_v15  ;;  %5033 = vmax.xlane.f32.xlu0 %v10186_v6 }
0x1e1a   :  { %5035 = vmax.xlane.f32.xlu1 %v10199_v58  ;;  %5383 = vmax.xlane.f32.xlu0 %v10202_v7 }
0x1e1e   :  { %5385 = vmax.xlane.f32.xlu1 %v10212_v63  ;;  %5029 = vmax.xlane.f32.xlu0 %v10209_v34 }
0x1e22   :  { %5031 = vmax.xlane.f32.xlu1 %v10219_v33  ;;  %5379 = vmax.xlane.f32.xlu0 %v10222_v54 }
0x1e26   :  { %5381 = vmax.xlane.f32.xlu1 %v10232_v53  ;;  %5025 = vmax.xlane.f32.xlu0 %v10229_v18 }
0x1e2a   :  { %5027 = vmax.xlane.f32.xlu1 %v10238_v57 }
0x1e73   :  { %v5408_v61 = vpop.xlane.xlu0 %5407 }
0x1e74   :  { %v5425_v12 = vsub.f32 %v10093_v28, %v5408_v61 }
0x1e76   :  { %v5455_v48 = vmul.f32 1.442695, %v5425_v12 }
0x1e77   :  { %v5054_v10 = vpop.xlane.xlu0 %5053  ;;  %v5410_v56 = vpop.xlane.xlu1 %5409 }
0x1e78   :  { %v5071_v39 = vsub.f32 %v10098_v60, %v5054_v10  ;;  %v5426_v25 = vsub.f32 %v10100_v14, %v5410_v56 }
0x1e7a   :  { %v5101_v47 = vmul.f32 1.442695, %v5071_v39  ;;  %v5457_v40 = vmul.f32 1.442695, %v5426_v25 }
0x1e7b   :  { %v5056_v35 = vpop.xlane.xlu1 %5055  ;;  %v5404_v19 = vpop.xlane.xlu0 %5403 }
0x1e7c   :  { %8036 = vpow2.f32 %v5101_v47  ;;  %v5072_v62 = vsub.f32 %v10106_v46, %v5056_v35  ;;  %v5423_v61 = vsub.f32 %v10108_v4, %v5404_v19 }
0x1e7d   :  { %8038 = vpow2.f32 %v5455_v48 }
0x1e7e   :  { %v5103_v45 = vmul.f32 1.442695, %v5072_v62  ;;  %v5451_v56 = vmul.f32 1.442695, %v5423_v61 }
0x1e7f   :  { %v5406_v49 = vpop.xlane.xlu1 %5405  ;;  %v5050_v3 = vpop.xlane.xlu0 %5049 }
0x1e80   :  { %8040 = vpow2.f32 %v5103_v45  ;;  %v5069_v28 = vsub.f32 %v10114_v29, %v5050_v3  ;;  %v5424_v39 = vsub.f32 %v10116_v41, %v5406_v49 }
0x1e81   :  { %8042 = vpow2.f32 %v5457_v40 }
0x1e82   :  { %v5097_v60 = vmul.f32 1.442695, %v5069_v28  ;;  %v5453_v25 = vmul.f32 1.442695, %v5424_v39 }
0x1e83   :  { %v5052_v10 = vpop.xlane.xlu1 %5051  ;;  %v5400_v12 = vpop.xlane.xlu0 %5399 }
0x1e84   :  { %v5070_v14 = vsub.f32 %v10122_v36, %v5052_v10  ;;  %8044 = vpow2.f32 %v5097_v60  ;;  %v5421_v46 = vsub.f32 %v10124_v43, %v5400_v12 }
0x1e86   :  { %v5099_v47 = vmul.f32 1.442695, %v5070_v14  ;;  %v5447_v19 = vmul.f32 1.442695, %v5421_v46 }
0x1e87   :  { %v5402_v48 = vpop.xlane.xlu1 %5401  ;;  %v5046_v35 = vpop.xlane.xlu0 %5045 }
0x1e88   :  { %8046 = vpow2.f32 %v5099_v47  ;;  %v5422_v29 = vsub.f32 %v10132_v27, %v5402_v48  ;;  %v5067_v40 = vsub.f32 %v10130_v5, %v5046_v35 }
0x1e89   :  { %v10251_v4 = vpop.eup %8036  ;;  %8048 = vpow2.f32 %v5451_v56 }
0x1e8a   :  { %5133 = vadd.xlane.f32.xlu0 %v10251_v4  ;;  %v10255_v62 = vpop.eup %8038  ;;  %8050 = vpow2.f32 %v5453_v25  ;;  %v5449_v43 = vmul.f32 1.442695, %v5422_v29  ;;  %v5093_v27 = vmul.f32 1.442695, %v5067_v40 }
0x1e8b   :  { %v5048_v41 = vpop.xlane.xlu1 %5047  ;;  %v5396_v36 = vpop.xlane.xlu0 %5395  ;;  %8052 = vpow2.f32 %v5447_v19 }
0x1e8c   :  { %v5068_v45 = vsub.f32 %v10138_v55, %v5048_v41  ;;  %v5419_v3 = vsub.f32 %v10140_v42, %v5396_v36  ;;  %8054 = vpow2.f32 %v5449_v43 }
0x1e8d   :  { %v10258_v49 = vpop.eup %8040  ;;  %8056 = vpow2.f32 %v5093_v27 }
0x1e8e   :  { %5135 = vadd.xlane.f32.xlu1 %v10258_v49  ;;  %5487 = vadd.xlane.f32.xlu0 %v10255_v62  ;;  %v5095_v61 = vmul.f32 1.442695, %v5068_v45  ;;  %v10264_v10 = vpop.eup %8042  ;;  %v5443_v55 = vmul.f32 1.442695, %v5419_v3 }
0x1e8f   :  { %v5398_v5 = vpop.xlane.xlu1 %5397  ;;  %v5042_v28 = vpop.xlane.xlu0 %5041 }
0x1e90   :  { %v5420_v60 = vsub.f32 %v10149_v26, %v5398_v5  ;;  %v5065_v12 = vsub.f32 %v10147_v11, %v5042_v28  ;;  %8058 = vpow2.f32 %v5095_v61 }
0x1e91   :  { %v10267_v39 = vpop.eup %8044  ;;  %8060 = vpow2.f32 %v5443_v55 }
0x1e92   :  { %5489 = vadd.xlane.f32.xlu1 %v10264_v10  ;;  %5129 = vadd.xlane.f32.xlu0 %v10267_v39  ;;  %v5445_v56 = vmul.f32 1.442695, %v5420_v60  ;;  %v5089_v26 = vmul.f32 1.442695, %v5065_v12 }
0x1e93   :  { %v5044_v42 = vpop.xlane.xlu1 %5043  ;;  %v5392_v14 = vpop.xlane.xlu0 %5391 }
0x1e94   :  { %v5066_v46 = vsub.f32 %v10156_v23, %v5044_v42  ;;  %v5417_v48 = vsub.f32 %v10158_v51, %v5392_v14  ;;  %8062 = vpow2.f32 %v5445_v56 }
0x1e95   :  { %v10272_v47 = vpop.eup %8046  ;;  %8064 = vpow2.f32 %v5089_v26 }
0x1e96   :  { %v10275_v35 = vpop.eup %8048  ;;  %5131 = vadd.xlane.f32.xlu1 %v10272_v47  ;;  %v5091_v29 = vmul.f32 1.442695, %v5066_v46  ;;  %v5439_v23 = vmul.f32 1.442695, %v5417_v48 }
0x1e97   :  { %5483 = vadd.xlane.f32.xlu0 %v10275_v35  ;;  %v5394_v11 = vpop.xlane.xlu1 %5393  ;;  %v5038_v25 = vpop.xlane.xlu0 %5037 }
0x1e98   :  { %v5418_v19 = vsub.f32 %v10168_v0, %v5394_v11  ;;  %v10280_v40 = vpop.eup %8050  ;;  %v5063_v41 = vsub.f32 %v10165_v1, %v5038_v25  ;;  %8066 = vpow2.f32 %v5091_v29 }
0x1e99   :  { %v10283_v36 = vpop.eup %8052  ;;  %8068 = vpow2.f32 %v5439_v23 }
0x1e9a   :  { %5485 = vadd.xlane.f32.xlu1 %v10280_v40  ;;  %v5441_v45 = vmul.f32 1.442695, %v5418_v19  ;;  %v10288_v3 = vpop.eup %8054  ;;  %v5085_v0 = vmul.f32 1.442695, %v5063_v41 }
0x1e9b   :  { %5479 = vadd.xlane.f32.xlu0 %v10283_v36  ;;  %v5040_v51 = vpop.xlane.xlu1 %5039  ;;  %v5388_v43 = vpop.xlane.xlu0 %5387 }
0x1e9c   :  { %v5064_v27 = vsub.f32 %v10175_v24, %v5040_v51  ;;  %v5415_v5 = vsub.f32 %v10178_v32, %v5388_v43  ;;  %v10291_v28 = vpop.eup %8056  ;;  %8070 = vpow2.f32 %v5441_v45 }
0x1e9d   :  { %v10296_v12 = vpop.eup %8058  ;;  %8072 = vpow2.f32 %v5085_v0 }
0x1e9e   :  { %5481 = vadd.xlane.f32.xlu1 %v10288_v3  ;;  %v5087_v60 = vmul.f32 1.442695, %v5064_v27  ;;  %v5435_v24 = vmul.f32 1.442695, %v5415_v5  ;;  %v10299_v14 = vpop.eup %8060 }
0x1e9f   :  { %5125 = vadd.xlane.f32.xlu0 %v10291_v28  ;;  %v5390_v1 = vpop.xlane.xlu1 %5389  ;;  %v5034_v61 = vpop.xlane.xlu0 %5033 }
0x1ea0   :  { %v5416_v55 = vsub.f32 %v10189_v15, %v5390_v1  ;;  %v5061_v42 = vsub.f32 %v10186_v6, %v5034_v61  ;;  %8074 = vpow2.f32 %v5087_v60 }
0x1ea1   :  { %v10304_v48 = vpop.eup %8062  ;;  %8076 = vpow2.f32 %v5435_v24 }
0x1ea2   :  { %5127 = vadd.xlane.f32.xlu1 %v10296_v12  ;;  %v5437_v46 = vmul.f32 1.442695, %v5416_v55  ;;  %v5081_v15 = vmul.f32 1.442695, %v5061_v42  ;;  %v10307_v25 = vpop.eup %8064 }
0x1ea3   :  { %5475 = vadd.xlane.f32.xlu0 %v10299_v14  ;;  %v5036_v32 = vpop.xlane.xlu1 %5035  ;;  %v5384_v56 = vpop.xlane.xlu0 %5383 }
0x1ea4   :  { %v5062_v26 = vsub.f32 %v10199_v58, %v5036_v32  ;;  %v5413_v11 = vsub.f32 %v10202_v7, %v5384_v56  ;;  %8078 = vpow2.f32 %v5437_v46 }
0x1ea5   :  { %v10312_v41 = vpop.eup %8066  ;;  %8080 = vpow2.f32 %v5081_v15 }
0x1ea6   :  { %5477 = vadd.xlane.f32.xlu1 %v10304_v48  ;;  %v5083_v19 = vmul.f32 1.442695, %v5062_v26  ;;  %v5431_v58 = vmul.f32 1.442695, %v5413_v11  ;;  %v10315_v43 = vpop.eup %8068 }
0x1ea7   :  { %5121 = vadd.xlane.f32.xlu0 %v10307_v25  ;;  %v5386_v6 = vpop.xlane.xlu1 %5385  ;;  %v5030_v29 = vpop.xlane.xlu0 %5029 }
0x1ea8   :  { %v5414_v23 = vsub.f32 %v10212_v63, %v5386_v6  ;;  %v5059_v51 = vsub.f32 %v10209_v34, %v5030_v29  ;;  %8082 = vpow2.f32 %v5083_v19 }
0x1ea9   :  { %v10320_v5 = vpop.eup %8070  ;;  %8084 = vpow2.f32 %v5431_v58 }
0x1eaa   :  { %5123 = vadd.xlane.f32.xlu1 %v10312_v41  ;;  %v5433_v27 = vmul.f32 1.442695, %v5414_v23  ;;  %v5077_v63 = vmul.f32 1.442695, %v5059_v51  ;;  %v10323_v61 = vpop.eup %8072 }
0x1eab   :  { %5471 = vadd.xlane.f32.xlu0 %v10315_v43  ;;  %v5032_v7 = vpop.xlane.xlu1 %5031  ;;  %v5380_v45 = vpop.xlane.xlu0 %5379 }
0x1eac   :  { %v5060_v0 = vsub.f32 %v10219_v33, %v5032_v7  ;;  %v5411_v1 = vsub.f32 %v10222_v54, %v5380_v45  ;;  %8086 = vpow2.f32 %v5433_v27 }
0x1ead   :  { %v10328_v42 = vpop.eup %8074  ;;  %8088 = vpow2.f32 %v5077_v63  ;;  %v6709_v63 = vld [vmem:[%s8351_s30 + $0xb0] sm:$0xff] }
0x1eae   :  { %5473 = vadd.xlane.f32.xlu1 %v10320_v5  ;;  %v5079_v55 = vmul.f32 1.442695, %v5060_v0  ;;  %v5427_v33 = vmul.f32 1.442695, %v5411_v1  ;;  %v10331_v56 = vpop.eup %8076 }
0x1eaf   :  { %5117 = vadd.xlane.f32.xlu0 %v10323_v61  ;;  %v5382_v34 = vpop.xlane.xlu1 %5381  ;;  %v5026_v60 = vpop.xlane.xlu0 %5025 }
0x1eb0   :  { %v5412_v24 = vsub.f32 %v10232_v53, %v5382_v34  ;;  %v5057_v32 = vsub.f32 %v10229_v18, %v5026_v60  ;;  %8090 = vpow2.f32 %v5079_v55  ;;  %v10369_v27 = vpop.f32.mrf.mxu1  ;;  %v6710_v34 = vld [vmem:[%s8351_s30 + $0xb8] sm:$0xff]  ;;  %v6715_v55 = vld [vmem:[%s8764_s20 + $0x30] sm:$0xff] }
0x1eb1   :  { %v10336_v15 = vpop.eup %8078  ;;  %8092 = vpow2.f32 %v5427_v33  ;;  %v6717_v33 = vld [vmem:[%s8772_s27 + $0x30] sm:$0xff] }
0x1eb2   :  { %5119 = vadd.xlane.f32.xlu1 %v10328_v42  ;;  %v5429_v46 = vmul.f32 1.442695, %v5412_v24  ;;  %v5073_v53 = vmul.f32 1.442695, %v5057_v32  ;;  %v10338_v11 = vpop.eup %8080  ;;  %v7389_v0 = vpop.f32.mrf.mxu1  ;;  %v6716_v24 = vld [vmem:[%s8764_s20 + $0x38] sm:$0xff] }
0x1eb3   :  { %5467 = vadd.xlane.f32.xlu0 %v10331_v56  ;;  %v5028_v54 = vpop.xlane.xlu1 %5027  ;;  %v6718_v32 = vld [vmem:[%s8772_s27 + $0x38] sm:$0xff]  ;;  %v6726_v0 = vld [vmem:[%s8788_s9 + $0x68] sm:$0xff]  ;;  %s6430_s27 = sld [smem:[%s10670_s0 + %s8218_s5]]  }
0x1eb4   :  { %v5058_v26 = vsub.f32 %v10238_v57, %v5028_v54  ;;  %8094 = vpow2.f32 %v5429_v46  ;;  %v10372_v1 = vpop.f32.mrf.mxu1  ;;  %v6719_v54 = vld [vmem:[%s8781_s3 + $0x30] sm:$0xff]  ;;  %v6720_v46 = vld [vmem:[%s8781_s3 + $0x38] sm:$0xff] }
0x1eb5   :  { %v10342_v6 = vpop.eup %8082  ;;  %8096 = vpow2.f32 %v5073_v53  ;;  %v6728_v53 = vld [vmem:[%s8788_s9 + $0x78] sm:$0xff] }
0x1eb6   :  { %5469 = vadd.xlane.f32.xlu1 %v10336_v15  ;;  %v5075_v18 = vmul.f32 1.442695, %v5058_v26  ;;  %v10344_v29 = vpop.eup %8084  ;;  %v7390_v60 = vpop.f32.mrf.mxu1  ;;  %v6727_v26 = vld [vmem:[%s8788_s9 + $0x70] sm:$0xff] }
0x1eb7   :  { %5113 = vadd.xlane.f32.xlu0 %v10338_v11 }
0x1eb8   :  { %8098 = vpow2.f32 %v5075_v18  ;;  %v6725_v18 = vld [vmem:[%s8788_s9 + $0x60] sm:$0xff] }
0x1eb9   :  { %v10348_v57 = vpop.eup %8086 }
0x1eba   :  { %5115 = vadd.xlane.f32.xlu1 %v10342_v6  ;;  %v10350_v19 = vpop.eup %8088 }
0x1ebb   :  { %5463 = vadd.xlane.f32.xlu0 %v10344_v29 }
0x1ebd   :  { %v10354_v23 = vpop.eup %8090 }
0x1ebe   :  { %5465 = vadd.xlane.f32.xlu1 %v10348_v57  ;;  %v10356_v58 = vpop.eup %8092 }
0x1ebf   :  { %5109 = vadd.xlane.f32.xlu0 %v10350_v19 }
0x1ec1   :  { %v10360_v51 = vpop.eup %8094 }
0x1ec2   :  { %5111 = vadd.xlane.f32.xlu1 %v10354_v23  ;;  %v10362_v7 = vpop.eup %8096 }
0x1ec3   :  { %5459 = vadd.xlane.f32.xlu0 %v10356_v58 }
0x1ec5   :  { %v10366_v45 = vpop.eup %8098 }
0x1ec6   :  { %5461 = vadd.xlane.f32.xlu1 %v10360_v51 }
0x1ec7   :  { %5105 = vadd.xlane.f32.xlu0 %v10362_v7 }
0x1eca   :  { %5107 = vadd.xlane.f32.xlu1 %v10366_v45 }
0x1edb   :  { %4775 = vperm.xlu1 %7538, %v6709_v63   ;;  %v6731_v63 = vld [vmem:[%s8797_s22 + $0x30] sm:$0xff] }
0x1edd   :  { %4780 = vperm.xlu0 %7537, %v6710_v34   ;;  %v6732_v34 = vld [vmem:[%s8797_s22 + $0x38] sm:$0xff] }
0x1edf   :  { %5678 = vperm.xlu1 %7538, %v6715_v55  }
0x1ee1   :  { %5683 = vperm.xlu0 %7537, %v6716_v24  }
0x1ee3   :  { %5716 = vperm.xlu1 %7538, %v6717_v33  }
0x1ee5   :  { %5721 = vperm.xlu0 %7537, %v6718_v32  }
0x1ee7   :  { %5728 = vperm.xlu1 %7538, %v6719_v54  }
0x1ee9   :  { %5733 = vperm.xlu0 %7537, %v6720_v46  }
0x1eeb   :  { %5751 = vperm.xlu1 %7538, %v6727_v26  }
0x1eed   :  { %5756 = vperm.xlu0 %7537, %v6728_v53  }
0x1eef   :  { %5741 = vperm.xlu1 %7538, %v6725_v18  }
0x1ef1   :  { %5746 = vperm.xlu0 %7537, %v6726_v0  }
0x1ef3   :  { %5932 = vperm.xlu1 %7538, %v6731_v63  }
0x1ef5   :  { %5937 = vperm.xlu0 %7537, %v6732_v34  }
0x1f13   :  { %v5134_v60 = vpop.xlane.xlu0 %5133 }
0x1f14   :  { %8100 = vrcp.f32 %v5134_v60 }
0x1f17   :  { %v5136_v55 = vpop.xlane.xlu1 %5135  ;;  %v5488_v24 = vpop.xlane.xlu0 %5487 }
0x1f18   :  { %8102 = vrcp.f32 %v5136_v55 }
0x1f19   :  { %8104 = vrcp.f32 %v5488_v24 }
0x1f1b   :  { %v5490_v33 = vpop.xlane.xlu1 %5489  ;;  %v5130_v32 = vpop.xlane.xlu0 %5129 }
0x1f1c   :  { %8106 = vrcp.f32 %v5490_v33 }
0x1f1d   :  { %8108 = vrcp.f32 %v5130_v32 }
0x1f1f   :  { %v5132_v54 = vpop.xlane.xlu1 %5131 }
0x1f20   :  { %8110 = vrcp.f32 %v5132_v54  ;;  %v5484_v46 = vpop.xlane.xlu0 %5483 }
0x1f21   :  { %8112 = vrcp.f32 %v5484_v46  ;;  %v8101_v26 = vpop.eup %8100 }
0x1f22   :  { %v5167_v63 = vmul.f32 %v8101_v26, %v10251_v4 }
0x1f23   :  { %v5486_v53 = vpop.xlane.xlu1 %5485 }
0x1f24   :  { %8114 = vrcp.f32 %v5486_v53  ;;  %v5480_v18 = vpop.xlane.xlu0 %5479 }
0x1f25   :  { %v8103_v0 = vpop.eup %8102 }
0x1f26   :  { %v5168_v34 = vmul.f32 %v8103_v0, %v10258_v49  ;;  %v8105_v60 = vpop.eup %8104 }
0x1f27   :  { %v5482_v55 = vpop.xlane.xlu1 %5481  ;;  %v5521_v32 = vmul.f32 %v8105_v60, %v10255_v62 }
0x1f28   :  { %8116 = vrcp.f32 %v5482_v55  ;;  %v5126_v24 = vpop.xlane.xlu0 %5125  ;;  %v5176_v33 = vpack.c.bf16 %v5168_v34, %v5167_v63 }
0x1f29   :  { %v8107_v2 = vpop.eup %8106  ;;  %8118 = vrcp.f32 %v5480_v18 }
0x1f2a   :  { %8120 = vrcp.f32 %v5126_v24  ;;  %7410 = vmatpush3.bf16.xpose.msra.mxu1 %v5176_v33  ;;  %v5522_v54 = vmul.f32 %v8107_v2, %v10264_v10  ;;  %v8109_v46 = vpop.eup %8108 }
0x1f2b   :  { %v5128_v53 = vpop.xlane.xlu1 %5127  ;;  %7411 = vmatprep.subr.bf16.mxu1 %v10683_v50  ;;  %v5165_v0 = vmul.f32 %v8109_v46, %v10267_v39 }
0x1f2c   :  { %8122 = vrcp.f32 %v5128_v53  ;;  %v5476_v4 = vpop.xlane.xlu0 %5475  ;;  %v5530_v49 = vpack.c.bf16 %v5522_v54, %v5521_v32 }
0x1f2d   :  { %v8111_v26 = vpop.eup %8110 }
0x1f2e   :  { %7448 = vmatpush3.bf16.xpose.msra.mxu0 %v5530_v49  ;;  %v5166_v63 = vmul.f32 %v8111_v26, %v10272_v47  ;;  %v8113_v18 = vpop.eup %8112 }
0x1f2f   :  { %v5478_v34 = vpop.xlane.xlu1 %5477  ;;  %7449 = vmatprep.subr.bf16.mxu0 %v10683_v50  ;;  %v5519_v60 = vmul.f32 %v8113_v18, %v10275_v35 }
0x1f30   :  { %8124 = vrcp.f32 %v5478_v34  ;;  %v5122_v62 = vpop.xlane.xlu0 %5121  ;;  %v5175_v2 = vpack.c.bf16 %v5166_v63, %v5165_v0 }
0x1f31   :  { %v8115_v10 = vpop.eup %8114  ;;  %8126 = vrcp.f32 %v5476_v4 }
0x1f32   :  { %8128 = vrcp.f32 %v5122_v62  ;;  %7412 = vmatpush3.bf16.xpose.msra.mxu1 %v5175_v2  ;;  %v5520_v55 = vmul.f32 %v8115_v10, %v10280_v40 }
0x1f33   :  { %v5124_v24 = vpop.xlane.xlu1 %5123  ;;  %7413 = vmatprep.subr.bf16.mxu1 %v10683_v50 }
0x1f34   :  { %8130 = vrcp.f32 %v5124_v24  ;;  %v5472_v39 = vpop.xlane.xlu0 %5471  ;;  %v5529_v47 = vpack.c.bf16 %v5520_v55, %v5519_v60 }
0x1f35   :  { %v8117_v33 = vpop.eup %8116 }
0x1f36   :  { %v8119_v32 = vpop.eup %8118  ;;  %7450 = vmatpush3.bf16.xpose.msra.mxu0 %v5529_v47  ;;  %v5518_v4 = vmul.f32 %v8117_v33, %v10288_v3 }
0x1f37   :  { %v8121_v54 = vpop.eup %8120  ;;  %v5474_v46 = vpop.xlane.xlu1 %5473  ;;  %7451 = vmatprep.subr.bf16.mxu0 %v10683_v50  ;;  %v5517_v26 = vmul.f32 %v8119_v32, %v10283_v36 }
0x1f38   :  { %8132 = vrcp.f32 %v5474_v46  ;;  %v5118_v53 = vpop.xlane.xlu0 %5117  ;;  %v5163_v40 = vmul.f32 %v8121_v54, %v10291_v28 }
0x1f39   :  { %v8123_v35 = vpop.eup %8122  ;;  %8134 = vrcp.f32 %v5472_v39  ;;  %v5528_v34 = vpack.c.bf16 %v5518_v4, %v5517_v26 }
0x1f3a   :  { %8136 = vrcp.f32 %v5118_v53  ;;  %v5164_v49 = vmul.f32 %v8123_v35, %v10296_v12 }
0x1f3b   :  { %v5120_v0 = vpop.xlane.xlu1 %5119 }
0x1f3c   :  { %8138 = vrcp.f32 %v5120_v0  ;;  %v5468_v63 = vpop.xlane.xlu0 %5467  ;;  %v5174_v18 = vpack.c.bf16 %v5164_v49, %v5163_v40 }
0x1f3d   :  { %v8125_v62 = vpop.eup %8124 }
0x1f3e   :  { %v8127_v2 = vpop.eup %8126  ;;  %7414 = vmatpush3.bf16.xpose.msra.mxu1 %v5174_v18  ;;  %7452 = vmatpush3.bf16.xpose.msra.mxu0 %v5528_v34  ;;  %v5516_v12 = vmul.f32 %v8125_v62, %v10304_v48 }
0x1f3f   :  { %v8129_v10 = vpop.eup %8128  ;;  %v5470_v3 = vpop.xlane.xlu1 %5469  ;;  %7415 = vmatprep.subr.bf16.mxu1 %v10683_v50  ;;  %7453 = vmatprep.subr.bf16.mxu0 %v10683_v50  ;;  %v5515_v24 = vmul.f32 %v8127_v2, %v10299_v14 }
0x1f40   :  { %8140 = vrcp.f32 %v5470_v3  ;;  %v5114_v28 = vpop.xlane.xlu0 %5113  ;;  %v5161_v60 = vmul.f32 %v8129_v10, %v10307_v25 }
0x1f41   :  { %v8131_v36 = vpop.eup %8130  ;;  %8142 = vrcp.f32 %v5468_v63  ;;  %v5527_v32 = vpack.c.bf16 %v5516_v12, %v5515_v24 }
0x1f42   :  { %8144 = vrcp.f32 %v5114_v28  ;;  %v5162_v55 = vmul.f32 %v8131_v36, %v10312_v41 }
0x1f43   :  { %v5116_v39 = vpop.xlane.xlu1 %5115 }
0x1f44   :  { %8146 = vrcp.f32 %v5116_v39  ;;  %v5464_v47 = vpop.xlane.xlu0 %5463  ;;  %v5173_v33 = vpack.c.bf16 %v5162_v55, %v5161_v60 }
0x1f45   :  { %v8133_v54 = vpop.eup %8132 }
0x1f46   :  { %v8135_v46 = vpop.eup %8134  ;;  %7416 = vmatpush3.bf16.xpose.msra.mxu1 %v5173_v33  ;;  %7454 = vmatpush3.bf16.xpose.msra.mxu0 %v5527_v32  ;;  %v5514_v41 = vmul.f32 %v8133_v54, %v10320_v5 }
0x1f47   :  { %v8137_v53 = vpop.eup %8136  ;;  %v5466_v48 = vpop.xlane.xlu1 %5465  ;;  %7417 = vmatprep.subr.bf16.mxu1 %v10683_v50  ;;  %7455 = vmatprep.subr.bf16.mxu0 %v10683_v50  ;;  %v5513_v40 = vmul.f32 %v8135_v46, %v10315_v43 }
0x1f48   :  { %8148 = vrcp.f32 %v5466_v48  ;;  %v5110_v25 = vpop.xlane.xlu0 %5109  ;;  %v5159_v4 = vmul.f32 %v8137_v53, %v10323_v61 }
0x1f49   :  { %v8139_v14 = vpop.eup %8138  ;;  %8150 = vrcp.f32 %v5464_v47  ;;  %v5526_v63 = vpack.c.bf16 %v5514_v41, %v5513_v40 }
0x1f4a   :  { %8152 = vrcp.f32 %v5110_v25  ;;  %v5160_v35 = vmul.f32 %v8139_v14, %v10328_v42 }
0x1f4b   :  { %v5112_v49 = vpop.xlane.xlu1 %5111 }
0x1f4c   :  { %8154 = vrcp.f32 %v5112_v49  ;;  %v5460_v26 = vpop.xlane.xlu0 %5459  ;;  %v5172_v0 = vpack.c.bf16 %v5160_v35, %v5159_v4 }
0x1f4d   :  { %v8141_v18 = vpop.eup %8140 }
0x1f4e   :  { %v8143_v34 = vpop.eup %8142  ;;  %7418 = vmatpush3.bf16.xpose.msra.mxu1 %v5172_v0  ;;  %7456 = vmatpush3.bf16.xpose.msra.mxu0 %v5526_v63  ;;  %v5512_v42 = vmul.f32 %v8141_v18, %v10336_v15  ;;  %v7573_v0 = vld [vmem:[%s8866_s29 + $0x38] sm:$0xff]  }
0x1f4f   :  { %v8145_v62 = vpop.eup %8144  ;;  %v5462_v5 = vpop.xlane.xlu1 %5461  ;;  %7419 = vmatprep.subr.bf16.mxu1 %v10683_v50  ;;  %7457 = vmatprep.subr.bf16.mxu0 %v10683_v50  ;;  %v5511_v3 = vmul.f32 %v8143_v34, %v10331_v56 }
0x1f50   :  { %8156 = vrcp.f32 %v5462_v5  ;;  %v5106_v61 = vpop.xlane.xlu0 %5105  ;;  %v5157_v2 = vmul.f32 %v8145_v62, %v10338_v11 }
0x1f51   :  { %v8147_v43 = vpop.eup %8146  ;;  %8158 = vrcp.f32 %v5460_v26  ;;  %v5525_v36 = vpack.c.bf16 %v5512_v42, %v5511_v3  ;;  %v7575_v42 = vld [vmem:[%s8880_s8 + $0x30] sm:$0xff]  }
0x1f52   :  { %8160 = vrcp.f32 %v5106_v61  ;;  %v5158_v10 = vmul.f32 %v8147_v43, %v10342_v6  ;;  %v7574_v61 = vld [vmem:[%s8866_s29 + $0x30] sm:$0xff]  }
0x1f53   :  { %v5108_v28 = vpop.xlane.xlu1 %5107 }
0x1f54   :  { %8162 = vrcp.f32 %v5108_v28  ;;  %v5171_v12 = vpack.c.bf16 %v5158_v10, %v5157_v2 }
0x1f55   :  { %v8149_v60 = vpop.eup %8148 }
0x1f56   :  { %v8151_v55 = vpop.eup %8150  ;;  %7420 = vmatpush3.bf16.xpose.msra.mxu1 %v5171_v12  ;;  %7458 = vmatpush3.bf16.xpose.msra.mxu0 %v5525_v36  ;;  %v5510_v15 = vmul.f32 %v8149_v60, %v10348_v57 }
0x1f57   :  { %v8153_v24 = vpop.eup %8152  ;;  %7421 = vmatprep.subr.bf16.mxu1 %v10683_v50  ;;  %7459 = vmatprep.subr.bf16.mxu0 %v10683_v50  ;;  %v5509_v39 = vmul.f32 %v8151_v55, %v10344_v29  ;;  %v4776_v48 = vpop.permute.xlu1 %4775 }
0x1f58   :  { %v5155_v6 = vmul.f32 %v8153_v24, %v10350_v19  ;;  %v4781_v25 = vpop.permute.xlu0 %4780  ;;  %v4858_v4 = vadd.f32 %v10369_v27, %v4776_v48 }
0x1f59   :  { %v8155_v11 = vpop.eup %8154  ;;  %v5524_v33 = vpack.c.bf16 %v5510_v15, %v5509_v39  ;;  %v4861_v35 = vadd.f32 %v10372_v1, %v4781_v25 }
0x1f5a   :  { %v5156_v56 = vmul.f32 %v8155_v11, %v10354_v23 }
0x1f5b   :  { %v5679_v60 = vpop.permute.xlu1 %5678 }
0x1f5c   :  { %v5170_v47 = vpack.c.bf16 %v5156_v56, %v5155_v6  ;;  %v5684_v11 = vpop.permute.xlu0 %5683 }
0x1f5d   :  { %v8157_v32 = vpop.eup %8156 }
0x1f5e   :  { %v8159_v54 = vpop.eup %8158  ;;  %7422 = vmatpush3.bf16.xpose.msra.mxu1 %v5170_v47  ;;  %7460 = vmatpush3.bf16.xpose.msra.mxu0 %v5524_v33  ;;  %v5508_v57 = vmul.f32 %v8157_v32, %v10360_v51  ;;  %v4867_v51 = vpack.c.bf16 %v4858_v4, %v4858_v4 }
0x1f5f   :  { %v8161_v46 = vpop.eup %8160  ;;  %7423 = vmatprep.subr.bf16.mxu1 %v10683_v50  ;;  %7461 = vmatprep.subr.bf16.mxu0 %v10683_v50  ;;  %v5507_v29 = vmul.f32 %v8159_v54, %v10356_v58 }
0x1f60   :  { %v5153_v19 = vmul.f32 %v8161_v46, %v10362_v7  ;;  %v5221_v7 = vpack.c.bf16 %v4861_v35, %v4861_v35 }
0x1f61   :  { %v8163_v53 = vpop.eup %8162  ;;  %v5523_v14 = vpack.c.bf16 %v5508_v57, %v5507_v29 }
0x1f62   :  { %v5154_v23 = vmul.f32 %v8163_v53, %v10366_v45 }
0x1f64   :  { %v5169_v41 = vpack.c.bf16 %v5154_v23, %v5153_v19 }
0x1f66   :  { %7424 = vmatpush3.bf16.xpose.msra.mxu1 %v5169_v41  ;;  %7462 = vmatpush3.bf16.xpose.msra.mxu0 %v5523_v14 }
0x1f67   :  { %7467 = vmatprep.subr.bf16.mxu1 %v10683_v50  ;;  %6234 = vmatprep.subr.bf16.mxu0 %v10684_v17 }
0x1f6d   :  { %7426 = vmatmul.mubr.bf16.vlgmr.msra.gmra.mxu1 %v4867_v51  ;;  %7464 = vmatmul.mubr.bf16.vlgmr.msra.gmra.mxu0 %v5221_v7 }
0x1f6e   :  { %7469 = vmatprep.mubr.msk.bf16.mxu1 %vm8194_vm0, %v10683_v50 }
0x202d   :  { %v5211_v58 = vpop.f32.mrf.mxu1  ;;  %v5565_v45 = vpop.f32.mrf.mxu0 }
0x202e   :  { %v5571_v40 = vpack.c.bf16 %v5565_v45, %v5565_v45  ;;  %v5217_v26 = vpack.c.bf16 %v5211_v58, %v5211_v58 }
0x202f   :  { %v7427_v49 = vpop.f32.mrf.mxu1  ;;  %v7465_v27 = vpop.f32.mrf.mxu0 }
0x2030   :  { %v5581_v1 = vsel %vm215_vm1, %v5571_v40, 0  ;;  %v5633_v5 = vsel %vm215_vm1, %v5217_v26, 0  ;;  %v5717_v40 = vpop.permute.xlu1 %5716  ;;  %v5722_v49 = vpop.permute.xlu0 %5721 }
0x2031   :  { %v5214_v63 = vpop.f32.mrf.mxu1  ;;  %v5568_v18 = vpop.f32.mrf.mxu0  ;;  %7468 = vmatpush3.bf16.msra.mxu1 %v5581_v1 }
0x2032   :  { %7473 = vmatprep.subr.bf16.mxu1 %v10683_v50 }
0x2033   :  { %v7428_v34 = vpop.f32.mrf.mxu1  ;;  %v7466_v62 = vpop.f32.mrf.mxu0 }
0x2034   :  { %7470 = vmatmul.mubr.msk.bf16.vlgmr.msra.gmra.mxu1 %vm684_vm6, %v7573_v0  ;;  %v5729_v18 = vpop.permute.xlu1 %5728  ;;  %v5734_v34 = vpop.permute.xlu0 %5733 }
0x2035   :  { %7474 = vmatpush3.bf16.msra.mxu1 %v5633_v5  ;;  %7475 = vmatprep.mubr.msk.bf16.mxu1 %vm8194_vm0, %v10683_v50 }
0x203c   :  { %7476 = vmatmul.mubr.msk.bf16.vlgmr.msra.gmra.mxu1 %vm684_vm6, %v7574_v61 }
0x203d   :  { %7481 = vmatprep.mubr.msk.bf16.mxu1 %vm348_vm5, %v7575_v42  ;;  %v7576_v42 = vld [vmem:[%s8880_s8 + $0x38] sm:$0xff]  }
0x20f4   :  { %v5617_v43 = vpop.f32.mrf.mxu1 }
0x20f6   :  { %v7471_v2 = vpop.f32.mrf.mxu1 }
0x20f8   :  { %v5620_v10 = vpop.f32.mrf.mxu1 }
0x20fa   :  { %v7472_v3 = vpop.f32.mrf.mxu1 }
0x20fc   :  { %v5669_v28 = vpop.f32.mrf.mxu1 }
0x20fd   :  { %v5670_v12 = vadd.f32 %v5669_v28, %v5617_v43  ;;  %v5752_v43 = vpop.permute.xlu1 %5751 }
0x20fe   :  { %v7477_v36 = vpop.f32.mrf.mxu1 }
0x20ff   :  { %v5686_v24 = vadd.f32 %v5679_v60, %v5670_v12 }
0x2100   :  { %v5672_v55 = vpop.f32.mrf.mxu1 }
0x2101   :  { %v5673_v15 = vadd.f32 %v5672_v55, %v5620_v10  ;;  %v10451_v39 = vadd.f32 %v5686_v24, %v10017_v52  ;;  %v5757_v10 = vpop.permute.xlu0 %5756  ;;  %v5742_v28 = vpop.permute.xlu1 %5741 }
0x2102   :  { %v7478_v6 = vpop.f32.mrf.mxu1 }
0x2103   :  { %v5687_v56 = vadd.f32 %v5684_v11, %v5673_v15 }
0x2105   :  { %v10454_v47 = vadd.f32 %v5687_v56, %v10020_v9  ;;  %v5747_v56 = vpop.permute.xlu0 %5746 }
0x2107   :  { %v5690_v33 = vadd.f32 %v10454_v47, %v10451_v39 }
0x2109   :  { %v5691_v32 = vrot.slane %v5690_v33, 4 }
0x210b   :  { %v5692_v54 = vadd.f32 %v5691_v32, %v5690_v33 }
0x210d   :  { %v5693_v46 = vrot.slane %v5692_v54, 2 }
0x210f   :  { %v5694_v57 = vadd.f32 %v5693_v46, %v5692_v54 }
0x2111   :  { %v5695_v53 = vrot.slane %v5694_v57, 1 }
0x2113   :  { %v5696_v19 = vadd.f32 %v5695_v53, %v5694_v57 }
0x2115   :  { %v5697_v23 = vmul.f32 0.0625, %v5696_v19 }
0x2117   :  { %v5699_v29 = vsub.f32 %v10454_v47, %v5697_v23  ;;  %v5698_v48 = vsub.f32 %v10451_v39, %v5697_v23 }
0x2119   :  { %v5701_v25 = vmul.f32 %v5699_v29, %v5699_v29  ;;  %v5700_v52 = vmul.f32 %v5698_v48, %v5698_v48 }
0x211b   :  { %v5702_v41 = vadd.f32 %v5701_v25, %v5700_v52 }
0x211d   :  { %v5703_v14 = vrot.slane %v5702_v41, 4 }
0x211f   :  { %v5704_v9 = vadd.f32 %v5703_v14, %v5702_v41 }
0x2121   :  { %v5705_v4 = vrot.slane %v5704_v9, 2 }
0x2123   :  { %v5706_v35 = vadd.f32 %v5705_v4, %v5704_v9 }
0x2125   :  { %v5707_v51 = vrot.slane %v5706_v35, 1 }
0x2127   :  { %v5708_v7 = vadd.f32 %v5707_v51, %v5706_v35 }
0x2129   :  { %v5709_v58 = vmul.f32 0.0625, %v5708_v7 }
0x212b   :  { %v5710_v45 = vadd.f32 1e-05, %v5709_v58 }
0x212d   :  { %8164 = vrsqrt.f32 %v5710_v45 }
0x213a   :  { %v8165_v27 = vpop.eup %8164 }
0x213b   :  { %v5712_v26 = vmul.f32 %v8165_v27, %v5698_v48  ;;  %v5713_v1 = vmul.f32 %v8165_v27, %v5699_v29 }
0x213d   :  { %v5724_v0 = vmul.f32 %v5717_v40, %v5712_v26  ;;  %v5725_v63 = vmul.f32 %v5722_v49, %v5713_v1 }
0x213f   :  { %v5736_v62 = vadd.f32 %v5729_v18, %v5724_v0  ;;  %v5737_v5 = vadd.f32 %v5734_v34, %v5725_v63 }
0x2141   :  { %v5738_v61 = vpack.c.bf16 %v5737_v5, %v5736_v62 }
0x2143   :  { %7479 = vmatprep.subr.bf16.mxu1 %v5738_v61 }
0x2144   :  { %7480 = vmatpush3.bf16.msra.mxu1 %v5738_v61 }
0x2145   :  { %7485 = vmatprep.subr.bf16.mxu1 %v10683_v50 }
0x2147   :  { %7482 = vmatmul.mubr.msk.bf16.vlgmr.msra.gmra.mxu1 %vm348_vm5, %v7576_v42 }
0x2148   :  { %7489 = vmatprep.mubr.msk.bf16.mxu1 %vm8194_vm0, %v10683_v50 }
0x2207   :  { %v7483_v2 = vpop.f32.mrf.mxu1 }
0x2208   :  { %v10465_v3 = vadd.f32 %v7483_v2, %v5752_v43 }
0x2209   :  { %v5809_v12 = vpop.f32.mrf.mxu1 }
0x220a   :  { %v10468_v36 = vmul.f32 0.70710677, %v10465_v3  ;;  %v10470_v60 = vadd.f32 %v5809_v12, %v5742_v28 }
0x220b   :  { %v7484_v55 = vpop.f32.mrf.mxu1 }
0x220c   :  { %v5834_v24 = vand.u32 2147483647, %v10468_v36  ;;  %v10474_v15 = vmul.f32 0.70710677, %v10470_v60  ;;  %v10476_v11 = vadd.f32 %v7484_v55, %v5757_v10  ;;  %vm5910_vm0 = vcmp.lt.f32.partialorder %v10468_v36, 0.0 }
0x220d   :  { %v5812_v6 = vpop.f32.mrf.mxu1 }
0x220e   :  { %v5838_v33 = vmul.f32 0.3275911, %v5834_v24  ;;  %v5832_v32 = vand.u32 2147483647, %v10474_v15  ;;  %v10480_v54 = vmul.f32 0.70710677, %v10476_v11  ;;  %v10482_v46 = vadd.f32 %v5812_v6, %v5747_v56 }
0x220f   :  { %v5886_v9 = vsub.f32 0.0, %v5834_v24  ;;  %vm5908_vm1 = vcmp.lt.f32.partialorder %v10474_v15, 0.0 }
0x2210   :  { %v5842_v57 = vadd.f32 1.0, %v5838_v33  ;;  %v5836_v53 = vmul.f32 0.3275911, %v5832_v32  ;;  %v5835_v19 = vand.u32 2147483647, %v10480_v54  ;;  %v5884_v4 = vsub.f32 0.0, %v5832_v32 }
0x2211   :  { %v10486_v23 = vmul.f32 0.70710677, %v10482_v46  ;;  %v5890_v35 = vmul.f32 %v5886_v9, %v5834_v24  ;;  %vm5911_vm6 = vcmp.lt.f32.partialorder %v10480_v54, 0.0  ;;  %v5825_v15 = vmul.f32 0.5, %v10482_v46 }
0x2212   :  { %8166 = vrcp.f32 %v5842_v57  ;;  %v5840_v29 = vadd.f32 1.0, %v5836_v53  ;;  %v5839_v48 = vmul.f32 0.3275911, %v5835_v19  ;;  %v5887_v51 = vsub.f32 0.0, %v5835_v19 }
0x2213   :  { %v5833_v25 = vand.u32 2147483647, %v10486_v23  ;;  %v5888_v58 = vmul.f32 %v5884_v4, %v5832_v32  ;;  %v5896_v40 = vmul.f32 1.442695, %v5890_v35  ;;  %vm5909_vm8 = vcmp.lt.f32.partialorder %v10486_v23, 0.0  ;;  %v5933_v23 = vpop.permute.xlu1 %5932 }
0x2214   :  { %8168 = vrcp.f32 %v5840_v29  ;;  %v5843_v52 = vadd.f32 1.0, %v5839_v48  ;;  %v5891_v27 = vmul.f32 %v5887_v51, %v5835_v19  ;;  %v5824_v54 = vmul.f32 0.5, %v10470_v60  ;;  %v5938_v60 = vpop.permute.xlu0 %5937 }
0x2215   :  { %v5837_v41 = vmul.f32 0.3275911, %v5833_v25  ;;  %v5885_v49 = vsub.f32 0.0, %v5833_v25  ;;  %v5892_v63 = vmul.f32 1.442695, %v5888_v58 }
0x2216   :  { %8170 = vrcp.f32 %v5843_v52  ;;  %v5898_v42 = vmul.f32 1.442695, %v5891_v27 }
0x2217   :  { %v5841_v14 = vadd.f32 1.0, %v5837_v41  ;;  %v5889_v62 = vmul.f32 %v5885_v49, %v5833_v25 }
0x2219   :  { %8172 = vrcp.f32 %v5841_v14  ;;  %v5894_v24 = vmul.f32 1.442695, %v5889_v62 }
0x221a   :  { %8174 = vpow2.f32 %v5896_v40 }
0x221b   :  { %8176 = vpow2.f32 %v5892_v63 }
0x221c   :  { %8178 = vpow2.f32 %v5898_v42 }
0x221d   :  { %8180 = vpow2.f32 %v5894_v24 }
0x221f   :  { %v8167_v7 = vpop.eup %8166 }
0x2220   :  { %v5850_v45 = vmul.f32 1.0614054, %v8167_v7 }
0x2221   :  { %v8169_v26 = vpop.eup %8168 }
0x2222   :  { %v5854_v1 = vadd.f32 -1.4531521, %v5850_v45  ;;  %v5848_v0 = vmul.f32 1.0614054, %v8169_v26 }
0x2223   :  { %v8171_v18 = vpop.eup %8170 }
0x2224   :  { %v5858_v34 = vmul.f32 %v8167_v7, %v5854_v1  ;;  %v5852_v5 = vadd.f32 -1.4531521, %v5848_v0  ;;  %v5851_v61 = vmul.f32 1.0614054, %v8171_v18 }
0x2226   :  { %v5862_v43 = vadd.f32 1.4214138, %v5858_v34  ;;  %v8173_v2 = vpop.eup %8172  ;;  %v5856_v10 = vmul.f32 %v8169_v26, %v5852_v5  ;;  %v5855_v28 = vadd.f32 -1.4531521, %v5851_v61 }
0x2227   :  { %v5849_v55 = vmul.f32 1.0614054, %v8173_v2  ;;  %v8175_v51 = vpop.eup %8174 }
0x2228   :  { %v5866_v12 = vmul.f32 %v8167_v7, %v5862_v43  ;;  %v5860_v6 = vadd.f32 1.4214138, %v5856_v10  ;;  %v5859_v56 = vmul.f32 %v8171_v18, %v5855_v28  ;;  %v8177_v0 = vpop.eup %8176 }
0x2229   :  { %v5853_v32 = vadd.f32 -1.4531521, %v5849_v55  ;;  %v8179_v61 = vpop.eup %8178 }
0x222a   :  { %v5870_v33 = vadd.f32 -0.28449672, %v5866_v12  ;;  %v5864_v57 = vmul.f32 %v8169_v26, %v5860_v6  ;;  %v5863_v53 = vadd.f32 1.4214138, %v5859_v56  ;;  %v8181_v12 = vpop.eup %8180 }
0x222b   :  { %v5857_v29 = vmul.f32 %v8173_v2, %v5853_v32 }
0x222c   :  { %v5874_v19 = vmul.f32 %v8167_v7, %v5870_v33  ;;  %v5868_v48 = vadd.f32 -0.28449672, %v5864_v57  ;;  %v5867_v25 = vmul.f32 %v8171_v18, %v5863_v53  ;;  %v5826_v53 = vmul.f32 0.5, %v10465_v3 }
0x222d   :  { %v5861_v41 = vadd.f32 1.4214138, %v5857_v29 }
0x222e   :  { %v5878_v52 = vadd.f32 0.2548296, %v5874_v19  ;;  %v5872_v14 = vmul.f32 %v8169_v26, %v5868_v48  ;;  %v5871_v9 = vadd.f32 -0.28449672, %v5867_v25  ;;  %v5827_v19 = vmul.f32 0.5, %v10476_v11  ;;  %v7577_v11 = vld [vmem:[%s8902_s23 + $0x18] sm:$0xff]  }
0x222f   :  { %v5865_v35 = vmul.f32 %v8173_v2, %v5861_v41 }
0x2230   :  { %v5882_v4 = vmul.f32 %v8167_v7, %v5878_v52  ;;  %v5876_v58 = vadd.f32 0.2548296, %v5872_v14  ;;  %v5875_v45 = vmul.f32 %v8171_v18, %v5871_v9 }
0x2231   :  { %v5869_v49 = vadd.f32 -0.28449672, %v5865_v35 }
0x2232   :  { %v5902_v40 = vmul.f32 %v8175_v51, %v5882_v4  ;;  %v5880_v27 = vmul.f32 %v8169_v26, %v5876_v58  ;;  %v5879_v1 = vadd.f32 0.2548296, %v5875_v45 }
0x2233   :  { %v5873_v34 = vmul.f32 %v8173_v2, %v5869_v49 }
0x2234   :  { %v5906_v63 = vsub.f32 1.0, %v5902_v40  ;;  %v5900_v62 = vmul.f32 %v8177_v0, %v5880_v27  ;;  %v5883_v5 = vmul.f32 %v8171_v18, %v5879_v1 }
0x2235   :  { %v5877_v43 = vadd.f32 0.2548296, %v5873_v34 }
0x2236   :  { %v5914_v42 = vsub.f32 0.0, %v5906_v63  ;;  %v5904_v10 = vsub.f32 1.0, %v5900_v62  ;;  %v5903_v28 = vmul.f32 %v8179_v61, %v5883_v5 }
0x2237   :  { %v5881_v7 = vmul.f32 %v8173_v2, %v5877_v43 }
0x2238   :  { %v5918_v55 = vsel %vm5910_vm0, %v5914_v42, %v5906_v63  ;;  %v5912_v24 = vsub.f32 0.0, %v5904_v10  ;;  %v5907_v6 = vsub.f32 1.0, %v5903_v28  ;;  %v6800_v63 = vld [vmem:[%s9453_s4 + $0x18] sm:$0xff] }
0x2239   :  { %v5901_v56 = vmul.f32 %v8181_v12, %v5881_v7  ;;  %v5922_v33 = vadd.f32 1.0, %v5918_v55 }
0x223a   :  { %v5915_v26 = vsub.f32 0.0, %v5907_v6  ;;  %v5916_v32 = vsel %vm5908_vm1, %v5912_v24, %v5904_v10 }
0x223b   :  { %v5905_v18 = vsub.f32 1.0, %v5901_v56  ;;  %v5926_v29 = vmul.f32 %v5922_v33, %v5826_v53  ;;  %v5920_v48 = vadd.f32 1.0, %v5916_v32 }
0x223c   :  { %v5919_v57 = vsel %vm5911_vm6, %v5915_v26, %v5907_v6 }
0x223d   :  { %v5923_v36 = vadd.f32 1.0, %v5919_v57  ;;  %v5913_v2 = vsub.f32 0.0, %v5905_v18  ;;  %v5924_v4 = vmul.f32 %v5920_v48, %v5824_v54 }
0x223f   :  { %v5927_v25 = vmul.f32 %v5923_v36, %v5827_v19  ;;  %v5917_v52 = vsel %vm5909_vm8, %v5913_v2, %v5905_v18 }
0x2240   :  { %v5921_v41 = vadd.f32 1.0, %v5917_v52 }
0x2241   :  { %v5929_v14 = vpack.c.bf16 %v5927_v25, %v5926_v29 }
0x2242   :  { %v5925_v9 = vmul.f32 %v5921_v41, %v5825_v15 }
0x2243   :  { %7486 = vmatpush3.bf16.msra.mxu1 %v5929_v14 }
0x2244   :  { %7487 = vmatprep.subr.bf16.mxu1 %v10683_v50  ;;  %v5928_v3 = vpack.c.bf16 %v5925_v9, %v5924_v4 }
0x2247   :  { %7488 = vmatpush3.bf16.msra.mxu1 %v5928_v3 }
0x2248   :  { %6078 = vmatprep.subr.bf16.mxu1 %v10684_v17 }
0x224a   :  { %7490 = vmatmul.mubr.msk.bf16.vlgmr.msra.gmra.mxu1 %vm1729_vm11, %v7577_v11 }
0x230a   :  { %v5982_v35 = vpop.f32.mrf.mxu1 }
0x230b   :  { %v5983_v51 = vadd.f32 %v5982_v35, %v5933_v23 }
0x230c   :  { %v7491_v46 = vpop.f32.mrf.mxu1 }
0x230d   :  { %v5989_v58 = vadd.f32 %v5983_v51, %v10451_v39  ;;  %v7580_v39 = vld [vmem:[%s9458_s19 + $0x14] ss:$8 sps:$4 sm:$0xff]   ;;  %v10547_v51 = vld [vmem:[%s8256_s24 + $0x8] ss:$0 sm:$0xff]  ;;  %s8217_s24 = smov 25  }
0x230e   :  { %v5985_v45 = vpop.f32.mrf.mxu1  ;;  %6803 = vmatprep.mubr.msk.bf16.mxu1 %vm348_vm5, %v7580_v39  ;;  %s10575_s30 = sld [smem:[%s10670_s0 + %s8217_s24]]  }
0x230f   :  { %v5986_v40 = vadd.f32 %v5985_v45, %v5938_v60  ;;  %6035 = vrot.lane.b32.xlu1 %v5989_v58, %s8188_s7  ;;  %v6021_v27 = vmul.f32 %v5989_v58, %v8267_v20  ;;  %v7578_v45 = vld [vmem:[%s9458_s19 + $0x10] ss:$8 sps:$4 sm:$0xff]  }
0x2310   :  { %v7492_v49 = vpop.f32.mrf.mxu1 }
0x2311   :  { %v5990_v50 = vadd.f32 %v5986_v40, %v10454_v47  ;;  %v6799_v47 = vld [vmem:[%s9453_s4 + $0x10] sm:$0xff] }
0x2313   :  { %6029 = vrot.lane.b32.xlu1 %v5989_v58, %s8190_s12  ;;  %6037 = vrot.lane.b32.xlu0 %v5990_v50, %s8188_s7  ;;  %v6022_v1 = vmul.f32 %v5990_v50, %v8267_v20 }
0x2315   :  { %v6051_v0 = vpack.c.bf16 %v6022_v1, %v6021_v27 }
0x2317   :  { %6023 = vrot.lane.b32.xlu1 %v5989_v58, %s8191_s13  ;;  %6031 = vrot.lane.b32.xlu0 %v5990_v50, %s8190_s12 }
0x231b   :  { %6015 = vrot.lane.b32.xlu1 %v5989_v58, %s10688_s14  ;;  %6025 = vrot.lane.b32.xlu0 %v5990_v50, %s8191_s13 }
0x231f   :  { %6009 = vrot.lane.b32.xlu1 %v5989_v58, %s10689_s15  ;;  %6017 = vrot.lane.b32.xlu0 %v5990_v50, %s10688_s14 }
0x2323   :  { %6003 = vrot.lane.b32.xlu1 %v5989_v58, %s8195_s16  ;;  %6011 = vrot.lane.b32.xlu0 %v5990_v50, %s10689_s15 }
0x2327   :  { %5997 = vrot.lane.b32.xlu1 %v5989_v58, %s8196_s17  ;;  %6005 = vrot.lane.b32.xlu0 %v5990_v50, %s8195_s16 }
0x232b   :  { %6041 = vrot.lane.b32.xlu1 %v5989_v58, %s8187_s6  ;;  %5999 = vrot.lane.b32.xlu0 %v5990_v50, %s8196_s17 }
0x232f   :  { %6058 = vperm.xlu1 %7538, %v6799_v47   ;;  %6043 = vrot.lane.b32.xlu0 %v5990_v50, %s8187_s6 }
0x2333   :  { %6063 = vperm.xlu0 %7537, %v6800_v63  }
0x2381   :  { %v6036_v34 = vpop.permute.xlu1 %6035 }
0x2382   :  { %v6039_v61 = vmul.f32 %v6036_v34, %v8262_v13 }
0x2385   :  { %v6030_v62 = vpop.permute.xlu1 %6029  ;;  %v6038_v5 = vpop.permute.xlu0 %6037 }
0x2386   :  { %v6040_v42 = vmul.f32 %v6038_v5, %v8262_v13  ;;  %v6033_v7 = vmul.f32 %v6030_v62, %v8264_v16 }
0x2388   :  { %v6054_v43 = vpack.c.bf16 %v6040_v42, %v6039_v61 }
0x2389   :  { %v6024_v10 = vpop.permute.xlu1 %6023  ;;  %v6032_v28 = vpop.permute.xlu0 %6031 }
0x238a   :  { %v6034_v12 = vmul.f32 %v6032_v28, %v8264_v16  ;;  %6079 = vmatpush1.bf16.msra.mxu1 %v6054_v43  ;;  %v6027_v56 = vmul.f32 %v6024_v10, %v8269_v21 }
0x238b   :  { %6080 = vmatprep.subr.bf16.mxu1 %v10684_v17 }
0x238c   :  { %v6053_v55 = vpack.c.bf16 %v6034_v12, %v6033_v7 }
0x238d   :  { %v6016_v24 = vpop.permute.xlu1 %6015  ;;  %v6026_v6 = vpop.permute.xlu0 %6025 }
0x238e   :  { %v6028_v26 = vmul.f32 %v6026_v6, %v8269_v21  ;;  %6081 = vmatpush1.bf16.msra.mxu1 %v6053_v55  ;;  %v6019_v19 = vmul.f32 %v6016_v24, %v8276_v31 }
0x238f   :  { %6082 = vmatprep.subr.bf16.mxu1 %v10684_v17 }
0x2390   :  { %v6052_v33 = vpack.c.bf16 %v6028_v26, %v6027_v56 }
0x2391   :  { %v6010_v18 = vpop.permute.xlu1 %6009  ;;  %v6018_v32 = vpop.permute.xlu0 %6017 }
0x2392   :  { %6083 = vmatpush1.bf16.msra.mxu1 %v6052_v33  ;;  %v6020_v57 = vmul.f32 %v6018_v32, %v8276_v31  ;;  %v6013_v25 = vmul.f32 %v6010_v18, %v8274_v30 }
0x2393   :  { %6084 = vmatprep.subr.bf16.mxu1 %v10684_v17 }
0x2394   :  { %v6050_v2 = vpack.c.bf16 %v6020_v57, %v6019_v19 }
0x2395   :  { %v6012_v53 = vpop.permute.xlu0 %6011  ;;  %v6004_v36 = vpop.permute.xlu1 %6003 }
0x2396   :  { %6085 = vmatpush1.bf16.msra.mxu1 %v6051_v0  ;;  %v6014_v29 = vmul.f32 %v6012_v53, %v8274_v30  ;;  %v6007_v14 = vmul.f32 %v6004_v36, %v8283_v38 }
0x2397   :  { %6086 = vmatprep.subr.bf16.mxu1 %v10684_v17 }
0x2398   :  { %v6049_v52 = vpack.c.bf16 %v6014_v29, %v6013_v25  ;;  %v10690_v25 = vld [vmem:[#allocation3_spill] sm:$0xff] }
0x2399   :  { %v6006_v48 = vpop.permute.xlu0 %6005  ;;  %v5998_v41 = vpop.permute.xlu1 %5997 }
0x239a   :  { %6087 = vmatpush1.bf16.msra.mxu1 %v6050_v2  ;;  %v6008_v15 = vmul.f32 %v6006_v48, %v8283_v38  ;;  %v6001_v11 = vmul.f32 %v5998_v41, %v8281_v37 }
0x239b   :  { %6088 = vmatprep.subr.bf16.mxu1 %v10684_v17 }
0x239c   :  { %v6048_v9 = vpack.c.bf16 %v6008_v15, %v6007_v14  ;;  %v10691_v15 = vld [vmem:[#allocation4_spill] sm:$0xff] }
0x239d   :  { %v6000_v54 = vpop.permute.xlu0 %5999  ;;  %v6042_v23 = vpop.permute.xlu1 %6041 }
0x239e   :  { %6089 = vmatpush1.bf16.msra.mxu1 %v6049_v52  ;;  %v6002_v4 = vmul.f32 %v6000_v54, %v8281_v37  ;;  %v6045_v58 = vmul.f32 %v10547_v51, %v6042_v23 }
0x239f   :  { %6090 = vmatprep.subr.bf16.mxu1 %v10684_v17 }
0x23a0   :  { %v6047_v35 = vpack.c.bf16 %v6002_v4, %v6001_v11  ;;  %v6151_v4 = vld [vmem:[%s6430_s27] sm:$0xff] }
0x23a1   :  { %v6044_v3 = vpop.permute.xlu0 %6043 }
0x23a2   :  { %6091 = vmatpush1.bf16.msra.mxu1 %v6048_v9  ;;  %v6046_v46 = vmul.f32 %v10547_v51, %v6044_v3 }
0x23a3   :  { %6092 = vmatprep.subr.bf16.mxu1 %v10684_v17 }
0x23a4   :  { %v6055_v60 = vpack.c.bf16 %v6046_v46, %v6045_v58 }
0x23a6   :  { %6093 = vmatpush1.bf16.msra.mxu1 %v6047_v35 }
0x23a7   :  { %6108 = vmatprep.subr.bf16.mxu1 %v10684_v17 }
0x23aa   :  { %6109 = vmatpush2.bf16.msra.mxu1 %v6055_v60  ;;  %v6059_v49 = vpop.permute.xlu1 %6058 }
0x23ab   :  { %6360 = vmatprep.subr.bf16.mxu1 %v10684_v17 }
0x23ad   :  { %6111 = vmatmul.mubr.bf16.vlgmr.msra.gmra.mxu1 %v7578_v45 }
0x23ae   :  { %v6064_v1 = vpop.permute.xlu0 %6063 }
0x246d   :  { %v6112_v40 = vpop.f32.mrf.mxu1 }
0x246e   :  { %v6113_v27 = vadd.f32 %v6112_v40, %v6059_v49 }
0x246f   :  { %v6114_v50 = vpop.f32.mrf.mxu1 }
0x2470   :  { %v6119_v63 = vadd.f32 %v6113_v27, %v9529_v44 }
0x2471   :  { %v6115_v0 = vpop.f32.mrf.mxu1 }
0x2472   :  { %v6116_v39 = vadd.f32 %v6115_v0, %v6064_v1 }
0x2473   :  { %v6117_v47 = vpop.f32.mrf.mxu1 }
0x2474   :  { %v6120_v34 = vadd.f32 %v6116_v39, %v9532_v59 }
0x2476   :  { %v6121_v62 = vadd.f32 %v6120_v34, %v6119_v63 }
0x2478   :  { %v6122_v5 = vrot.slane %v6121_v62, 4 }
0x247a   :  { %v6123_v61 = vadd.f32 %v6122_v5, %v6121_v62 }
0x247c   :  { %v6124_v42 = vrot.slane %v6123_v61, 2 }
0x247e   :  { %v6125_v43 = vadd.f32 %v6124_v42, %v6123_v61 }
0x2480   :  { %v6126_v10 = vrot.slane %v6125_v43, 1 }
0x2482   :  { %v6127_v28 = vadd.f32 %v6126_v10, %v6125_v43 }
0x2484   :  { %v6128_v7 = vmul.f32 0.0625, %v6127_v28 }
0x2486   :  { %v6129_v12 = vsub.f32 %v6119_v63, %v6128_v7  ;;  %v6130_v55 = vsub.f32 %v6120_v34, %v6128_v7 }
0x2488   :  { %v6131_v24 = vmul.f32 %v6129_v12, %v6129_v12  ;;  %v6132_v6 = vmul.f32 %v6130_v55, %v6130_v55 }
0x248a   :  { %v6133_v56 = vadd.f32 %v6132_v6, %v6131_v24 }
0x248c   :  { %v6134_v26 = vrot.slane %v6133_v56, 4 }
0x248e   :  { %v6135_v33 = vadd.f32 %v6134_v26, %v6133_v56 }
0x2490   :  { %v6136_v18 = vrot.slane %v6135_v33, 2 }
0x2492   :  { %v6137_v32 = vadd.f32 %v6136_v18, %v6135_v33 }
0x2494   :  { %v6138_v44 = vrot.slane %v6137_v32, 1 }
0x2496   :  { %v6139_v57 = vadd.f32 %v6138_v44, %v6137_v32 }
0x2498   :  { %v6140_v59 = vmul.f32 0.0625, %v6139_v57 }
0x249a   :  { %v6141_v53 = vadd.f32 1e-05, %v6140_v59 }
0x249c   :  { %8182 = vrsqrt.f32 %v6141_v53 }
0x24a9   :  { %v8183_v19 = vpop.eup %8182 }
0x24aa   :  { %v6143_v36 = vmul.f32 %v8183_v19, %v6129_v12  ;;  %v6144_v2 = vmul.f32 %v8183_v19, %v6130_v55 }
0x24ac   :  { %v6145_v29 = vmul.f32 %v6143_v36, %v9514_v22  ;;  %v6146_v48 = vmul.f32 %v6144_v2, %v9516_v8  ;;  %v7583_v22 = vld [vmem:[%s10575_s30 + $0x4] ss:$8 sps:$4 sm:$0xff]   ;;  %v7581_v36 = vld [vmem:[%s10575_s30] ss:$8 sps:$4 sm:$0xff]  }
0x24ad   :  { %6806 = vmatprep.mubr.msk.bf16.mxu0 %vm348_vm5, %v7583_v22  ;;  %v6152_v8 = vld [vmem:[%s6430_s27 + $0x8] sm:$0xff] }
0x24ae   :  { %v6147_v52 = vadd.f32 %v6145_v29, %v10690_v25  ;;  %v6148_v41 = vadd.f32 %v6146_v48, %v10691_v15 }
0x24b0   :  { %6193 = vrot.lane.b32.xlu0 %v6148_v41, %s8188_s7  ;;  %6191 = vrot.lane.b32.xlu1 %v6147_v52, %s8188_s7  ;;  %v6177_v54 = vmul.f32 %v6147_v52, %v8267_v20  ;;  %v6178_v14 = vmul.f32 %v6148_v41, %v8267_v20 }
0x24b2   :  { %v6207_v9 = vpack.c.bf16 %v6178_v14, %v6177_v54 }
0x24b4   :  { %6187 = vrot.lane.b32.xlu0 %v6148_v41, %s8190_s12  ;;  %6185 = vrot.lane.b32.xlu1 %v6147_v52, %s8190_s12 }
0x24b8   :  { %6181 = vrot.lane.b32.xlu0 %v6148_v41, %s8191_s13  ;;  %6179 = vrot.lane.b32.xlu1 %v6147_v52, %s8191_s13 }
0x24bc   :  { %6173 = vrot.lane.b32.xlu0 %v6148_v41, %s10688_s14  ;;  %6171 = vrot.lane.b32.xlu1 %v6147_v52, %s10688_s14 }
0x24c0   :  { %6167 = vrot.lane.b32.xlu0 %v6148_v41, %s10689_s15  ;;  %6165 = vrot.lane.b32.xlu1 %v6147_v52, %s10689_s15 }
0x24c4   :  { %6161 = vrot.lane.b32.xlu0 %v6148_v41, %s8195_s16  ;;  %6159 = vrot.lane.b32.xlu1 %v6147_v52, %s8195_s16 }
0x24c8   :  { %6155 = vrot.lane.b32.xlu0 %v6148_v41, %s8196_s17  ;;  %6153 = vrot.lane.b32.xlu1 %v6147_v52, %s8196_s17 }
0x24cc   :  { %6199 = vrot.lane.b32.xlu0 %v6148_v41, %s8187_s6  ;;  %6197 = vrot.lane.b32.xlu1 %v6147_v52, %s8187_s6 }
0x24d0   :  { %6219 = vperm.xlu0 %7537, %v6152_v8   ;;  %6214 = vperm.xlu1 %7538, %v6151_v4  }
0x2522   :  { %v6194_v3 = vpop.permute.xlu0 %6193  ;;  %v6192_v11 = vpop.permute.xlu1 %6191 }
0x2523   :  { %v6196_v23 = vmul.f32 %v6194_v3, %v8262_v13  ;;  %v6195_v35 = vmul.f32 %v6192_v11, %v8262_v13 }
0x2525   :  { %v6210_v46 = vpack.c.bf16 %v6196_v23, %v6195_v35 }
0x2526   :  { %v6188_v58 = vpop.permute.xlu0 %6187  ;;  %v6186_v60 = vpop.permute.xlu1 %6185 }
0x2527   :  { %v6190_v45 = vmul.f32 %v6188_v58, %v8264_v16  ;;  %v6189_v40 = vmul.f32 %v6186_v60, %v8264_v16  ;;  %6235 = vmatpush1.bf16.msra.mxu0 %v6210_v46 }
0x2528   :  { %6236 = vmatprep.subr.bf16.mxu0 %v10684_v17 }
0x2529   :  { %v6209_v49 = vpack.c.bf16 %v6190_v45, %v6189_v40 }
0x252a   :  { %v6182_v50 = vpop.permute.xlu0 %6181  ;;  %v6180_v27 = vpop.permute.xlu1 %6179 }
0x252b   :  { %v6184_v1 = vmul.f32 %v6182_v50, %v8269_v21  ;;  %v6183_v0 = vmul.f32 %v6180_v27, %v8269_v21  ;;  %6237 = vmatpush1.bf16.msra.mxu0 %v6209_v49 }
0x252c   :  { %6238 = vmatprep.subr.bf16.mxu0 %v10684_v17 }
0x252d   :  { %v6208_v39 = vpack.c.bf16 %v6184_v1, %v6183_v0 }
0x252e   :  { %v6174_v47 = vpop.permute.xlu0 %6173  ;;  %v6172_v63 = vpop.permute.xlu1 %6171 }
0x252f   :  { %6239 = vmatpush1.bf16.msra.mxu0 %v6208_v39  ;;  %v6176_v34 = vmul.f32 %v6174_v47, %v8276_v31  ;;  %v6175_v62 = vmul.f32 %v6172_v63, %v8276_v31 }
0x2530   :  { %6240 = vmatprep.subr.bf16.mxu0 %v10684_v17 }
0x2531   :  { %v6206_v42 = vpack.c.bf16 %v6176_v34, %v6175_v62 }
0x2532   :  { %v6168_v5 = vpop.permute.xlu0 %6167  ;;  %v6166_v61 = vpop.permute.xlu1 %6165 }
0x2533   :  { %6241 = vmatpush1.bf16.msra.mxu0 %v6207_v9  ;;  %v6170_v43 = vmul.f32 %v6168_v5, %v8274_v30  ;;  %v6169_v10 = vmul.f32 %v6166_v61, %v8274_v30 }
0x2534   :  { %6242 = vmatprep.subr.bf16.mxu0 %v10684_v17 }
0x2535   :  { %v6205_v12 = vpack.c.bf16 %v6170_v43, %v6169_v10 }
0x2536   :  { %v6162_v28 = vpop.permute.xlu0 %6161  ;;  %v6160_v7 = vpop.permute.xlu1 %6159 }
0x2537   :  { %6243 = vmatpush1.bf16.msra.mxu0 %v6206_v42  ;;  %v6164_v55 = vmul.f32 %v6162_v28, %v8283_v38  ;;  %v6163_v24 = vmul.f32 %v6160_v7, %v8283_v38 }
0x2538   :  { %6244 = vmatprep.subr.bf16.mxu0 %v10684_v17 }
0x2539   :  { %v6204_v26 = vpack.c.bf16 %v6164_v55, %v6163_v24 }
0x253a   :  { %v6156_v6 = vpop.permute.xlu0 %6155  ;;  %v6154_v56 = vpop.permute.xlu1 %6153 }
0x253b   :  { %6245 = vmatpush1.bf16.msra.mxu0 %v6205_v12  ;;  %v6158_v33 = vmul.f32 %v6156_v6, %v8281_v37  ;;  %v6157_v18 = vmul.f32 %v6154_v56, %v8281_v37 }
0x253c   :  { %6246 = vmatprep.subr.bf16.mxu0 %v10684_v17 }
0x253d   :  { %v6203_v57 = vpack.c.bf16 %v6158_v33, %v6157_v18 }
0x253e   :  { %v6200_v32 = vpop.permute.xlu0 %6199  ;;  %v6198_v44 = vpop.permute.xlu1 %6197 }
0x253f   :  { %6247 = vmatpush1.bf16.msra.mxu0 %v6204_v26  ;;  %v6202_v59 = vmul.f32 %v10547_v51, %v6200_v32  ;;  %v6201_v53 = vmul.f32 %v10547_v51, %v6198_v44 }
0x2540   :  { %6248 = vmatprep.subr.bf16.mxu0 %v10684_v17 }
0x2541   :  { %v6211_v19 = vpack.c.bf16 %v6202_v59, %v6201_v53 }
0x2543   :  { %6249 = vmatpush1.bf16.msra.mxu0 %v6203_v57 }
0x2544   :  { %6264 = vmatprep.subr.bf16.mxu0 %v10684_v17 }
0x2547   :  { %6265 = vmatpush2.bf16.msra.mxu0 %v6211_v19 }
0x254a   :  { %6267 = vmatmul.mubr.bf16.vlgmr.msra.gmra.mxu0 %v7581_v36 }
0x254b   :  { %v6215_v2 = vpop.permute.xlu1 %6214  ;;  %v6220_v15 = vpop.permute.xlu0 %6219 }
0x260a   :  { %v6268_v29 = vpop.f32.mrf.mxu0 }
0x260b   :  { %v6269_v48 = vadd.f32 %v6268_v29, %v6215_v2 }
0x260c   :  { %v6270_v25 = vpop.f32.mrf.mxu0 }
0x260d   :  { %vm6275_vm9 = vcmp.ge.f32.partialorder %v6269_v48, 0.0  ;;  %v6277_v52 = vmul.f32 0.1, %v6269_v48 }
0x260e   :  { %v6271_v41 = vpop.f32.mrf.mxu0 }
0x260f   :  { %v6279_v54 = vsel %vm6275_vm9, %v6269_v48, %v6277_v52  ;;  %v6272_v14 = vadd.f32 %v6271_v41, %v6220_v15 }
0x2610   :  { %v6273_v9 = vpop.f32.mrf.mxu0  ;;  %6321 = vrot.lane.b32.xlu1 %v6279_v54, %s8188_s7  ;;  %v6307_v4 = vmul.f32 %v6279_v54, %v8267_v20 }
0x2611   :  { %vm6276_vm10 = vcmp.ge.f32.partialorder %v6272_v14, 0.0  ;;  %v6278_v22 = vmul.f32 0.1, %v6272_v14 }
0x2613   :  { %v6280_v8 = vsel %vm6276_vm10, %v6272_v14, %v6278_v22 }
0x2614   :  { %6323 = vrot.lane.b32.xlu0 %v6280_v8, %s8188_s7  ;;  %6315 = vrot.lane.b32.xlu1 %v6279_v54, %s8190_s12  ;;  %v6308_v3 = vmul.f32 %v6280_v8, %v8267_v20  ;;  %s8219_s7 = smov 28  }
0x2615   :  { %s6432_s22 = sld [smem:[%s10670_s0 + %s8219_s7]]  }
0x2616   :  { %v6337_v11 = vpack.c.bf16 %v6308_v3, %v6307_v4 }
0x2618   :  { %6317 = vrot.lane.b32.xlu0 %v6280_v8, %s8190_s12  ;;  %6309 = vrot.lane.b32.xlu1 %v6279_v54, %s8191_s13  ;;  %s8220_s12 = smov 27  }
0x261b   :  { %v6282_v35 = vld [vmem:[%s6432_s22] sm:$0x7] }
0x261c   :  { %6311 = vrot.lane.b32.xlu0 %v6280_v8, %s8191_s13  ;;  %6301 = vrot.lane.b32.xlu1 %v6279_v54, %s10688_s14  ;;  %s6431_s13 = sld [smem:[%s10670_s0 + %s8220_s12]]  }
0x2620   :  { %6303 = vrot.lane.b32.xlu0 %v6280_v8, %s10688_s14  ;;  %6295 = vrot.lane.b32.xlu1 %v6279_v54, %s10689_s15 }
0x2622   :  { %v10634_v20 = vld.sshfl [vmem:[%s6431_s13] sm:$0x33 pattern:$0x76325410] }
0x2623   :  { %v6355_v23 = vcombine.high %v10634_v20, %v10634_v20 }
0x2624   :  { %6297 = vrot.lane.b32.xlu0 %v6280_v8, %s10689_s15  ;;  %6289 = vrot.lane.b32.xlu1 %v6279_v54, %s8195_s16 }
0x2625   :  { %6808 = vmatprep.mubr.msk.bf16.mxu1 %vm348_vm5, %v6355_v23 }
0x2628   :  { %6291 = vrot.lane.b32.xlu0 %v6280_v8, %s8195_s16  ;;  %6283 = vrot.lane.b32.xlu1 %v6279_v54, %s8196_s17 }
0x262c   :  { %6285 = vrot.lane.b32.xlu0 %v6280_v8, %s8196_s17  ;;  %6327 = vrot.lane.b32.xlu1 %v6279_v54, %s8187_s6 }
0x2630   :  { %6329 = vrot.lane.b32.xlu0 %v6280_v8, %s8187_s6  ;;  %6344 = vperm.xlu1 %7538, %v6282_v35   ;;  %s8221_s6 = smov 29  }
0x2631   :  { %s6433_s23 = sld [smem:[%s10670_s0 + %s8221_s6]]  }
0x2682   :  { %v6322_v46 = vpop.permute.xlu1 %6321 }
0x2683   :  { %v6325_v45 = vmul.f32 %v6322_v46, %v8262_v13 }
0x2686   :  { %v6324_v58 = vpop.permute.xlu0 %6323  ;;  %v6316_v60 = vpop.permute.xlu1 %6315 }
0x2687   :  { %v6326_v40 = vmul.f32 %v6324_v58, %v8262_v13  ;;  %v6319_v1 = vmul.f32 %v6316_v60, %v8264_v16 }
0x2689   :  { %v6340_v49 = vpack.c.bf16 %v6326_v40, %v6325_v45 }
0x268a   :  { %v6318_v50 = vpop.permute.xlu0 %6317  ;;  %v6310_v27 = vpop.permute.xlu1 %6309 }
0x268b   :  { %v6320_v0 = vmul.f32 %v6318_v50, %v8264_v16  ;;  %6361 = vmatpush1.bf16.msra.mxu1 %v6340_v49  ;;  %v6313_v34 = vmul.f32 %v6310_v27, %v8269_v21 }
0x268c   :  { %6362 = vmatprep.subr.bf16.mxu1 %v10684_v17 }
0x268d   :  { %v6339_v39 = vpack.c.bf16 %v6320_v0, %v6319_v1 }
0x268e   :  { %v6312_v47 = vpop.permute.xlu0 %6311  ;;  %v6302_v63 = vpop.permute.xlu1 %6301 }
0x268f   :  { %v6314_v62 = vmul.f32 %v6312_v47, %v8269_v21  ;;  %6363 = vmatpush1.bf16.msra.mxu1 %v6339_v39  ;;  %v6305_v43 = vmul.f32 %v6302_v63, %v8276_v31 }
0x2690   :  { %6364 = vmatprep.subr.bf16.mxu1 %v10684_v17 }
0x2691   :  { %v6338_v13 = vpack.c.bf16 %v6314_v62, %v6313_v34 }
0x2692   :  { %v6304_v5 = vpop.permute.xlu0 %6303  ;;  %v6296_v61 = vpop.permute.xlu1 %6295 }
0x2693   :  { %6365 = vmatpush1.bf16.msra.mxu1 %v6338_v13  ;;  %v6306_v16 = vmul.f32 %v6304_v5, %v8276_v31  ;;  %v6299_v12 = vmul.f32 %v6296_v61, %v8274_v30 }
0x2694   :  { %6366 = vmatprep.subr.bf16.mxu1 %v10684_v17 }
0x2695   :  { %v6336_v28 = vpack.c.bf16 %v6306_v16, %v6305_v43 }
0x2696   :  { %v6298_v42 = vpop.permute.xlu0 %6297  ;;  %v6290_v10 = vpop.permute.xlu1 %6289 }
0x2697   :  { %6367 = vmatpush1.bf16.msra.mxu1 %v6337_v11  ;;  %v6300_v21 = vmul.f32 %v6298_v42, %v8274_v30  ;;  %v6293_v31 = vmul.f32 %v6290_v10, %v8283_v38 }
0x2698   :  { %6368 = vmatprep.subr.bf16.mxu1 %v10684_v17 }
0x2699   :  { %v6335_v55 = vpack.c.bf16 %v6300_v21, %v6299_v12 }
0x269a   :  { %v6292_v7 = vpop.permute.xlu0 %6291  ;;  %v6284_v6 = vpop.permute.xlu1 %6283 }
0x269b   :  { %6369 = vmatpush1.bf16.msra.mxu1 %v6336_v28  ;;  %v6294_v24 = vmul.f32 %v6292_v7, %v8283_v38  ;;  %v6287_v32 = vmul.f32 %v6284_v6, %v8281_v37 }
0x269c   :  { %6370 = vmatprep.subr.bf16.mxu1 %v10684_v17 }
0x269d   :  { %v6334_v26 = vpack.c.bf16 %v6294_v24, %v6293_v31 }
0x269e   :  { %v6286_v56 = vpop.permute.xlu0 %6285  ;;  %v6328_v30 = vpop.permute.xlu1 %6327 }
0x269f   :  { %6371 = vmatpush1.bf16.msra.mxu1 %v6335_v55  ;;  %v6288_v33 = vmul.f32 %v6286_v56, %v8281_v37  ;;  %v6331_v59 = vmul.f32 %v10547_v51, %v6328_v30 }
0x26a0   :  { %6372 = vmatprep.subr.bf16.mxu1 %v10684_v17 }
0x26a1   :  { %v6333_v44 = vpack.c.bf16 %v6288_v33, %v6287_v32 }
0x26a2   :  { %v6330_v18 = vpop.permute.xlu0 %6329 }
0x26a3   :  { %6373 = vmatpush1.bf16.msra.mxu1 %v6334_v26  ;;  %v6332_v57 = vmul.f32 %v10547_v51, %v6330_v18 }
0x26a4   :  { %6374 = vmatprep.subr.bf16.mxu1 %v10684_v17 }
0x26a5   :  { %v6341_v38 = vpack.c.bf16 %v6332_v57, %v6331_v59 }
0x26a7   :  { %6375 = vmatpush1.bf16.msra.mxu1 %v6333_v44 }
0x26a8   :  { %6390 = vmatprep.subr.bf16.mxu1 %v10684_v17 }
0x26ab   :  { %6391 = vmatpush2.bf16.msra.mxu1 %v6341_v38  ;;  %v6345_v37 = vpop.permute.xlu1 %6344 }
0x26ae   :  { %6393 = vmatmul.mubr.bf16.vlgmr.msra.gmra.mxu1 %v10634_v20 }
0x276e   :  { %v6394_v53 = vpop.f32.mrf.mxu1 }
0x276f   :  { %v6395_v19 = vadd.f32 %v6394_v53, %v6345_v37 }
0x2770   :  { %v6396_v36 = vpop.f32.mrf.mxu1 }
0x2771   :  { %6400 = vst [vmem:[%s6433_s23] sm:$0x7] %v6395_v19 }
0x2772   :  { %v6397_v2 = vpop.f32.mrf.mxu1 }
0x2774   :  { %v6398_v29 = vpop.f32.mrf.mxu1 }

</bundles_post_ra>
